<compile_context>
chip_gen: v7x
topology: tpu7x:2x2x1
jax: 0.10.0
libtpu: 0.0.40
codegen_flags: <defaults>
</compile_context>

<pallas_src>
import functools

import jax
import jax.numpy as jnp
from jax import lax
from jax.experimental import pallas as pl
from jax.experimental.pallas import tpu as pltpu

F32 = jnp.float32
BF16 = jnp.bfloat16
VMEM_LIMIT = 32 * 1024 * 1024          # safe scoped-VMEM ceiling on v5e/v6e/v7x
ATTN_VMEM_BUDGET = 12 * 1024 * 1024    # working-set target for the fused transformer


# ---------------------------------------------------------------------------
# Small in-kernel helpers
# ---------------------------------------------------------------------------
def _silu(y):
    # y * sigmoid(y); the reciprocal runs on the otherwise-idle EUP slot.
    return y * pl.reciprocal(1.0 + jnp.exp(-y), approx=True)


def _layernorm(x, eps):
    mu = jnp.mean(x, axis=-1, keepdims=True)
    xc = x - mu
    var = jnp.mean(xc * xc, axis=-1, keepdims=True)
    return xc * lax.rsqrt(var + eps)


def _const_spec(shape):
    """Grid-invariant (broadcast) block covering the whole array."""
    return pl.BlockSpec(shape, lambda *_: (0,) * len(shape))


def _cparams():
    return pltpu.CompilerParams(dimension_semantics=("parallel",),
                                vmem_limit_bytes=VMEM_LIMIT)


def _conv3x3_taps(xpad, w_taps_ref, H, W):
    """3x3 / stride 1 / pad 1 conv as 9 shifted accumulating matmuls.

    `xpad` is one padded NHWC image [H+2, W+2, C] already resident in VMEM, so the
    im2col expansion never touches HBM (in-kernel im2col per perf review)."""
    C = xpad.shape[-1]
    acc = None
    for kh in range(3):
        for kw in range(3):
            win = xpad[kh:kh + H, kw:kw + W, :].reshape(H * W, C)
            d = jnp.dot(win, w_taps_ref[kh * 3 + kw], preferred_element_type=F32)
            acc = d if acc is None else acc + d
    return acc


# ---------------------------------------------------------------------------
# Pallas kernels
# ---------------------------------------------------------------------------
def _conv12_kernel(xp_ref, w1_ref, b1_ref, w2_ref, b2_ref, o_ref, *, H, W):
    """conv1(3x3)+BN1+SiLU fused with conv2(1x1)+BN2+SiLU (BN folded into weights)."""
    xpad = xp_ref[0]                                              # [H+2, W+2, C] bf16
    h = _silu(_conv3x3_taps(xpad, w1_ref, H, W) + b1_ref[...])    # [H*W, C] f32
    y = jnp.dot(h.astype(BF16), w2_ref[...], preferred_element_type=F32) + b2_ref[...]
    o_ref[...] = _silu(y).reshape(o_ref.shape).astype(o_ref.dtype)


def _transformer_kernel(x_ref, wqkv_ref, sqkv_ref, wo_ref, bo_ref,
                        wff1_ref, bff1_ref, wff2_ref, bff2_ref, w3_ref, b3_ref,
                        o_ref, *, heads, dim_head, eps):
    """Fused PreNorm attention + PreNorm FFN + conv3(1x1)+BN+SiLU.

    Processes G whole sequences per grid step.  LN gammas/betas, BN3 scale and the
    attention scale are folded into the bf16 weights by the glue code."""
    G, seq, dim = x_ref.shape
    rows = G * seq
    inner = heads * dim_head

    x = x_ref[...].reshape(rows, dim).astype(F32)
    xn = _layernorm(x, eps).astype(BF16)

    # One lane-dense QKV projection: N = 3*inner (= 384 at default config).
    qkv = jnp.dot(xn, wqkv_ref[...], preferred_element_type=F32) + sqkv_ref[...]

    def to_batched(base):
        parts = [qkv[:, base + h * dim_head: base + (h + 1) * dim_head]
                 .reshape(G, seq, dim_head) for h in range(heads)]
        return jnp.concatenate(parts, axis=0).astype(BF16)        # [heads*G, seq, dh]

    q = to_batched(0)
    k = to_batched(inner)
    v = to_batched(2 * inner)

    # All heads and sequences in one batched matmul pair + one softmax.
    s = jnp.einsum('bqd,bkd->bqk', q, k, preferred_element_type=F32)
    m = jnp.max(s, axis=-1, keepdims=True)
    p = jnp.exp(s - m)
    p = p / jnp.sum(p, axis=-1, keepdims=True)    # exact softmax (torch parity)
    ctx = jnp.einsum('bqk,bkd->bqd', p.astype(BF16), v, preferred_element_type=F32)

    # Re-pack head contexts to [rows, inner] and run a single K=inner output proj.
    ctx2 = jnp.concatenate(
        [ctx[h * G:(h + 1) * G].reshape(rows, dim_head) for h in range(heads)],
        axis=-1).astype(BF16)
    attn = jnp.dot(ctx2, wo_ref[...], preferred_element_type=F32) + bo_ref[...] + x

    # PreNorm FeedForward (+ residual); LN2 folded into wff1/bff1.
    xn2 = _layernorm(attn, eps).astype(BF16)
    hmid = _silu(jnp.dot(xn2, wff1_ref[...], preferred_element_type=F32) + bff1_ref[...])
    t = (jnp.dot(hmid.astype(BF16), wff2_ref[...], preferred_element_type=F32)
         + bff2_ref[...] + attn)

    # conv3 (1x1 dim->channel) + BN + SiLU; per-pixel so it commutes with the
    # patch<->spatial rearrange done outside.
    z = _silu(jnp.dot(t.astype(BF16), w3_ref[...], preferred_element_type=F32)
              + b3_ref[...])
    o_ref[...] = z.reshape(G, seq, -1).astype(o_ref.dtype)


def _conv4_kernel(zp_ref, yp_ref, wz_ref, wy_ref, b_ref, o_ref, *, H, W):
    """conv4(3x3, 2C->C)+BN+SiLU; the channel concat is replaced by split-K
    accumulation over the two padded operands (conv3 output, residual)."""
    acc = _conv3x3_taps(zp_ref[0], wz_ref, H, W)
    acc = acc + _conv3x3_taps(yp_ref[0], wy_ref, H, W)
    o_ref[...] = _silu(acc + b_ref[...]).reshape(o_ref.shape).astype(o_ref.dtype)


# ---------------------------------------------------------------------------
# pallas_call wrappers
# ---------------------------------------------------------------------------
# TODO(synk): conv kernels use one grid step per image (B steps); at B=2 on v7x that
# is 1 step/core with no DMA/compute overlap, but the per-image working set is a few
# KiB so extra grid steps would only add fixed per-step overhead at these shapes.
def conv12(xpad, w1_taps, b1, w2, b2, *, H, W):
    B, _, _, C = xpad.shape
    C1, dim = w1_taps.shape[-1], w2.shape[-1]
    return pl.pallas_call(
        functools.partial(_conv12_kernel, H=H, W=W),
        out_shape=jax.ShapeDtypeStruct((B, H * W, dim), BF16),
        grid=(B,),
        in_specs=[
            pl.BlockSpec((1, H + 2, W + 2, C), lambda b: (b, 0, 0, 0)),
            _const_spec((9, C, C1)), _const_spec((1, C1)),
            _const_spec((C1, dim)), _const_spec((1, dim)),
        ],
        out_specs=pl.BlockSpec((1, H * W, dim), lambda b: (b, 0, 0)),
        compiler_params=_cparams(),
    )(xpad, w1_taps, b1.reshape(1, C1), w2, b2.reshape(1, dim))


def _attn_group(n_seqs, seq, dim, heads, dim_head, mlp, cout):
    """Largest #sequences per grid step whose working set (scores, probs, f32 copies,
    double-buffered I/O blocks and weights included) fits the VMEM budget while
    leaving >= 4 grid steps (v7x: 2 TensorCores x double buffering)."""
    inner = heads * dim_head

    def workset(g):
        rows = g * seq
        b = 3 * rows * dim * 4 + 2 * rows * dim * 2            # x/attn/t f32, xn/xn2
        b += rows * 3 * inner * 4                               # qkv f32
        b += 3 * heads * g * seq * dim_head * 2                 # q, k, v bf16
        b += 2 * heads * g * seq * seq * 4                      # scores + probs f32
        b += heads * g * seq * dim_head * 4 + rows * inner * 2  # ctx f32, ctx2 bf16
        b += rows * mlp * (4 + 2) + rows * cout * 4             # ffn hidden, conv3 out
        b += 2 * (rows * dim * 2 + rows * cout * 2)             # double-buffered I/O
        b += 2 * ((dim * 3 * inner + inner * dim + dim * mlp + mlp * dim
                   + dim * cout) * 2 + (3 * inner + 3 * dim + mlp + cout) * 4)
        return b

    min_steps = min(4, n_seqs)
    cands = [g for g in range(n_seqs, 0, -1)
             if n_seqs % g == 0 and n_seqs // g >= min_steps]
    for g in cands:
        if workset(g) <= ATTN_VMEM_BUDGET:
            return g
    return cands[-1]


def transformer_conv3(x3, wqkv, sqkv, wo, bo, wff1, bff1, wff2, bff2, w3, b3, *,
                      heads, dim_head, eps=1e-5):
    n_seqs, seq, dim = x3.shape
    inner = heads * dim_head
    mlp, cout = wff1.shape[-1], w3.shape[-1]
    G = _attn_group(n_seqs, seq, dim, heads, dim_head, mlp, cout)
    kernel = functools.partial(_transformer_kernel, heads=heads, dim_head=dim_head,
                               eps=eps)
    return pl.pallas_call(
        kernel,
        out_shape=jax.ShapeDtypeStruct((n_seqs, seq, cout), BF16),
        grid=(n_seqs // G,),
        in_specs=[
            pl.BlockSpec((G, seq, dim), lambda i: (i, 0, 0)),
            _const_spec((dim, 3 * inner)), _const_spec((1, 3 * inner)),
            _const_spec((inner, dim)), _const_spec((1, dim)),
            _const_spec((dim, mlp)), _const_spec((1, mlp)),
            _const_spec((mlp, dim)), _const_spec((1, dim)),
            _const_spec((dim, cout)), _const_spec((1, cout)),
        ],
        out_specs=pl.BlockSpec((G, seq, cout), lambda i: (i, 0, 0)),
        compiler_params=_cparams(),
    )(x3, wqkv, sqkv.reshape(1, 3 * inner), wo, bo.reshape(1, dim),
      wff1, bff1.reshape(1, mlp), wff2, bff2.reshape(1, dim), w3, b3.reshape(1, cout))


def conv4(zpad, ypad, w4z, w4y, b4, *, H, W):
    B, _, _, C = zpad.shape
    Co = w4z.shape[-1]
    return pl.pallas_call(
        functools.partial(_conv4_kernel, H=H, W=W),
        out_shape=jax.ShapeDtypeStruct((B, H * W, Co), F32),
        grid=(B,),
        in_specs=[
            pl.BlockSpec((1, H + 2, W + 2, C), lambda b: (b, 0, 0, 0)),
            pl.BlockSpec((1, H + 2, W + 2, C), lambda b: (b, 0, 0, 0)),
            _const_spec((9, C, Co)), _const_spec((9, C, Co)), _const_spec((1, Co)),
        ],
        out_specs=pl.BlockSpec((1, H * W, Co), lambda b: (b, 0, 0)),
        compiler_params=_cparams(),
    )(zpad, ypad, w4z, w4y, b4.reshape(1, Co))


# ---------------------------------------------------------------------------
# Glue helpers (weight reshaping / BN-LN folding) — all tiny XLA ops
# ---------------------------------------------------------------------------
def conv3x3_taps_mat(w, scale):
    """[Cout, Cin, 3, 3] (* folded BN scale) -> [9, Cin, Cout], tap order (kh, kw)."""
    return (jnp.transpose(w, (2, 3, 1, 0)) * scale).reshape(9, w.shape[1], w.shape[0])


def conv1x1_mat(w, scale):
    """[Cout, Cin, 1, 1] -> [Cin, Cout] with folded BN scale."""
    return jnp.transpose(w[:, :, 0, 0], (1, 0)) * scale


def bn_fold(gamma, beta, mean, var, eps=1e-5):
    """Eval-mode BatchNorm folded into (scale, shift)."""
    scale = gamma / jnp.sqrt(var + eps)
    return scale, beta - mean * scale


# ---------------------------------------------------------------------------
# GlobalBlock forward (depth = 1 transformer)
# ---------------------------------------------------------------------------
def global_block_forward(x_nchw, p, *, dim, channel, heads, dim_head, ph, pw,
                         eps=1e-5):
    B, C, H, W = x_nchw.shape
    inner = heads * dim_head
    h_o, w_o = H // ph, W // pw
    seq = h_o * w_o
    n_seqs = B * ph * pw

    # NCHW -> NHWC (channels on lanes) + the single spatial pad both 3x3 convs need.
    y_nhwc = jnp.transpose(x_nchw, (0, 2, 3, 1)).astype(BF16)
    xpad = jnp.pad(y_nhwc, ((0, 0), (1, 1), (1, 1), (0, 0)))

    # kernel 1: conv1(3x3)+BN1+SiLU -> conv2(1x1)+BN2+SiLU
    s1, b1 = bn_fold(*p["bn1"], eps)
    s2, b2 = bn_fold(*p["bn2"], eps)
    w1_taps = conv3x3_taps_mat(p["conv1_w"], s1).astype(BF16)
    w2 = conv1x1_mat(p["conv2_w"], s2).astype(BF16)
    xc = conv12(xpad, w1_taps, b1, w2, b2, H=H, W=W)              # [B, H*W, dim] bf16

    # rearrange 'b d (h ph) (w pw) -> b (ph pw) (h w) d' (one tiny XLA transpose).
    x3 = (xc.reshape(B, h_o, ph, w_o, pw, dim)
            .transpose(0, 2, 4, 1, 3, 5)
            .reshape(n_seqs, seq, dim))

    # kernel 2 weights: fold LN1/LN2 gamma+beta and the attention scale into matmuls.
    scale = dim_head ** -0.5
    qscale = jnp.concatenate([jnp.full((inner,), scale, F32),
                              jnp.ones((2 * inner,), F32)])
    wqkv = (p["ln1_g"][:, None] * p["w_qkv"] * qscale[None, :]).astype(BF16)
    sqkv = (p["ln1_b"] @ p["w_qkv"]) * qscale
    wff1 = (p["ln2_g"][:, None] * p["w_ff1"]).astype(BF16)
    bff1 = p["b_ff1"] + p["ln2_b"] @ p["w_ff1"]
    # TODO(synk): reference declares BatchNorm2d(dim) after conv3, whose output has
    # `channel` features (would raise in PyTorch); we normalize over `channel`.
    s3, b3 = bn_fold(*p["bn3"], eps)
    w3 = conv1x1_mat(p["conv3_w"], s3).astype(BF16)
    z3 = transformer_conv3(x3, wqkv, sqkv, p["w_out"].astype(BF16), p["b_out"],
                           wff1, bff1, p["w_ff2"].astype(BF16), p["b_ff2"], w3, b3,
                           heads=heads, dim_head=dim_head, eps=eps)
    # z3: [n_seqs, seq, channel] bf16

    # inverse rearrange back to NHWC spatial + pad for conv4.
    z = (z3.reshape(B, ph, pw, h_o, w_o, channel)
           .transpose(0, 3, 1, 4, 2, 5)
           .reshape(B, H, W, channel))
    zpad = jnp.pad(z, ((0, 0), (1, 1), (1, 1), (0, 0)))

    # kernel 3: conv4(3x3 over concat(z, residual)) via split-K accumulation; xpad is
    # reused as the padded residual, so no [B,H,W,2C] concat ever hits HBM.
    s4, b4 = bn_fold(*p["bn4"], eps)
    w4t = jnp.transpose(p["conv4_w"], (2, 3, 1, 0)) * s4          # [3,3,2C,Cout]
    w4z = w4t[:, :, :channel, :].reshape(9, channel, channel).astype(BF16)
    w4y = w4t[:, :, channel:, :].reshape(9, channel, channel).astype(BF16)
    out = conv4(zpad, xpad, w4z, w4y, b4, H=H, W=W)               # [B, H*W, C] f32

    return jnp.transpose(out.reshape(B, H, W, channel), (0, 3, 1, 2))   # NCHW


# ---------------------------------------------------------------------------
# Deterministic parameter init (synthetic; no checkpoint loading)
# ---------------------------------------------------------------------------
def init_params(key, *, dim, channel, heads, dim_head, mlp_dim):
    inner = heads * dim_head
    ks = iter(jax.random.split(key, 40))

    def nrm(shape, s=0.05):
        return jax.random.normal(next(ks), shape, F32) * s

    def bn(n):  # (gamma, beta, running_mean, running_var)
        return (1.0 + nrm((n,)), nrm((n,)), nrm((n,)), 1.0 + jnp.abs(nrm((n,))))

    return {
        "conv1_w": nrm((channel, channel, 3, 3), 0.2),
        "bn1": bn(channel),
        "conv2_w": nrm((dim, channel, 1, 1), 0.2),
        "bn2": bn(dim),
        "ln1_g": 1.0 + nrm((dim,)),
        "ln1_b": nrm((dim,)),
        "w_qkv": nrm((dim, 3 * inner), 0.1),
        "w_out": nrm((inner, dim), 0.1),
        "b_out": nrm((dim,)),
        "ln2_g": 1.0 + nrm((dim,)),
        "ln2_b": nrm((dim,)),
        "w_ff1": nrm((dim, mlp_dim), 0.1),
        "b_ff1": nrm((mlp_dim,)),
        "w_ff2": nrm((mlp_dim, dim), 0.1),
        "b_ff2": nrm((dim,)),
        "conv3_w": nrm((channel, dim, 1, 1), 0.2),
        "bn3": bn(channel),
        "conv4_w": nrm((channel, 2 * channel, 3, 3), 0.2),
        "bn4": bn(channel),
    }


if __name__ == "__main__":
    B, channel, H, W = 2, 4, 16, 16
    dim, heads, dim_head = 32, 4, 32          # Transformer(dim, depth=1, 4, 32, 2*dim)
    ph, pw = 2, 2                             # patch_size = (2, 2)
    mlp_dim = dim * 2

    key = jax.random.PRNGKey(0)
    kx, kp = jax.random.split(key)
    x = jax.random.normal(kx, (B, channel, H, W), F32)
    params = init_params(kp, dim=dim, channel=channel, heads=heads,
                         dim_head=dim_head, mlp_dim=mlp_dim)

    fwd = jax.jit(functools.partial(global_block_forward, dim=dim, channel=channel,
                                    heads=heads, dim_head=dim_head, ph=ph, pw=pw))
    out = fwd(x, params)
    jax.block_until_ready(out)
    assert out.shape == (B, channel, H, W)
    assert bool(jnp.all(jnp.isfinite(out)))
    print("KERNEL_OK")
</pallas_src>

<mosaic_0001>
module attributes {stable_mosaic.version = 11 : i64} {
  func.func @_conv12_kernel(%arg0: i32, %arg1: memref<1x18x18x4xbf16, #tpu.memory_space<vmem>>, %arg2: memref<9x4x4xbf16, #tpu.memory_space<vmem>>, %arg3: memref<1x4xf32, #tpu.memory_space<vmem>>, %arg4: memref<4x32xbf16, #tpu.memory_space<vmem>>, %arg5: memref<1x32xf32, #tpu.memory_space<vmem>>, %arg6: memref<1x256x32xbf16, #tpu.memory_space<vmem>>) attributes {dimension_semantics = [#tpu.dimension_semantics<parallel>], iteration_bounds = array<i64: 2>, scalar_prefetch = 0 : i64, scratch_operands = 0 : i64, tpu.core_type = #tpu.core_type<tc>, window_params = [{transform_indices = @transform_0, window_bounds = array<i64: 1, 18, 18, 4>}, {pipeline_mode = #tpu.pipeline_mode<synchronous>, transform_indices = @transform_1, window_bounds = array<i64: 9, 4, 4>}, {pipeline_mode = #tpu.pipeline_mode<synchronous>, transform_indices = @transform_2, window_bounds = array<i64: 1, 4>}, {pipeline_mode = #tpu.pipeline_mode<synchronous>, transform_indices = @transform_3, window_bounds = array<i64: 4, 32>}, {pipeline_mode = #tpu.pipeline_mode<synchronous>, transform_indices = @transform_4, window_bounds = array<i64: 1, 32>}, {transform_indices = @transform_5, window_bounds = array<i64: 1, 256, 32>}]} {
    %c0 = arith.constant 0 : index
    %c0_0 = arith.constant 0 : index
    %c0_1 = arith.constant 0 : index
    %c0_2 = arith.constant 0 : index
    %0 = vector.load %arg1[%c0, %c0_0, %c0_1, %c0_2] : memref<1x18x18x4xbf16, #tpu.memory_space<vmem>>, vector<1x18x18x4xbf16>
    %1 = vector.shape_cast %0 : vector<1x18x18x4xbf16> to vector<18x18x4xbf16>
    %2 = vector.extract_strided_slice %1 {offsets = [0, 0, 0], sizes = [16, 16, 4], strides = [1, 1, 1]} : vector<18x18x4xbf16> to vector<16x16x4xbf16>
    %3 = vector.shape_cast %2 : vector<16x16x4xbf16> to vector<256x4xbf16>
    %c0_3 = arith.constant 0 : index
    %c0_4 = arith.constant 0 : index
    %c0_5 = arith.constant 0 : index
    %4 = vector.load %arg2[%c0_3, %c0_4, %c0_5] : memref<9x4x4xbf16, #tpu.memory_space<vmem>>, vector<1x4x4xbf16>
    %5 = vector.shape_cast %4 : vector<1x4x4xbf16> to vector<4x4xbf16>
    %cst = arith.constant dense<0.000000e+00> : vector<256x4xf32>
    %6 = tpu.matmul %3, %5, %cst {dimension_numbers = #tpu.dot_dimension_numbers<[1], [0], [0], [1], [0, 0, 1, 1], [], []>} : vector<256x4xbf16>, vector<4x4xbf16>, vector<256x4xf32> -> vector<256x4xf32>
    %7 = vector.extract_strided_slice %1 {offsets = [0, 1, 0], sizes = [16, 16, 4], strides = [1, 1, 1]} : vector<18x18x4xbf16> to vector<16x16x4xbf16>
    %8 = vector.shape_cast %7 : vector<16x16x4xbf16> to vector<256x4xbf16>
    %c1 = arith.constant 1 : index
    %c0_6 = arith.constant 0 : index
    %c0_7 = arith.constant 0 : index
    %9 = vector.load %arg2[%c1, %c0_6, %c0_7] : memref<9x4x4xbf16, #tpu.memory_space<vmem>>, vector<1x4x4xbf16>
    %10 = vector.shape_cast %9 : vector<1x4x4xbf16> to vector<4x4xbf16>
    %cst_8 = arith.constant dense<0.000000e+00> : vector<256x4xf32>
    %11 = tpu.matmul %8, %10, %cst_8 {dimension_numbers = #tpu.dot_dimension_numbers<[1], [0], [0], [1], [0, 0, 1, 1], [], []>} : vector<256x4xbf16>, vector<4x4xbf16>, vector<256x4xf32> -> vector<256x4xf32>
    %12 = arith.addf %6, %11 : vector<256x4xf32>
    %13 = vector.extract_strided_slice %1 {offsets = [0, 2, 0], sizes = [16, 16, 4], strides = [1, 1, 1]} : vector<18x18x4xbf16> to vector<16x16x4xbf16>
    %14 = vector.shape_cast %13 : vector<16x16x4xbf16> to vector<256x4xbf16>
    %c2 = arith.constant 2 : index
    %c0_9 = arith.constant 0 : index
    %c0_10 = arith.constant 0 : index
    %15 = vector.load %arg2[%c2, %c0_9, %c0_10] : memref<9x4x4xbf16, #tpu.memory_space<vmem>>, vector<1x4x4xbf16>
    %16 = vector.shape_cast %15 : vector<1x4x4xbf16> to vector<4x4xbf16>
    %cst_11 = arith.constant dense<0.000000e+00> : vector<256x4xf32>
    %17 = tpu.matmul %14, %16, %cst_11 {dimension_numbers = #tpu.dot_dimension_numbers<[1], [0], [0], [1], [0, 0, 1, 1], [], []>} : vector<256x4xbf16>, vector<4x4xbf16>, vector<256x4xf32> -> vector<256x4xf32>
    %18 = arith.addf %12, %17 : vector<256x4xf32>
    %19 = vector.extract_strided_slice %1 {offsets = [1, 0, 0], sizes = [16, 16, 4], strides = [1, 1, 1]} : vector<18x18x4xbf16> to vector<16x16x4xbf16>
    %20 = vector.shape_cast %19 : vector<16x16x4xbf16> to vector<256x4xbf16>
    %c3 = arith.constant 3 : index
    %c0_12 = arith.constant 0 : index
    %c0_13 = arith.constant 0 : index
    %21 = vector.load %arg2[%c3, %c0_12, %c0_13] : memref<9x4x4xbf16, #tpu.memory_space<vmem>>, vector<1x4x4xbf16>
    %22 = vector.shape_cast %21 : vector<1x4x4xbf16> to vector<4x4xbf16>
    %cst_14 = arith.constant dense<0.000000e+00> : vector<256x4xf32>
    %23 = tpu.matmul %20, %22, %cst_14 {dimension_numbers = #tpu.dot_dimension_numbers<[1], [0], [0], [1], [0, 0, 1, 1], [], []>} : vector<256x4xbf16>, vector<4x4xbf16>, vector<256x4xf32> -> vector<256x4xf32>
    %24 = arith.addf %18, %23 : vector<256x4xf32>
    %25 = vector.extract_strided_slice %1 {offsets = [1, 1, 0], sizes = [16, 16, 4], strides = [1, 1, 1]} : vector<18x18x4xbf16> to vector<16x16x4xbf16>
    %26 = vector.shape_cast %25 : vector<16x16x4xbf16> to vector<256x4xbf16>
    %c4 = arith.constant 4 : index
    %c0_15 = arith.constant 0 : index
    %c0_16 = arith.constant 0 : index
    %27 = vector.load %arg2[%c4, %c0_15, %c0_16] : memref<9x4x4xbf16, #tpu.memory_space<vmem>>, vector<1x4x4xbf16>
    %28 = vector.shape_cast %27 : vector<1x4x4xbf16> to vector<4x4xbf16>
    %cst_17 = arith.constant dense<0.000000e+00> : vector<256x4xf32>
    %29 = tpu.matmul %26, %28, %cst_17 {dimension_numbers = #tpu.dot_dimension_numbers<[1], [0], [0], [1], [0, 0, 1, 1], [], []>} : vector<256x4xbf16>, vector<4x4xbf16>, vector<256x4xf32> -> vector<256x4xf32>
    %30 = arith.addf %24, %29 : vector<256x4xf32>
    %31 = vector.extract_strided_slice %1 {offsets = [1, 2, 0], sizes = [16, 16, 4], strides = [1, 1, 1]} : vector<18x18x4xbf16> to vector<16x16x4xbf16>
    %32 = vector.shape_cast %31 : vector<16x16x4xbf16> to vector<256x4xbf16>
    %c5 = arith.constant 5 : index
    %c0_18 = arith.constant 0 : index
    %c0_19 = arith.constant 0 : index
    %33 = vector.load %arg2[%c5, %c0_18, %c0_19] : memref<9x4x4xbf16, #tpu.memory_space<vmem>>, vector<1x4x4xbf16>
    %34 = vector.shape_cast %33 : vector<1x4x4xbf16> to vector<4x4xbf16>
    %cst_20 = arith.constant dense<0.000000e+00> : vector<256x4xf32>
    %35 = tpu.matmul %32, %34, %cst_20 {dimension_numbers = #tpu.dot_dimension_numbers<[1], [0], [0], [1], [0, 0, 1, 1], [], []>} : vector<256x4xbf16>, vector<4x4xbf16>, vector<256x4xf32> -> vector<256x4xf32>
    %36 = arith.addf %30, %35 : vector<256x4xf32>
    %37 = vector.extract_strided_slice %1 {offsets = [2, 0, 0], sizes = [16, 16, 4], strides = [1, 1, 1]} : vector<18x18x4xbf16> to vector<16x16x4xbf16>
    %38 = vector.shape_cast %37 : vector<16x16x4xbf16> to vector<256x4xbf16>
    %c6 = arith.constant 6 : index
    %c0_21 = arith.constant 0 : index
    %c0_22 = arith.constant 0 : index
    %39 = vector.load %arg2[%c6, %c0_21, %c0_22] : memref<9x4x4xbf16, #tpu.memory_space<vmem>>, vector<1x4x4xbf16>
    %40 = vector.shape_cast %39 : vector<1x4x4xbf16> to vector<4x4xbf16>
    %cst_23 = arith.constant dense<0.000000e+00> : vector<256x4xf32>
    %41 = tpu.matmul %38, %40, %cst_23 {dimension_numbers = #tpu.dot_dimension_numbers<[1], [0], [0], [1], [0, 0, 1, 1], [], []>} : vector<256x4xbf16>, vector<4x4xbf16>, vector<256x4xf32> -> vector<256x4xf32>
    %42 = arith.addf %36, %41 : vector<256x4xf32>
    %43 = vector.extract_strided_slice %1 {offsets = [2, 1, 0], sizes = [16, 16, 4], strides = [1, 1, 1]} : vector<18x18x4xbf16> to vector<16x16x4xbf16>
    %44 = vector.shape_cast %43 : vector<16x16x4xbf16> to vector<256x4xbf16>
    %c7 = arith.constant 7 : index
    %c0_24 = arith.constant 0 : index
    %c0_25 = arith.constant 0 : index
    %45 = vector.load %arg2[%c7, %c0_24, %c0_25] : memref<9x4x4xbf16, #tpu.memory_space<vmem>>, vector<1x4x4xbf16>
    %46 = vector.shape_cast %45 : vector<1x4x4xbf16> to vector<4x4xbf16>
    %cst_26 = arith.constant dense<0.000000e+00> : vector<256x4xf32>
    %47 = tpu.matmul %44, %46, %cst_26 {dimension_numbers = #tpu.dot_dimension_numbers<[1], [0], [0], [1], [0, 0, 1, 1], [], []>} : vector<256x4xbf16>, vector<4x4xbf16>, vector<256x4xf32> -> vector<256x4xf32>
    %48 = arith.addf %42, %47 : vector<256x4xf32>
    %49 = vector.extract_strided_slice %1 {offsets = [2, 2, 0], sizes = [16, 16, 4], strides = [1, 1, 1]} : vector<18x18x4xbf16> to vector<16x16x4xbf16>
    %50 = vector.shape_cast %49 : vector<16x16x4xbf16> to vector<256x4xbf16>
    %c8 = arith.constant 8 : index
    %c0_27 = arith.constant 0 : index
    %c0_28 = arith.constant 0 : index
    %51 = vector.load %arg2[%c8, %c0_27, %c0_28] : memref<9x4x4xbf16, #tpu.memory_space<vmem>>, vector<1x4x4xbf16>
    %52 = vector.shape_cast %51 : vector<1x4x4xbf16> to vector<4x4xbf16>
    %cst_29 = arith.constant dense<0.000000e+00> : vector<256x4xf32>
    %53 = tpu.matmul %50, %52, %cst_29 {dimension_numbers = #tpu.dot_dimension_numbers<[1], [0], [0], [1], [0, 0, 1, 1], [], []>} : vector<256x4xbf16>, vector<4x4xbf16>, vector<256x4xf32> -> vector<256x4xf32>
    %54 = arith.addf %48, %53 : vector<256x4xf32>
    %c0_30 = arith.constant 0 : index
    %c0_31 = arith.constant 0 : index
    %55 = vector.load %arg3[%c0_30, %c0_31] : memref<1x4xf32, #tpu.memory_space<vmem>>, vector<1x4xf32>
    %56 = vector.broadcast %55 : vector<1x4xf32> to vector<256x4xf32>
    %57 = arith.addf %54, %56 : vector<256x4xf32>
    %cst_32 = arith.constant 0.000000e+00 : f32
    %58 = vector.broadcast %cst_32 : f32 to vector<256x4xf32>
    %59 = arith.subf %58, %57 : vector<256x4xf32>
    %60 = math.exp %59 : vector<256x4xf32>
    %cst_33 = arith.constant 1.000000e+00 : f32
    %61 = vector.broadcast %cst_33 : f32 to vector<256x4xf32>
    %62 = arith.addf %61, %60 : vector<256x4xf32>
    %63 = tpu.reciprocal %62 {approx = true} : vector<256x4xf32> -> vector<256x4xf32>
    %64 = arith.mulf %57, %63 : vector<256x4xf32>
    %65 = arith.truncf %64 : vector<256x4xf32> to vector<256x4xbf16>
    %c0_34 = arith.constant 0 : index
    %c0_35 = arith.constant 0 : index
    %66 = vector.load %arg4[%c0_34, %c0_35] : memref<4x32xbf16, #tpu.memory_space<vmem>>, vector<4x32xbf16>
    %cst_36 = arith.constant dense<0.000000e+00> : vector<256x32xf32>
    %67 = tpu.matmul %65, %66, %cst_36 {dimension_numbers = #tpu.dot_dimension_numbers<[1], [0], [0], [1], [0, 0, 1, 1], [], []>} : vector<256x4xbf16>, vector<4x32xbf16>, vector<256x32xf32> -> vector<256x32xf32>
    %c0_37 = arith.constant 0 : index
    %c0_38 = arith.constant 0 : index
    %68 = vector.load %arg5[%c0_37, %c0_38] : memref<1x32xf32, #tpu.memory_space<vmem>>, vector<1x32xf32>
    %69 = vector.broadcast %68 : vector<1x32xf32> to vector<256x32xf32>
    %70 = arith.addf %67, %69 : vector<256x32xf32>
    %cst_39 = arith.constant 0.000000e+00 : f32
    %71 = vector.broadcast %cst_39 : f32 to vector<256x32xf32>
    %72 = arith.subf %71, %70 : vector<256x32xf32>
    %73 = math.exp %72 : vector<256x32xf32>
    %cst_40 = arith.constant 1.000000e+00 : f32
    %74 = vector.broadcast %cst_40 : f32 to vector<256x32xf32>
    %75 = arith.addf %74, %73 : vector<256x32xf32>
    %76 = tpu.reciprocal %75 {approx = true} : vector<256x32xf32> -> vector<256x32xf32>
    %77 = arith.mulf %70, %76 : vector<256x32xf32>
    %78 = vector.shape_cast %77 : vector<256x32xf32> to vector<1x256x32xf32>
    %79 = arith.truncf %78 : vector<1x256x32xf32> to vector<1x256x32xbf16>
    %c0_41 = arith.constant 0 : index
    %c0_42 = arith.constant 0 : index
    %c0_43 = arith.constant 0 : index
    %80 = vector.load %arg6[%c0_41, %c0_42, %c0_43] : memref<1x256x32xbf16, #tpu.memory_space<vmem>>, vector<1x256x32xbf16>
    tpu.vector_store %arg6[%c0_41, %c0_42, %c0_43], %79 {strides = array<i32>} : memref<1x256x32xbf16, #tpu.memory_space<vmem>>, vector<1x256x32xbf16>,
    return
  }
  func.func @transform_0(%arg0: i32) -> (i32, i32, i32, i32) {
    %c0_i32 = arith.constant 0 : i32
    %c0_i32_0 = arith.constant 0 : i32
    %c0_i32_1 = arith.constant 0 : i32
    %c0_i32_2 = arith.constant 0 : i32
    return %arg0, %c0_i32, %c0_i32_0, %c0_i32_1 : i32, i32, i32, i32
  }
  func.func @transform_1(%arg0: i32) -> (i32, i32, i32) {
    %c0_i32 = arith.constant 0 : i32
    %c0_i32_0 = arith.constant 0 : i32
    %c0_i32_1 = arith.constant 0 : i32
    %c0_i32_2 = arith.constant 0 : i32
    return %c0_i32, %c0_i32_0, %c0_i32_1 : i32, i32, i32
  }
  func.func @transform_2(%arg0: i32) -> (i32, i32) {
    %c0_i32 = arith.constant 0 : i32
    %c0_i32_0 = arith.constant 0 : i32
    %c0_i32_1 = arith.constant 0 : i32
    return %c0_i32, %c0_i32_0 : i32, i32
  }
  func.func @transform_3(%arg0: i32) -> (i32, i32) {
    %c0_i32 = arith.constant 0 : i32
    %c0_i32_0 = arith.constant 0 : i32
    %c0_i32_1 = arith.constant 0 : i32
    return %c0_i32, %c0_i32_0 : i32, i32
  }
  func.func @transform_4(%arg0: i32) -> (i32, i32) {
    %c0_i32 = arith.constant 0 : i32
    %c0_i32_0 = arith.constant 0 : i32
    %c0_i32_1 = arith.constant 0 : i32
    return %c0_i32, %c0_i32_0 : i32, i32
  }
  func.func @transform_5(%arg0: i32) -> (i32, i32, i32) {
    %c0_i32 = arith.constant 0 : i32
    %c0_i32_0 = arith.constant 0 : i32
    %c0_i32_1 = arith.constant 0 : i32
    return %arg0, %c0_i32, %c0_i32_0 : i32, i32, i32
  }
}

module attributes {stable_mosaic.version = 11 : i64} {
  func.func @_transformer_kernel(%arg0: i32, %arg1: memref<2x64x32xbf16, #tpu.memory_space<vmem>>, %arg2: memref<32x384xbf16, #tpu.memory_space<vmem>>, %arg3: memref<1x384xf32, #tpu.memory_space<vmem>>, %arg4: memref<128x32xbf16, #tpu.memory_space<vmem>>, %arg5: memref<1x32xf32, #tpu.memory_space<vmem>>, %arg6: memref<32x64xbf16, #tpu.memory_space<vmem>>, %arg7: memref<1x64xf32, #tpu.memory_space<vmem>>, %arg8: memref<64x32xbf16, #tpu.memory_space<vmem>>, %arg9: memref<1x32xf32, #tpu.memory_space<vmem>>, %arg10: memref<32x4xbf16, #tpu.memory_space<vmem>>, %arg11: memref<1x4xf32, #tpu.memory_space<vmem>>, %arg12: memref<2x64x4xbf16, #tpu.memory_space<vmem>>) attributes {dimension_semantics = [#tpu.dimension_semantics<parallel>], iteration_bounds = array<i64: 4>, scalar_prefetch = 0 : i64, scratch_operands = 0 : i64, tpu.core_type = #tpu.core_type<tc>, window_params = [{transform_indices = @transform_0, window_bounds = array<i64: 2, 64, 32>}, {pipeline_mode = #tpu.pipeline_mode<synchronous>, transform_indices = @transform_1, window_bounds = array<i64: 32, 384>}, {pipeline_mode = #tpu.pipeline_mode<synchronous>, transform_indices = @transform_2, window_bounds = array<i64: 1, 384>}, {pipeline_mode = #tpu.pipeline_mode<synchronous>, transform_indices = @transform_3, window_bounds = array<i64: 128, 32>}, {pipeline_mode = #tpu.pipeline_mode<synchronous>, transform_indices = @transform_4, window_bounds = array<i64: 1, 32>}, {pipeline_mode = #tpu.pipeline_mode<synchronous>, transform_indices = @transform_5, window_bounds = array<i64: 32, 64>}, {pipeline_mode = #tpu.pipeline_mode<synchronous>, transform_indices = @transform_6, window_bounds = array<i64: 1, 64>}, {pipeline_mode = #tpu.pipeline_mode<synchronous>, transform_indices = @transform_7, window_bounds = array<i64: 64, 32>}, {pipeline_mode = #tpu.pipeline_mode<synchronous>, transform_indices = @transform_8, window_bounds = array<i64: 1, 32>}, {pipeline_mode = #tpu.pipeline_mode<synchronous>, transform_indices = @transform_9, window_bounds = array<i64: 32, 4>}, {pipeline_mode = #tpu.pipeline_mode<synchronous>, transform_indices = @transform_10, window_bounds = array<i64: 1, 4>}, {transform_indices = @transform_11, window_bounds = array<i64: 2, 64, 4>}]} {
    %c0 = arith.constant 0 : index
    %c0_0 = arith.constant 0 : index
    %c0_1 = arith.constant 0 : index
    %0 = vector.load %arg1[%c0, %c0_0, %c0_1] : memref<2x64x32xbf16, #tpu.memory_space<vmem>>, vector<2x64x32xbf16>
    %1 = vector.shape_cast %0 : vector<2x64x32xbf16> to vector<128x32xbf16>
    %2 = arith.extf %1 : vector<128x32xbf16> to vector<128x32xf32>
    %cst = arith.constant dense<0.000000e+00> : vector<128xf32>
    %3 = vector.multi_reduction <add>, %2, %cst [1] : vector<128x32xf32> to vector<128xf32>
    %4 = vector.shape_cast %3 : vector<128xf32> to vector<128x1xf32>
    %cst_2 = arith.constant 3.200000e+01 : f32
    %5 = vector.broadcast %cst_2 : f32 to vector<128x1xf32>
    %6 = arith.divf %4, %5 : vector<128x1xf32>
    %7 = vector.broadcast %6 : vector<128x1xf32> to vector<128x32xf32>
    %8 = arith.subf %2, %7 : vector<128x32xf32>
    %9 = arith.mulf %8, %8 : vector<128x32xf32>
    %cst_3 = arith.constant dense<0.000000e+00> : vector<128xf32>
    %10 = vector.multi_reduction <add>, %9, %cst_3 [1] : vector<128x32xf32> to vector<128xf32>
    %11 = vector.shape_cast %10 : vector<128xf32> to vector<128x1xf32>
    %cst_4 = arith.constant 3.200000e+01 : f32
    %12 = vector.broadcast %cst_4 : f32 to vector<128x1xf32>
    %13 = arith.divf %11, %12 : vector<128x1xf32>
    %cst_5 = arith.constant 9.99999974E-6 : f32
    %14 = vector.broadcast %cst_5 : f32 to vector<128x1xf32>
    %15 = arith.addf %13, %14 : vector<128x1xf32>
    %16 = math.rsqrt %15 : vector<128x1xf32>
    %17 = vector.broadcast %16 : vector<128x1xf32> to vector<128x32xf32>
    %18 = arith.mulf %8, %17 : vector<128x32xf32>
    %19 = arith.truncf %18 : vector<128x32xf32> to vector<128x32xbf16>
    %c0_6 = arith.constant 0 : index
    %c0_7 = arith.constant 0 : index
    %20 = vector.load %arg2[%c0_6, %c0_7] : memref<32x384xbf16, #tpu.memory_space<vmem>>, vector<32x384xbf16>
    %cst_8 = arith.constant dense<0.000000e+00> : vector<128x384xf32>
    %21 = tpu.matmul %19, %20, %cst_8 {dimension_numbers = #tpu.dot_dimension_numbers<[1], [0], [0], [1], [0, 0, 1, 1], [], []>} : vector<128x32xbf16>, vector<32x384xbf16>, vector<128x384xf32> -> vector<128x384xf32>
    %c0_9 = arith.constant 0 : index
    %c0_10 = arith.constant 0 : index
    %22 = vector.load %arg3[%c0_9, %c0_10] : memref<1x384xf32, #tpu.memory_space<vmem>>, vector<1x384xf32>
    %23 = vector.broadcast %22 : vector<1x384xf32> to vector<128x384xf32>
    %24 = arith.addf %21, %23 : vector<128x384xf32>
    %25 = vector.extract_strided_slice %24 {offsets = [0, 0], sizes = [128, 32], strides = [1, 1]} : vector<128x384xf32> to vector<128x32xf32>
    %26 = vector.shape_cast %25 : vector<128x32xf32> to vector<2x64x32xf32>
    %27 = vector.extract_strided_slice %24 {offsets = [0, 32], sizes = [128, 32], strides = [1, 1]} : vector<128x384xf32> to vector<128x32xf32>
    %28 = vector.shape_cast %27 : vector<128x32xf32> to vector<2x64x32xf32>
    %29 = vector.extract_strided_slice %24 {offsets = [0, 64], sizes = [128, 32], strides = [1, 1]} : vector<128x384xf32> to vector<128x32xf32>
    %30 = vector.shape_cast %29 : vector<128x32xf32> to vector<2x64x32xf32>
    %31 = vector.extract_strided_slice %24 {offsets = [0, 96], sizes = [128, 32], strides = [1, 1]} : vector<128x384xf32> to vector<128x32xf32>
    %32 = vector.shape_cast %31 : vector<128x32xf32> to vector<2x64x32xf32>
    %33 = tpu.concatenate %26, %28, %30, %32 in 0 : vector<2x64x32xf32>, vector<2x64x32xf32>, vector<2x64x32xf32>, vector<2x64x32xf32> -> vector<8x64x32xf32>
    %34 = arith.truncf %33 : vector<8x64x32xf32> to vector<8x64x32xbf16>
    %35 = vector.extract_strided_slice %24 {offsets = [0, 128], sizes = [128, 32], strides = [1, 1]} : vector<128x384xf32> to vector<128x32xf32>
    %36 = vector.shape_cast %35 : vector<128x32xf32> to vector<2x64x32xf32>
    %37 = vector.extract_strided_slice %24 {offsets = [0, 160], sizes = [128, 32], strides = [1, 1]} : vector<128x384xf32> to vector<128x32xf32>
    %38 = vector.shape_cast %37 : vector<128x32xf32> to vector<2x64x32xf32>
    %39 = vector.extract_strided_slice %24 {offsets = [0, 192], sizes = [128, 32], strides = [1, 1]} : vector<128x384xf32> to vector<128x32xf32>
    %40 = vector.shape_cast %39 : vector<128x32xf32> to vector<2x64x32xf32>
    %41 = vector.extract_strided_slice %24 {offsets = [0, 224], sizes = [128, 32], strides = [1, 1]} : vector<128x384xf32> to vector<128x32xf32>
    %42 = vector.shape_cast %41 : vector<128x32xf32> to vector<2x64x32xf32>
    %43 = tpu.concatenate %36, %38, %40, %42 in 0 : vector<2x64x32xf32>, vector<2x64x32xf32>, vector<2x64x32xf32>, vector<2x64x32xf32> -> vector<8x64x32xf32>
    %44 = arith.truncf %43 : vector<8x64x32xf32> to vector<8x64x32xbf16>
    %45 = vector.extract_strided_slice %24 {offsets = [0, 256], sizes = [128, 32], strides = [1, 1]} : vector<128x384xf32> to vector<128x32xf32>
    %46 = vector.shape_cast %45 : vector<128x32xf32> to vector<2x64x32xf32>
    %47 = vector.extract_strided_slice %24 {offsets = [0, 288], sizes = [128, 32], strides = [1, 1]} : vector<128x384xf32> to vector<128x32xf32>
    %48 = vector.shape_cast %47 : vector<128x32xf32> to vector<2x64x32xf32>
    %49 = vector.extract_strided_slice %24 {offsets = [0, 320], sizes = [128, 32], strides = [1, 1]} : vector<128x384xf32> to vector<128x32xf32>
    %50 = vector.shape_cast %49 : vector<128x32xf32> to vector<2x64x32xf32>
    %51 = vector.extract_strided_slice %24 {offsets = [0, 352], sizes = [128, 32], strides = [1, 1]} : vector<128x384xf32> to vector<128x32xf32>
    %52 = vector.shape_cast %51 : vector<128x32xf32> to vector<2x64x32xf32>
    %53 = tpu.concatenate %46, %48, %50, %52 in 0 : vector<2x64x32xf32>, vector<2x64x32xf32>, vector<2x64x32xf32>, vector<2x64x32xf32> -> vector<8x64x32xf32>
    %54 = arith.truncf %53 : vector<8x64x32xf32> to vector<8x64x32xbf16>
    "tpu.trace_start"() <{level = 10 : i32, message = "bqd,bkd->bqk"}> : () -> ()
    %cst_11 = arith.constant dense<0.000000e+00> : vector<8x64x64xf32>
    %55 = tpu.matmul %34, %44, %cst_11 {dimension_numbers = #tpu.dot_dimension_numbers<[2], [2], [1], [1], [0, 0, 0, 1, 1, 1], [0], [0]>} : vector<8x64x32xbf16>, vector<8x64x32xbf16>, vector<8x64x64xf32> -> vector<8x64x64xf32>
    "tpu.trace_stop"() : () -> ()
    %cst_12 = arith.constant dense<0xFF800000> : vector<8x64xf32>
    %56 = vector.multi_reduction <maximumf>, %55, %cst_12 [2] : vector<8x64x64xf32> to vector<8x64xf32>
    %57 = vector.shape_cast %56 : vector<8x64xf32> to vector<8x64x1xf32>
    %58 = vector.broadcast %57 : vector<8x64x1xf32> to vector<8x64x64xf32>
    %59 = arith.subf %55, %58 : vector<8x64x64xf32>
    %60 = math.exp %59 : vector<8x64x64xf32>
    %cst_13 = arith.constant dense<0.000000e+00> : vector<8x64xf32>
    %61 = vector.multi_reduction <add>, %60, %cst_13 [2] : vector<8x64x64xf32> to vector<8x64xf32>
    %62 = vector.shape_cast %61 : vector<8x64xf32> to vector<8x64x1xf32>
    %63 = vector.broadcast %62 : vector<8x64x1xf32> to vector<8x64x64xf32>
    %64 = arith.divf %60, %63 : vector<8x64x64xf32>
    %65 = arith.truncf %64 : vector<8x64x64xf32> to vector<8x64x64xbf16>
    "tpu.trace_start"() <{level = 10 : i32, message = "bqk,bkd->bqd"}> : () -> ()
    %cst_14 = arith.constant dense<0.000000e+00> : vector<8x64x32xf32>
    %66 = tpu.matmul %65, %54, %cst_14 {dimension_numbers = #tpu.dot_dimension_numbers<[2], [1], [1], [2], [0, 0, 0, 1, 1, 2], [0], [0]>} : vector<8x64x64xbf16>, vector<8x64x32xbf16>, vector<8x64x32xf32> -> vector<8x64x32xf32>
    "tpu.trace_stop"() : () -> ()
    %67 = vector.extract_strided_slice %66 {offsets = [0, 0, 0], sizes = [2, 64, 32], strides = [1, 1, 1]} : vector<8x64x32xf32> to vector<2x64x32xf32>
    %68 = vector.shape_cast %67 : vector<2x64x32xf32> to vector<128x32xf32>
    %69 = vector.extract_strided_slice %66 {offsets = [2, 0, 0], sizes = [2, 64, 32], strides = [1, 1, 1]} : vector<8x64x32xf32> to vector<2x64x32xf32>
    %70 = vector.shape_cast %69 : vector<2x64x32xf32> to vector<128x32xf32>
    %71 = vector.extract_strided_slice %66 {offsets = [4, 0, 0], sizes = [2, 64, 32], strides = [1, 1, 1]} : vector<8x64x32xf32> to vector<2x64x32xf32>
    %72 = vector.shape_cast %71 : vector<2x64x32xf32> to vector<128x32xf32>
    %73 = vector.extract_strided_slice %66 {offsets = [6, 0, 0], sizes = [2, 64, 32], strides = [1, 1, 1]} : vector<8x64x32xf32> to vector<2x64x32xf32>
    %74 = vector.shape_cast %73 : vector<2x64x32xf32> to vector<128x32xf32>
    %75 = tpu.concatenate %68, %70, %72, %74 in 1 : vector<128x32xf32>, vector<128x32xf32>, vector<128x32xf32>, vector<128x32xf32> -> vector<128x128xf32>
    %76 = arith.truncf %75 : vector<128x128xf32> to vector<128x128xbf16>
    %c0_15 = arith.constant 0 : index
    %c0_16 = arith.constant 0 : index
    %77 = vector.load %arg4[%c0_15, %c0_16] : memref<128x32xbf16, #tpu.memory_space<vmem>>, vector<128x32xbf16>
    %cst_17 = arith.constant dense<0.000000e+00> : vector<128x32xf32>
    %78 = tpu.matmul %76, %77, %cst_17 {dimension_numbers = #tpu.dot_dimension_numbers<[1], [0], [0], [1], [0, 0, 1, 1], [], []>} : vector<128x128xbf16>, vector<128x32xbf16>, vector<128x32xf32> -> vector<128x32xf32>
    %c0_18 = arith.constant 0 : index
    %c0_19 = arith.constant 0 : index
    %79 = vector.load %arg5[%c0_18, %c0_19] : memref<1x32xf32, #tpu.memory_space<vmem>>, vector<1x32xf32>
    %80 = vector.broadcast %79 : vector<1x32xf32> to vector<128x32xf32>
    %81 = arith.addf %78, %80 : vector<128x32xf32>
    %82 = arith.addf %81, %2 : vector<128x32xf32>
    %cst_20 = arith.constant dense<0.000000e+00> : vector<128xf32>
    %83 = vector.multi_reduction <add>, %82, %cst_20 [1] : vector<128x32xf32> to vector<128xf32>
    %84 = vector.shape_cast %83 : vector<128xf32> to vector<128x1xf32>
    %cst_21 = arith.constant 3.200000e+01 : f32
    %85 = vector.broadcast %cst_21 : f32 to vector<128x1xf32>
    %86 = arith.divf %84, %85 : vector<128x1xf32>
    %87 = vector.broadcast %86 : vector<128x1xf32> to vector<128x32xf32>
    %88 = arith.subf %82, %87 : vector<128x32xf32>
    %89 = arith.mulf %88, %88 : vector<128x32xf32>
    %cst_22 = arith.constant dense<0.000000e+00> : vector<128xf32>
    %90 = vector.multi_reduction <add>, %89, %cst_22 [1] : vector<128x32xf32> to vector<128xf32>
    %91 = vector.shape_cast %90 : vector<128xf32> to vector<128x1xf32>
    %cst_23 = arith.constant 3.200000e+01 : f32
    %92 = vector.broadcast %cst_23 : f32 to vector<128x1xf32>
    %93 = arith.divf %91, %92 : vector<128x1xf32>
    %cst_24 = arith.constant 9.99999974E-6 : f32
    %94 = vector.broadcast %cst_24 : f32 to vector<128x1xf32>
    %95 = arith.addf %93, %94 : vector<128x1xf32>
    %96 = math.rsqrt %95 : vector<128x1xf32>
    %97 = vector.broadcast %96 : vector<128x1xf32> to vector<128x32xf32>
    %98 = arith.mulf %88, %97 : vector<128x32xf32>
    %99 = arith.truncf %98 : vector<128x32xf32> to vector<128x32xbf16>
    %c0_25 = arith.constant 0 : index
    %c0_26 = arith.constant 0 : index
    %100 = vector.load %arg6[%c0_25, %c0_26] : memref<32x64xbf16, #tpu.memory_space<vmem>>, vector<32x64xbf16>
    %cst_27 = arith.constant dense<0.000000e+00> : vector<128x64xf32>
    %101 = tpu.matmul %99, %100, %cst_27 {dimension_numbers = #tpu.dot_dimension_numbers<[1], [0], [0], [1], [0, 0, 1, 1], [], []>} : vector<128x32xbf16>, vector<32x64xbf16>, vector<128x64xf32> -> vector<128x64xf32>
    %c0_28 = arith.constant 0 : index
    %c0_29 = arith.constant 0 : index
    %102 = vector.load %arg7[%c0_28, %c0_29] : memref<1x64xf32, #tpu.memory_space<vmem>>, vector<1x64xf32>
    %103 = vector.broadcast %102 : vector<1x64xf32> to vector<128x64xf32>
    %104 = arith.addf %101, %103 : vector<128x64xf32>
    %cst_30 = arith.constant 0.000000e+00 : f32
    %105 = vector.broadcast %cst_30 : f32 to vector<128x64xf32>
    %106 = arith.subf %105, %104 : vector<128x64xf32>
    %107 = math.exp %106 : vector<128x64xf32>
    %cst_31 = arith.constant 1.000000e+00 : f32
    %108 = vector.broadcast %cst_31 : f32 to vector<128x64xf32>
    %109 = arith.addf %108, %107 : vector<128x64xf32>
    %110 = tpu.reciprocal %109 {approx = true} : vector<128x64xf32> -> vector<128x64xf32>
    %111 = arith.mulf %104, %110 : vector<128x64xf32>
    %112 = arith.truncf %111 : vector<128x64xf32> to vector<128x64xbf16>
    %c0_32 = arith.constant 0 : index
    %c0_33 = arith.constant 0 : index
    %113 = vector.load %arg8[%c0_32, %c0_33] : memref<64x32xbf16, #tpu.memory_space<vmem>>, vector<64x32xbf16>
    %cst_34 = arith.constant dense<0.000000e+00> : vector<128x32xf32>
    %114 = tpu.matmul %112, %113, %cst_34 {dimension_numbers = #tpu.dot_dimension_numbers<[1], [0], [0], [1], [0, 0, 1, 1], [], []>} : vector<128x64xbf16>, vector<64x32xbf16>, vector<128x32xf32> -> vector<128x32xf32>
    %c0_35 = arith.constant 0 : index
    %c0_36 = arith.constant 0 : index
    %115 = vector.load %arg9[%c0_35, %c0_36] : memref<1x32xf32, #tpu.memory_space<vmem>>, vector<1x32xf32>
    %116 = vector.broadcast %115 : vector<1x32xf32> to vector<128x32xf32>
    %117 = arith.addf %114, %116 : vector<128x32xf32>
    %118 = arith.addf %117, %82 : vector<128x32xf32>
    %119 = arith.truncf %118 : vector<128x32xf32> to vector<128x32xbf16>
    %c0_37 = arith.constant 0 : index
    %c0_38 = arith.constant 0 : index
    %120 = vector.load %arg10[%c0_37, %c0_38] : memref<32x4xbf16, #tpu.memory_space<vmem>>, vector<32x4xbf16>
    %cst_39 = arith.constant dense<0.000000e+00> : vector<128x4xf32>
    %121 = tpu.matmul %119, %120, %cst_39 {dimension_numbers = #tpu.dot_dimension_numbers<[1], [0], [0], [1], [0, 0, 1, 1], [], []>} : vector<128x32xbf16>, vector<32x4xbf16>, vector<128x4xf32> -> vector<128x4xf32>
    %c0_40 = arith.constant 0 : index
    %c0_41 = arith.constant 0 : index
    %122 = vector.load %arg11[%c0_40, %c0_41] : memref<1x4xf32, #tpu.memory_space<vmem>>, vector<1x4xf32>
    %123 = vector.broadcast %122 : vector<1x4xf32> to vector<128x4xf32>
    %124 = arith.addf %121, %123 : vector<128x4xf32>
    %cst_42 = arith.constant 0.000000e+00 : f32
    %125 = vector.broadcast %cst_42 : f32 to vector<128x4xf32>
    %126 = arith.subf %125, %124 : vector<128x4xf32>
    %127 = math.exp %126 : vector<128x4xf32>
    %cst_43 = arith.constant 1.000000e+00 : f32
    %128 = vector.broadcast %cst_43 : f32 to vector<128x4xf32>
    %129 = arith.addf %128, %127 : vector<128x4xf32>
    %130 = tpu.reciprocal %129 {approx = true} : vector<128x4xf32> -> vector<128x4xf32>
    %131 = arith.mulf %124, %130 : vector<128x4xf32>
    %132 = vector.shape_cast %131 : vector<128x4xf32> to vector<2x64x4xf32>
    %133 = arith.truncf %132 : vector<2x64x4xf32> to vector<2x64x4xbf16>
    %c0_44 = arith.constant 0 : index
    %c0_45 = arith.constant 0 : index
    %c0_46 = arith.constant 0 : index
    %134 = vector.load %arg12[%c0_44, %c0_45, %c0_46] : memref<2x64x4xbf16, #tpu.memory_space<vmem>>, vector<2x64x4xbf16>
    tpu.vector_store %arg12[%c0_44, %c0_45, %c0_46], %133 {strides = array<i32>} : memref<2x64x4xbf16, #tpu.memory_space<vmem>>, vector<2x64x4xbf16>,
    return
  }
  func.func @transform_0(%arg0: i32) -> (i32, i32, i32) {
    %c0_i32 = arith.constant 0 : i32
    %c0_i32_0 = arith.constant 0 : i32
    %c0_i32_1 = arith.constant 0 : i32
    return %arg0, %c0_i32, %c0_i32_0 : i32, i32, i32
  }
  func.func @transform_1(%arg0: i32) -> (i32, i32) {
    %c0_i32 = arith.constant 0 : i32
    %c0_i32_0 = arith.constant 0 : i32
    %c0_i32_1 = arith.constant 0 : i32
    return %c0_i32, %c0_i32_0 : i32, i32
  }
  func.func @transform_2(%arg0: i32) -> (i32, i32) {
    %c0_i32 = arith.constant 0 : i32
    %c0_i32_0 = arith.constant 0 : i32
    %c0_i32_1 = arith.constant 0 : i32
    return %c0_i32, %c0_i32_0 : i32, i32
  }
  func.func @transform_3(%arg0: i32) -> (i32, i32) {
    %c0_i32 = arith.constant 0 : i32
    %c0_i32_0 = arith.constant 0 : i32
    %c0_i32_1 = arith.constant 0 : i32
    return %c0_i32, %c0_i32_0 : i32, i32
  }
  func.func @transform_4(%arg0: i32) -> (i32, i32) {
    %c0_i32 = arith.constant 0 : i32
    %c0_i32_0 = arith.constant 0 : i32
    %c0_i32_1 = arith.constant 0 : i32
    return %c0_i32, %c0_i32_0 : i32, i32
  }
  func.func @transform_5(%arg0: i32) -> (i32, i32) {
    %c0_i32 = arith.constant 0 : i32
    %c0_i32_0 = arith.constant 0 : i32
    %c0_i32_1 = arith.constant 0 : i32
    return %c0_i32, %c0_i32_0 : i32, i32
  }
  func.func @transform_6(%arg0: i32) -> (i32, i32) {
    %c0_i32 = arith.constant 0 : i32
    %c0_i32_0 = arith.constant 0 : i32
    %c0_i32_1 = arith.constant 0 : i32
    return %c0_i32, %c0_i32_0 : i32, i32
  }
  func.func @transform_7(%arg0: i32) -> (i32, i32) {
    %c0_i32 = arith.constant 0 : i32
    %c0_i32_0 = arith.constant 0 : i32
    %c0_i32_1 = arith.constant 0 : i32
    return %c0_i32, %c0_i32_0 : i32, i32
  }
  func.func @transform_8(%arg0: i32) -> (i32, i32) {
    %c0_i32 = arith.constant 0 : i32
    %c0_i32_0 = arith.constant 0 : i32
    %c0_i32_1 = arith.constant 0 : i32
    return %c0_i32, %c0_i32_0 : i32, i32
  }
  func.func @transform_9(%arg0: i32) -> (i32, i32) {
    %c0_i32 = arith.constant 0 : i32
    %c0_i32_0 = arith.constant 0 : i32
    %c0_i32_1 = arith.constant 0 : i32
    return %c0_i32, %c0_i32_0 : i32, i32
  }
  func.func @transform_10(%arg0: i32) -> (i32, i32) {
    %c0_i32 = arith.constant 0 : i32
    %c0_i32_0 = arith.constant 0 : i32
    %c0_i32_1 = arith.constant 0 : i32
    return %c0_i32, %c0_i32_0 : i32, i32
  }
  func.func @transform_11(%arg0: i32) -> (i32, i32, i32) {
    %c0_i32 = arith.constant 0 : i32
    %c0_i32_0 = arith.constant 0 : i32
    %c0_i32_1 = arith.constant 0 : i32
    return %arg0, %c0_i32, %c0_i32_0 : i32, i32, i32
  }
}

module attributes {stable_mosaic.version = 11 : i64} {
  func.func @_conv4_kernel(%arg0: i32, %arg1: memref<1x18x18x4xbf16, #tpu.memory_space<vmem>>, %arg2: memref<1x18x18x4xbf16, #tpu.memory_space<vmem>>, %arg3: memref<9x4x4xbf16, #tpu.memory_space<vmem>>, %arg4: memref<9x4x4xbf16, #tpu.memory_space<vmem>>, %arg5: memref<1x4xf32, #tpu.memory_space<vmem>>, %arg6: memref<1x256x4xf32, #tpu.memory_space<vmem>>) attributes {dimension_semantics = [#tpu.dimension_semantics<parallel>], iteration_bounds = array<i64: 2>, scalar_prefetch = 0 : i64, scratch_operands = 0 : i64, tpu.core_type = #tpu.core_type<tc>, window_params = [{transform_indices = @transform_0, window_bounds = array<i64: 1, 18, 18, 4>}, {transform_indices = @transform_1, window_bounds = array<i64: 1, 18, 18, 4>}, {pipeline_mode = #tpu.pipeline_mode<synchronous>, transform_indices = @transform_2, window_bounds = array<i64: 9, 4, 4>}, {pipeline_mode = #tpu.pipeline_mode<synchronous>, transform_indices = @transform_3, window_bounds = array<i64: 9, 4, 4>}, {pipeline_mode = #tpu.pipeline_mode<synchronous>, transform_indices = @transform_4, window_bounds = array<i64: 1, 4>}, {transform_indices = @transform_5, window_bounds = array<i64: 1, 256, 4>}]} {
    %c0 = arith.constant 0 : index
    %c0_0 = arith.constant 0 : index
    %c0_1 = arith.constant 0 : index
    %c0_2 = arith.constant 0 : index
    %0 = vector.load %arg1[%c0, %c0_0, %c0_1, %c0_2] : memref<1x18x18x4xbf16, #tpu.memory_space<vmem>>, vector<1x18x18x4xbf16>
    %1 = vector.shape_cast %0 : vector<1x18x18x4xbf16> to vector<18x18x4xbf16>
    %2 = vector.extract_strided_slice %1 {offsets = [0, 0, 0], sizes = [16, 16, 4], strides = [1, 1, 1]} : vector<18x18x4xbf16> to vector<16x16x4xbf16>
    %3 = vector.shape_cast %2 : vector<16x16x4xbf16> to vector<256x4xbf16>
    %c0_3 = arith.constant 0 : index
    %c0_4 = arith.constant 0 : index
    %c0_5 = arith.constant 0 : index
    %4 = vector.load %arg3[%c0_3, %c0_4, %c0_5] : memref<9x4x4xbf16, #tpu.memory_space<vmem>>, vector<1x4x4xbf16>
    %5 = vector.shape_cast %4 : vector<1x4x4xbf16> to vector<4x4xbf16>
    %cst = arith.constant dense<0.000000e+00> : vector<256x4xf32>
    %6 = tpu.matmul %3, %5, %cst {dimension_numbers = #tpu.dot_dimension_numbers<[1], [0], [0], [1], [0, 0, 1, 1], [], []>} : vector<256x4xbf16>, vector<4x4xbf16>, vector<256x4xf32> -> vector<256x4xf32>
    %7 = vector.extract_strided_slice %1 {offsets = [0, 1, 0], sizes = [16, 16, 4], strides = [1, 1, 1]} : vector<18x18x4xbf16> to vector<16x16x4xbf16>
    %8 = vector.shape_cast %7 : vector<16x16x4xbf16> to vector<256x4xbf16>
    %c1 = arith.constant 1 : index
    %c0_6 = arith.constant 0 : index
    %c0_7 = arith.constant 0 : index
    %9 = vector.load %arg3[%c1, %c0_6, %c0_7] : memref<9x4x4xbf16, #tpu.memory_space<vmem>>, vector<1x4x4xbf16>
    %10 = vector.shape_cast %9 : vector<1x4x4xbf16> to vector<4x4xbf16>
    %cst_8 = arith.constant dense<0.000000e+00> : vector<256x4xf32>
    %11 = tpu.matmul %8, %10, %cst_8 {dimension_numbers = #tpu.dot_dimension_numbers<[1], [0], [0], [1], [0, 0, 1, 1], [], []>} : vector<256x4xbf16>, vector<4x4xbf16>, vector<256x4xf32> -> vector<256x4xf32>
    %12 = arith.addf %6, %11 : vector<256x4xf32>
    %13 = vector.extract_strided_slice %1 {offsets = [0, 2, 0], sizes = [16, 16, 4], strides = [1, 1, 1]} : vector<18x18x4xbf16> to vector<16x16x4xbf16>
    %14 = vector.shape_cast %13 : vector<16x16x4xbf16> to vector<256x4xbf16>
    %c2 = arith.constant 2 : index
    %c0_9 = arith.constant 0 : index
    %c0_10 = arith.constant 0 : index
    %15 = vector.load %arg3[%c2, %c0_9, %c0_10] : memref<9x4x4xbf16, #tpu.memory_space<vmem>>, vector<1x4x4xbf16>
    %16 = vector.shape_cast %15 : vector<1x4x4xbf16> to vector<4x4xbf16>
    %cst_11 = arith.constant dense<0.000000e+00> : vector<256x4xf32>
    %17 = tpu.matmul %14, %16, %cst_11 {dimension_numbers = #tpu.dot_dimension_numbers<[1], [0], [0], [1], [0, 0, 1, 1], [], []>} : vector<256x4xbf16>, vector<4x4xbf16>, vector<256x4xf32> -> vector<256x4xf32>
    %18 = arith.addf %12, %17 : vector<256x4xf32>
    %19 = vector.extract_strided_slice %1 {offsets = [1, 0, 0], sizes = [16, 16, 4], strides = [1, 1, 1]} : vector<18x18x4xbf16> to vector<16x16x4xbf16>
    %20 = vector.shape_cast %19 : vector<16x16x4xbf16> to vector<256x4xbf16>
    %c3 = arith.constant 3 : index
    %c0_12 = arith.constant 0 : index
    %c0_13 = arith.constant 0 : index
    %21 = vector.load %arg3[%c3, %c0_12, %c0_13] : memref<9x4x4xbf16, #tpu.memory_space<vmem>>, vector<1x4x4xbf16>
    %22 = vector.shape_cast %21 : vector<1x4x4xbf16> to vector<4x4xbf16>
    %cst_14 = arith.constant dense<0.000000e+00> : vector<256x4xf32>
    %23 = tpu.matmul %20, %22, %cst_14 {dimension_numbers = #tpu.dot_dimension_numbers<[1], [0], [0], [1], [0, 0, 1, 1], [], []>} : vector<256x4xbf16>, vector<4x4xbf16>, vector<256x4xf32> -> vector<256x4xf32>
    %24 = arith.addf %18, %23 : vector<256x4xf32>
    %25 = vector.extract_strided_slice %1 {offsets = [1, 1, 0], sizes = [16, 16, 4], strides = [1, 1, 1]} : vector<18x18x4xbf16> to vector<16x16x4xbf16>
    %26 = vector.shape_cast %25 : vector<16x16x4xbf16> to vector<256x4xbf16>
    %c4 = arith.constant 4 : index
    %c0_15 = arith.constant 0 : index
    %c0_16 = arith.constant 0 : index
    %27 = vector.load %arg3[%c4, %c0_15, %c0_16] : memref<9x4x4xbf16, #tpu.memory_space<vmem>>, vector<1x4x4xbf16>
    %28 = vector.shape_cast %27 : vector<1x4x4xbf16> to vector<4x4xbf16>
    %cst_17 = arith.constant dense<0.000000e+00> : vector<256x4xf32>
    %29 = tpu.matmul %26, %28, %cst_17 {dimension_numbers = #tpu.dot_dimension_numbers<[1], [0], [0], [1], [0, 0, 1, 1], [], []>} : vector<256x4xbf16>, vector<4x4xbf16>, vector<256x4xf32> -> vector<256x4xf32>
    %30 = arith.addf %24, %29 : vector<256x4xf32>
    %31 = vector.extract_strided_slice %1 {offsets = [1, 2, 0], sizes = [16, 16, 4], strides = [1, 1, 1]} : vector<18x18x4xbf16> to vector<16x16x4xbf16>
    %32 = vector.shape_cast %31 : vector<16x16x4xbf16> to vector<256x4xbf16>
    %c5 = arith.constant 5 : index
    %c0_18 = arith.constant 0 : index
    %c0_19 = arith.constant 0 : index
    %33 = vector.load %arg3[%c5, %c0_18, %c0_19] : memref<9x4x4xbf16, #tpu.memory_space<vmem>>, vector<1x4x4xbf16>
    %34 = vector.shape_cast %33 : vector<1x4x4xbf16> to vector<4x4xbf16>
    %cst_20 = arith.constant dense<0.000000e+00> : vector<256x4xf32>
    %35 = tpu.matmul %32, %34, %cst_20 {dimension_numbers = #tpu.dot_dimension_numbers<[1], [0], [0], [1], [0, 0, 1, 1], [], []>} : vector<256x4xbf16>, vector<4x4xbf16>, vector<256x4xf32> -> vector<256x4xf32>
    %36 = arith.addf %30, %35 : vector<256x4xf32>
    %37 = vector.extract_strided_slice %1 {offsets = [2, 0, 0], sizes = [16, 16, 4], strides = [1, 1, 1]} : vector<18x18x4xbf16> to vector<16x16x4xbf16>
    %38 = vector.shape_cast %37 : vector<16x16x4xbf16> to vector<256x4xbf16>
    %c6 = arith.constant 6 : index
    %c0_21 = arith.constant 0 : index
    %c0_22 = arith.constant 0 : index
    %39 = vector.load %arg3[%c6, %c0_21, %c0_22] : memref<9x4x4xbf16, #tpu.memory_space<vmem>>, vector<1x4x4xbf16>
    %40 = vector.shape_cast %39 : vector<1x4x4xbf16> to vector<4x4xbf16>
    %cst_23 = arith.constant dense<0.000000e+00> : vector<256x4xf32>
    %41 = tpu.matmul %38, %40, %cst_23 {dimension_numbers = #tpu.dot_dimension_numbers<[1], [0], [0], [1], [0, 0, 1, 1], [], []>} : vector<256x4xbf16>, vector<4x4xbf16>, vector<256x4xf32> -> vector<256x4xf32>
    %42 = arith.addf %36, %41 : vector<256x4xf32>
    %43 = vector.extract_strided_slice %1 {offsets = [2, 1, 0], sizes = [16, 16, 4], strides = [1, 1, 1]} : vector<18x18x4xbf16> to vector<16x16x4xbf16>
    %44 = vector.shape_cast %43 : vector<16x16x4xbf16> to vector<256x4xbf16>
    %c7 = arith.constant 7 : index
    %c0_24 = arith.constant 0 : index
    %c0_25 = arith.constant 0 : index
    %45 = vector.load %arg3[%c7, %c0_24, %c0_25] : memref<9x4x4xbf16, #tpu.memory_space<vmem>>, vector<1x4x4xbf16>
    %46 = vector.shape_cast %45 : vector<1x4x4xbf16> to vector<4x4xbf16>
    %cst_26 = arith.constant dense<0.000000e+00> : vector<256x4xf32>
    %47 = tpu.matmul %44, %46, %cst_26 {dimension_numbers = #tpu.dot_dimension_numbers<[1], [0], [0], [1], [0, 0, 1, 1], [], []>} : vector<256x4xbf16>, vector<4x4xbf16>, vector<256x4xf32> -> vector<256x4xf32>
    %48 = arith.addf %42, %47 : vector<256x4xf32>
    %49 = vector.extract_strided_slice %1 {offsets = [2, 2, 0], sizes = [16, 16, 4], strides = [1, 1, 1]} : vector<18x18x4xbf16> to vector<16x16x4xbf16>
    %50 = vector.shape_cast %49 : vector<16x16x4xbf16> to vector<256x4xbf16>
    %c8 = arith.constant 8 : index
    %c0_27 = arith.constant 0 : index
    %c0_28 = arith.constant 0 : index
    %51 = vector.load %arg3[%c8, %c0_27, %c0_28] : memref<9x4x4xbf16, #tpu.memory_space<vmem>>, vector<1x4x4xbf16>
    %52 = vector.shape_cast %51 : vector<1x4x4xbf16> to vector<4x4xbf16>
    %cst_29 = arith.constant dense<0.000000e+00> : vector<256x4xf32>
    %53 = tpu.matmul %50, %52, %cst_29 {dimension_numbers = #tpu.dot_dimension_numbers<[1], [0], [0], [1], [0, 0, 1, 1], [], []>} : vector<256x4xbf16>, vector<4x4xbf16>, vector<256x4xf32> -> vector<256x4xf32>
    %54 = arith.addf %48, %53 : vector<256x4xf32>
    %c0_30 = arith.constant 0 : index
    %c0_31 = arith.constant 0 : index
    %c0_32 = arith.constant 0 : index
    %c0_33 = arith.constant 0 : index
    %55 = vector.load %arg2[%c0_30, %c0_31, %c0_32, %c0_33] : memref<1x18x18x4xbf16, #tpu.memory_space<vmem>>, vector<1x18x18x4xbf16>
    %56 = vector.shape_cast %55 : vector<1x18x18x4xbf16> to vector<18x18x4xbf16>
    %57 = vector.extract_strided_slice %56 {offsets = [0, 0, 0], sizes = [16, 16, 4], strides = [1, 1, 1]} : vector<18x18x4xbf16> to vector<16x16x4xbf16>
    %58 = vector.shape_cast %57 : vector<16x16x4xbf16> to vector<256x4xbf16>
    %c0_34 = arith.constant 0 : index
    %c0_35 = arith.constant 0 : index
    %c0_36 = arith.constant 0 : index
    %59 = vector.load %arg4[%c0_34, %c0_35, %c0_36] : memref<9x4x4xbf16, #tpu.memory_space<vmem>>, vector<1x4x4xbf16>
    %60 = vector.shape_cast %59 : vector<1x4x4xbf16> to vector<4x4xbf16>
    %cst_37 = arith.constant dense<0.000000e+00> : vector<256x4xf32>
    %61 = tpu.matmul %58, %60, %cst_37 {dimension_numbers = #tpu.dot_dimension_numbers<[1], [0], [0], [1], [0, 0, 1, 1], [], []>} : vector<256x4xbf16>, vector<4x4xbf16>, vector<256x4xf32> -> vector<256x4xf32>
    %62 = vector.extract_strided_slice %56 {offsets = [0, 1, 0], sizes = [16, 16, 4], strides = [1, 1, 1]} : vector<18x18x4xbf16> to vector<16x16x4xbf16>
    %63 = vector.shape_cast %62 : vector<16x16x4xbf16> to vector<256x4xbf16>
    %c1_38 = arith.constant 1 : index
    %c0_39 = arith.constant 0 : index
    %c0_40 = arith.constant 0 : index
    %64 = vector.load %arg4[%c1_38, %c0_39, %c0_40] : memref<9x4x4xbf16, #tpu.memory_space<vmem>>, vector<1x4x4xbf16>
    %65 = vector.shape_cast %64 : vector<1x4x4xbf16> to vector<4x4xbf16>
    %cst_41 = arith.constant dense<0.000000e+00> : vector<256x4xf32>
    %66 = tpu.matmul %63, %65, %cst_41 {dimension_numbers = #tpu.dot_dimension_numbers<[1], [0], [0], [1], [0, 0, 1, 1], [], []>} : vector<256x4xbf16>, vector<4x4xbf16>, vector<256x4xf32> -> vector<256x4xf32>
    %67 = arith.addf %61, %66 : vector<256x4xf32>
    %68 = vector.extract_strided_slice %56 {offsets = [0, 2, 0], sizes = [16, 16, 4], strides = [1, 1, 1]} : vector<18x18x4xbf16> to vector<16x16x4xbf16>
    %69 = vector.shape_cast %68 : vector<16x16x4xbf16> to vector<256x4xbf16>
    %c2_42 = arith.constant 2 : index
    %c0_43 = arith.constant 0 : index
    %c0_44 = arith.constant 0 : index
    %70 = vector.load %arg4[%c2_42, %c0_43, %c0_44] : memref<9x4x4xbf16, #tpu.memory_space<vmem>>, vector<1x4x4xbf16>
    %71 = vector.shape_cast %70 : vector<1x4x4xbf16> to vector<4x4xbf16>
    %cst_45 = arith.constant dense<0.000000e+00> : vector<256x4xf32>
    %72 = tpu.matmul %69, %71, %cst_45 {dimension_numbers = #tpu.dot_dimension_numbers<[1], [0], [0], [1], [0, 0, 1, 1], [], []>} : vector<256x4xbf16>, vector<4x4xbf16>, vector<256x4xf32> -> vector<256x4xf32>
    %73 = arith.addf %67, %72 : vector<256x4xf32>
    %74 = vector.extract_strided_slice %56 {offsets = [1, 0, 0], sizes = [16, 16, 4], strides = [1, 1, 1]} : vector<18x18x4xbf16> to vector<16x16x4xbf16>
    %75 = vector.shape_cast %74 : vector<16x16x4xbf16> to vector<256x4xbf16>
    %c3_46 = arith.constant 3 : index
    %c0_47 = arith.constant 0 : index
    %c0_48 = arith.constant 0 : index
    %76 = vector.load %arg4[%c3_46, %c0_47, %c0_48] : memref<9x4x4xbf16, #tpu.memory_space<vmem>>, vector<1x4x4xbf16>
    %77 = vector.shape_cast %76 : vector<1x4x4xbf16> to vector<4x4xbf16>
    %cst_49 = arith.constant dense<0.000000e+00> : vector<256x4xf32>
    %78 = tpu.matmul %75, %77, %cst_49 {dimension_numbers = #tpu.dot_dimension_numbers<[1], [0], [0], [1], [0, 0, 1, 1], [], []>} : vector<256x4xbf16>, vector<4x4xbf16>, vector<256x4xf32> -> vector<256x4xf32>
    %79 = arith.addf %73, %78 : vector<256x4xf32>
    %80 = vector.extract_strided_slice %56 {offsets = [1, 1, 0], sizes = [16, 16, 4], strides = [1, 1, 1]} : vector<18x18x4xbf16> to vector<16x16x4xbf16>
    %81 = vector.shape_cast %80 : vector<16x16x4xbf16> to vector<256x4xbf16>
    %c4_50 = arith.constant 4 : index
    %c0_51 = arith.constant 0 : index
    %c0_52 = arith.constant 0 : index
    %82 = vector.load %arg4[%c4_50, %c0_51, %c0_52] : memref<9x4x4xbf16, #tpu.memory_space<vmem>>, vector<1x4x4xbf16>
    %83 = vector.shape_cast %82 : vector<1x4x4xbf16> to vector<4x4xbf16>
    %cst_53 = arith.constant dense<0.000000e+00> : vector<256x4xf32>
    %84 = tpu.matmul %81, %83, %cst_53 {dimension_numbers = #tpu.dot_dimension_numbers<[1], [0], [0], [1], [0, 0, 1, 1], [], []>} : vector<256x4xbf16>, vector<4x4xbf16>, vector<256x4xf32> -> vector<256x4xf32>
    %85 = arith.addf %79, %84 : vector<256x4xf32>
    %86 = vector.extract_strided_slice %56 {offsets = [1, 2, 0], sizes = [16, 16, 4], strides = [1, 1, 1]} : vector<18x18x4xbf16> to vector<16x16x4xbf16>
    %87 = vector.shape_cast %86 : vector<16x16x4xbf16> to vector<256x4xbf16>
    %c5_54 = arith.constant 5 : index
    %c0_55 = arith.constant 0 : index
    %c0_56 = arith.constant 0 : index
    %88 = vector.load %arg4[%c5_54, %c0_55, %c0_56] : memref<9x4x4xbf16, #tpu.memory_space<vmem>>, vector<1x4x4xbf16>
    %89 = vector.shape_cast %88 : vector<1x4x4xbf16> to vector<4x4xbf16>
    %cst_57 = arith.constant dense<0.000000e+00> : vector<256x4xf32>
    %90 = tpu.matmul %87, %89, %cst_57 {dimension_numbers = #tpu.dot_dimension_numbers<[1], [0], [0], [1], [0, 0, 1, 1], [], []>} : vector<256x4xbf16>, vector<4x4xbf16>, vector<256x4xf32> -> vector<256x4xf32>
    %91 = arith.addf %85, %90 : vector<256x4xf32>
    %92 = vector.extract_strided_slice %56 {offsets = [2, 0, 0], sizes = [16, 16, 4], strides = [1, 1, 1]} : vector<18x18x4xbf16> to vector<16x16x4xbf16>
    %93 = vector.shape_cast %92 : vector<16x16x4xbf16> to vector<256x4xbf16>
    %c6_58 = arith.constant 6 : index
    %c0_59 = arith.constant 0 : index
    %c0_60 = arith.constant 0 : index
    %94 = vector.load %arg4[%c6_58, %c0_59, %c0_60] : memref<9x4x4xbf16, #tpu.memory_space<vmem>>, vector<1x4x4xbf16>
    %95 = vector.shape_cast %94 : vector<1x4x4xbf16> to vector<4x4xbf16>
    %cst_61 = arith.constant dense<0.000000e+00> : vector<256x4xf32>
    %96 = tpu.matmul %93, %95, %cst_61 {dimension_numbers = #tpu.dot_dimension_numbers<[1], [0], [0], [1], [0, 0, 1, 1], [], []>} : vector<256x4xbf16>, vector<4x4xbf16>, vector<256x4xf32> -> vector<256x4xf32>
    %97 = arith.addf %91, %96 : vector<256x4xf32>
    %98 = vector.extract_strided_slice %56 {offsets = [2, 1, 0], sizes = [16, 16, 4], strides = [1, 1, 1]} : vector<18x18x4xbf16> to vector<16x16x4xbf16>
    %99 = vector.shape_cast %98 : vector<16x16x4xbf16> to vector<256x4xbf16>
    %c7_62 = arith.constant 7 : index
    %c0_63 = arith.constant 0 : index
    %c0_64 = arith.constant 0 : index
    %100 = vector.load %arg4[%c7_62, %c0_63, %c0_64] : memref<9x4x4xbf16, #tpu.memory_space<vmem>>, vector<1x4x4xbf16>
    %101 = vector.shape_cast %100 : vector<1x4x4xbf16> to vector<4x4xbf16>
    %cst_65 = arith.constant dense<0.000000e+00> : vector<256x4xf32>
    %102 = tpu.matmul %99, %101, %cst_65 {dimension_numbers = #tpu.dot_dimension_numbers<[1], [0], [0], [1], [0, 0, 1, 1], [], []>} : vector<256x4xbf16>, vector<4x4xbf16>, vector<256x4xf32> -> vector<256x4xf32>
    %103 = arith.addf %97, %102 : vector<256x4xf32>
    %104 = vector.extract_strided_slice %56 {offsets = [2, 2, 0], sizes = [16, 16, 4], strides = [1, 1, 1]} : vector<18x18x4xbf16> to vector<16x16x4xbf16>
    %105 = vector.shape_cast %104 : vector<16x16x4xbf16> to vector<256x4xbf16>
    %c8_66 = arith.constant 8 : index
    %c0_67 = arith.constant 0 : index
    %c0_68 = arith.constant 0 : index
    %106 = vector.load %arg4[%c8_66, %c0_67, %c0_68] : memref<9x4x4xbf16, #tpu.memory_space<vmem>>, vector<1x4x4xbf16>
    %107 = vector.shape_cast %106 : vector<1x4x4xbf16> to vector<4x4xbf16>
    %cst_69 = arith.constant dense<0.000000e+00> : vector<256x4xf32>
    %108 = tpu.matmul %105, %107, %cst_69 {dimension_numbers = #tpu.dot_dimension_numbers<[1], [0], [0], [1], [0, 0, 1, 1], [], []>} : vector<256x4xbf16>, vector<4x4xbf16>, vector<256x4xf32> -> vector<256x4xf32>
    %109 = arith.addf %103, %108 : vector<256x4xf32>
    %110 = arith.addf %54, %109 : vector<256x4xf32>
    %c0_70 = arith.constant 0 : index
    %c0_71 = arith.constant 0 : index
    %111 = vector.load %arg5[%c0_70, %c0_71] : memref<1x4xf32, #tpu.memory_space<vmem>>, vector<1x4xf32>
    %112 = vector.broadcast %111 : vector<1x4xf32> to vector<256x4xf32>
    %113 = arith.addf %110, %112 : vector<256x4xf32>
    %cst_72 = arith.constant 0.000000e+00 : f32
    %114 = vector.broadcast %cst_72 : f32 to vector<256x4xf32>
    %115 = arith.subf %114, %113 : vector<256x4xf32>
    %116 = math.exp %115 : vector<256x4xf32>
    %cst_73 = arith.constant 1.000000e+00 : f32
    %117 = vector.broadcast %cst_73 : f32 to vector<256x4xf32>
    %118 = arith.addf %117, %116 : vector<256x4xf32>
    %119 = tpu.reciprocal %118 {approx = true} : vector<256x4xf32> -> vector<256x4xf32>
    %120 = arith.mulf %113, %119 : vector<256x4xf32>
    %121 = vector.shape_cast %120 : vector<256x4xf32> to vector<1x256x4xf32>
    %c0_74 = arith.constant 0 : index
    %c0_75 = arith.constant 0 : index
    %c0_76 = arith.constant 0 : index
    %122 = vector.load %arg6[%c0_74, %c0_75, %c0_76] : memref<1x256x4xf32, #tpu.memory_space<vmem>>, vector<1x256x4xf32>
    tpu.vector_store %arg6[%c0_74, %c0_75, %c0_76], %121 {strides = array<i32>} : memref<1x256x4xf32, #tpu.memory_space<vmem>>, vector<1x256x4xf32>,
    return
  }
  func.func @transform_0(%arg0: i32) -> (i32, i32, i32, i32) {
    %c0_i32 = arith.constant 0 : i32
    %c0_i32_0 = arith.constant 0 : i32
    %c0_i32_1 = arith.constant 0 : i32
    %c0_i32_2 = arith.constant 0 : i32
    return %arg0, %c0_i32, %c0_i32_0, %c0_i32_1 : i32, i32, i32, i32
  }
  func.func @transform_1(%arg0: i32) -> (i32, i32, i32, i32) {
    %c0_i32 = arith.constant 0 : i32
    %c0_i32_0 = arith.constant 0 : i32
    %c0_i32_1 = arith.constant 0 : i32
    %c0_i32_2 = arith.constant 0 : i32
    return %arg0, %c0_i32, %c0_i32_0, %c0_i32_1 : i32, i32, i32, i32
  }
  func.func @transform_2(%arg0: i32) -> (i32, i32, i32) {
    %c0_i32 = arith.constant 0 : i32
    %c0_i32_0 = arith.constant 0 : i32
    %c0_i32_1 = arith.constant 0 : i32
    %c0_i32_2 = arith.constant 0 : i32
    return %c0_i32, %c0_i32_0, %c0_i32_1 : i32, i32, i32
  }
  func.func @transform_3(%arg0: i32) -> (i32, i32, i32) {
    %c0_i32 = arith.constant 0 : i32
    %c0_i32_0 = arith.constant 0 : i32
    %c0_i32_1 = arith.constant 0 : i32
    %c0_i32_2 = arith.constant 0 : i32
    return %c0_i32, %c0_i32_0, %c0_i32_1 : i32, i32, i32
  }
  func.func @transform_4(%arg0: i32) -> (i32, i32) {
    %c0_i32 = arith.constant 0 : i32
    %c0_i32_0 = arith.constant 0 : i32
    %c0_i32_1 = arith.constant 0 : i32
    return %c0_i32, %c0_i32_0 : i32, i32
  }
  func.func @transform_5(%arg0: i32) -> (i32, i32, i32) {
    %c0_i32 = arith.constant 0 : i32
    %c0_i32_0 = arith.constant 0 : i32
    %c0_i32_1 = arith.constant 0 : i32
    return %arg0, %c0_i32, %c0_i32_0 : i32, i32, i32
  }
}

</mosaic_0001>

<bundles_post_ra>
// kernel: mul.11
= control target key start
LH: loop header
LB: loop body
LE: loop exit
PB: predicated region body
PF: predicated region fallthrough
CT: control target
= control target key end

     0   :  { %s34_s0 = inlined_call_operand.vmem [shape: f32[384], index: 0, kind: input, shape index: {}]   ;;  %s35_s1 = inlined_call_operand.vmem [shape: f32[384], index: 1, kind: input, shape index: {}]   ;;  %s36_s2 = inlined_call_operand.vmem [shape: f32[384], index: 2, kind: output, shape index: {}]  }
   0x1   :  { %v3_v0 = vld [vmem:[%s34_s0] sm:$0x7] }
   0x2   :  { %v4_v1 = vld [vmem:[%s35_s1] sm:$0x7] }
   0x3   :  { %v7_v2 = vmul.f32 %v4_v1, %v3_v0 }
   0x5   :  { %9 = vst [vmem:[%s36_s2] sm:$0xf] %v7_v2 }

// kernel: global_block_forward.3
= control target key start
LH: loop header
LB: loop body
LE: loop exit
PB: predicated region body
PF: predicated region fallthrough
CT: control target
= control target key end

     0   :  { %s5233_s18 = smov 0   ;;  %s6687_s0 = inlined_call_operand.vmem [shape: bf16[2,18,18,4], index: 0, kind: input, shape index: {}]   ;;  %s6688_s1 = inlined_call_operand.vmem [shape: bf16[9,4,4], index: 1, kind: input, shape index: {}]   ;;  %s6689_s2 = inlined_call_operand.vmem [shape: f32[1,4], index: 2, kind: input, shape index: {}]   ;;  %s6690_s3 = inlined_call_operand.vmem [shape: bf16[4,32], index: 3, kind: input, shape index: {}]   ;;  %s6691_s4 = inlined_call_operand.vmem [shape: f32[1,32], index: 4, kind: input, shape index: {}]   ;;  %s6692_s5 = inlined_call_operand.vmem [shape: bf16[2,256,32], index: 5, kind: output, shape index: {}]  }
   0x1 LB: > { %s3816_s19 = sadd.s32 4294967295, %s5201_s18   ;;  %p3820_p0 = scmp.ge.s32.totalorder %s5201_s18, 1  ;;  %s5201_s18 = sphi %s5233_s18, %s15_s18  }
   0x2   : > { %p187_p1 = scmp.lt.s32.totalorder %s5201_s18, 3 }
   0x4   : > { %p188_p2 = pnand %p3820_p0, %p187_p1 }
   0x6   : > { %191 = sbr.rel (%p188_p2) target bundleno = 875 (0x36b), region = 40 }
   0xd   : > { %vm767_vm0 = vcmask 1041408   ;;  %v3956_v0 = vld [vmem:[%s6688_s1 + $0x8] sm:$0x3]  ;;  %v3824_v1 = vld [vmem:[%s6688_s1 + $0x2] sm:$0x3]  ;;  %p215_p3 = scmp.lt.s32.totalorder %s3816_s19, 1 }
   0xe   : > { %4903 = vmatprep.subr.msk.bf16.mxu0 %vm767_vm0, %v3956_v0  ;;  %4899 = vmatprep.subr.msk.bf16.mxu1 %vm767_vm0, %v3824_v1  ;;  %v1888_v2 = vsel %vm767_vm0, %v3956_v0, 0  ;;  %v769_v3 = vsel %vm767_vm0, %v3824_v1, 0  ;;  %v3975_v4 = vld [vmem:[%s6688_s1 + $0xa] sm:$0x3]  ;;  %v280_v5 = vld [vmem:[%s6688_s1] sm:$0x3] }
   0xf   : > { %4440 = vmatpush3.bf16.msra.mxu0 %v1888_v2  ;;  %4304 = vmatpush3.bf16.msra.mxu1 %v769_v3  ;;  %s6783_s19 = smov (!%p215_p3, %s3816_s19), 1  ;;  %vm281_vm1 = vsmask.f32 3328  ;;  %vm282_vm2 = vsmask.f32 7440  ;;  %v5268_v6 = vsel %vm767_vm0, %v3975_v4, 0 }
  0x10   : > { %4904 = vmatprep.subr.msk.bf16.mxu0 %vm767_vm0, %v3975_v4  ;;  %4900 = vmatprep.subr.msk.bf16.mxu1 %vm767_vm0, %v280_v5  ;;  %s4909_s28 = smul.u32 216, %s6783_s19  ;;  %v5271_v7 = vsel %vm767_vm0, %v280_v5, 0  ;;  %v5276_v8 = vld [vmem:[%s6688_s1 + $0xc] sm:$0x3]  ;;  %vm718_vm3 = vcmask 31744   ;;  %vm5314_vm4 = vmor %vm281_vm1, %vm282_vm2  ;;  %vm1240_vm5 = vcmask 1042432  }
  0x11   : > { %v5302_v21 = vsel %vm767_vm0, %v5276_v8, 0  ;;  %vm1241_vm6 = vcmask 1046532   ;;  %s4100_s25 = sshll.u32 %s6783_s19, 7  ;;  %vm3728_vm8 = vcmask 257024  }
  0x12   : > { %s5265_s6 = scalar_lea.vmem %s6687_s0, %s4909_s28  ;;  %vm5682_vm7 = vmor %vm1240_vm5, %vm1241_vm6  ;;  %s6523_s27 = scalar_lea.vmem %s6692_s5, %s4100_s25 }
  0x13   : > { %v5279_v9 = vld [vmem:[%s5265_s6] sm:$0xf]  ;;  %v5282_v10 = vld [vmem:[%s5265_s6 + $0x4] sm:$0xf]  ;;  %v228_v11 = vld [vmem:[%s5265_s6 + $0x8] sm:$0x1] }
  0x14   : > { %v285_v12 = vshrl.u32 %v5279_v9, 16  ;;  %v288_v13 = vshll.u32 %v5279_v9, 16  ;;  %v294_v14 = vshll.u32 %v5282_v10, 16  ;;  %v298_v15 = vshrl.u32 %v5282_v10, 16  ;;  %v5290_v16 = vld [vmem:[%s5265_s6 + $0xc] sm:$0xf] }
  0x15   : > { %v304_v17 = vshll.u32 %v228_v11, 16  ;;  %v5293_v18 = vld [vmem:[%s5265_s6 + $0x10] sm:$0xf]  ;;  %v5296_v19 = vld [vmem:[%s5265_s6 + $0x14] sm:$0x1]  ;;  %v309_v27 = vshrl.u32 %v5290_v16, 16 }
  0x16   : > { %v287_v22 = vrot.slane %v285_v12, 4  ;;  %v290_v23 = vrot.slane %v288_v13, 5  ;;  %v296_v24 = vrot.slane %v294_v14, 5  ;;  %v300_v25 = vrot.slane %v298_v15, 4  ;;  %v5310_v34 = vld [vmem:[%s5265_s6 + $0x18] sm:$0xf] }
  0x17   : > { %v306_v26 = vrot.slane %v304_v17, 5  ;;  %v312_v28 = vshll.u32 %v5290_v16, 16  ;;  %v318_v29 = vshll.u32 %v5293_v18, 16  ;;  %v322_v32 = vshrl.u32 %v5293_v18, 16  ;;  %v5323_v40 = vld [vmem:[%s5265_s6 + $0x1c] sm:$0xf] }
  0x18   : > { %v291_v30 = vor.u32 %v290_v23, %v287_v22  ;;  %v301_v31 = vor.u32 %v300_v25, %v296_v24  ;;  %v328_v33 = vshll.u32 %v5296_v19, 16  ;;  %v311_v36 = vrot.slane %v309_v27, 4  ;;  %v5327_v47 = vld [vmem:[%s5265_s6 + $0x20] sm:$0x1]  ;;  %v5337_v58 = vld [vmem:[%s5265_s6 + $0x24] sm:$0xf] }
  0x19   : > { %v314_v37 = vrot.slane %v312_v28, 5  ;;  %v320_v38 = vrot.slane %v318_v29, 5  ;;  %v5320_v39 = vcombine.low %v5290_v16, %v5293_v18  ;;  %v324_v43 = vrot.slane %v322_v32, 4  ;;  %v5342_v63 = vld [vmem:[%s5265_s6 + $0x28] sm:$0xf] }
  0x1a   : > { %v292_v41 = vrot.slane %v291_v30, 4  ;;  %v302_v42 = vrot.slane %v301_v31, 4  ;;  %v330_v44 = vrot.slane %v328_v33, 5  ;;  %v333_v48 = vshrl.u32 %v5310_v34, 16  ;;  %v5350_v4 = vld [vmem:[%s5265_s6 + $0x2c] sm:$0x1] }
  0x1b   : > { %v315_v45 = vor.u32 %v314_v37, %v311_v36  ;;  %v336_v49 = vshll.u32 %v5310_v34, 16  ;;  %v325_v52 = vor.u32 %v324_v43, %v320_v38  ;;  %v342_v53 = vshll.u32 %v5323_v40, 16  ;;  %v5356_v14 = vld [vmem:[%s5265_s6 + $0x30] sm:$0xf]  ;;  %v5363_v28 = vld [vmem:[%s5265_s6 + $0x34] sm:$0xf] }
  0x1c   : > { %v297_v50 = vsel %vm5314_vm4, %v292_v41, %v296_v24  ;;  %v307_v51 = vsel %vm5314_vm4, %v302_v42, %v306_v26  ;;  %v335_v56 = vrot.slane %v333_v48, 4  ;;  %v346_v61 = vshrl.u32 %v5323_v40, 16  ;;  %v5370_v32 = vld [vmem:[%s5265_s6 + $0x38] sm:$0x1]  ;;  %v5378_v48 = vld [vmem:[%s5265_s6 + $0x3c] sm:$0xf] }
  0x1d   : > { %v3825_v54 = vcombine.low %v297_v50, %v307_v51  ;;  %v316_v55 = vrot.slane %v315_v45, 4  ;;  %v338_v57 = vrot.slane %v336_v49, 5  ;;  %v326_v59 = vrot.slane %v325_v52, 4  ;;  %v5521_v20 = vld [vmem:[%s5265_s6 + $0x80] sm:$0x1] }
  0x1e   : > { %v344_v60 = vrot.slane %v342_v53, 5  ;;  %v352_v62 = vshll.u32 %v5327_v47, 16  ;;  %v348_v11 = vrot.slane %v346_v61, 4  ;;  %v357_v13 = vshrl.u32 %v5337_v58, 16  ;;  %v5384_v53 = vld [vmem:[%s5265_s6 + $0x40] sm:$0xf] }
  0x1f   : > { %4305 = vmatprep.mubr.msk.bf16.mxu1 %vm718_vm3, %v3825_v54  ;;  %v321_v0 = vsel %vm5314_vm4, %v316_v55, %v320_v38  ;;  %v339_v1 = vor.u32 %v338_v57, %v335_v56  ;;  %v331_v5 = vsel %vm5314_vm4, %v326_v59, %v330_v44  ;;  %v360_v22 = vshll.u32 %v5337_v58, 16 }
  0x20   : > { %v354_v12 = vrot.slane %v352_v62, 5  ;;  %v3826_v15 = vcombine.low %v321_v0, %v331_v5  ;;  %v366_v23 = vshll.u32 %v5342_v63, 16  ;;  %v349_v24 = vor.u32 %v348_v11, %v344_v60 }
  0x21   : > { %v340_v17 = vrot.slane %v339_v1, 4  ;;  %v359_v25 = vrot.slane %v357_v13, 4  ;;  %v370_v26 = vshrl.u32 %v5342_v63, 16  ;;  %v376_v27 = vshll.u32 %v5350_v4, 16  ;;  %v5396_v1 = vld [vmem:[%s5265_s6 + $0x44] sm:$0x1] }
  0x22   : > { %4441 = vmatprep.mubr.msk.bf16.mxu0 %vm718_vm3, %v3826_v15  ;;  %4306 = vmatmul.mubr.msk.bf16.vlgmr.msra.gmra.mrb[0].mxu1 %vm718_vm3, %v3826_v15  ;;  %v362_v30 = vrot.slane %v360_v22, 5  ;;  %v368_v31 = vrot.slane %v366_v23, 5  ;;  %v381_v33 = vshrl.u32 %v5356_v14, 16  ;;  %v350_v36 = vrot.slane %v349_v24, 4  ;;  %v5408_v23 = vld [vmem:[%s5265_s6 + $0x4c] sm:$0xf] }
  0x23   : > { %v345_v29 = vsel %vm5314_vm4, %v340_v17, %v344_v60  ;;  %v372_v37 = vrot.slane %v370_v26, 4  ;;  %v378_v38 = vrot.slane %v376_v27, 5  ;;  %v384_v41 = vshll.u32 %v5356_v14, 16  ;;  %4338 = vmatpush3.bf16.msra.mxu1 %v5271_v7 }
  0x24   : > { %v363_v42 = vor.u32 %v362_v30, %v359_v25  ;;  %v383_v43 = vrot.slane %v381_v33, 4  ;;  %v390_v44 = vshll.u32 %v5363_v28, 16  ;;  %v394_v45 = vshrl.u32 %v5363_v28, 16 }
  0x25   : > { %v355_v49 = vsel %vm5314_vm4, %v350_v36, %v354_v12  ;;  %v373_v50 = vor.u32 %v372_v37, %v368_v31  ;;  %v386_v51 = vrot.slane %v384_v41, 5  ;;  %v400_v52 = vshll.u32 %v5370_v32, 16  ;;  %v5401_v12 = vld [vmem:[%s5265_s6 + $0x48] sm:$0xf]  ;;  %v5430_v41 = vld [vmem:[%s5265_s6 + $0x54] sm:$0xf] }
  0x26   : > { %v5386_v7 = vcombine.low %v345_v29, %v355_v49  ;;  %v364_v54 = vrot.slane %v363_v42, 4  ;;  %v392_v55 = vrot.slane %v390_v44, 5  ;;  %v396_v56 = vrot.slane %v394_v45, 4  ;;  %v5435_v49 = vld [vmem:[%s5265_s6 + $0x58] sm:$0xf] }
  0x27   : > { %v374_v57 = vrot.slane %v373_v50, 4  ;;  %v387_v59 = vor.u32 %v386_v51, %v383_v43  ;;  %v402_v60 = vrot.slane %v400_v52, 5  ;;  %v405_v61 = vshrl.u32 %v5378_v48, 16 }
  0x28   : > { %6727 = vst [vmem:[#allocation2_spill] sm:$0xff] %v5386_v7  ;;  %4442 = vmatmul.mubr.msk.bf16.vlgmr.msra.gmra.mrb[0].mxu0 %vm718_vm3, %v5386_v7  ;;  %4309 = vmatprep.mubr.msk.bf16.mxu1 %vm718_vm3, %v5386_v7  ;;  %v369_v62 = vsel %vm5314_vm4, %v364_v54, %v368_v31  ;;  %v397_v0 = vor.u32 %v396_v56, %v392_v55  ;;  %v408_v5 = vshll.u32 %v5378_v48, 16  ;;  %v414_v11 = vshll.u32 %v5384_v53, 16 }
  0x29   : > { %4474 = vmatpush3.bf16.msra.mxu0 %v5268_v6  ;;  %v379_v13 = vsel %vm5314_vm4, %v374_v57, %v378_v38  ;;  %v388_v15 = vrot.slane %v387_v59, 4  ;;  %v407_v17 = vrot.slane %v405_v61, 4  ;;  %v418_v22 = vshrl.u32 %v5384_v53, 16 }
  0x2a   : > { %v5410_v24 = vcombine.low %v369_v62, %v379_v13  ;;  %v398_v25 = vrot.slane %v397_v0, 4  ;;  %v410_v26 = vrot.slane %v408_v5, 5  ;;  %v416_v27 = vrot.slane %v414_v11, 5  ;;  %4905 = vmatprep.subr.msk.bf16.mxu0 %vm767_vm0, %v5276_v8  ;;  %v5425_v8 = vld [vmem:[%s5265_s6 + $0x50] sm:$0x1] }
  0x2b   : > { %v393_v6 = vsel %vm5314_vm4, %v388_v15, %v392_v55  ;;  %v420_v29 = vrot.slane %v418_v22, 4  ;;  %v424_v30 = vshll.u32 %v5396_v1, 16  ;;  %v429_v31 = vshrl.u32 %v5401_v12, 16  ;;  %v5448_v0 = vld [vmem:[%s5265_s6 + $0x5c] sm:$0x1] }
  0x2c   : > { %6728 = vst [vmem:[#allocation3_spill] sm:$0xff] %v5410_v24  ;;  %4445 = vmatprep.mubr.msk.bf16.mxu0 %vm718_vm3, %v5410_v24  ;;  %4310 = vmatmul.mubr.msk.bf16.gmra.mrb[4].mxu1 %vm718_vm3, %v5410_v24  ;;  %v403_v33 = vsel %vm5314_vm4, %v398_v25, %v402_v60  ;;  %v411_v36 = vor.u32 %v410_v26, %v407_v17  ;;  %v432_v37 = vshll.u32 %v5401_v12, 16  ;;  %v438_v38 = vshll.u32 %v5408_v23, 16  ;;  %v5452_v11 = vld [vmem:[%s5265_s6 + $0x60] sm:$0xf] }
  0x2d   : > { %v5432_v42 = vcombine.low %v393_v6, %v403_v33  ;;  %v421_v43 = vor.u32 %v420_v29, %v416_v27  ;;  %v426_v44 = vrot.slane %v424_v30, 5  ;;  %v431_v45 = vrot.slane %v429_v31, 4  ;;  %v5457_v25 = vld [vmem:[%s5265_s6 + $0x64] sm:$0xf] }
  0x2e   : > { %v412_v50 = vrot.slane %v411_v36, 4  ;;  %v434_v51 = vrot.slane %v432_v37, 5  ;;  %v440_v52 = vrot.slane %v438_v38, 5  ;;  %v442_v54 = vshrl.u32 %v5408_v23, 16 }
  0x2f   : > { %6729 = vst [vmem:[#allocation4_spill] sm:$0xff] %v5432_v42  ;;  %4313 = vmatprep.mubr.msk.bf16.mxu1 %vm718_vm3, %v5432_v42  ;;  %v422_v55 = vrot.slane %v421_v43, 4  ;;  %v448_v56 = vshll.u32 %v5425_v8, 16  ;;  %v453_v57 = vshrl.u32 %v5430_v41, 16  ;;  %v456_v59 = vshll.u32 %v5430_v41, 16 }
  0x30   : > { %4446 = vmatmul.mubr.msk.bf16.gmra.mrb[4].mxu0 %vm718_vm3, %v5432_v42  ;;  %v417_v60 = vsel %vm5314_vm4, %v412_v50, %v416_v27  ;;  %v435_v61 = vor.u32 %v434_v51, %v431_v45  ;;  %v444_v62 = vrot.slane %v442_v54, 4  ;;  %v462_v5 = vshll.u32 %v5435_v49, 16  ;;  %v5471_v43 = vld [vmem:[%s5265_s6 + $0x68] sm:$0x1] }
  0x31   : > { %v427_v13 = vsel %vm5314_vm4, %v422_v55, %v426_v44  ;;  %v450_v15 = vrot.slane %v448_v56, 5  ;;  %v455_v17 = vrot.slane %v453_v57, 4  ;;  %v458_v22 = vrot.slane %v456_v59, 5  ;;  %v5476_v56 = vld [vmem:[%s5265_s6 + $0x6c] sm:$0xf] }
  0x32   : > { %v5459_v26 = vcombine.low %v417_v60, %v427_v13  ;;  %v436_v27 = vrot.slane %v435_v61, 4  ;;  %v445_v6 = vor.u32 %v444_v62, %v440_v52  ;;  %v464_v29 = vrot.slane %v462_v5, 5  ;;  %v5482_v61 = vld [vmem:[%s5265_s6 + $0x70] sm:$0xf] }
  0x33   : > { %v459_v30 = vor.u32 %v458_v22, %v455_v17  ;;  %v466_v31 = vshrl.u32 %v5435_v49, 16  ;;  %v472_v33 = vshll.u32 %v5448_v0, 16  ;;  %v477_v36 = vshrl.u32 %v5452_v11, 16  ;;  %v5490_v22 = vld [vmem:[%s5265_s6 + $0x74] sm:$0x1] }
  0x34   : > { %6730 = vst [vmem:[#allocation5_spill] sm:$0xff] %v5459_v26  ;;  %4449 = vmatprep.mubr.msk.bf16.mxu0 %vm718_vm3, %v5459_v26  ;;  %4314 = vmatmul.mubr.msk.bf16.gmra.mrb[8].mxu1 %vm718_vm3, %v5459_v26  ;;  %v441_v37 = vsel %vm5314_vm4, %v436_v27, %v440_v52  ;;  %v446_v38 = vrot.slane %v445_v6, 4  ;;  %v480_v44 = vshll.u32 %v5452_v11, 16  ;;  %v486_v45 = vshll.u32 %v5457_v25, 16 }
  0x35   : > { %v460_v50 = vrot.slane %v459_v30, 4  ;;  %v468_v51 = vrot.slane %v466_v31, 4  ;;  %v474_v54 = vrot.slane %v472_v33, 5  ;;  %v479_v55 = vrot.slane %v477_v36, 4  ;;  %v5497_v31 = vld [vmem:[%s6688_s1 + $0x4] sm:$0x3] }
  0x36   : > { %v451_v57 = vsel %vm5314_vm4, %v446_v38, %v450_v15  ;;  %v482_v59 = vrot.slane %v480_v44, 5  ;;  %v488_v60 = vrot.slane %v486_v45, 5  ;;  %v490_v52 = vshrl.u32 %v5457_v25, 16  ;;  %6732 = vst [vmem:[#allocation7_spill] sm:$0xff] %v5497_v31  ;;  %4901 = vmatprep.subr.msk.bf16.mxu1 %vm767_vm0, %v5497_v31  ;;  %v5603_v31 = vld [vmem:[%s5265_s6 + $0xa8] sm:$0xf] }
  0x37   : > { %v5484_v62 = vcombine.low %v441_v37, %v451_v57  ;;  %v465_v5 = vsel %vm5314_vm4, %v460_v50, %v464_v29  ;;  %v469_v13 = vor.u32 %v468_v51, %v464_v29  ;;  %v496_v17 = vshll.u32 %v5471_v43, 16  ;;  %v5506_v51 = vld [vmem:[%s5265_s6 + $0x78] sm:$0xf]  ;;  %6742 = vst [vmem:[#allocation17_spill] sm:$0xff] %v5603_v31 }
  0x38   : > { %v483_v27 = vor.u32 %v482_v59, %v479_v55  ;;  %v492_v6 = vrot.slane %v490_v52, 4  ;;  %v501_v15 = vshrl.u32 %v5476_v56, 16  ;;  %v504_v30 = vshll.u32 %v5476_v56, 16 }
  0x39   : > { %6731 = vst [vmem:[#allocation6_spill] sm:$0xff] %v5484_v62  ;;  %4450 = vmatmul.mubr.msk.bf16.gmra.mrb[8].mxu0 %vm718_vm3, %v5484_v62  ;;  %4317 = vmatprep.mubr.msk.bf16.mxu1 %vm718_vm3, %v5484_v62  ;;  %v470_v29 = vrot.slane %v469_v13, 4  ;;  %v498_v33 = vrot.slane %v496_v17, 5  ;;  %v510_v36 = vshll.u32 %v5482_v61, 16  ;;  %v514_v37 = vshrl.u32 %v5482_v61, 16 }
  0x3a   : > { %v484_v38 = vrot.slane %v483_v27, 4  ;;  %v493_v44 = vor.u32 %v492_v6, %v488_v60  ;;  %v503_v45 = vrot.slane %v501_v15, 4  ;;  %v506_v50 = vrot.slane %v504_v30, 5  ;;  %v5514_v13 = vld [vmem:[%s5265_s6 + $0x7c] sm:$0xf] }
  0x3b   : > { %v475_v55 = vsel %vm5314_vm4, %v470_v29, %v474_v54  ;;  %v512_v57 = vrot.slane %v510_v36, 5  ;;  %v516_v59 = vrot.slane %v514_v37, 4  ;;  %v520_v52 = vshll.u32 %v5490_v22, 16  ;;  %v5576_v62 = vld [vmem:[%s5265_s6 + $0x9c] sm:$0xf] }
  0x3c   : > { %v5516_v17 = vcombine.low %v465_v5, %v475_v55  ;;  %v489_v27 = vsel %vm5314_vm4, %v484_v38, %v488_v60  ;;  %v494_v6 = vrot.slane %v493_v44, 4  ;;  %v507_v15 = vor.u32 %v506_v50, %v503_v45  ;;  %v5534_v38 = vld [vmem:[%s5265_s6 + $0x84] sm:$0xf]  ;;  %6739 = vst [vmem:[#allocation14_spill] sm:$0xff] %v5576_v62 }
  0x3d   : > { %v517_v30 = vor.u32 %v516_v59, %v512_v57  ;;  %v522_v3 = vrot.slane %v520_v52, 5  ;;  %v525_v54 = vshrl.u32 %v5506_v51, 16  ;;  %v528_v29 = vshll.u32 %v5506_v51, 16  ;;  %v5539_v59 = vld [vmem:[%s5265_s6 + $0x88] sm:$0xf] }
  0x3e   : > { %6733 = vst [vmem:[#allocation8_spill] sm:$0xff] %v5516_v17  ;;  %4453 = vmatprep.mubr.msk.bf16.mxu0 %vm718_vm3, %v5516_v17  ;;  %4318 = vmatmul.mubr.msk.bf16.gmra.mrb[12].mxu1 %vm718_vm3, %v5516_v17  ;;  %v499_v60 = vsel %vm5314_vm4, %v494_v6, %v498_v33  ;;  %v508_v5 = vrot.slane %v507_v15, 4  ;;  %v534_v36 = vshll.u32 %v5514_v13, 16  ;;  %v538_v37 = vshrl.u32 %v5514_v13, 16 }
  0x3f   : > { %v5536_v44 = vcombine.low %v489_v27, %v499_v60  ;;  %v518_v45 = vrot.slane %v517_v30, 4  ;;  %v527_v50 = vrot.slane %v525_v54, 4  ;;  %v530_v55 = vrot.slane %v528_v29, 5  ;;  %v5551_v54 = vld [vmem:[%s5265_s6 + $0x8c] sm:$0x1] }
  0x40   : > { %v513_v52 = vsel %vm5314_vm4, %v508_v5, %v512_v57  ;;  %v536_v33 = vrot.slane %v534_v36, 5  ;;  %v540_v6 = vrot.slane %v538_v37, 4  ;;  %v544_v15 = vshll.u32 %v5521_v20, 16  ;;  %v5556_v60 = vld [vmem:[%s5265_s6 + $0x90] sm:$0xf] }
  0x41   : > { %6734 = vst [vmem:[#allocation9_spill] sm:$0xff] %v5536_v44  ;;  %4454 = vmatmul.mubr.msk.bf16.gmra.mrb[12].mxu0 %vm718_vm3, %v5536_v44  ;;  %4321 = vmatprep.mubr.msk.bf16.mxu1 %vm718_vm3, %v5536_v44  ;;  %v523_v27 = vsel %vm5314_vm4, %v518_v45, %v522_v3  ;;  %v531_v30 = vor.u32 %v530_v55, %v527_v50  ;;  %v549_v29 = vshrl.u32 %v5534_v38, 16  ;;  %v552_v57 = vshll.u32 %v5534_v38, 16  ;;  %v5563_v50 = vld [vmem:[%s5265_s6 + $0x94] sm:$0xf] }
  0x42   : > { %6735 = vst [vmem:[#allocation10_spill] sm:$0xff] %v5556_v60  ;;  %v5558_v5 = vcombine.low %v513_v52, %v523_v27  ;;  %v541_v36 = vor.u32 %v540_v6, %v536_v33  ;;  %v546_v37 = vrot.slane %v544_v15, 5  ;;  %v558_v46 = vshll.u32 %v5539_v59, 16  ;;  %6737 = vst [vmem:[#allocation12_spill] sm:$0xff] %v5563_v50 }
  0x43   : > { %v532_v2 = vrot.slane %v531_v30, 4  ;;  %v551_v44 = vrot.slane %v549_v29, 4  ;;  %v554_v3 = vrot.slane %v552_v57, 5  ;;  %v562_v45 = vshrl.u32 %v5539_v59, 16  ;;  %v5572_v29 = vld [vmem:[%s5265_s6 + $0x98] sm:$0x1] }
  0x44   : > { %6736 = vst [vmem:[#allocation11_spill] sm:$0xff] %v5558_v5  ;;  %4457 = vmatprep.mubr.msk.bf16.mxu0 %vm718_vm3, %v5558_v5  ;;  %v542_v55 = vrot.slane %v541_v36, 4  ;;  %v560_v17 = vrot.slane %v558_v46, 5  ;;  %v568_v52 = vshll.u32 %v5551_v54, 16  ;;  %v573_v6 = vshrl.u32 %v5556_v60, 16  ;;  %6738 = vst [vmem:[#allocation13_spill] sm:$0xff] %v5572_v29 }
  0x45   : > { %v537_v15 = vsel %vm5314_vm4, %v532_v2, %v536_v33  ;;  %v555_v27 = vor.u32 %v554_v3, %v551_v44  ;;  %v564_v30 = vrot.slane %v562_v45, 4  ;;  %v576_v57 = vshll.u32 %v5556_v60, 16  ;;  %v5586_v45 = vld [vmem:[%s5265_s6 + $0xa0] sm:$0xf]  ;;  %v5617_v60 = vld [vmem:[%s5265_s6 + $0xb0] sm:$0x1] }
  0x46   : > { %4322 = vmatmul.mubr.msk.bf16.gmra.mrb[16].mxu1 %vm718_vm3, %v5558_v5  ;;  %v547_v46 = vsel %vm5314_vm4, %v542_v55, %v546_v37  ;;  %v570_v36 = vrot.slane %v568_v52, 5  ;;  %v575_v26 = vrot.slane %v573_v6, 4  ;;  %v582_v42 = vshll.u32 %v5563_v50, 16 }
  0x47   : > { %v5583_v2 = vcombine.low %v537_v15, %v547_v46  ;;  %v556_v44 = vrot.slane %v555_v27, 4  ;;  %v565_v33 = vor.u32 %v564_v30, %v560_v17  ;;  %v578_v3 = vrot.slane %v576_v57, 5  ;;  %v5598_v15 = vld [vmem:[%s5265_s6 + $0xa4] sm:$0x1] }
  0x48   : > { %v584_v24 = vrot.slane %v582_v42, 5  ;;  %v586_v7 = vshrl.u32 %v5563_v50, 16  ;;  %v592_v5 = vshll.u32 %v5572_v29, 16  ;;  %v597_v37 = vshrl.u32 %v5576_v62, 16  ;;  %6741 = vst [vmem:[#allocation16_spill] sm:$0xff] %v5598_v15 }
  0x49   : > { %6740 = vst [vmem:[#allocation15_spill] sm:$0xff] %v5583_v2  ;;  %4458 = vmatmul.mubr.msk.bf16.gmra.mrb[16].mxu0 %vm718_vm3, %v5583_v2  ;;  %4325 = vmatprep.mubr.msk.bf16.mxu1 %vm718_vm3, %v5583_v2  ;;  %v561_v55 = vsel %vm5314_vm4, %v556_v44, %v560_v17  ;;  %v566_v52 = vrot.slane %v565_v33, 4  ;;  %v579_v6 = vor.u32 %v578_v3, %v575_v26  ;;  %v600_v42 = vshll.u32 %v5576_v62, 16  ;;  %v5609_v26 = vld [vmem:[%s5265_s6 + $0xac] sm:$0xf] }
  0x4a   : > { %v588_v27 = vrot.slane %v586_v7, 4  ;;  %v594_v30 = vrot.slane %v592_v5, 5  ;;  %v599_v57 = vrot.slane %v597_v37, 4  ;;  %v606_v46 = vshll.u32 %v5586_v45, 16  ;;  %6743 = vst [vmem:[#allocation18_spill] sm:$0xff] %v5609_v26 }
  0x4b   : > { %v571_v2 = vsel %vm5314_vm4, %v566_v52, %v570_v36  ;;  %v580_v29 = vrot.slane %v579_v6, 4  ;;  %v602_v50 = vrot.slane %v600_v42, 5  ;;  %v610_v17 = vshrl.u32 %v5586_v45, 16 }
  0x4c   : > { %v5611_v44 = vcombine.low %v561_v55, %v571_v2  ;;  %v589_v33 = vor.u32 %v588_v27, %v584_v24  ;;  %v608_v7 = vrot.slane %v606_v46, 5  ;;  %v616_v5 = vshll.u32 %v5598_v15, 16  ;;  %v5628_v27 = vld [vmem:[%s5265_s6 + $0xb4] sm:$0xf]  ;;  %v5641_v15 = vld [vmem:[%s5265_s6 + $0xbc] sm:$0x1] }
  0x4d   : > { %v585_v3 = vsel %vm5314_vm4, %v580_v29, %v584_v24  ;;  %v603_v37 = vor.u32 %v602_v50, %v599_v57  ;;  %v612_v62 = vrot.slane %v610_v17, 4  ;;  %v621_v36 = vshrl.u32 %v5603_v31, 16  ;;  %6745 = vst [vmem:[#allocation20_spill] sm:$0xff] %v5628_v27  ;;  %6748 = vst [vmem:[#allocation23_spill] sm:$0xff] %v5641_v15 }
  0x4e   : > { %6744 = vst [vmem:[#allocation19_spill] sm:$0xff] %v5611_v44  ;;  %4461 = vmatprep.mubr.msk.bf16.mxu0 %vm718_vm3, %v5611_v44  ;;  %4326 = vmatmul.mubr.msk.bf16.gmra.mrb[20].mxu1 %vm718_vm3, %v5611_v44  ;;  %v590_v2 = vrot.slane %v589_v33, 4  ;;  %v618_v55 = vrot.slane %v616_v5, 5  ;;  %v624_v52 = vshll.u32 %v5603_v31, 16  ;;  %v630_v24 = vshll.u32 %v5609_v26, 16 }
  0x4f   : > { %v604_v50 = vrot.slane %v603_v37, 4  ;;  %v613_v29 = vor.u32 %v612_v62, %v608_v7  ;;  %v623_v6 = vrot.slane %v621_v36, 4  ;;  %v634_v42 = vshrl.u32 %v5609_v26, 16  ;;  %v5634_v5 = vld [vmem:[%s5265_s6 + $0xb8] sm:$0xf] }
  0x50   : > { %v595_v57 = vsel %vm5314_vm4, %v590_v2, %v594_v30  ;;  %v626_v46 = vrot.slane %v624_v52, 5  ;;  %v632_v17 = vrot.slane %v630_v24, 5  ;;  %v640_v33 = vshll.u32 %v5617_v60, 16  ;;  %6746 = vst [vmem:[#allocation21_spill] sm:$0xff] %v5634_v5 }
  0x51   : > { %v5636_v44 = vcombine.low %v585_v3, %v595_v57  ;;  %v609_v62 = vsel %vm5314_vm4, %v604_v50, %v608_v7  ;;  %v614_v37 = vrot.slane %v613_v29, 4  ;;  %v636_v36 = vrot.slane %v634_v42, 4  ;;  %v5654_v50 = vld [vmem:[%s5265_s6 + $0xc0] sm:$0xf] }
  0x52   : > { %v627_v26 = vor.u32 %v626_v46, %v623_v6  ;;  %v642_v31 = vrot.slane %v640_v33, 5  ;;  %v645_v30 = vshrl.u32 %v5628_v27, 16  ;;  %v648_v2 = vshll.u32 %v5628_v27, 16  ;;  %6749 = vst [vmem:[#allocation24_spill] sm:$0xff] %v5654_v50  ;;  %v5659_v46 = vld [vmem:[%s5265_s6 + $0xc4] sm:$0xf] }
  0x53   : > { %6747 = vst [vmem:[#allocation22_spill] sm:$0xff] %v5636_v44  ;;  %4462 = vmatmul.mubr.msk.bf16.gmra.mrb[20].mxu0 %vm718_vm3, %v5636_v44  ;;  %4329 = vmatprep.mubr.msk.bf16.mxu1 %vm718_vm3, %v5636_v44  ;;  %v619_v7 = vsel %vm5314_vm4, %v614_v37, %v618_v55  ;;  %v637_v3 = vor.u32 %v636_v36, %v632_v17  ;;  %v654_v52 = vshll.u32 %v5634_v5, 16  ;;  %v658_v24 = vshrl.u32 %v5634_v5, 16 }
  0x54   : > { %v5656_v29 = vcombine.low %v609_v62, %v619_v7  ;;  %v628_v6 = vrot.slane %v627_v26, 4  ;;  %v647_v42 = vrot.slane %v645_v30, 4  ;;  %v650_v57 = vrot.slane %v648_v2, 5  ;;  %v5669_v26 = vld [vmem:[%s5265_s6 + $0xc8] sm:$0x1] }
  0x55   : > { %v638_v33 = vrot.slane %v637_v3, 4  ;;  %v656_v44 = vrot.slane %v654_v52, 5  ;;  %v660_v27 = vrot.slane %v658_v24, 4  ;;  %v664_v55 = vshll.u32 %v5641_v15, 16 }
  0x56   : > { %6750 = vst [vmem:[#allocation25_spill] sm:$0xff] %v5656_v29  ;;  %4465 = vmatprep.mubr.msk.bf16.mxu0 %vm718_vm3, %v5656_v29  ;;  %4330 = vmatmul.mubr.msk.bf16.gmra.mrb[24].mxu1 %vm718_vm3, %v5656_v29  ;;  %v633_v62 = vsel %vm5314_vm4, %v628_v6, %v632_v17  ;;  %v651_v37 = vor.u32 %v650_v57, %v647_v42  ;;  %v1856_v36 = vshrl.u32 %v5654_v50, 16  ;;  %v1859_v30 = vshll.u32 %v5654_v50, 16 }
  0x57   : > { %v643_v2 = vsel %vm5314_vm4, %v638_v33, %v642_v31  ;;  %v661_v7 = vor.u32 %v660_v27, %v656_v44  ;;  %v666_v3 = vrot.slane %v664_v55, 5  ;;  %v1865_v52 = vshll.u32 %v5659_v46, 16 }
  0x58   : > { %v5676_v24 = vcombine.low %v633_v62, %v643_v2  ;;  %v652_v29 = vrot.slane %v651_v37, 4  ;;  %v1858_v15 = vrot.slane %v1856_v36, 4  ;;  %v1861_v5 = vrot.slane %v1859_v30, 5 }
  0x59   : > { %v662_v17 = vrot.slane %v661_v7, 4  ;;  %v1867_v6 = vrot.slane %v1865_v52, 5  ;;  %v1869_v42 = vshrl.u32 %v5659_v46, 16  ;;  %v1875_v57 = vshll.u32 %v5669_v26, 16 }
  0x5a   : > { %4333 = vmatprep.mubr.msk.bf16.mxu1 %vm718_vm3, %v5676_v24  ;;  %v657_v31 = vsel %vm5314_vm4, %v652_v29, %v656_v44  ;;  %v1862_v27 = vor.u32 %v1861_v5, %v1858_v15  ;;  %v3890_v33 = vrot.slane %v5290_v16, 9  ;;  %v1252_v55 = vrot.slane %v5293_v18, 5 }
  0x5b   : > { %4466 = vmatmul.mubr.msk.bf16.gmra.mrb[24].mxu0 %vm718_vm3, %v5676_v24  ;;  %v667_v62 = vsel %vm5314_vm4, %v662_v17, %v666_v3  ;;  %v1871_v37 = vrot.slane %v1869_v42, 4  ;;  %v1877_v36 = vrot.slane %v1875_v57, 5  ;;  %v3891_v30 = vrot.slane %v5310_v34, 9 }
  0x5c   : > { %v5697_v2 = vcombine.low %v657_v31, %v667_v62  ;;  %v1863_v7 = vrot.slane %v1862_v27, 4  ;;  %v1253_v15 = vsel %vm5682_vm7, %v3890_v33, %v1252_v55  ;;  %v1254_v44 = vrot.slane %v1252_v55, 4 }
  0x5d   : > { %v1872_v16 = vor.u32 %v1871_v37, %v1867_v6  ;;  %v6753_v18 = vrot.slane %v5323_v40, 5  ;;  %v5709_v52 = vcombine.low %v5310_v34, %v5323_v40  ;;  %v6755_v42 = vrot.slane %v5296_v19, 5 }
  0x5e   : > { %4469 = vmatprep.mubr.msk.bf16.mxu0 %vm718_vm3, %v5697_v2  ;;  %4334 = vmatmul.mubr.msk.bf16.gmra.mrb[28].mxu1 %vm718_vm3, %v5697_v2  ;;  %v1868_v17 = vsel %vm5314_vm4, %v1863_v7, %v1867_v6  ;;  %v3892_v31 = vrot.slane %v5337_v58, 9  ;;  %v1266_v27 = vrot.slane %v5342_v63, 5  ;;  %v6756_v40 = vcombine.low %v5279_v9, %v5282_v10 }
  0x5f   : > { %v1260_v5 = vsel %vm5682_vm7, %v3891_v30, %v6753_v18  ;;  %v6754_v29 = vmov %v6753_v18  ;;  %v1256_v57 = vsel %vm5682_vm7, %v1254_v44, %v6755_v42  ;;  %v1873_v34 = vrot.slane %v1872_v16, 4 }
  0x60   : > { %v1261_v3 = vrot.slane %v6754_v29, 4  ;;  %4339 = vmatprep.mubr.msk.bf16.mxu1 %vm718_vm3, %v6756_v40  ;;  %v5727_v33 = vcombine.low %v1253_v15, %v1256_v57  ;;  %v6757_v55 = vrot.slane %v5327_v47, 5  ;;  %v1269_v6 = vrot.slane %v5350_v4, 5 }
  0x61   : > { %v1267_v37 = vsel %vm5682_vm7, %v3892_v31, %v1266_v27  ;;  %v1268_v30 = vrot.slane %v1266_v27, 4  ;;  %v5740_v9 = vcombine.low %v5337_v58, %v5342_v63  ;;  %v1878_v10 = vsel %vm5314_vm4, %v1873_v34, %v1877_v36 }
  0x62   : > { %v1263_v19 = vsel %vm5682_vm7, %v1261_v3, %v6757_v55  ;;  %v3893_v47 = vrot.slane %v5356_v14, 9  ;;  %v1273_v7 = vrot.slane %v5363_v28, 5  ;;  %v1276_v15 = vrot.slane %v5370_v32, 5 }
  0x63   : > { %v5734_v62 = vcombine.low %v1260_v5, %v1263_v19  ;;  %v5747_v4 = vcombine.low %v1868_v17, %v1878_v10  ;;  %v1270_v44 = vsel %vm5682_vm7, %v1268_v30, %v1269_v6  ;;  %v5753_v16 = vcombine.low %v5356_v14, %v5363_v28 }
  0x64   : > { %v3894_v58 = vrot.slane %v5378_v48, 9  ;;  %v5756_v63 = vcombine.low %v1267_v37, %v1270_v44  ;;  %v1274_v36 = vsel %vm5682_vm7, %v3893_v47, %v1273_v7  ;;  %v1275_v18 = vrot.slane %v1273_v7, 4 }
  0x65   : > { %v1280_v5 = vrot.slane %v5384_v53, 5  ;;  %4470 = vmatmul.mubr.msk.bf16.gmra.mrb[28].mxu0 %vm718_vm3, %v5747_v4  ;;  %v1283_v32 = vrot.slane %v5396_v1, 5  ;;  %v5766_v29 = vcombine.low %v5378_v48, %v5384_v53  ;;  %v3895_v14 = vrot.slane %v5401_v12, 9 }
  0x66   : > { %v1287_v28 = vrot.slane %v5408_v23, 5  ;;  %4475 = vmatprep.mubr.msk.bf16.mxu0 %vm718_vm3, %v5727_v33  ;;  %v1277_v3 = vsel %vm5682_vm7, %v1275_v18, %v1276_v15  ;;  %v1290_v1 = vrot.slane %v5425_v8, 5  ;;  %4340 = vmatmul.mubr.msk.bf16.vlgmr.msra.gmra.mrb[0].mxu1 %vm718_vm3, %v5320_v39  ;;  %v5785_v31 = vcombine.low %v5401_v12, %v5408_v23 }
  0x67   : > { %v1281_v17 = vsel %vm5682_vm7, %v3894_v58, %v1280_v5  ;;  %v1282_v42 = vrot.slane %v1280_v5, 4  ;;  %v5779_v48 = vcombine.low %v1274_v36, %v1277_v3  ;;  %4343 = vmatprep.mubr.msk.bf16.mxu1 %vm718_vm3, %v5709_v52  ;;  %v3896_v8 = vrot.slane %v5430_v41, 9 }
  0x68   : > { %v1288_v53 = vsel %vm5682_vm7, %v3895_v14, %v1287_v28  ;;  %v1289_v57 = vrot.slane %v1287_v28, 4  ;;  %v1294_v34 = vrot.slane %v5435_v49, 5  ;;  %v1297_v40 = vrot.slane %v5448_v0, 5 }
  0x69   : > { %v1284_v27 = vsel %vm5682_vm7, %v1282_v42, %v1283_v32  ;;  %v5800_v12 = vcombine.low %v5430_v41, %v5435_v49  ;;  %v3897_v23 = vrot.slane %v5452_v11, 9  ;;  %v1301_v10 = vrot.slane %v5457_v25, 5 }
  0x6a   : > { %v5794_v55 = vcombine.low %v1281_v17, %v1284_v27  ;;  %v1291_v19 = vsel %vm5682_vm7, %v1289_v57, %v1290_v1  ;;  %v1295_v37 = vsel %vm5682_vm7, %v3896_v8, %v1294_v34  ;;  %v1296_v30 = vrot.slane %v1294_v34, 4  ;;  %v6759_v57 = vld [vmem:[#allocation12_spill] sm:$0xff] }
  0x6b   : > { %v5803_v6 = vcombine.low %v1288_v53, %v1291_v19  ;;  %v1304_v0 = vrot.slane %v5471_v43, 5  ;;  %v5811_v47 = vcombine.low %v5452_v11, %v5457_v25  ;;  %v3898_v7 = vrot.slane %v5476_v56, 9  ;;  %v5823_v43 = vld [vmem:[%s6688_s1 + $0xe] sm:$0x3]  ;;  %v6760_v19 = vld [vmem:[#allocation13_spill] sm:$0xff] }
  0x6c   : > { %v1308_v41 = vrot.slane %v5482_v61, 5  ;;  %v1298_v49 = vsel %vm5682_vm7, %v1296_v30, %v1297_v40  ;;  %v1302_v15 = vsel %vm5682_vm7, %v3897_v23, %v1301_v10  ;;  %v1303_v44 = vrot.slane %v1301_v10, 4  ;;  %v6761_v10 = vld [vmem:[#allocation14_spill] sm:$0xff] }
  0x6d   : > { %v1311_v58 = vrot.slane %v5490_v22, 5  ;;  %4476 = vmatmul.mubr.msk.bf16.vlgmr.msra.gmra.mrb[0].mxu0 %vm718_vm3, %v5734_v62  ;;  %v5827_v11 = vcombine.low %v1295_v37, %v1298_v49  ;;  %v5833_v18 = vcombine.low %v5476_v56, %v5482_v61  ;;  %v3899_v5 = vrot.slane %v5506_v51, 9 }
  0x6e   : > { %v1309_v25 = vsel %vm5682_vm7, %v3898_v7, %v1308_v41  ;;  %v1310_v36 = vrot.slane %v1308_v41, 4  ;;  %4508 = vmatpush3.bf16.msra.mxu0 %v5302_v21  ;;  %4479 = vmatprep.mubr.msk.bf16.mxu0 %vm718_vm3, %v5756_v63  ;;  %v1305_v22 = vsel %vm5682_vm7, %v1303_v44, %v1304_v0  ;;  %v1315_v32 = vrot.slane %v5514_v13, 5  ;;  %v6762_v41 = vld [vmem:[#allocation16_spill] sm:$0xff] }
  0x6f   : > { %v1318_v14 = vrot.slane %v5521_v20, 5  ;;  %4344 = vmatmul.mubr.msk.bf16.gmra.mrb[4].mxu1 %vm718_vm3, %v5740_v9  ;;  %v5845_v28 = vcombine.low %v1302_v15, %v1305_v22  ;;  %v5851_v56 = vcombine.low %v5506_v51, %v5514_v13  ;;  %v3900_v61 = vrot.slane %v5534_v38, 9  ;;  %4906 = vmatprep.subr.msk.bf16.mxu0 %vm767_vm0, %v5823_v43  ;;  %v6758_v13 = vld [vmem:[#allocation10_spill] sm:$0xff] }
  0x70   : > { %v1312_v21 = vsel %vm5682_vm7, %v1310_v36, %v1311_v58  ;;  %4347 = vmatprep.mubr.msk.bf16.mxu1 %vm718_vm3, %v5753_v16  ;;  %v1316_v3 = vsel %vm5682_vm7, %v3899_v5, %v1315_v32  ;;  %v1317_v17 = vrot.slane %v1315_v32, 4  ;;  %v1322_v42 = vrot.slane %v5539_v59, 5 }
  0x71   : > { %v5858_v20 = vcombine.low %v1309_v25, %v1312_v21  ;;  %v1325_v1 = vrot.slane %v5551_v54, 5  ;;  %v5866_v51 = vcombine.low %v5534_v38, %v5539_v59  ;;  %v3901_v53 = vrot.slane %v6758_v13, 9  ;;  %v6763_v25 = vld [vmem:[#allocation17_spill] sm:$0xff] }
  0x72   : > { %v1329_v27 = vrot.slane %v6759_v57, 5  ;;  %v1319_v8 = vsel %vm5682_vm7, %v1317_v17, %v1318_v14  ;;  %v1323_v34 = vsel %vm5682_vm7, %v3900_v61, %v1322_v42  ;;  %v1324_v40 = vrot.slane %v1322_v42, 4  ;;  %v6764_v14 = vld [vmem:[#allocation18_spill] sm:$0xff]  ;;  %v6766_v42 = vld [vmem:[#allocation21_spill] sm:$0xff] }
  0x73   : > { %v1332_v23 = vrot.slane %v6760_v19, 5  ;;  %v5875_v37 = vcombine.low %v1316_v3, %v1319_v8  ;;  %v5881_v59 = vcombine.low %v6758_v13, %v6759_v57  ;;  %v3902_v0 = vrot.slane %v6761_v10, 9  ;;  %v6765_v3 = vld [vmem:[#allocation20_spill] sm:$0xff] }
  0x74   : > { %v1330_v54 = vsel %vm5682_vm7, %v3901_v53, %v1329_v27  ;;  %v1331_v38 = vrot.slane %v1329_v27, 4  ;;  %v1326_v30 = vsel %vm5682_vm7, %v1324_v40, %v1325_v1  ;;  %v1336_v7 = vrot.slane %v5586_v45, 5  ;;  %v6767_v27 = vld [vmem:[#allocation23_spill] sm:$0xff] }
  0x75   : > { %v1339_v49 = vrot.slane %v6762_v41, 5  ;;  %4480 = vmatmul.mubr.msk.bf16.gmra.mrb[4].mxu0 %vm718_vm3, %v5779_v48  ;;  %v5890_v15 = vcombine.low %v1323_v34, %v1326_v30  ;;  %v5896_v58 = vcombine.low %v6761_v10, %v5586_v45  ;;  %v3903_v36 = vrot.slane %v6763_v25, 9 }
  0x76   : > { %v1333_v44 = vsel %vm5682_vm7, %v1331_v38, %v1332_v23  ;;  %4483 = vmatprep.mubr.msk.bf16.mxu0 %vm718_vm3, %v5794_v55  ;;  %v1337_v5 = vsel %vm5682_vm7, %v3902_v0, %v1336_v7  ;;  %v1338_v32 = vrot.slane %v1336_v7, 4  ;;  %v1343_v21 = vrot.slane %v6764_v14, 5  ;;  %v3938_v0 = vld [vmem:[%s6688_s1 + $0x6] sm:$0x3] }
  0x77   : > { %v5901_v22 = vcombine.low %v1330_v54, %v1333_v44  ;;  %4348 = vmatmul.mubr.msk.bf16.gmra.mrb[8].mxu1 %vm718_vm3, %v5766_v29  ;;  %v1346_v61 = vrot.slane %v5617_v60, 5  ;;  %v5911_v45 = vcombine.low %v6763_v25, %v6764_v14  ;;  %v3904_v17 = vrot.slane %v6765_v3, 9  ;;  %v6768_v54 = vld [vmem:[#allocation24_spill] sm:$0xff] }
  0x78   : > { %v1350_v1 = vrot.slane %v6766_v42, 5  ;;  %4351 = vmatprep.mubr.msk.bf16.mxu1 %vm718_vm3, %v5785_v31  ;;  %v1340_v13 = vsel %vm5682_vm7, %v1338_v32, %v1339_v49  ;;  %v1344_v53 = vsel %vm5682_vm7, %v3903_v36, %v1343_v21  ;;  %v1345_v57 = vrot.slane %v1343_v21, 4  ;;  %v6769_v49 = vld [vmem:[#allocation7_spill] sm:$0xff] }
  0x79   : > { %v1353_v60 = vrot.slane %v6767_v27, 5  ;;  %v5922_v8 = vcombine.low %v1337_v5, %v1340_v13  ;;  %v5928_v19 = vcombine.low %v6765_v3, %v6766_v42  ;;  %v3974_v38 = vrot.slane %v6768_v54, 9 }
  0x7a   : > { %v1351_v34 = vsel %vm5682_vm7, %v3904_v17, %v1350_v1  ;;  %v1352_v40 = vrot.slane %v1350_v1, 4  ;;  %v1347_v23 = vsel %vm5682_vm7, %v1345_v57, %v1346_v61  ;;  %v2086_v30 = vrot.slane %v5659_v46, 5  ;;  %v5193_v61 = vld [vmem:[%s5265_s6 + $0x8] sm:$0x1]  ;;  %v5194_v17 = vld [vmem:[%s5265_s6] sm:$0xf] }
  0x7b   : > { %v2089_v10 = vrot.slane %v5669_v26, 5  ;;  %v5938_v7 = vcombine.low %v1344_v53, %v1347_v23  ;;  %v1454_v44 = vsel %vm767_vm0, %v6769_v49, 0  ;;  %v5952_v26 = vcombine.low %v6768_v54, %v5659_v46  ;;  %v5192_v46 = vld [vmem:[%s5265_s6 + $0x4] sm:$0xf] }
  0x7c   : > { %v1354_v41 = vsel %vm5682_vm7, %v1352_v40, %v1353_v60  ;;  %v2087_v36 = vsel %vm5682_vm7, %v3974_v38, %v2086_v30  ;;  %v2088_v5 = vrot.slane %v2086_v30, 4  ;;  %4372 = vmatpush3.bf16.msra.mxu1 %v1454_v44  ;;  %v1245_v21 = vrot.slane %v5192_v46, 5  ;;  %v6770_v23 = vld [vmem:[#allocation2_spill] sm:$0xff]  ;;  %v6771_v38 = vld [vmem:[#allocation3_spill] sm:$0xff]  ;;  %v6773_v30 = vld [vmem:[#allocation5_spill] sm:$0xff] }
  0x7d   : > { %v5944_v25 = vcombine.low %v1351_v34, %v1354_v41  ;;  %4484 = vmatmul.mubr.msk.bf16.gmra.mrb[8].mxu0 %vm718_vm3, %v5803_v6  ;;  %4902 = vmatprep.subr.msk.bf16.mxu1 %vm767_vm0, %v3938_v0  ;;  %v1248_v3 = vrot.slane %v5193_v61, 5  ;;  %v3889_v42 = vrot.slane %v5194_v17, 9  ;;  %v1660_v27 = vsel %vm767_vm0, %v3938_v0, 0  ;;  %v4030_v34 = vld [vmem:[%s6688_s1 + $0x10] sm:$0x3]  ;;  %v6780_v0 = vld [vmem:[#allocation22_spill] sm:$0xff] }
  0x7e   : > { %4487 = vmatprep.mubr.msk.bf16.mxu0 %vm718_vm3, %v5827_v11  ;;  %v2090_v32 = vsel %vm5682_vm7, %v2088_v5, %v2089_v10  ;;  %v1247_v1 = vrot.slane %v1245_v21, 4  ;;  %v2534_v60 = vsel %vm767_vm0, %v5823_v43, 0  ;;  %v6074_v43 = vld [vmem:[%s5265_s6 + $0xd0] sm:$0xf]  ;;  %v2746_v54 = vsel %vm767_vm0, %v4030_v34, 0  ;;  %v6776_v10 = vld [vmem:[#allocation9_spill] sm:$0xff] }
  0x7f   : > { %4352 = vmatmul.mubr.msk.bf16.gmra.mrb[12].mxu1 %vm718_vm3, %v5800_v12  ;;  %v5961_v14 = vcombine.low %v2087_v36, %v2090_v32  ;;  %v1246_v13 = vsel %vm5682_vm7, %v3889_v42, %v1245_v21  ;;  %v2511_v41 = vshll.u32 %v6074_v43, 16  ;;  %v279_v36 = vld [vmem:[%s5265_s6 + $0xd4] sm:$0x1]  ;;  %v6781_v5 = vld [vmem:[#allocation25_spill] sm:$0xff]  ;;  %v2732_v35 = vrot.slane %v6074_v43, 5 }
  0x80   : > { %4355 = vmatprep.mubr.msk.bf16.mxu1 %vm718_vm3, %v5811_v47  ;;  %v1249_v53 = vsel %vm5682_vm7, %v1247_v1, %v1248_v3  ;;  %v2521_v21 = vshll.u32 %v279_v36, 16 }
  0x81   : > { %v3906_v57 = vcombine.low %v1246_v13, %v1249_v53  ;;  %v2513_v49 = vrot.slane %v2511_v41, 5 }
  0x82   : > { %v2523_v61 = vrot.slane %v2521_v21, 5 }
  0x85   : > { %4488 = vmatmul.mubr.msk.bf16.gmra.mrb[12].mxu0 %vm718_vm3, %v5845_v28 }
  0x86   : > { %4491 = vmatprep.mubr.msk.bf16.mxu0 %vm718_vm3, %v5858_v20 }
  0x87   : > { %4356 = vmatmul.mubr.msk.bf16.gmra.mrb[16].mxu1 %vm718_vm3, %v5833_v18 }
  0x88   : > { %4359 = vmatprep.mubr.msk.bf16.mxu1 %vm718_vm3, %v5851_v56 }
  0x8d   : > { %4492 = vmatmul.mubr.msk.bf16.gmra.mrb[16].mxu0 %vm718_vm3, %v5875_v37 }
  0x8e   : > { %4495 = vmatprep.mubr.msk.bf16.mxu0 %vm718_vm3, %v5890_v15 }
  0x8f   : > { %4360 = vmatmul.mubr.msk.bf16.gmra.mrb[20].mxu1 %vm718_vm3, %v5866_v51 }
  0x90   : > { %4363 = vmatprep.mubr.msk.bf16.mxu1 %vm718_vm3, %v5881_v59 }
  0x95   : > { %4496 = vmatmul.mubr.msk.bf16.gmra.mrb[20].mxu0 %vm718_vm3, %v5901_v22 }
  0x96   : > { %4499 = vmatprep.mubr.msk.bf16.mxu0 %vm718_vm3, %v5922_v8 }
  0x97   : > { %4364 = vmatmul.mubr.msk.bf16.gmra.mrb[24].mxu1 %vm718_vm3, %v5896_v58 }
  0x98   : > { %4367 = vmatprep.mubr.msk.bf16.mxu1 %vm718_vm3, %v5911_v45 }
  0x9d   : > { %4500 = vmatmul.mubr.msk.bf16.gmra.mrb[24].mxu0 %vm718_vm3, %v5938_v7 }
  0x9e   : > { %4503 = vmatprep.mubr.msk.bf16.mxu0 %vm718_vm3, %v5944_v25 }
  0x9f   : > { %4368 = vmatmul.mubr.msk.bf16.gmra.mrb[28].mxu1 %vm718_vm3, %v5928_v19 }
  0xa0   : > { %4373 = vmatprep.mubr.msk.bf16.mxu1 %vm718_vm3, %v3906_v57 }
  0xa5   : > { %4504 = vmatmul.mubr.msk.bf16.gmra.mrb[28].mxu0 %vm718_vm3, %v5961_v14 }
  0xa6   : > { %4509 = vmatprep.mubr.msk.bf16.mxu0 %vm718_vm3, %v5709_v52 }
  0xa7   : > { %4374 = vmatmul.mubr.msk.bf16.vlgmr.msra.gmra.mrb[0].mxu1 %vm718_vm3, %v5727_v33  ;;  %v6071_v33 = vld [vmem:[%s5265_s6 + $0xcc] sm:$0xf] }
  0xa8   : > { %4377 = vmatprep.mubr.msk.bf16.mxu1 %vm718_vm3, %v5734_v62  ;;  %4406 = vmatpush3.bf16.msra.mxu1 %v1660_v27  ;;  %v3994_v40 = vcombine.low %v6071_v33, %v6074_v43 }
  0xad   : > { %4510 = vmatmul.mubr.msk.bf16.vlgmr.msra.gmra.mrb[0].mxu0 %vm718_vm3, %v5740_v9 }
  0xae   : > { %4542 = vmatpush3.bf16.msra.mxu0 %v2534_v60  ;;  %4513 = vmatprep.mubr.msk.bf16.mxu0 %vm718_vm3, %v5753_v16 }
  0xaf   : > { %4378 = vmatmul.mubr.msk.bf16.gmra.mrb[4].mxu1 %vm718_vm3, %v5756_v63  ;;  %4907 = vmatprep.subr.msk.bf16.mxu0 %vm767_vm0, %v4030_v34 }
  0xb0   : > { %4381 = vmatprep.mubr.msk.bf16.mxu1 %vm718_vm3, %v5779_v48 }
  0xb5   : > { %4514 = vmatmul.mubr.msk.bf16.gmra.mrb[4].mxu0 %vm718_vm3, %v5766_v29 }
  0xb6   : > { %4517 = vmatprep.mubr.msk.bf16.mxu0 %vm718_vm3, %v5785_v31 }
  0xb7   : > { %4382 = vmatmul.mubr.msk.bf16.gmra.mrb[8].mxu1 %vm718_vm3, %v5794_v55 }
  0xb8   : > { %4385 = vmatprep.mubr.msk.bf16.mxu1 %vm718_vm3, %v5803_v6 }
  0xbd   : > { %4518 = vmatmul.mubr.msk.bf16.gmra.mrb[8].mxu0 %vm718_vm3, %v5800_v12 }
  0xbe   : > { %4521 = vmatprep.mubr.msk.bf16.mxu0 %vm718_vm3, %v5811_v47 }
  0xbf   : > { %4386 = vmatmul.mubr.msk.bf16.gmra.mrb[12].mxu1 %vm718_vm3, %v5827_v11 }
  0xc0   : > { %4389 = vmatprep.mubr.msk.bf16.mxu1 %vm718_vm3, %v5845_v28 }
  0xc5   : > { %4522 = vmatmul.mubr.msk.bf16.gmra.mrb[12].mxu0 %vm718_vm3, %v5833_v18 }
  0xc6   : > { %4525 = vmatprep.mubr.msk.bf16.mxu0 %vm718_vm3, %v5851_v56 }
  0xc7   : > { %4390 = vmatmul.mubr.msk.bf16.gmra.mrb[16].mxu1 %vm718_vm3, %v5858_v20 }
  0xc8   : > { %4393 = vmatprep.mubr.msk.bf16.mxu1 %vm718_vm3, %v5875_v37 }
  0xcd   : > { %4526 = vmatmul.mubr.msk.bf16.gmra.mrb[16].mxu0 %vm718_vm3, %v5866_v51 }
  0xce   : > { %4529 = vmatprep.mubr.msk.bf16.mxu0 %vm718_vm3, %v5881_v59 }
  0xcf   : > { %4394 = vmatmul.mubr.msk.bf16.gmra.mrb[20].mxu1 %vm718_vm3, %v5890_v15 }
  0xd0   : > { %4397 = vmatprep.mubr.msk.bf16.mxu1 %vm718_vm3, %v5901_v22 }
  0xd5   : > { %4530 = vmatmul.mubr.msk.bf16.gmra.mrb[20].mxu0 %vm718_vm3, %v5896_v58 }
  0xd6   : > { %4533 = vmatprep.mubr.msk.bf16.mxu0 %vm718_vm3, %v5911_v45 }
  0xd7   : > { %4398 = vmatmul.mubr.msk.bf16.gmra.mrb[24].mxu1 %vm718_vm3, %v5922_v8 }
  0xd8   : > { %4401 = vmatprep.mubr.msk.bf16.mxu1 %vm718_vm3, %v5938_v7 }
  0xdd   : > { %4534 = vmatmul.mubr.msk.bf16.gmra.mrb[24].mxu0 %vm718_vm3, %v5928_v19 }
  0xde   : > { %4537 = vmatprep.mubr.msk.bf16.mxu0 %vm718_vm3, %v5952_v26 }
  0xdf   : > { %4402 = vmatmul.mubr.msk.bf16.gmra.mrb[28].mxu1 %vm718_vm3, %v5944_v25 }
  0xe0   : > { %4407 = vmatprep.mubr.msk.bf16.mxu1 %vm718_vm3, %v5320_v39  ;;  %v6772_v39 = vld [vmem:[#allocation4_spill] sm:$0xff] }
  0xe5   : > { %4538 = vmatmul.mubr.msk.bf16.gmra.mrb[28].mxu0 %vm718_vm3, %v3994_v40 }
  0xe6   : > { %4543 = vmatprep.mubr.msk.bf16.mxu0 %vm718_vm3, %v6770_v23 }
  0xe7   : > { %4408 = vmatmul.mubr.msk.bf16.vlgmr.msra.gmra.mrb[0].mxu1 %vm718_vm3, %v5709_v52  ;;  %v6774_v52 = vld [vmem:[#allocation6_spill] sm:$0xff] }
  0xe8   : > { %4411 = vmatprep.mubr.msk.bf16.mxu1 %vm718_vm3, %v5740_v9  ;;  %v6775_v9 = vld [vmem:[#allocation8_spill] sm:$0xff] }
  0xed   : > { %4544 = vmatmul.mubr.msk.bf16.vlgmr.msra.gmra.mrb[0].mxu0 %vm718_vm3, %v6771_v38 }
  0xee   : > { %4576 = vmatpush3.bf16.msra.mxu0 %v2746_v54  ;;  %4547 = vmatprep.mubr.msk.bf16.mxu0 %vm718_vm3, %v6772_v39 }
  0xef   : > { %4412 = vmatmul.mubr.msk.bf16.gmra.mrb[4].mxu1 %vm718_vm3, %v5753_v16  ;;  %v6777_v16 = vld [vmem:[#allocation11_spill] sm:$0xff] }
  0xf0   : > { %4415 = vmatprep.mubr.msk.bf16.mxu1 %vm718_vm3, %v5766_v29  ;;  %v6778_v29 = vld [vmem:[#allocation15_spill] sm:$0xff] }
  0xf5   : > { %4548 = vmatmul.mubr.msk.bf16.gmra.mrb[4].mxu0 %vm718_vm3, %v6773_v30 }
  0xf6   : > { %4551 = vmatprep.mubr.msk.bf16.mxu0 %vm718_vm3, %v6774_v52 }
  0xf7   : > { %4416 = vmatmul.mubr.msk.bf16.gmra.mrb[8].mxu1 %vm718_vm3, %v5785_v31  ;;  %v6779_v31 = vld [vmem:[#allocation19_spill] sm:$0xff] }
  0xf8   : > { %4419 = vmatprep.mubr.msk.bf16.mxu1 %vm718_vm3, %v5800_v12  ;;  %v2502_v12 = vshrl.u32 %v6071_v33, 16 }
  0xfd   : > { %4552 = vmatmul.mubr.msk.bf16.gmra.mrb[8].mxu0 %vm718_vm3, %v6775_v9 }
  0xfe   : > { %4555 = vmatprep.mubr.msk.bf16.mxu0 %vm718_vm3, %v6776_v10 }
  0xff   : > { %4420 = vmatmul.mubr.msk.bf16.gmra.mrb[12].mxu1 %vm718_vm3, %v5811_v47  ;;  %v2505_v47 = vshll.u32 %v6071_v33, 16 }
 0x100   : > { %4423 = vmatprep.mubr.msk.bf16.mxu1 %vm718_vm3, %v5833_v18  ;;  %v2515_v18 = vshrl.u32 %v6074_v43, 16 }
 0x102   : > { %v2517_v44 = vrot.slane %v2515_v18, 4 }
 0x104   : > { %v2518_v46 = vor.u32 %v2517_v44, %v2513_v49 }
 0x105   : > { %4556 = vmatmul.mubr.msk.bf16.gmra.mrb[12].mxu0 %vm718_vm3, %v6777_v16 }
 0x106   : > { %4559 = vmatprep.mubr.msk.bf16.mxu0 %vm718_vm3, %v6778_v29  ;;  %v6247_v29 = vld [vmem:[%s6689_s2] ss:$0 sm:$0xff] }
 0x107   : > { %4424 = vmatmul.mubr.msk.bf16.gmra.mrb[16].mxu1 %vm718_vm3, %v5851_v56  ;;  %v2504_v56 = vrot.slane %v2502_v12, 4 }
 0x108   : > { %4427 = vmatprep.mubr.msk.bf16.mxu1 %vm718_vm3, %v5866_v51  ;;  %v2507_v51 = vrot.slane %v2505_v47, 5 }
 0x10a   : > { %v2508_v32 = vor.u32 %v2507_v51, %v2504_v56 }
 0x10d   : > { %4560 = vmatmul.mubr.msk.bf16.gmra.mrb[16].mxu0 %vm718_vm3, %v6779_v31 }
 0x10e   : > { %4563 = vmatprep.mubr.msk.bf16.mxu0 %vm718_vm3, %v6780_v0 }
 0x10f   : > { %4428 = vmatmul.mubr.msk.bf16.gmra.mrb[20].mxu1 %vm718_vm3, %v5881_v59  ;;  %v2509_v59 = vrot.slane %v2508_v32, 4 }
 0x110   : > { %4431 = vmatprep.mubr.msk.bf16.mxu1 %vm718_vm3, %v5896_v58  ;;  %v2519_v58 = vrot.slane %v2518_v46, 4 }
 0x112   : > { %v2524_v3 = vsel %vm5314_vm4, %v2519_v58, %v2523_v61 }
 0x115   : > { %4564 = vmatmul.mubr.msk.bf16.gmra.mrb[20].mxu0 %vm718_vm3, %v6781_v5 }
 0x116   : > { %4567 = vmatprep.mubr.msk.bf16.mxu0 %vm718_vm3, %v5676_v24  ;;  %v2514_v24 = vsel %vm5314_vm4, %v2509_v59, %v2513_v49 }
 0x117   : > { %4432 = vmatmul.mubr.msk.bf16.gmra.mrb[24].mxu1 %vm718_vm3, %v5911_v45  ;;  %v4012_v45 = vcombine.low %v2514_v24, %v2524_v3 }
 0x118   : > { %4435 = vmatprep.mubr.msk.bf16.mxu1 %vm718_vm3, %v5928_v19 }
 0x11d   : > { %4568 = vmatmul.mubr.msk.bf16.gmra.mrb[24].mxu0 %vm718_vm3, %v5697_v2  ;;  %v4029_v2 = vrot.slane %v6071_v33, 9 }
 0x11e   : > { %4571 = vmatprep.mubr.msk.bf16.mxu0 %vm718_vm3, %v5747_v4  ;;  %v2735_v4 = vrot.slane %v279_v36, 5 }
 0x11f   : > { %4436 = vmatmul.mubr.msk.bf16.gmra.mrb[28].mxu1 %vm718_vm3, %v5952_v26 }
 0x125   : > { %4572 = vmatmul.mubr.msk.bf16.gmra.mrb[28].mxu0 %vm718_vm3, %v4012_v45 }
 0x126   : > { %4577 = vmatprep.mubr.msk.bf16.mxu0 %vm718_vm3, %v5734_v62  ;;  %v2734_v62 = vrot.slane %v2732_v35, 4 }
 0x12d   : > { %4578 = vmatmul.mubr.msk.bf16.vlgmr.msra.gmra.mrb[0].mxu0 %vm718_vm3, %v5756_v63  ;;  %v2733_v63 = vsel %vm5682_vm7, %v4029_v2, %v2732_v35 }
 0x12e   : > { %4581 = vmatprep.mubr.msk.bf16.mxu0 %vm718_vm3, %v5779_v48  ;;  %v2736_v48 = vsel %vm5682_vm7, %v2734_v62, %v2735_v4 }
 0x135   : > { %4582 = vmatmul.mubr.msk.bf16.gmra.mrb[4].mxu0 %vm718_vm3, %v5794_v55  ;;  %v4031_v55 = vcombine.low %v2733_v63, %v2736_v48 }
 0x136   : > { %4585 = vmatprep.mubr.msk.bf16.mxu0 %vm718_vm3, %v5803_v6  ;;  %v3188_v6 = vld [vmem:[%s6690_s3] sm:$0x3] }
 0x137   : > { %4908 = vmatprep.subr.msk.bf16.mxu1 %vm767_vm0, %v3188_v6 }
 0x13d   : > { %4586 = vmatmul.mubr.msk.bf16.gmra.mrb[8].mxu0 %vm718_vm3, %v5827_v11  ;;  %v3245_v11 = vsel %vm767_vm0, %v3188_v6, 0 }
 0x13e   : > { %4589 = vmatprep.mubr.msk.bf16.mxu0 %vm718_vm3, %v5845_v28  ;;  %4610 = vmatpush3.bf16.msra.mxu1 %v3245_v11 }
 0x145   : > { %4590 = vmatmul.mubr.msk.bf16.gmra.mrb[12].mxu0 %vm718_vm3, %v5858_v20 }
 0x146   : > { %4593 = vmatprep.mubr.msk.bf16.mxu0 %vm718_vm3, %v5875_v37 }
 0x14d   : > { %4594 = vmatmul.mubr.msk.bf16.gmra.mrb[16].mxu0 %vm718_vm3, %v5890_v15 }
 0x14e   : > { %4597 = vmatprep.mubr.msk.bf16.mxu0 %vm718_vm3, %v5901_v22 }
 0x155   : > { %4598 = vmatmul.mubr.msk.bf16.gmra.mrb[20].mxu0 %vm718_vm3, %v5922_v8 }
 0x156   : > { %4601 = vmatprep.mubr.msk.bf16.mxu0 %vm718_vm3, %v5938_v7 }
 0x15d   : > { %4602 = vmatmul.mubr.msk.bf16.gmra.mrb[24].mxu0 %vm718_vm3, %v5944_v25 }
 0x15e   : > { %4605 = vmatprep.mubr.msk.bf16.mxu0 %vm718_vm3, %v5961_v14 }
 0x165   : > { %4606 = vmatmul.mubr.msk.bf16.gmra.mrb[28].mxu0 %vm718_vm3, %v4031_v55 }
 0x1ba   : > { %v4409_v28 = vpop.f32.mrb[0].mxu1 }
 0x1bb   : > { %v1696_v20 = vpop.f32.mrb[1].mxu1 }
 0x1bc   : > { %v4410_v37 = vpop.f32.mrb[2].mxu1 }
 0x1bd   : > { %v1699_v15 = vpop.f32.mrb[3].mxu1 }
 0x1c2   : > { %v4413_v22 = vpop.f32.mrb[4].mxu1 }
 0x1c3   : > { %v1712_v8 = vpop.f32.mrb[5].mxu1 }
 0x1c4   : > { %v4414_v50 = vpop.f32.mrb[6].mxu1 }
 0x1c5   : > { %v1715_v19 = vpop.f32.mrb[7].mxu1 }
 0x1ca   : > { %v6196_v7 = vpop.f32.mrb[8].mxu1 }
 0x1cb   : > { %v6198_v25 = vpop.f32.mrb[9].mxu1 }
 0x1cc   : > { %v6200_v26 = vpop.f32.mrb[10].mxu1 }
 0x1cd   : > { %v6202_v14 = vpop.f32.mrb[11].mxu1 }
 0x1d2   : > { %v6204_v17 = vpop.f32.mrb[12].mxu1 }
 0x1d3   : > { %v6206_v42 = vpop.f32.mrb[13].mxu1 }
 0x1d4   : > { %v6208_v1 = vpop.f32.mrb[14].mxu1 }
 0x1d5   : > { %v6210_v13 = vpop.f32.mrb[15].mxu1 }
 0x1da   : > { %v6212_v53 = vpop.f32.mrb[16].mxu1 }
 0x1db   : > { %v6214_v57 = vpop.f32.mrb[17].mxu1 }
 0x1dc   : > { %v6216_v27 = vpop.f32.mrb[18].mxu1 }
 0x1dd   : > { %v6218_v60 = vpop.f32.mrb[19].mxu1 }
 0x1e2   : > { %v6220_v34 = vpop.f32.mrb[20].mxu1 }
 0x1e3   : > { %v6222_v33 = vpop.f32.mrb[21].mxu1 }
 0x1e4   : > { %v6224_v43 = vpop.f32.mrb[22].mxu1 }
 0x1e5   : > { %v6226_v40 = vpop.f32.mrb[23].mxu1 }
 0x1ea   : > { %v6228_v23 = vpop.f32.mrb[24].mxu1 }
 0x1eb   : > { %v6230_v54 = vpop.f32.mrb[25].mxu1 }
 0x1ec   : > { %v6232_v38 = vpop.f32.mrb[26].mxu1 }
 0x1ed   : > { %v6234_v39 = vpop.f32.mrb[27].mxu1 }
 0x1f2   : > { %v6236_v30 = vpop.f32.mrb[28].mxu1 }
 0x1f3   : > { %v6238_v52 = vpop.f32.mrb[29].mxu1 }
 0x1f4   : > { %v6240_v9 = vpop.f32.mrb[30].mxu1 }
 0x1f5   : > { %v6242_v10 = vpop.f32.mrb[31].mxu1 }
 0x200   : > { %v4579_v16 = vpop.f32.mrb[0].mxu0 }
 0x201   : > { %v4643_v31 = vadd.f32 %v4579_v16, %v4409_v28  ;;  %v2782_v12 = vpop.f32.mrb[1].mxu0 }
 0x202   : > { %v4644_v47 = vadd.f32 %v2782_v12, %v1696_v20  ;;  %v4580_v18 = vpop.f32.mrb[2].mxu0 }
 0x203   : > { %v6250_v0 = vadd.f32 %v4643_v31, %v6247_v29  ;;  %v4645_v41 = vadd.f32 %v4580_v18, %v4410_v37  ;;  %v2785_v56 = vpop.f32.mrb[3].mxu0 }
 0x204   : > { %v6253_v51 = vadd.f32 %v4644_v47, %v6247_v29  ;;  %v4646_v49 = vadd.f32 %v2785_v56, %v1699_v15 }
 0x205   : > { %v2982_v44 = vsub.f32 0.0, %v6250_v0  ;;  %v6257_v36 = vadd.f32 %v4645_v41, %v6247_v29 }
 0x206   : > { %v2980_v5 = vsub.f32 0.0, %v6253_v51  ;;  %v6261_v32 = vadd.f32 %v4646_v49, %v6247_v29 }
 0x207   : > { %v3016_v46 = vmul.f32 1.442695, %v2982_v44  ;;  %v2983_v21 = vsub.f32 0.0, %v6257_v36 }
 0x208   : > { %v3012_v59 = vmul.f32 1.442695, %v2980_v5  ;;  %v2981_v58 = vsub.f32 0.0, %v6261_v32  ;;  %v4583_v61 = vpop.f32.mrb[4].mxu0 }
 0x209   : > { %4936 = vpow2.f32 %v3016_v46  ;;  %v3018_v24 = vmul.f32 1.442695, %v2983_v21  ;;  %v4647_v3 = vadd.f32 %v4583_v61, %v4413_v22  ;;  %v2798_v45 = vpop.f32.mrb[5].mxu0 }
 0x20a   : > { %4938 = vpow2.f32 %v3012_v59  ;;  %v3014_v35 = vmul.f32 1.442695, %v2981_v58  ;;  %v4648_v2 = vadd.f32 %v2798_v45, %v1712_v8  ;;  %v4584_v62 = vpop.f32.mrb[6].mxu0 }
 0x20b   : > { %4940 = vpow2.f32 %v3018_v24  ;;  %v6266_v4 = vadd.f32 %v4647_v3, %v6247_v29  ;;  %v4649_v63 = vadd.f32 %v4584_v62, %v4414_v50  ;;  %v2801_v48 = vpop.f32.mrb[7].mxu0 }
 0x20c   : > { %4942 = vpow2.f32 %v3014_v35  ;;  %v6269_v55 = vadd.f32 %v4648_v2, %v6247_v29  ;;  %v4650_v6 = vadd.f32 %v2801_v48, %v1715_v19 }
 0x20d   : > { %v2986_v11 = vsub.f32 0.0, %v6266_v4  ;;  %v6273_v28 = vadd.f32 %v4649_v63, %v6247_v29 }
 0x20e   : > { %v2984_v20 = vsub.f32 0.0, %v6269_v55  ;;  %v6277_v37 = vadd.f32 %v4650_v6, %v6247_v29 }
 0x20f   : > { %v3024_v15 = vmul.f32 1.442695, %v2986_v11  ;;  %v2987_v22 = vsub.f32 0.0, %v6273_v28 }
 0x210   : > { %v3020_v8 = vmul.f32 1.442695, %v2984_v20  ;;  %v2985_v50 = vsub.f32 0.0, %v6277_v37  ;;  %v4587_v16 = vpop.f32.mrb[8].mxu0 }
 0x211   : > { %4944 = vpow2.f32 %v3024_v15  ;;  %v3026_v31 = vmul.f32 1.442695, %v2987_v22  ;;  %v4651_v19 = vadd.f32 %v4587_v16, %v6196_v7  ;;  %v2814_v12 = vpop.f32.mrb[9].mxu0 }
 0x212   : > { %4946 = vpow2.f32 %v3020_v8  ;;  %v3022_v47 = vmul.f32 1.442695, %v2985_v50  ;;  %v4652_v18 = vadd.f32 %v2814_v12, %v6198_v25  ;;  %v4588_v41 = vpop.f32.mrb[10].mxu0 }
 0x213   : > { %v4937_v56 = vpop.eup %4936  ;;  %4948 = vpow2.f32 %v3026_v31  ;;  %v6284_v49 = vadd.f32 %v4651_v19, %v6247_v29  ;;  %v4653_v44 = vadd.f32 %v4588_v41, %v6200_v26  ;;  %v2817_v5 = vpop.f32.mrb[11].mxu0 }
 0x214   : > { %v4939_v46 = vpop.eup %4938  ;;  %v3078_v21 = vadd.f32 1.0, %v4937_v56  ;;  %4950 = vpow2.f32 %v3022_v47  ;;  %v6288_v59 = vadd.f32 %v4652_v18, %v6247_v29  ;;  %v4654_v7 = vadd.f32 %v2817_v5, %v6202_v14 }
 0x215   : > { %v4941_v58 = vpop.eup %4940  ;;  %v3076_v61 = vadd.f32 1.0, %v4939_v46  ;;  %v2990_v25 = vsub.f32 0.0, %v6284_v49  ;;  %v6293_v24 = vadd.f32 %v4653_v44, %v6247_v29 }
 0x216   : > { %v4943_v3 = vpop.eup %4942  ;;  %4952 = vrcp.f32 %v3078_v21  ;;  %v3079_v45 = vadd.f32 1.0, %v4941_v58  ;;  %v2988_v26 = vsub.f32 0.0, %v6288_v59  ;;  %v6297_v35 = vadd.f32 %v4654_v7, %v6247_v29 }
 0x217   : > { %4954 = vrcp.f32 %v3076_v61  ;;  %v3077_v2 = vadd.f32 1.0, %v4943_v3  ;;  %v3032_v62 = vmul.f32 1.442695, %v2990_v25  ;;  %v2991_v14 = vsub.f32 0.0, %v6293_v24 }
 0x218   : > { %4956 = vrcp.f32 %v3079_v45  ;;  %v3028_v63 = vmul.f32 1.442695, %v2988_v26  ;;  %v2989_v48 = vsub.f32 0.0, %v6297_v35  ;;  %v4591_v6 = vpop.f32.mrb[12].mxu0 }
 0x219   : > { %4958 = vrcp.f32 %v3077_v2  ;;  %v3034_v11 = vmul.f32 1.442695, %v2991_v14  ;;  %v4655_v20 = vadd.f32 %v4591_v6, %v6204_v17  ;;  %v2830_v15 = vpop.f32.mrb[13].mxu0 }
 0x21a   : > { %4960 = vpow2.f32 %v3032_v62  ;;  %v3030_v22 = vmul.f32 1.442695, %v2989_v48  ;;  %v4656_v8 = vadd.f32 %v2830_v15, %v6206_v42  ;;  %v4592_v50 = vpop.f32.mrb[14].mxu0 }
 0x21b   : > { %v4945_v16 = vpop.eup %4944  ;;  %4962 = vpow2.f32 %v3028_v63  ;;  %v6304_v31 = vadd.f32 %v4655_v20, %v6247_v29  ;;  %v4657_v19 = vadd.f32 %v4592_v50, %v6208_v1  ;;  %v2833_v12 = vpop.f32.mrb[15].mxu0 }
 0x21c   : > { %v4947_v47 = vpop.eup %4946  ;;  %v3082_v18 = vadd.f32 1.0, %v4945_v16  ;;  %4964 = vpow2.f32 %v3034_v11  ;;  %v6308_v41 = vadd.f32 %v4656_v8, %v6247_v29  ;;  %v4658_v17 = vadd.f32 %v2833_v12, %v6210_v13 }
 0x21d   : > { %v4949_v56 = vpop.eup %4948  ;;  %v3080_v44 = vadd.f32 1.0, %v4947_v47  ;;  %4966 = vpow2.f32 %v3030_v22  ;;  %v2994_v42 = vsub.f32 0.0, %v6304_v31  ;;  %v6313_v5 = vadd.f32 %v4657_v19, %v6247_v29 }
 0x21e   : > { %v4951_v46 = vpop.eup %4950  ;;  %4968 = vrcp.f32 %v3082_v18  ;;  %v3083_v1 = vadd.f32 1.0, %v4949_v56  ;;  %v2992_v21 = vsub.f32 0.0, %v6308_v41  ;;  %v6317_v7 = vadd.f32 %v4658_v17, %v6247_v29 }
 0x21f   : > { %4970 = vrcp.f32 %v3080_v44  ;;  %v3081_v58 = vadd.f32 1.0, %v4951_v46  ;;  %v3040_v61 = vmul.f32 1.442695, %v2994_v42  ;;  %v2995_v13 = vsub.f32 0.0, %v6313_v5 }
 0x220   : > { %v4953_v25 = vpop.eup %4952  ;;  %4972 = vrcp.f32 %v3083_v1  ;;  %v3036_v3 = vmul.f32 1.442695, %v2992_v21  ;;  %v2993_v45 = vsub.f32 0.0, %v6317_v7  ;;  %v4595_v26 = vpop.f32.mrb[16].mxu0 }
 0x221   : > { %v4955_v2 = vpop.eup %4954  ;;  %v3142_v62 = vmul.f32 %v4953_v25, %v6250_v0  ;;  %4974 = vrcp.f32 %v3081_v58  ;;  %v3042_v14 = vmul.f32 1.442695, %v2995_v13  ;;  %v4659_v63 = vadd.f32 %v4595_v26, %v6212_v53  ;;  %v2846_v48 = vpop.f32.mrb[17].mxu0 }
 0x222   : > { %v4957_v6 = vpop.eup %4956  ;;  %v3140_v11 = vmul.f32 %v4955_v2, %v6253_v51  ;;  %4976 = vpow2.f32 %v3040_v61  ;;  %v3038_v20 = vmul.f32 1.442695, %v2993_v45  ;;  %v4660_v15 = vadd.f32 %v2846_v48, %v6214_v57  ;;  %v4596_v22 = vpop.f32.mrb[18].mxu0 }
 0x223   : > { %v4959_v8 = vpop.eup %4958  ;;  %v3143_v50 = vmul.f32 %v4957_v6, %v6257_v36  ;;  %4978 = vpow2.f32 %v3036_v3  ;;  %v6327_v16 = vadd.f32 %v4659_v63, %v6247_v29  ;;  %v4661_v0 = vadd.f32 %v4596_v22, %v6216_v27  ;;  %v2849_v19 = vpop.f32.mrb[19].mxu0 }
 0x224   : > { %v4961_v53 = vpop.eup %4960  ;;  %v3141_v12 = vmul.f32 %v4959_v8, %v6261_v32  ;;  %4980 = vpow2.f32 %v3042_v14  ;;  %v6332_v51 = vadd.f32 %v4660_v15, %v6247_v29  ;;  %v4662_v57 = vadd.f32 %v2849_v19, %v6218_v60 }
 0x225   : > { %v4963_v47 = vpop.eup %4962  ;;  %v3173_v18 = vpack.c.bf16 %v3143_v50, %v3142_v62  ;;  %v3086_v17 = vadd.f32 1.0, %v4961_v53  ;;  %4982 = vpow2.f32 %v3038_v20  ;;  %v2998_v36 = vsub.f32 0.0, %v6327_v16 }
 0x226   : > { %v4965_v56 = vpop.eup %4964  ;;  %v3172_v44 = vpack.c.bf16 %v3141_v12, %v3140_v11  ;;  %v3084_v42 = vadd.f32 1.0, %v4963_v47  ;;  %v2996_v27 = vsub.f32 0.0, %v6332_v51  ;;  %v6338_v46 = vadd.f32 %v4661_v0, %v6247_v29 }
 0x227   : > { %v4967_v32 = vpop.eup %4966  ;;  %4984 = vrcp.f32 %v3086_v17  ;;  %v3087_v1 = vadd.f32 1.0, %v4965_v56  ;;  %v3048_v21 = vmul.f32 1.442695, %v2998_v36  ;;  %v6341_v60 = vadd.f32 %v4662_v57, %v6247_v29 }
 0x228   : > { %v4969_v58 = vpop.eup %4968  ;;  %4986 = vrcp.f32 %v3084_v42  ;;  %v3085_v61 = vadd.f32 1.0, %v4967_v32  ;;  %v3044_v13 = vmul.f32 1.442695, %v2996_v27  ;;  %v2999_v25 = vsub.f32 0.0, %v6338_v46  ;;  %v4599_v3 = vpop.f32.mrb[20].mxu0  ;;  %4611 = vmatprep.mubr.msk.bf16.mxu1 %vm718_vm3, %v3172_v44 }
 0x229   : > { %v4971_v45 = vpop.eup %4970  ;;  %v3146_v26 = vmul.f32 %v4969_v58, %v6266_v4  ;;  %4988 = vrcp.f32 %v3087_v1  ;;  %v2997_v2 = vsub.f32 0.0, %v6341_v60  ;;  %v4663_v62 = vadd.f32 %v4599_v3, %v6220_v34  ;;  %v2862_v14 = vpop.f32.mrb[21].mxu0  ;;  %4612 = vmatmul.mubr.msk.bf16.vlgmr.msra.gmra.mrb[32].mxu1 %vm718_vm3, %v3173_v18 }
 0x22a   : > { %v4973_v63 = vpop.eup %4972  ;;  %v3144_v48 = vmul.f32 %v4971_v45, %v6269_v55  ;;  %4990 = vrcp.f32 %v3085_v61  ;;  %v3050_v6 = vmul.f32 1.442695, %v2999_v25  ;;  %v4664_v11 = vadd.f32 %v2862_v14, %v6222_v33  ;;  %v4600_v20 = vpop.f32.mrb[22].mxu0 }
 0x22b   : > { %v4975_v15 = vpop.eup %4974  ;;  %v3147_v22 = vmul.f32 %v4973_v63, %v6273_v28  ;;  %4992 = vpow2.f32 %v3048_v21  ;;  %v3046_v4 = vmul.f32 1.442695, %v2997_v2  ;;  %v6353_v8 = vadd.f32 %v4663_v62, %v6247_v29  ;;  %v2865_v34 = vpop.f32.mrb[23].mxu0 }
 0x22c   : > { %v4977_v50 = vpop.eup %4976  ;;  %v3145_v0 = vmul.f32 %v4975_v15, %v6277_v37  ;;  %4994 = vpow2.f32 %v3044_v13  ;;  %v6357_v55 = vadd.f32 %v4664_v11, %v6247_v29  ;;  %v4665_v19 = vadd.f32 %v4600_v20, %v6224_v43 }
 0x22d   : > { %v4979_v33 = vpop.eup %4978  ;;  %v3175_v53 = vpack.c.bf16 %v3147_v22, %v3146_v26  ;;  %v3090_v12 = vadd.f32 1.0, %v4977_v50  ;;  %4996 = vpow2.f32 %v3050_v6  ;;  %v3002_v28 = vsub.f32 0.0, %v6353_v8 }
 0x22e   : > { %v4981_v57 = vpop.eup %4980  ;;  %v3174_v47 = vpack.c.bf16 %v3145_v0, %v3144_v48  ;;  %v3088_v18 = vadd.f32 1.0, %v4979_v33  ;;  %4998 = vpow2.f32 %v3046_v4  ;;  %v3000_v17 = vsub.f32 0.0, %v6357_v55 }
 0x22f   : > { %v4983_v36 = vpop.eup %4982  ;;  %5000 = vrcp.f32 %v3090_v12  ;;  %v3091_v37 = vadd.f32 1.0, %v4981_v57  ;;  %v3056_v56 = vmul.f32 1.442695, %v3002_v28  ;;  %v6363_v44 = vadd.f32 %v4665_v19, %v6247_v29 }
 0x230   : > { %5002 = vrcp.f32 %v3088_v18  ;;  %v3089_v43 = vadd.f32 1.0, %v4983_v36  ;;  %v3052_v42 = vmul.f32 1.442695, %v3000_v17  ;;  %v4666_v27 = vadd.f32 %v2865_v34, %v6226_v40  ;;  %v4603_v32 = vpop.f32.mrb[24].mxu0  ;;  %4615 = vmatprep.mubr.msk.bf16.mxu1 %vm718_vm3, %v3174_v47 }
 0x231   : > { %v4985_v1 = vpop.eup %4984  ;;  %5004 = vrcp.f32 %v3091_v37  ;;  %v3003_v21 = vsub.f32 0.0, %v6363_v44  ;;  %v4667_v58 = vadd.f32 %v4603_v32, %v6228_v23  ;;  %v2878_v61 = vpop.f32.mrb[25].mxu0  ;;  %4616 = vmatmul.mubr.msk.bf16.gmra.mrb[36].mxu1 %vm718_vm3, %v3175_v53 }
 0x232   : > { %v4987_v13 = vpop.eup %4986  ;;  %v3150_v25 = vmul.f32 %v4985_v1, %v6284_v49  ;;  %5006 = vrcp.f32 %v3089_v43  ;;  %v6372_v3 = vadd.f32 %v4666_v27, %v6247_v29  ;;  %v4668_v40 = vadd.f32 %v2878_v61, %v6230_v54  ;;  %v4604_v45 = vpop.f32.mrb[26].mxu0 }
 0x233   : > { %v4989_v26 = vpop.eup %4988  ;;  %v3148_v2 = vmul.f32 %v4987_v13, %v6288_v59  ;;  %5008 = vpow2.f32 %v3056_v56  ;;  %v3058_v62 = vmul.f32 1.442695, %v3003_v21  ;;  %v6377_v23 = vadd.f32 %v4667_v58, %v6247_v29  ;;  %v2881_v14 = vpop.f32.mrb[27].mxu0 }
 0x234   : > { %v4991_v63 = vpop.eup %4990  ;;  %v3151_v48 = vmul.f32 %v4989_v26, %v6293_v24  ;;  %5010 = vpow2.f32 %v3052_v42  ;;  %v3001_v49 = vsub.f32 0.0, %v6372_v3  ;;  %v6382_v6 = vadd.f32 %v4668_v40, %v6247_v29 }
 0x235   : > { %v4993_v54 = vpop.eup %4992  ;;  %v3149_v11 = vmul.f32 %v4991_v63, %v6297_v35  ;;  %5012 = vpow2.f32 %v3058_v62  ;;  %v3006_v59 = vsub.f32 0.0, %v6377_v23  ;;  %v4669_v20 = vadd.f32 %v4604_v45, %v6232_v38 }
 0x236   : > { %v4995_v15 = vpop.eup %4994  ;;  %v3177_v22 = vpack.c.bf16 %v3151_v48, %v3150_v25  ;;  %v3094_v4 = vadd.f32 1.0, %v4993_v54  ;;  %v3054_v34 = vmul.f32 1.442695, %v3001_v49  ;;  %v3004_v24 = vsub.f32 0.0, %v6382_v6 }
 0x237   : > { %v4997_v50 = vpop.eup %4996  ;;  %v3176_v0 = vpack.c.bf16 %v3149_v11, %v3148_v2  ;;  %v3092_v19 = vadd.f32 1.0, %v4995_v15  ;;  %v3064_v33 = vmul.f32 1.442695, %v3006_v59  ;;  %v6389_v53 = vadd.f32 %v4669_v20, %v6247_v29 }
 0x238   : > { %v4999_v12 = vpop.eup %4998  ;;  %5014 = vrcp.f32 %v3094_v4  ;;  %v3095_v35 = vadd.f32 1.0, %v4997_v50  ;;  %v3060_v28 = vmul.f32 1.442695, %v3004_v24  ;;  %v4670_v57 = vadd.f32 %v2881_v14, %v6234_v39  ;;  %v4607_v38 = vpop.f32.mrb[28].mxu0 }
 0x239   : > { %v5001_v47 = vpop.eup %5000  ;;  %5016 = vrcp.f32 %v3092_v19  ;;  %v3093_v18 = vadd.f32 1.0, %v4999_v12  ;;  %v3007_v17 = vsub.f32 0.0, %v6389_v53  ;;  %v4671_v36 = vadd.f32 %v4607_v38, %v6236_v30  ;;  %4619 = vmatprep.mubr.msk.bf16.mxu1 %vm718_vm3, %v3176_v0  ;;  %v2894_v37 = vpop.f32.mrb[29].mxu0 }
 0x23a   : > { %v5003_v56 = vpop.eup %5002  ;;  %v3154_v43 = vmul.f32 %v5001_v47, %v6304_v31  ;;  %5018 = vrcp.f32 %v3095_v35  ;;  %v6397_v42 = vadd.f32 %v4670_v57, %v6247_v29  ;;  %v4672_v39 = vadd.f32 %v2894_v37, %v6238_v52  ;;  %4620 = vmatmul.mubr.msk.bf16.gmra.mrb[40].mxu1 %vm718_vm3, %v3177_v22  ;;  %v4608_v27 = vpop.f32.mrb[30].mxu0 }
 0x23b   : > { %v5005_v32 = vpop.eup %5004  ;;  %v3152_v1 = vmul.f32 %v5003_v56, %v6308_v41  ;;  %5020 = vrcp.f32 %v3093_v18  ;;  %v3066_v30 = vmul.f32 1.442695, %v3007_v17  ;;  %v6403_v21 = vadd.f32 %v4671_v36, %v6247_v29  ;;  %v2897_v58 = vpop.f32.mrb[31].mxu0 }
 0x23c   : > { %v5007_v61 = vpop.eup %5006  ;;  %v3155_v31 = vmul.f32 %v5005_v32, %v6313_v5  ;;  %5022 = vpow2.f32 %v3054_v34  ;;  %v3005_v13 = vsub.f32 0.0, %v6397_v42  ;;  %v6408_v52 = vadd.f32 %v4672_v39, %v6247_v29 }
 0x23d   : > { %v5009_v25 = vpop.eup %5008  ;;  %v3153_v40 = vmul.f32 %v5007_v61, %v6317_v7  ;;  %5024 = vpow2.f32 %v3064_v33  ;;  %v3010_v41 = vsub.f32 0.0, %v6403_v21  ;;  %v4673_v45 = vadd.f32 %v4608_v27, %v6240_v9 }
 0x23e   : > { %v5011_v26 = vpop.eup %5010  ;;  %v3179_v2 = vpack.c.bf16 %v3155_v31, %v3154_v43  ;;  %v3098_v62 = vadd.f32 1.0, %v5009_v25  ;;  %5026 = vpow2.f32 %v3060_v28  ;;  %v3062_v63 = vmul.f32 1.442695, %v3005_v13 }
 0x23f   : > { %v5013_v14 = vpop.eup %5012  ;;  %v3178_v5 = vpack.c.bf16 %v3153_v40, %v3152_v1  ;;  %5028 = vpow2.f32 %v3066_v30  ;;  %v3072_v48 = vmul.f32 1.442695, %v3010_v41  ;;  %v3008_v54 = vsub.f32 0.0, %v6408_v52 }
 0x240   : > { %5030 = vrcp.f32 %v3098_v62  ;;  %v3099_v49 = vadd.f32 1.0, %v5013_v14  ;;  %v6415_v7 = vadd.f32 %v4673_v45, %v6247_v29  ;;  %v3096_v11 = vadd.f32 1.0, %v5011_v26 }
 0x241   : > { %v4674_v59 = vadd.f32 %v2897_v58, %v6242_v10  ;;  %4623 = vmatprep.mubr.msk.bf16.mxu1 %vm718_vm3, %v3178_v5  ;;  %v3068_v22 = vmul.f32 1.442695, %v3008_v54 }
 0x242   : > { %v5015_v9 = vpop.eup %5014  ;;  %5032 = vrcp.f32 %v3099_v49  ;;  %v3011_v20 = vsub.f32 0.0, %v6415_v7  ;;  %4624 = vmatmul.mubr.msk.bf16.gmra.mrb[44].mxu1 %vm718_vm3, %v3179_v2 }
 0x243   : > { %v5017_v15 = vpop.eup %5016  ;;  %5034 = vpow2.f32 %v3062_v63  ;;  %v6422_v4 = vadd.f32 %v4674_v59, %v6247_v29  ;;  %v3158_v10 = vmul.f32 %v5015_v9, %v6327_v16 }
 0x244   : > { %v5019_v34 = vpop.eup %5018  ;;  %5036 = vpow2.f32 %v3072_v48  ;;  %v3074_v24 = vmul.f32 1.442695, %v3011_v20  ;;  %v3156_v12 = vmul.f32 %v5017_v15, %v6332_v51 }
 0x245   : > { %v5021_v50 = vpop.eup %5020  ;;  %v3159_v0 = vmul.f32 %v5019_v34, %v6338_v46  ;;  %5038 = vrcp.f32 %v3096_v11  ;;  %v3009_v19 = vsub.f32 0.0, %v6422_v4 }
 0x246   : > { %v5023_v33 = vpop.eup %5022  ;;  %v3157_v35 = vmul.f32 %v5021_v50, %v6341_v60  ;;  %5040 = vpow2.f32 %v3074_v24 }
 0x247   : > { %v5025_v28 = vpop.eup %5024  ;;  %v3181_v29 = vpack.c.bf16 %v3159_v0, %v3158_v10  ;;  %v3097_v57 = vadd.f32 1.0, %v5023_v33  ;;  %5042 = vpow2.f32 %v3068_v22  ;;  %v3070_v16 = vmul.f32 1.442695, %v3009_v19 }
 0x248   : > { %v5027_v38 = vpop.eup %5026  ;;  %v3180_v47 = vpack.c.bf16 %v3157_v35, %v3156_v12  ;;  %v3102_v18 = vadd.f32 1.0, %v5025_v28 }
 0x249   : > { %v5029_v17 = vpop.eup %5028  ;;  %5044 = vrcp.f32 %v3097_v57  ;;  %v3100_v36 = vadd.f32 1.0, %v5027_v38 }
 0x24a   : > { %v5031_v46 = vpop.eup %5030  ;;  %5046 = vrcp.f32 %v3102_v18  ;;  %v3103_v37 = vadd.f32 1.0, %v5029_v17  ;;  %4627 = vmatprep.mubr.msk.bf16.mxu1 %vm718_vm3, %v3180_v47 }
 0x24b   : > { %4628 = vmatmul.mubr.msk.bf16.gmra.mrb[48].mxu1 %vm718_vm3, %v3181_v29  ;;  %v3162_v56 = vmul.f32 %v5031_v46, %v6353_v8 }
 0x24c   : > { %v5033_v51 = vpop.eup %5032  ;;  %5048 = vrcp.f32 %v3103_v37 }
 0x24d   : > { %v5035_v60 = vpop.eup %5034  ;;  %v3163_v43 = vmul.f32 %v5033_v51, %v6363_v44  ;;  %5050 = vpow2.f32 %v3070_v16 }
 0x24e   : > { %v5037_v39 = vpop.eup %5036  ;;  %5052 = vrcp.f32 %v3100_v36  ;;  %v3101_v27 = vadd.f32 1.0, %v5035_v60 }
 0x24f   : > { %v5039_v32 = vpop.eup %5038  ;;  %v3183_v1 = vpack.c.bf16 %v3163_v43, %v3162_v56  ;;  %v3106_v30 = vadd.f32 1.0, %v5037_v39 }
 0x250   : > { %v5041_v58 = vpop.eup %5040  ;;  %5054 = vrcp.f32 %v3101_v27  ;;  %v3160_v40 = vmul.f32 %v5039_v32, %v6357_v55 }
 0x251   : > { %v5043_v61 = vpop.eup %5042  ;;  %5056 = vrcp.f32 %v3106_v30  ;;  %v3107_v31 = vadd.f32 1.0, %v5041_v58 }
 0x252   : > { %v3104_v44 = vadd.f32 1.0, %v5043_v61 }
 0x253   : > { %v5045_v13 = vpop.eup %5044  ;;  %5058 = vrcp.f32 %v3107_v31 }
 0x254   : > { %v5047_v25 = vpop.eup %5046  ;;  %v3161_v8 = vmul.f32 %v5045_v13, %v6372_v3  ;;  %5060 = vrcp.f32 %v3104_v44 }
 0x255   : > { %v3166_v2 = vmul.f32 %v5047_v25, %v6377_v23 }
 0x256   : > { %v5049_v41 = vpop.eup %5048  ;;  %v3182_v45 = vpack.c.bf16 %v3161_v8, %v3160_v40 }
 0x257   : > { %v5051_v26 = vpop.eup %5050  ;;  %v3167_v62 = vmul.f32 %v5049_v41, %v6389_v53 }
 0x258   : > { %v5053_v14 = vpop.eup %5052  ;;  %v3105_v5 = vadd.f32 1.0, %v5051_v26  ;;  %4631 = vmatprep.mubr.msk.bf16.mxu1 %vm718_vm3, %v3182_v45 }
 0x259   : > { %v3185_v63 = vpack.c.bf16 %v3167_v62, %v3166_v2  ;;  %4632 = vmatmul.mubr.msk.bf16.gmra.mrb[52].mxu1 %vm718_vm3, %v3183_v1  ;;  %v3164_v3 = vmul.f32 %v5053_v14, %v6382_v6 }
 0x25a   : > { %v5055_v48 = vpop.eup %5054  ;;  %5062 = vrcp.f32 %v3105_v5 }
 0x25b   : > { %v5057_v55 = vpop.eup %5056  ;;  %v3165_v49 = vmul.f32 %v5055_v48, %v6397_v42  ;;  %v6452_v42 = vld [vmem:[%s6691_s4] ss:$0 sm:$0xff] }
 0x25c   : > { %v3170_v23 = vmul.f32 %v5057_v55, %v6403_v21 }
 0x25d   : > { %v5059_v54 = vpop.eup %5058  ;;  %v3184_v11 = vpack.c.bf16 %v3165_v49, %v3164_v3 }
 0x25e   : > { %v3171_v53 = vmul.f32 %v5059_v54, %v6415_v7  ;;  %v5061_v9 = vpop.eup %5060 }
 0x25f   : > { %4635 = vmatprep.mubr.msk.bf16.mxu1 %vm718_vm3, %v3184_v11  ;;  %v3168_v15 = vmul.f32 %v5061_v9, %v6408_v52 }
 0x260   : > { %v3187_v59 = vpack.c.bf16 %v3171_v53, %v3170_v23 }
 0x261   : > { %4636 = vmatmul.mubr.msk.bf16.gmra.mrb[56].mxu1 %vm718_vm3, %v3185_v63 }
 0x264   : > { %v5063_v20 = vpop.eup %5062 }
 0x265   : > { %v3169_v22 = vmul.f32 %v5063_v20, %v6422_v4 }
 0x267   : > { %v3186_v6 = vpack.c.bf16 %v3169_v22, %v3168_v15 }
 0x269   : > { %4639 = vmatprep.mubr.msk.bf16.mxu1 %vm718_vm3, %v3186_v6 }
 0x26a   : > { %4640 = vmatmul.mubr.msk.bf16.gmra.mrb[60].mxu1 %vm718_vm3, %v3187_v59 }
 0x2fc   : > { %v4613_v21 = vpop.f32.mrb[32].mxu1 }
 0x2fd   : > { %v6455_v7 = vadd.f32 %v4613_v21, %v6452_v42  ;;  %v3281_v34 = vpop.f32.mrb[33].mxu1 }
 0x2fe   : > { %v6458_v24 = vadd.f32 %v6452_v42, %v3281_v34  ;;  %v4614_v52 = vpop.f32.mrb[34].mxu1 }
 0x2ff   : > { %v3410_v4 = vsub.f32 0.0, %v6455_v7  ;;  %v6462_v50 = vadd.f32 %v4614_v52, %v6452_v42  ;;  %v3284_v10 = vpop.f32.mrb[35].mxu1 }
 0x300   : > { %v3408_v0 = vsub.f32 0.0, %v6458_v24  ;;  %v6466_v19 = vadd.f32 %v6452_v42, %v3284_v10 }
 0x301   : > { %v3444_v33 = vmul.f32 1.442695, %v3410_v4  ;;  %v3411_v12 = vsub.f32 0.0, %v6462_v50 }
 0x302   : > { %v3440_v35 = vmul.f32 1.442695, %v3408_v0  ;;  %v3409_v28 = vsub.f32 0.0, %v6466_v19 }
 0x303   : > { %5064 = vpow2.f32 %v3444_v33  ;;  %v3446_v29 = vmul.f32 1.442695, %v3411_v12 }
 0x304   : > { %5066 = vpow2.f32 %v3440_v35  ;;  %v3442_v57 = vmul.f32 1.442695, %v3409_v28  ;;  %v4617_v38 = vpop.f32.mrb[36].mxu1 }
 0x305   : > { %5068 = vpow2.f32 %v3446_v29  ;;  %v6471_v47 = vadd.f32 %v4617_v38, %v6452_v42  ;;  %v3297_v18 = vpop.f32.mrb[37].mxu1 }
 0x306   : > { %5070 = vpow2.f32 %v3442_v57  ;;  %v6474_v17 = vadd.f32 %v6452_v42, %v3297_v18  ;;  %v4618_v16 = vpop.f32.mrb[38].mxu1 }
 0x307   : > { %v3414_v46 = vsub.f32 0.0, %v6471_v47  ;;  %v6478_v36 = vadd.f32 %v4618_v16, %v6452_v42  ;;  %v3300_v37 = vpop.f32.mrb[39].mxu1 }
 0x308   : > { %v3412_v51 = vsub.f32 0.0, %v6474_v17  ;;  %v6482_v60 = vadd.f32 %v6452_v42, %v3300_v37 }
 0x309   : > { %v3452_v56 = vmul.f32 1.442695, %v3414_v46  ;;  %v3415_v43 = vsub.f32 0.0, %v6478_v36 }
 0x30a   : > { %v3448_v39 = vmul.f32 1.442695, %v3412_v51  ;;  %v3413_v27 = vsub.f32 0.0, %v6482_v60 }
 0x30b   : > { %5072 = vpow2.f32 %v3452_v56  ;;  %v3454_v32 = vmul.f32 1.442695, %v3415_v43 }
 0x30c   : > { %5074 = vpow2.f32 %v3448_v39  ;;  %v3450_v1 = vmul.f32 1.442695, %v3413_v27 }
 0x30d   : > { %v5065_v30 = vpop.eup %5064  ;;  %5076 = vpow2.f32 %v3454_v32  ;;  %v4621_v58 = vpop.f32.mrb[40].mxu1 }
 0x30e   : > { %v5067_v61 = vpop.eup %5066  ;;  %v3506_v31 = vadd.f32 1.0, %v5065_v30  ;;  %5078 = vpow2.f32 %v3450_v1  ;;  %v6487_v13 = vadd.f32 %v4621_v58, %v6452_v42  ;;  %v3313_v25 = vpop.f32.mrb[41].mxu1 }
 0x30f   : > { %v5069_v40 = vpop.eup %5068  ;;  %v3504_v8 = vadd.f32 1.0, %v5067_v61  ;;  %v6490_v44 = vadd.f32 %v6452_v42, %v3313_v25  ;;  %v4622_v41 = vpop.f32.mrb[42].mxu1 }
 0x310   : > { %v5071_v45 = vpop.eup %5070  ;;  %5080 = vrcp.f32 %v3506_v31  ;;  %v3507_v26 = vadd.f32 1.0, %v5069_v40  ;;  %v3418_v2 = vsub.f32 0.0, %v6487_v13  ;;  %v6494_v62 = vadd.f32 %v4622_v41, %v6452_v42  ;;  %v3316_v14 = vpop.f32.mrb[43].mxu1 }
 0x311   : > { %5082 = vrcp.f32 %v3504_v8  ;;  %v3505_v5 = vadd.f32 1.0, %v5071_v45  ;;  %v3416_v63 = vsub.f32 0.0, %v6490_v44  ;;  %v6498_v48 = vadd.f32 %v6452_v42, %v3316_v14 }
 0x312   : > { %5084 = vrcp.f32 %v3507_v26  ;;  %v3460_v55 = vmul.f32 1.442695, %v3418_v2  ;;  %v3419_v3 = vsub.f32 0.0, %v6494_v62 }
 0x313   : > { %5086 = vrcp.f32 %v3505_v5  ;;  %v3456_v49 = vmul.f32 1.442695, %v3416_v63  ;;  %v3417_v54 = vsub.f32 0.0, %v6498_v48 }
 0x314   : > { %5088 = vpow2.f32 %v3460_v55  ;;  %v3462_v11 = vmul.f32 1.442695, %v3419_v3 }
 0x315   : > { %v5073_v23 = vpop.eup %5072  ;;  %5090 = vpow2.f32 %v3456_v49  ;;  %v3458_v53 = vmul.f32 1.442695, %v3417_v54  ;;  %v4625_v59 = vpop.f32.mrb[44].mxu1 }
 0x316   : > { %v5075_v9 = vpop.eup %5074  ;;  %v3510_v20 = vadd.f32 1.0, %v5073_v23  ;;  %5092 = vpow2.f32 %v3462_v11  ;;  %v6503_v15 = vadd.f32 %v4625_v59, %v6452_v42  ;;  %v3329_v22 = vpop.f32.mrb[45].mxu1 }
 0x317   : > { %v5077_v6 = vpop.eup %5076  ;;  %v3508_v21 = vadd.f32 1.0, %v5075_v9  ;;  %5094 = vpow2.f32 %v3458_v53  ;;  %v6506_v34 = vadd.f32 %v6452_v42, %v3329_v22  ;;  %v4626_v52 = vpop.f32.mrb[46].mxu1 }
 0x318   : > { %v5079_v4 = vpop.eup %5078  ;;  %5096 = vrcp.f32 %v3510_v20  ;;  %v3511_v10 = vadd.f32 1.0, %v5077_v6  ;;  %v3422_v0 = vsub.f32 0.0, %v6503_v15  ;;  %v6510_v33 = vadd.f32 %v4626_v52, %v6452_v42  ;;  %v3332_v12 = vpop.f32.mrb[47].mxu1 }
 0x319   : > { %5098 = vrcp.f32 %v3508_v21  ;;  %v3509_v35 = vadd.f32 1.0, %v5079_v4  ;;  %v3420_v28 = vsub.f32 0.0, %v6506_v34  ;;  %v6515_v29 = vadd.f32 %v6452_v42, %v3332_v12 }
 0x31a   : > { %v5081_v57 = vpop.eup %5080  ;;  %5100 = vrcp.f32 %v3511_v10  ;;  %v3468_v38 = vmul.f32 1.442695, %v3422_v0  ;;  %v3423_v18 = vsub.f32 0.0, %v6510_v33 }
 0x31b   : > { %v5083_v16 = vpop.eup %5082  ;;  %v3570_v46 = vmul.f32 %v5081_v57, %v6455_v7  ;;  %5102 = vrcp.f32 %v3509_v35  ;;  %v3464_v37 = vmul.f32 1.442695, %v3420_v28  ;;  %v3421_v51 = vsub.f32 0.0, %v6515_v29 }
 0x31c   : > { %v5085_v56 = vpop.eup %5084  ;;  %v3568_v43 = vmul.f32 %v5083_v16, %v6458_v24  ;;  %5104 = vpow2.f32 %v3468_v38  ;;  %v3470_v39 = vmul.f32 1.442695, %v3423_v18 }
 0x31d   : > { %v5087_v27 = vpop.eup %5086  ;;  %v4103_v32 = vpack.c.bf16 %v3570_v46, %v3570_v46  ;;  %v3571_v7 = vmul.f32 %v5085_v56, %v6462_v50  ;;  %5106 = vpow2.f32 %v3464_v37  ;;  %v3466_v1 = vmul.f32 1.442695, %v3421_v51 }
 0x31e   : > { %v5089_v30 = vpop.eup %5088  ;;  %v4101_v58 = vpack.c.bf16 %v3568_v43, %v3568_v43  ;;  %v3569_v61 = vmul.f32 %v5087_v27, %v6466_v19  ;;  %5108 = vpow2.f32 %v3470_v39  ;;  %v4629_v31 = vpop.f32.mrb[48].mxu1 }
 0x31f   : > { %v5091_v25 = vpop.eup %5090  ;;  %3731 = vst.msk [vmem:[%s6523_s27 + $0x8] sm:$0xf] %vm3728_vm8, %v4103_v32  ;;  %v4104_v24 = vpack.c.bf16 %v3571_v7, %v3571_v7  ;;  %v3514_v40 = vadd.f32 1.0, %v5089_v30  ;;  %5110 = vpow2.f32 %v3466_v1  ;;  %v6531_v8 = vadd.f32 %v4629_v31, %v6452_v42  ;;  %v3345_v50 = vpop.f32.mrb[49].mxu1 }
 0x320   : > { %v5093_v41 = vpop.eup %5092  ;;  %3729 = vst.msk [vmem:[%s6523_s27] sm:$0xf] %vm3728_vm8, %v4101_v58  ;;  %v4102_v45 = vpack.c.bf16 %v3569_v61, %v3569_v61  ;;  %v3512_v26 = vadd.f32 1.0, %v5091_v25  ;;  %v6536_v19 = vadd.f32 %v6452_v42, %v3345_v50  ;;  %v4630_v2 = vpop.f32.mrb[50].mxu1 }
 0x321   : > { %v5095_v14 = vpop.eup %5094  ;;  %3732 = vst.msk [vmem:[%s6523_s27 + $0xc] sm:$0xf] %vm3728_vm8, %v4104_v24  ;;  %5112 = vrcp.f32 %v3514_v40  ;;  %v3515_v5 = vadd.f32 1.0, %v5093_v41  ;;  %v3426_v63 = vsub.f32 0.0, %v6531_v8  ;;  %v6542_v55 = vadd.f32 %v4630_v2, %v6452_v42  ;;  %v3348_v3 = vpop.f32.mrb[51].mxu1 }
 0x322   : > { %v5097_v49 = vpop.eup %5096  ;;  %3730 = vst.msk [vmem:[%s6523_s27 + $0x4] sm:$0xf] %vm3728_vm8, %v4102_v45  ;;  %5114 = vrcp.f32 %v3512_v26  ;;  %v3513_v54 = vadd.f32 1.0, %v5095_v14  ;;  %v3424_v11 = vsub.f32 0.0, %v6536_v19  ;;  %v6548_v23 = vadd.f32 %v6452_v42, %v3348_v3 }
 0x323   : > { %v5099_v53 = vpop.eup %5098  ;;  %v3574_v59 = vmul.f32 %v5097_v49, %v6471_v47  ;;  %5116 = vrcp.f32 %v3515_v5  ;;  %v3476_v9 = vmul.f32 1.442695, %v3426_v63  ;;  %v3427_v20 = vsub.f32 0.0, %v6542_v55 }
 0x324   : > { %v5101_v22 = vpop.eup %5100  ;;  %v3572_v6 = vmul.f32 %v5099_v53, %v6474_v17  ;;  %5118 = vrcp.f32 %v3513_v54  ;;  %v3472_v21 = vmul.f32 1.442695, %v3424_v11  ;;  %v3425_v52 = vsub.f32 0.0, %v6548_v23 }
 0x325   : > { %v5103_v4 = vpop.eup %5102  ;;  %v4107_v10 = vpack.c.bf16 %v3574_v59, %v3574_v59  ;;  %v3575_v0 = vmul.f32 %v5101_v22, %v6478_v36  ;;  %5120 = vpow2.f32 %v3476_v9  ;;  %v3478_v12 = vmul.f32 1.442695, %v3427_v20 }
 0x326   : > { %v5105_v47 = vpop.eup %5104  ;;  %v4105_v35 = vpack.c.bf16 %v3572_v6, %v3572_v6  ;;  %v3573_v28 = vmul.f32 %v5103_v4, %v6482_v60  ;;  %5122 = vpow2.f32 %v3472_v21  ;;  %v3474_v57 = vmul.f32 1.442695, %v3425_v52 }
 0x327   : > { %v5107_v17 = vpop.eup %5106  ;;  %3735 = vst.msk [vmem:[%s6523_s27 + $0x18] sm:$0xf] %vm3728_vm8, %v4107_v10  ;;  %v4108_v38 = vpack.c.bf16 %v3575_v0, %v3575_v0  ;;  %v3518_v18 = vadd.f32 1.0, %v5105_v47  ;;  %5124 = vpow2.f32 %v3478_v12 }
 0x328   : > { %v5109_v16 = vpop.eup %5108  ;;  %3733 = vst.msk [vmem:[%s6523_s27 + $0x10] sm:$0xf] %vm3728_vm8, %v4105_v35  ;;  %v4106_v36 = vpack.c.bf16 %v3573_v28, %v3573_v28  ;;  %v3516_v46 = vadd.f32 1.0, %v5107_v17  ;;  %5126 = vpow2.f32 %v3474_v57 }
 0x329   : > { %v5111_v37 = vpop.eup %5110  ;;  %3736 = vst.msk [vmem:[%s6523_s27 + $0x1c] sm:$0xf] %vm3728_vm8, %v4108_v38  ;;  %5128 = vrcp.f32 %v3518_v18  ;;  %v3519_v60 = vadd.f32 1.0, %v5109_v16 }
 0x32a   : > { %3734 = vst.msk [vmem:[%s6523_s27 + $0x14] sm:$0xf] %vm3728_vm8, %v4106_v36  ;;  %5130 = vrcp.f32 %v3516_v46  ;;  %v3517_v51 = vadd.f32 1.0, %v5111_v37 }
 0x32b   : > { %v5113_v56 = vpop.eup %5112  ;;  %5132 = vrcp.f32 %v3519_v60 }
 0x32c   : > { %v5115_v43 = vpop.eup %5114  ;;  %v3578_v39 = vmul.f32 %v5113_v56, %v6487_v13  ;;  %5134 = vrcp.f32 %v3517_v51  ;;  %v4633_v27 = vpop.f32.mrb[52].mxu1 }
 0x32d   : > { %v5117_v32 = vpop.eup %5116  ;;  %v3576_v7 = vmul.f32 %v5115_v43, %v6490_v44  ;;  %v6567_v1 = vadd.f32 %v4633_v27, %v6452_v42  ;;  %v3361_v30 = vpop.f32.mrb[53].mxu1 }
 0x32e   : > { %v5119_v58 = vpop.eup %5118  ;;  %v4111_v61 = vpack.c.bf16 %v3578_v39, %v3578_v39  ;;  %v3579_v31 = vmul.f32 %v5117_v32, %v6494_v62  ;;  %v6571_v25 = vadd.f32 %v6452_v42, %v3361_v30  ;;  %v4634_v24 = vpop.f32.mrb[54].mxu1 }
 0x32f   : > { %v5121_v13 = vpop.eup %5120  ;;  %v4109_v40 = vpack.c.bf16 %v3576_v7, %v3576_v7  ;;  %v3577_v50 = vmul.f32 %v5119_v58, %v6498_v48  ;;  %v3430_v44 = vsub.f32 0.0, %v6567_v1  ;;  %v6576_v41 = vadd.f32 %v4634_v24, %v6452_v42  ;;  %v3364_v45 = vpop.f32.mrb[55].mxu1 }
 0x330   : > { %v5123_v26 = vpop.eup %5122  ;;  %3739 = vst.msk [vmem:[%s6523_s27 + $0x28] sm:$0xf] %vm3728_vm8, %v4111_v61  ;;  %v4112_v62 = vpack.c.bf16 %v3579_v31, %v3579_v31  ;;  %v3522_v2 = vadd.f32 1.0, %v5121_v13  ;;  %v3428_v14 = vsub.f32 0.0, %v6571_v25  ;;  %v6582_v5 = vadd.f32 %v6452_v42, %v3364_v45 }
 0x331   : > { %v5125_v63 = vpop.eup %5124  ;;  %3737 = vst.msk [vmem:[%s6523_s27 + $0x20] sm:$0xf] %vm3728_vm8, %v4109_v40  ;;  %v4110_v48 = vpack.c.bf16 %v3577_v50, %v3577_v50  ;;  %v3520_v3 = vadd.f32 1.0, %v5123_v26  ;;  %v3431_v49 = vsub.f32 0.0, %v6576_v41  ;;  %v3484_v53 = vmul.f32 1.442695, %v3430_v44 }
 0x332   : > { %v5127_v54 = vpop.eup %5126  ;;  %3740 = vst.msk [vmem:[%s6523_s27 + $0x2c] sm:$0xf] %vm3728_vm8, %v4112_v62  ;;  %5136 = vrcp.f32 %v3522_v2  ;;  %v3523_v11 = vadd.f32 1.0, %v5125_v63  ;;  %v3429_v59 = vsub.f32 0.0, %v6582_v5  ;;  %v3480_v22 = vmul.f32 1.442695, %v3428_v14 }
 0x333   : > { %v5129_v9 = vpop.eup %5128  ;;  %3738 = vst.msk [vmem:[%s6523_s27 + $0x24] sm:$0xf] %vm3728_vm8, %v4110_v48  ;;  %5138 = vrcp.f32 %v3520_v3  ;;  %v3521_v20 = vadd.f32 1.0, %v5127_v54  ;;  %v3486_v52 = vmul.f32 1.442695, %v3431_v49 }
 0x334   : > { %v5131_v6 = vpop.eup %5130  ;;  %v3582_v21 = vmul.f32 %v5129_v9, %v6503_v15  ;;  %5140 = vrcp.f32 %v3523_v11  ;;  %v4637_v4 = vpop.f32.mrb[56].mxu1  ;;  %v3482_v12 = vmul.f32 1.442695, %v3429_v59 }
 0x335   : > { %v5133_v10 = vpop.eup %5132  ;;  %v3580_v0 = vmul.f32 %v5131_v6, %v6506_v34  ;;  %5142 = vrcp.f32 %v3521_v20  ;;  %v6595_v47 = vadd.f32 %v4637_v4, %v6452_v42  ;;  %v3377_v35 = vpop.f32.mrb[57].mxu1 }
 0x336   : > { %v5135_v28 = vpop.eup %5134  ;;  %v4115_v57 = vpack.c.bf16 %v3582_v21, %v3582_v21  ;;  %v3583_v17 = vmul.f32 %v5133_v10, %v6510_v33  ;;  %5144 = vpow2.f32 %v3484_v53  ;;  %v6599_v15 = vadd.f32 %v6452_v42, %v3377_v35  ;;  %v4638_v38 = vpop.f32.mrb[58].mxu1 }
 0x337   : > { %v4113_v18 = vpack.c.bf16 %v3580_v0, %v3580_v0  ;;  %v3581_v34 = vmul.f32 %v5135_v28, %v6515_v29  ;;  %5146 = vpow2.f32 %v3480_v22  ;;  %v3434_v16 = vsub.f32 0.0, %v6595_v47  ;;  %v3380_v36 = vpop.f32.mrb[59].mxu1 }
 0x338   : > { %3743 = vst.msk [vmem:[%s6523_s27 + $0x38] sm:$0xf] %vm3728_vm8, %v4115_v57  ;;  %v4116_v46 = vpack.c.bf16 %v3583_v17, %v3583_v17  ;;  %5148 = vpow2.f32 %v3486_v52  ;;  %v3432_v33 = vsub.f32 0.0, %v6599_v15  ;;  %v6607_v37 = vadd.f32 %v4638_v38, %v6452_v42 }
 0x339   : > { %3741 = vst.msk [vmem:[%s6523_s27 + $0x30] sm:$0xf] %vm3728_vm8, %v4113_v18  ;;  %v4114_v60 = vpack.c.bf16 %v3581_v34, %v3581_v34  ;;  %5150 = vpow2.f32 %v3482_v12  ;;  %v3492_v51 = vmul.f32 1.442695, %v3434_v16  ;;  %v6612_v29 = vadd.f32 %v6452_v42, %v3380_v36 }
 0x33a   : > { %3744 = vst.msk [vmem:[%s6523_s27 + $0x3c] sm:$0xf] %vm3728_vm8, %v4116_v46  ;;  %v3488_v56 = vmul.f32 1.442695, %v3432_v33  ;;  %v3435_v43 = vsub.f32 0.0, %v6607_v37 }
 0x33b   : > { %3742 = vst.msk [vmem:[%s6523_s27 + $0x34] sm:$0xf] %vm3728_vm8, %v4114_v60  ;;  %5152 = vpow2.f32 %v3492_v51  ;;  %v3433_v39 = vsub.f32 0.0, %v6612_v29 }
 0x33c   : > { %v5137_v27 = vpop.eup %5136  ;;  %5154 = vpow2.f32 %v3488_v56  ;;  %v3494_v32 = vmul.f32 1.442695, %v3435_v43 }
 0x33d   : > { %v5139_v7 = vpop.eup %5138  ;;  %v3586_v30 = vmul.f32 %v5137_v27, %v6531_v8  ;;  %v3490_v58 = vmul.f32 1.442695, %v3433_v39  ;;  %v4641_v61 = vpop.f32.mrb[60].mxu1 }
 0x33e   : > { %v5141_v31 = vpop.eup %5140  ;;  %v3584_v24 = vmul.f32 %v5139_v7, %v6536_v19  ;;  %5156 = vpow2.f32 %v3494_v32  ;;  %v6623_v13 = vadd.f32 %v4641_v61, %v6452_v42  ;;  %v3393_v40 = vpop.f32.mrb[61].mxu1 }
 0x33f   : > { %v5143_v50 = vpop.eup %5142  ;;  %v4119_v44 = vpack.c.bf16 %v3586_v30, %v3586_v30  ;;  %v3587_v45 = vmul.f32 %v5141_v31, %v6542_v55  ;;  %5158 = vpow2.f32 %v3490_v58  ;;  %v6627_v26 = vadd.f32 %v6452_v42, %v3393_v40  ;;  %v4642_v8 = vpop.f32.mrb[62].mxu1 }
 0x340   : > { %v5145_v62 = vpop.eup %5144  ;;  %v4117_v2 = vpack.c.bf16 %v3584_v24, %v3584_v24  ;;  %v3585_v19 = vmul.f32 %v5143_v50, %v6548_v23  ;;  %v3438_v14 = vsub.f32 0.0, %v6623_v13  ;;  %v3396_v63 = vpop.f32.mrb[63].mxu1  ;;  %v6634_v55 = vadd.f32 %v4642_v8, %v6452_v42 }
 0x341   : > { %v5147_v48 = vpop.eup %5146  ;;  %3747 = vst.msk [vmem:[%s6523_s27 + $0x48] sm:$0xf] %vm3728_vm8, %v4119_v44  ;;  %v4120_v3 = vpack.c.bf16 %v3587_v45, %v3587_v45  ;;  %v3526_v49 = vadd.f32 1.0, %v5145_v62  ;;  %v3436_v59 = vsub.f32 0.0, %v6627_v26  ;;  %v6640_v23 = vadd.f32 %v6452_v42, %v3396_v63 }
 0x342   : > { %v5149_v54 = vpop.eup %5148  ;;  %3745 = vst.msk [vmem:[%s6523_s27 + $0x40] sm:$0xf] %vm3728_vm8, %v4117_v2  ;;  %v4118_v11 = vpack.c.bf16 %v3585_v19, %v3585_v19  ;;  %v3524_v53 = vadd.f32 1.0, %v5147_v48  ;;  %v3500_v22 = vmul.f32 1.442695, %v3438_v14  ;;  %v3439_v52 = vsub.f32 0.0, %v6634_v55 }
 0x343   : > { %v5151_v9 = vpop.eup %5150  ;;  %3748 = vst.msk [vmem:[%s6523_s27 + $0x4c] sm:$0xf] %vm3728_vm8, %v4120_v3  ;;  %5160 = vrcp.f32 %v3526_v49  ;;  %v3527_v20 = vadd.f32 1.0, %v5149_v54  ;;  %v3496_v0 = vmul.f32 1.442695, %v3436_v59  ;;  %v3437_v42 = vsub.f32 0.0, %v6640_v23 }
 0x344   : > { %3746 = vst.msk [vmem:[%s6523_s27 + $0x44] sm:$0xf] %vm3728_vm8, %v4118_v11  ;;  %5162 = vrcp.f32 %v3524_v53  ;;  %v3525_v6 = vadd.f32 1.0, %v5151_v9  ;;  %v3502_v17 = vmul.f32 1.442695, %v3439_v52 }
 0x345   : > { %v5153_v21 = vpop.eup %5152  ;;  %5164 = vrcp.f32 %v3527_v20  ;;  %v3498_v18 = vmul.f32 1.442695, %v3437_v42 }
 0x346   : > { %v5155_v4 = vpop.eup %5154  ;;  %5166 = vrcp.f32 %v3525_v6  ;;  %v3530_v10 = vadd.f32 1.0, %v5153_v21 }
 0x347   : > { %v3528_v12 = vadd.f32 1.0, %v5155_v4  ;;  %5168 = vpow2.f32 %v3500_v22 }
 0x348   : > { %v5157_v35 = vpop.eup %5156  ;;  %5170 = vrcp.f32 %v3530_v10 }
 0x349   : > { %v5159_v28 = vpop.eup %5158  ;;  %5172 = vrcp.f32 %v3528_v12  ;;  %v3531_v57 = vadd.f32 1.0, %v5157_v35 }
 0x34a   : > { %v3529_v38 = vadd.f32 1.0, %v5159_v28  ;;  %5174 = vpow2.f32 %v3496_v0 }
 0x34b   : > { %5176 = vrcp.f32 %v3531_v57 }
 0x34c   : > { %5178 = vrcp.f32 %v3529_v38 }
 0x34d   : > { %v5161_v34 = vpop.eup %5160  ;;  %5180 = vpow2.f32 %v3502_v17 }
 0x34e   : > { %v5163_v16 = vpop.eup %5162  ;;  %v3590_v36 = vmul.f32 %v5161_v34, %v6567_v1  ;;  %5182 = vpow2.f32 %v3498_v18 }
 0x34f   : > { %v5165_v46 = vpop.eup %5164  ;;  %v3588_v33 = vmul.f32 %v5163_v16, %v6571_v25 }
 0x350   : > { %v5167_v60 = vpop.eup %5166  ;;  %v4123_v51 = vpack.c.bf16 %v3590_v36, %v3590_v36  ;;  %v3591_v56 = vmul.f32 %v5165_v46, %v6576_v41 }
 0x351   : > { %v5169_v43 = vpop.eup %5168  ;;  %v4121_v39 = vpack.c.bf16 %v3588_v33, %v3588_v33  ;;  %v3589_v27 = vmul.f32 %v5167_v60, %v6582_v5 }
 0x352   : > { %v5171_v32 = vpop.eup %5170  ;;  %3751 = vst.msk [vmem:[%s6523_s27 + $0x58] sm:$0xf] %vm3728_vm8, %v4123_v51  ;;  %v4124_v7 = vpack.c.bf16 %v3591_v56, %v3591_v56  ;;  %v3534_v30 = vadd.f32 1.0, %v5169_v43 }
 0x353   : > { %v5173_v1 = vpop.eup %5172  ;;  %3749 = vst.msk [vmem:[%s6523_s27 + $0x50] sm:$0xf] %vm3728_vm8, %v4121_v39  ;;  %v4122_v25 = vpack.c.bf16 %v3589_v27, %v3589_v27  ;;  %v3594_v58 = vmul.f32 %v5171_v32, %v6595_v47 }
 0x354   : > { %v5175_v61 = vpop.eup %5174  ;;  %3752 = vst.msk [vmem:[%s6523_s27 + $0x5c] sm:$0xf] %vm3728_vm8, %v4124_v7  ;;  %v3592_v41 = vmul.f32 %v5173_v1, %v6599_v15  ;;  %5184 = vrcp.f32 %v3534_v30 }
 0x355   : > { %v5177_v5 = vpop.eup %5176  ;;  %3750 = vst.msk [vmem:[%s6523_s27 + $0x54] sm:$0xf] %vm3728_vm8, %v4122_v25  ;;  %v4127_v31 = vpack.c.bf16 %v3594_v58, %v3594_v58  ;;  %v3532_v24 = vadd.f32 1.0, %v5175_v61 }
 0x356   : > { %v5179_v40 = vpop.eup %5178  ;;  %v4125_v50 = vpack.c.bf16 %v3592_v41, %v3592_v41  ;;  %v3595_v44 = vmul.f32 %v5177_v5, %v6607_v37 }
 0x357   : > { %v5181_v45 = vpop.eup %5180  ;;  %3755 = vst.msk [vmem:[%s6523_s27 + $0x68] sm:$0xf] %vm3728_vm8, %v4127_v31  ;;  %v3593_v47 = vmul.f32 %v5179_v40, %v6612_v29  ;;  %5186 = vrcp.f32 %v3532_v24 }
 0x358   : > { %v5183_v15 = vpop.eup %5182  ;;  %3753 = vst.msk [vmem:[%s6523_s27 + $0x60] sm:$0xf] %vm3728_vm8, %v4125_v50  ;;  %v4128_v8 = vpack.c.bf16 %v3595_v44, %v3595_v44  ;;  %v3535_v62 = vadd.f32 1.0, %v5181_v45 }
 0x359   : > { %v4126_v2 = vpack.c.bf16 %v3593_v47, %v3593_v47  ;;  %v3533_v19 = vadd.f32 1.0, %v5183_v15 }
 0x35a   : > { %3756 = vst.msk [vmem:[%s6523_s27 + $0x6c] sm:$0xf] %vm3728_vm8, %v4128_v8  ;;  %5188 = vrcp.f32 %v3535_v62 }
 0x35b   : > { %3754 = vst.msk [vmem:[%s6523_s27 + $0x64] sm:$0xf] %vm3728_vm8, %v4126_v2  ;;  %5190 = vrcp.f32 %v3533_v19 }
 0x35e   : > { %v5185_v37 = vpop.eup %5184 }
 0x35f   : > { %v3598_v29 = vmul.f32 %v5185_v37, %v6623_v13 }
 0x361   : > { %v5187_v14 = vpop.eup %5186  ;;  %v4131_v63 = vpack.c.bf16 %v3598_v29, %v3598_v29 }
 0x362   : > { %v3596_v48 = vmul.f32 %v5187_v14, %v6627_v26 }
 0x363   : > { %3759 = vst.msk [vmem:[%s6523_s27 + $0x78] sm:$0xf] %vm3728_vm8, %v4131_v63 }
 0x364   : > { %v5189_v3 = vpop.eup %5188  ;;  %v4129_v49 = vpack.c.bf16 %v3596_v48, %v3596_v48 }
 0x365   : > { %v5191_v54 = vpop.eup %5190  ;;  %v3599_v11 = vmul.f32 %v5189_v3, %v6634_v55 }
 0x366   : > { %3757 = vst.msk [vmem:[%s6523_s27 + $0x70] sm:$0xf] %vm3728_vm8, %v4129_v49  ;;  %v3597_v53 = vmul.f32 %v5191_v54, %v6640_v23 }
 0x367   : > { %v4132_v59 = vpack.c.bf16 %v3599_v11, %v3599_v11 }
 0x368   : > { %v4130_v9 = vpack.c.bf16 %v3597_v53, %v3597_v53 }
 0x369   : > { %3760 = vst.msk [vmem:[%s6523_s27 + $0x7c] sm:$0xf] %vm3728_vm8, %v4132_v59 }
 0x36a   : > { %3758 = vst.msk [vmem:[%s6523_s27 + $0x74] sm:$0xf] %vm3728_vm8, %v4130_v9 }
 0x36b PF: > { %s15_s18 = sadd.s32 1, %s5201_s18  }
 0x36c   : > { %p12_p4 = scmp.ge.s32.totalorder %s15_s18, 4  }
 0x36e   :  { %14 = sbr.rel (!%p12_p4) target bundleno = 1 (0x1), region = 78 }

// kernel: global_block_forward.4
= control target key start
LH: loop header
LB: loop body
LE: loop exit
PB: predicated region body
PF: predicated region fallthrough
CT: control target
= control target key end

     0   :  { %s6884_s17 = smov 0   ;;  %s8890_s0 = inlined_call_operand.vmem [shape: bf16[8,64,32], index: 0, kind: input, shape index: {}]   ;;  %s8891_s1 = inlined_call_operand.vmem [shape: bf16[32,384], index: 1, kind: input, shape index: {}]   ;;  %s8892_s2 = inlined_call_operand.vmem [shape: f32[1,384], index: 2, kind: input, shape index: {}]   ;;  %s8893_s3 = inlined_call_operand.vmem [shape: bf16[128,32], index: 3, kind: input, shape index: {}]   ;;  %s8894_s4 = inlined_call_operand.vmem [shape: f32[1,32], index: 4, kind: input, shape index: {}]   ;;  %s8895_s5 = inlined_call_operand.vmem [shape: bf16[32,64], index: 5, kind: input, shape index: {}]   ;;  %s8896_s6 = inlined_call_operand.vmem [shape: f32[1,64], index: 6, kind: input, shape index: {}]   ;;  %s8897_s7 = inlined_call_operand.vmem [shape: bf16[64,32], index: 7, kind: input, shape index: {}]   ;;  %s8898_s8 = inlined_call_operand.vmem [shape: f32[1,32], index: 8, kind: input, shape index: {}]   ;;  %s8899_s9 = inlined_call_operand.vmem [shape: bf16[32,4], index: 9, kind: input, shape index: {}]   ;;  %s8900_s10 = inlined_call_operand.vmem [shape: f32[1,4], index: 10, kind: input, shape index: {}]   ;;  %s8901_s11 = inlined_call_operand.vmem [shape: bf16[8,64,4], index: 11, kind: output, shape index: {}]  }
   0x1 LB: > { %s5038_s18 = sadd.s32 4294967295, %s6818_s17   ;;  %p5042_p0 = scmp.ge.s32.totalorder %s6818_s17, 1  ;;  %s6818_s17 = sphi %s6884_s17, %s21_s17  }
   0x2   : > { %p339_p1 = scmp.lt.s32.totalorder %s6818_s17, 5 }
   0x4   : > { %p340_p2 = pnand %p5042_p0, %p339_p1 }
   0x6   : > { %343 = sbr.rel (%p340_p2) target bundleno = 3037 (0xbdd), region = 64 }
   0xd   : > { %s5043_s19 = sshll.u32 %s5038_s18, 1  ;;  %vm428_vm0 = vcmask 261120   ;;  %s6821_s22 = smov 96   ;;  %vm2225_vm1 = vcmask 523264   ;;  %vm3802_vm2 = vcmask 785408   ;;  %vm4963_vm3 = vcmask 27648  }
   0xe   : > { %p382_p3 = scmp.lt.s32.totalorder %s5043_s19, 7  ;;  %s6823_s24 = smov 32  }
  0x10   : > { %s9098_s19 = smov (!%p382_p3, %s5043_s19), 7 }
  0x11   : > { %s5197_s20 = sshll.u32 %s9098_s19, 5 }
  0x12   : > { %s6900_s23 = scalar_lea.vmem %s8890_s0, %s5197_s20  ;;  %s8829_s16 = scalar_lea.vmem %s8901_s11, %s5197_s20 }
  0x13   : > { %v5216_v0 = vld [vmem:[%s6900_s23] sm:$0xff]   ;;  %v5247_v1 = vld [vmem:[%s6900_s23 + $0x8] sm:$0xff]   ;;  %v5248_v6 = vld [vmem:[%s6900_s23 + $0x10] sm:$0xff]  }
  0x14   : > { %v6904_v2 = vunpack.c.l.bf16 %v5216_v0  ;;  %v6906_v3 = vunpack.c.l.bf16 %v5247_v1  ;;  %v6908_v4 = vunpack.c.h.bf16 %v5216_v0  ;;  %v6910_v5 = vunpack.c.h.bf16 %v5247_v1  ;;  %v5249_v13 = vld [vmem:[%s6900_s23 + $0x18] sm:$0xff]   ;;  %v5250_v16 = vld [vmem:[%s6900_s23 + $0x20] sm:$0xff]   ;;  %v5251_v23 = vld [vmem:[%s6900_s23 + $0x28] sm:$0xff]  }
  0x15   : > { %v6921_v11 = vunpack.c.l.bf16 %v5248_v6  ;;  %v6923_v12 = vunpack.c.h.bf16 %v5248_v6  ;;  %v6931_v17 = vunpack.c.l.bf16 %v5249_v13  ;;  %v6933_v18 = vunpack.c.h.bf16 %v5249_v13  ;;  %v5252_v28 = vld [vmem:[%s6900_s23 + $0x30] sm:$0xff]   ;;  %v5253_v33 = vld [vmem:[%s6900_s23 + $0x38] sm:$0xff]   ;;  %s6822_s23 = smov 64  }
  0x16   : > { %8967 = vst [vmem:[#allocation2_spill] sm:$0xff] %v6904_v2  ;;  %8968 = vst [vmem:[#allocation3_spill] sm:$0xff] %v6906_v3  ;;  %v429_v7 = vsel %vm428_vm0, %v6904_v2, 0.0  ;;  %v435_v8 = vsel %vm428_vm0, %v6906_v3, 0.0  ;;  %v432_v9 = vsel %vm428_vm0, %v6908_v4, 0.0  ;;  %v438_v10 = vsel %vm428_vm0, %v6910_v5, 0.0 }
  0x17   : > { %8969 = vst [vmem:[#allocation4_spill] sm:$0xff] %v6908_v4  ;;  %8970 = vst [vmem:[#allocation5_spill] sm:$0xff] %v6910_v5  ;;  %430 = vadd.xlane.f32.xlu0 %v429_v7  ;;  %436 = vadd.xlane.f32.xlu1 %v435_v8  ;;  %v441_v14 = vsel %vm428_vm0, %v6921_v11, 0.0  ;;  %v444_v15 = vsel %vm428_vm0, %v6923_v12, 0.0  ;;  %v447_v19 = vsel %vm428_vm0, %v6931_v17, 0.0  ;;  %v450_v20 = vsel %vm428_vm0, %v6933_v18, 0.0 }
  0x18   : > { %8971 = vst [vmem:[#allocation6_spill] sm:$0xff] %v6921_v11  ;;  %8972 = vst [vmem:[#allocation7_spill] sm:$0xff] %v6923_v12  ;;  %v6939_v21 = vunpack.c.l.bf16 %v5250_v16  ;;  %v6941_v22 = vunpack.c.h.bf16 %v5250_v16  ;;  %v6948_v26 = vunpack.c.l.bf16 %v5251_v23  ;;  %v6950_v27 = vunpack.c.h.bf16 %v5251_v23 }
  0x19   : > { %8973 = vst [vmem:[#allocation8_spill] sm:$0xff] %v6931_v17  ;;  %8974 = vst [vmem:[#allocation9_spill] sm:$0xff] %v6933_v18  ;;  %v6957_v31 = vunpack.c.l.bf16 %v5252_v28  ;;  %v6959_v32 = vunpack.c.h.bf16 %v5252_v28  ;;  %v6966_v36 = vunpack.c.l.bf16 %v5253_v33  ;;  %v6968_v37 = vunpack.c.h.bf16 %v5253_v33 }
  0x1a   : > { %8975 = vst [vmem:[#allocation10_spill] sm:$0xff] %v6939_v21  ;;  %8976 = vst [vmem:[#allocation11_spill] sm:$0xff] %v6941_v22  ;;  %v453_v24 = vsel %vm428_vm0, %v6939_v21, 0.0  ;;  %v456_v25 = vsel %vm428_vm0, %v6941_v22, 0.0  ;;  %v459_v29 = vsel %vm428_vm0, %v6948_v26, 0.0  ;;  %v462_v30 = vsel %vm428_vm0, %v6950_v27, 0.0 }
  0x1b   : > { %433 = vadd.xlane.f32.xlu0 %v432_v9  ;;  %439 = vadd.xlane.f32.xlu1 %v438_v10  ;;  %8977 = vst [vmem:[#allocation12_spill] sm:$0xff] %v6948_v26  ;;  %8978 = vst [vmem:[#allocation13_spill] sm:$0xff] %v6950_v27  ;;  %v465_v34 = vsel %vm428_vm0, %v6957_v31, 0.0  ;;  %v468_v35 = vsel %vm428_vm0, %v6959_v32, 0.0  ;;  %v471_v38 = vsel %vm428_vm0, %v6966_v36, 0.0  ;;  %v474_v39 = vsel %vm428_vm0, %v6968_v37, 0.0 }
  0x1c   : > { %8979 = vst [vmem:[#allocation14_spill] sm:$0xff] %v6957_v31  ;;  %8980 = vst [vmem:[#allocation15_spill] sm:$0xff] %v6959_v32 }
  0x1d   : > { %8981 = vst [vmem:[#allocation16_spill] sm:$0xff] %v6966_v36  ;;  %8982 = vst [vmem:[#allocation17_spill] sm:$0xff] %v6968_v37 }
  0x1f   : > { %442 = vadd.xlane.f32.xlu0 %v441_v14  ;;  %445 = vadd.xlane.f32.xlu1 %v444_v15 }
  0x23   : > { %448 = vadd.xlane.f32.xlu0 %v447_v19  ;;  %451 = vadd.xlane.f32.xlu1 %v450_v20 }
  0x27   : > { %454 = vadd.xlane.f32.xlu0 %v453_v24  ;;  %457 = vadd.xlane.f32.xlu1 %v456_v25 }
  0x2b   : > { %460 = vadd.xlane.f32.xlu0 %v459_v29  ;;  %463 = vadd.xlane.f32.xlu1 %v462_v30 }
  0x2f   : > { %466 = vadd.xlane.f32.xlu0 %v465_v34  ;;  %469 = vadd.xlane.f32.xlu1 %v468_v35 }
  0x33   : > { %472 = vadd.xlane.f32.xlu0 %v471_v38  ;;  %475 = vadd.xlane.f32.xlu1 %v474_v39 }
  0xa4   : > { %v431_v40 = vpop.xlane.xlu0 %430  ;;  %v437_v41 = vpop.xlane.xlu1 %436 }
  0xa5   : > { %v478_v42 = vmul.f32 0.03125, %v431_v40  ;;  %v480_v43 = vmul.f32 0.03125, %v437_v41 }
  0xa7   : > { %v6975_v44 = vsub.f32 %v6904_v2, %v478_v42  ;;  %v6978_v45 = vsub.f32 %v6906_v3, %v480_v43 }
  0xa8   : > { %v434_v46 = vpop.xlane.xlu0 %433  ;;  %v440_v47 = vpop.xlane.xlu1 %439 }
  0xa9   : > { %v479_v48 = vmul.f32 0.03125, %v434_v46  ;;  %v481_v49 = vmul.f32 0.03125, %v440_v47  ;;  %v510_v50 = vmul.f32 %v6975_v44, %v6975_v44  ;;  %v512_v51 = vmul.f32 %v6978_v45, %v6978_v45 }
  0xab   : > { %v6985_v52 = vsub.f32 %v6908_v4, %v479_v48  ;;  %v6988_v53 = vsub.f32 %v6910_v5, %v481_v49  ;;  %v526_v54 = vsel %vm428_vm0, %v510_v50, 0.0  ;;  %v532_v57 = vsel %vm428_vm0, %v512_v51, 0.0 }
  0xac   : > { %527 = vadd.xlane.f32.xlu0 %v526_v54  ;;  %v443_v55 = vpop.xlane.xlu0 %442  ;;  %v446_v56 = vpop.xlane.xlu1 %445 }
  0xad   : > { %v482_v58 = vmul.f32 0.03125, %v443_v55  ;;  %v483_v59 = vmul.f32 0.03125, %v446_v56  ;;  %v511_v60 = vmul.f32 %v6985_v52, %v6985_v52  ;;  %v513_v61 = vmul.f32 %v6988_v53, %v6988_v53 }
  0xaf   : > { %v6997_v62 = vsub.f32 %v6921_v11, %v482_v58  ;;  %v7000_v63 = vsub.f32 %v6923_v12, %v483_v59  ;;  %v529_v0 = vsel %vm428_vm0, %v511_v60, 0.0  ;;  %v535_v7 = vsel %vm428_vm0, %v513_v61, 0.0 }
  0xb0   : > { %533 = vadd.xlane.f32.xlu0 %v532_v57  ;;  %530 = vadd.xlane.f32.xlu1 %v529_v0  ;;  %v449_v1 = vpop.xlane.xlu0 %448  ;;  %v452_v6 = vpop.xlane.xlu1 %451 }
  0xb1   : > { %v484_v8 = vmul.f32 0.03125, %v449_v1  ;;  %v485_v9 = vmul.f32 0.03125, %v452_v6  ;;  %v514_v10 = vmul.f32 %v6997_v62, %v6997_v62  ;;  %v515_v13 = vmul.f32 %v7000_v63, %v7000_v63 }
  0xb3   : > { %v7009_v14 = vsub.f32 %v6931_v17, %v484_v8  ;;  %v7012_v15 = vsub.f32 %v6933_v18, %v485_v9  ;;  %v538_v16 = vsel %vm428_vm0, %v514_v10, 0.0  ;;  %v541_v23 = vsel %vm428_vm0, %v515_v13, 0.0 }
  0xb4   : > { %536 = vadd.xlane.f32.xlu1 %v535_v7  ;;  %539 = vadd.xlane.f32.xlu0 %v538_v16  ;;  %v455_v19 = vpop.xlane.xlu0 %454  ;;  %v458_v20 = vpop.xlane.xlu1 %457 }
  0xb5   : > { %v486_v24 = vmul.f32 0.03125, %v455_v19  ;;  %v487_v25 = vmul.f32 0.03125, %v458_v20  ;;  %v516_v28 = vmul.f32 %v7009_v14, %v7009_v14  ;;  %v517_v29 = vmul.f32 %v7012_v15, %v7012_v15 }
  0xb7   : > { %v7021_v30 = vsub.f32 %v6939_v21, %v486_v24  ;;  %v7024_v33 = vsub.f32 %v6941_v22, %v487_v25  ;;  %v544_v34 = vsel %vm428_vm0, %v516_v28, 0.0  ;;  %v547_v39 = vsel %vm428_vm0, %v517_v29, 0.0  ;;  %v6340_v25 = vld [vmem:[%s8891_s1 + $0x4] ss:$12 sps:$4 sm:$0xff]   ;;  %v6342_v29 = vld [vmem:[%s8891_s1] ss:$12 sps:$4 sm:$0xff]  }
  0xb8   : > { %542 = vadd.xlane.f32.xlu1 %v541_v23  ;;  %545 = vadd.xlane.f32.xlu0 %v544_v34  ;;  %v461_v35 = vpop.xlane.xlu0 %460  ;;  %v464_v38 = vpop.xlane.xlu1 %463  ;;  %v6343_v34 = vld [vmem:[%s8891_s1 + $0x1c] ss:$12 sps:$4 sm:$0xff]  }
  0xb9   : > { %v488_v40 = vmul.f32 0.03125, %v461_v35  ;;  %v489_v41 = vmul.f32 0.03125, %v464_v38  ;;  %v518_v42 = vmul.f32 %v7021_v30, %v7021_v30  ;;  %v519_v43 = vmul.f32 %v7024_v33, %v7024_v33  ;;  %727 = vmatprep.subr.bf16.mxu0 %v6340_v25  ;;  %5812 = vmatprep.subr.bf16.mxu1 %v6340_v25  ;;  %v6345_v35 = vld [vmem:[%s8891_s1 + $0x18] ss:$12 sps:$4 sm:$0xff]  }
  0xba   : > { %728 = vmatpush1.bf16.msra.mxu0 %v6342_v29  ;;  %5814 = vmatpush1.bf16.msra.mxu1 %v6342_v29  ;;  %v6820_v38 = vmov 0  }
  0xbb   : > { %v7033_v46 = vsub.f32 %v6948_v26, %v488_v40  ;;  %v7036_v47 = vsub.f32 %v6950_v27, %v489_v41  ;;  %v550_v48 = vsel %vm428_vm0, %v518_v42, 0.0  ;;  %v553_v51 = vsel %vm428_vm0, %v519_v43, 0.0  ;;  %729 = vmatprep.subr.bf16.mxu0 %v6343_v34  ;;  %5813 = vmatprep.subr.bf16.mxu1 %v6343_v34 }
  0xbc   : > { %548 = vadd.xlane.f32.xlu1 %v547_v39  ;;  %551 = vadd.xlane.f32.xlu0 %v550_v48  ;;  %v467_v49 = vpop.xlane.xlu0 %466  ;;  %v470_v50 = vpop.xlane.xlu1 %469  ;;  %v7087_v39 = vld [vmem:[%s8891_s1 + $0x8] ss:$12 sps:$4 sm:$0xff]  }
  0xbd   : > { %v490_v54 = vmul.f32 0.03125, %v467_v49  ;;  %v491_v55 = vmul.f32 0.03125, %v470_v50  ;;  %v520_v56 = vmul.f32 %v7033_v46, %v7033_v46  ;;  %v521_v57 = vmul.f32 %v7036_v47, %v7036_v47  ;;  %759 = vmatprep.mubr.bf16.mxu0 %v6820_v38  ;;  %829 = vmatprep.mubr.bf16.mxu1 %v6820_v38 }
  0xbe   : > { %730 = vmatpush1.bf16.msra.mxu0 %v6345_v35  ;;  %5815 = vmatpush1.bf16.msra.mxu1 %v6345_v35 }
  0xbf   : > { %v7045_v58 = vsub.f32 %v6957_v31, %v490_v54  ;;  %v7048_v59 = vsub.f32 %v6959_v32, %v491_v55  ;;  %v556_v60 = vsel %vm428_vm0, %v520_v56, 0.0  ;;  %v559_v1 = vsel %vm428_vm0, %v521_v57, 0.0  ;;  %5440 = vmatprep.subr.bf16.mxu1 %v7087_v39 }
  0xc0   : > { %554 = vadd.xlane.f32.xlu1 %v553_v51  ;;  %557 = vadd.xlane.f32.xlu0 %v556_v60  ;;  %v473_v61 = vpop.xlane.xlu0 %472  ;;  %v476_v0 = vpop.xlane.xlu1 %475 }
  0xc1   : > { %v492_v6 = vmul.f32 0.03125, %v473_v61  ;;  %v493_v7 = vmul.f32 0.03125, %v476_v0  ;;  %v522_v8 = vmul.f32 %v7045_v58, %v7045_v58  ;;  %v523_v9 = vmul.f32 %v7048_v59, %v7048_v59 }
  0xc3   : > { %v7057_v10 = vsub.f32 %v6966_v36, %v492_v6  ;;  %v7060_v13 = vsub.f32 %v6968_v37, %v493_v7  ;;  %v562_v16 = vsel %vm428_vm0, %v522_v8, 0.0  ;;  %v565_v19 = vsel %vm428_vm0, %v523_v9, 0.0 }
  0xc4   : > { %560 = vadd.xlane.f32.xlu1 %v559_v1  ;;  %563 = vadd.xlane.f32.xlu0 %v562_v16 }
  0xc5   : > { %v524_v20 = vmul.f32 %v7057_v10, %v7057_v10  ;;  %v525_v23 = vmul.f32 %v7060_v13, %v7060_v13 }
  0xc7   : > { %v568_v24 = vsel %vm428_vm0, %v524_v20, 0.0  ;;  %v571_v28 = vsel %vm428_vm0, %v525_v23, 0.0 }
  0xc8   : > { %566 = vadd.xlane.f32.xlu1 %v565_v19  ;;  %569 = vadd.xlane.f32.xlu0 %v568_v24 }
  0xcc   : > { %572 = vadd.xlane.f32.xlu1 %v571_v28 }
 0x139   : > { %v528_v40 = vpop.xlane.xlu0 %527 }
 0x13a   : > { %v574_v41 = vmul.f32 0.03125, %v528_v40 }
 0x13c   : > { %v590_v42 = vadd.f32 1e-05, %v574_v41 }
 0x13d   : > { %v531_v43 = vpop.xlane.xlu1 %530  ;;  %v534_v48 = vpop.xlane.xlu0 %533 }
 0x13e   : > { %v575_v49 = vmul.f32 0.03125, %v531_v43  ;;  %6364 = vrsqrt.f32 %v590_v42  ;;  %v576_v51 = vmul.f32 0.03125, %v534_v48 }
 0x140   : > { %v591_v50 = vadd.f32 1e-05, %v575_v49  ;;  %v592_v57 = vadd.f32 1e-05, %v576_v51 }
 0x141   : > { %v537_v54 = vpop.xlane.xlu1 %536  ;;  %v540_v55 = vpop.xlane.xlu0 %539 }
 0x142   : > { %6366 = vrsqrt.f32 %v591_v50  ;;  %v577_v56 = vmul.f32 0.03125, %v537_v54  ;;  %v578_v6 = vmul.f32 0.03125, %v540_v55 }
 0x144   : > { %v593_v60 = vadd.f32 1e-05, %v577_v56  ;;  %v594_v20 = vadd.f32 1e-05, %v578_v6 }
 0x145   : > { %v543_v61 = vpop.xlane.xlu1 %542  ;;  %v546_v0 = vpop.xlane.xlu0 %545 }
 0x146   : > { %6368 = vrsqrt.f32 %v593_v60  ;;  %v579_v1 = vmul.f32 0.03125, %v543_v61  ;;  %v580_v40 = vmul.f32 0.03125, %v546_v0 }
 0x147   : > { %6370 = vrsqrt.f32 %v592_v57 }
 0x148   : > { %v6365_v9 = vpop.eup %6364  ;;  %v595_v16 = vadd.f32 1e-05, %v579_v1  ;;  %v596_v49 = vadd.f32 1e-05, %v580_v40 }
 0x149   : > { %v549_v7 = vpop.xlane.xlu1 %548  ;;  %v552_v8 = vpop.xlane.xlu0 %551  ;;  %v622_v25 = vmul.f32 %v6365_v9, %v6975_v44 }
 0x14a   : > { %6372 = vrsqrt.f32 %v595_v16  ;;  %v581_v29 = vmul.f32 0.03125, %v549_v7  ;;  %v582_v60 = vmul.f32 0.03125, %v552_v8 }
 0x14b   : > { %6374 = vrsqrt.f32 %v594_v20 }
 0x14c   : > { %v6367_v19 = vpop.eup %6366  ;;  %v597_v48 = vadd.f32 1e-05, %v581_v29  ;;  %v598_v9 = vadd.f32 1e-05, %v582_v60 }
 0x14d   : > { %v555_v23 = vpop.xlane.xlu1 %554  ;;  %v558_v24 = vpop.xlane.xlu0 %557  ;;  %v623_v28 = vmul.f32 %v6367_v19, %v6985_v52 }
 0x14e   : > { %v583_v52 = vmul.f32 0.03125, %v555_v23  ;;  %6376 = vrsqrt.f32 %v597_v48  ;;  %v584_v23 = vmul.f32 0.03125, %v558_v24 }
 0x14f   : > { %v7092_v34 = vpack.c.bf16 %v623_v28, %v622_v25  ;;  %6378 = vrsqrt.f32 %v596_v49 }
 0x150   : > { %v6369_v35 = vpop.eup %6368  ;;  %v599_v0 = vadd.f32 1e-05, %v583_v52  ;;  %v600_v29 = vadd.f32 1e-05, %v584_v23 }
 0x151   : > { %v561_v41 = vpop.xlane.xlu1 %560  ;;  %5055 = vmatmul.mubr.msk.bf16.vlgmr.msra.gmra.mrb[0].mxu0 %vm428_vm0, %v7092_v34  ;;  %v564_v42 = vpop.xlane.xlu0 %563  ;;  %v625_v44 = vmul.f32 %v6369_v35, %v6988_v53 }
 0x152   : > { %v6371_v43 = vpop.eup %6370  ;;  %769 = vmatprep.mubr.bf16.mxu0 %v6820_v38  ;;  %v585_v19 = vmul.f32 0.03125, %v561_v41 }
 0x153   : > { %v624_v54 = vmul.f32 %v6371_v43, %v6978_v45 }
 0x154   : > { %v6373_v57 = vpop.eup %6372  ;;  %v601_v28 = vadd.f32 1e-05, %v585_v19 }
 0x155   : > { %v567_v50 = vpop.xlane.xlu1 %566  ;;  %v570_v51 = vpop.xlane.xlu0 %569  ;;  %v639_v56 = vpack.c.bf16 %v625_v44, %v624_v54  ;;  %v627_v53 = vmul.f32 %v6373_v57, %v7000_v63  ;;  %v586_v44 = vmul.f32 0.03125, %v564_v42 }
 0x156   : > { %v588_v55 = vmul.f32 0.03125, %v570_v51  ;;  %v6375_v6 = vpop.eup %6374 }
 0x157   : > { %v626_v16 = vmul.f32 %v6375_v6, %v6997_v62  ;;  %v587_v62 = vmul.f32 0.03125, %v567_v50  ;;  %v6347_v50 = vld [vmem:[%s8891_s1 + $0x20] ss:$12 sps:$4 sm:$0xff]   ;;  %v602_v54 = vadd.f32 1e-05, %v586_v44 }
 0x158   : > { %v604_v61 = vadd.f32 1e-05, %v588_v55  ;;  %v6377_v20 = vpop.eup %6376 }
 0x159   : > { %v573_v1 = vpop.xlane.xlu1 %572  ;;  %5056 = vmatmul.mubr.msk.bf16.gmra.mrb[4].mxu0 %vm428_vm0, %v639_v56  ;;  %v640_v8 = vpack.c.bf16 %v627_v53, %v626_v16  ;;  %v6379_v25 = vpop.eup %6378  ;;  %v629_v63 = vmul.f32 %v6377_v20, %v7012_v15  ;;  %v603_v51 = vadd.f32 1e-05, %v587_v62 }
 0x15a   : > { %v589_v7 = vmul.f32 0.03125, %v573_v1  ;;  %779 = vmatprep.mubr.bf16.mxu0 %v6820_v38  ;;  %6380 = vrsqrt.f32 %v604_v61  ;;  %v628_v35 = vmul.f32 %v6379_v25, %v7009_v14 }
 0x15b   : > { %6382 = vrsqrt.f32 %v599_v0 }
 0x15c   : > { %v605_v45 = vadd.f32 1e-05, %v589_v7  ;;  %v641_v43 = vpack.c.bf16 %v629_v63, %v628_v35 }
 0x15e   : > { %6384 = vrsqrt.f32 %v605_v45 }
 0x15f   : > { %6386 = vrsqrt.f32 %v598_v9 }
 0x160   : > { %6388 = vrsqrt.f32 %v601_v28 }
 0x161   : > { %5057 = vmatmul.mubr.msk.bf16.gmra.mrb[8].mxu0 %vm428_vm0, %v640_v8  ;;  %6390 = vrsqrt.f32 %v600_v29 }
 0x162   : > { %789 = vmatprep.mubr.bf16.mxu0 %v6820_v38  ;;  %6392 = vrsqrt.f32 %v603_v51 }
 0x163   : > { %6394 = vrsqrt.f32 %v602_v54 }
 0x164   : > { %v6381_v40 = vpop.eup %6380 }
 0x165   : > { %v6383_v41 = vpop.eup %6382  ;;  %v636_v24 = vmul.f32 %v6381_v40, %v7057_v10 }
 0x166   : > { %v631_v14 = vmul.f32 %v6383_v41, %v7024_v33 }
 0x168   : > { %v6385_v48 = vpop.eup %6384 }
 0x169   : > { %5058 = vmatmul.mubr.msk.bf16.gmra.mrb[12].mxu0 %vm428_vm0, %v641_v43  ;;  %v637_v49 = vmul.f32 %v6385_v48, %v7060_v13  ;;  %v6387_v52 = vpop.eup %6386 }
 0x16a   : > { %799 = vmatprep.mubr.bf16.mxu0 %v6820_v38  ;;  %v630_v42 = vmul.f32 %v6387_v52, %v7021_v30  ;;  %v6389_v13 = vpop.eup %6388 }
 0x16b   : > { %v645_v15 = vpack.c.bf16 %v637_v49, %v636_v24  ;;  %v6391_v33 = vpop.eup %6390  ;;  %v633_v55 = vmul.f32 %v6389_v13, %v7036_v47 }
 0x16c   : > { %v642_v10 = vpack.c.bf16 %v631_v14, %v630_v42  ;;  %v632_v30 = vmul.f32 %v6391_v33, %v7033_v46  ;;  %v656_v46 = vlaneseq }
 0x16d   : > { %5062 = vmatmul.mubr.msk.bf16.vlgmr.msra.gmra.mrb[0].mxu1 %vm428_vm0, %v645_v15 }
 0x16e   : > { %5441 = vmatpush3.bf16.msra.mxu1 %v7087_v39  ;;  %5444 = vmatprep.mubr.msk.bf16.mxu1 %vm428_vm0, %v7092_v34  ;;  %v643_v39 = vpack.c.bf16 %v633_v55, %v632_v30  ;;  %v6393_v34 = vpop.eup %6392 }
 0x16f   : > { %5442 = vmatprep.subr.bf16.mxu1 %v6347_v50  ;;  %v6395_v57 = vpop.eup %6394  ;;  %v635_v60 = vmul.f32 %v6393_v34, %v7048_v59 }
 0x170   : > { %v634_v61 = vmul.f32 %v6395_v57, %v7045_v58  ;;  %v7142_v58 = vld [vmem:[%s8892_s2] sm:$0x7] }
 0x171   : > { %5059 = vmatmul.mubr.msk.bf16.gmra.mrb[16].mxu0 %vm428_vm0, %v642_v10 }
 0x172   : > { %5443 = vmatpush3.bf16.msra.mxu1 %v6347_v50  ;;  %809 = vmatprep.mubr.bf16.mxu0 %v6820_v38  ;;  %v644_v47 = vpack.c.bf16 %v635_v60, %v634_v61 }
 0x175   : > { %5445 = vmatmul.mubr.msk.bf16.vlgmr.msra.gmra.mrb[4].mxu1 %vm428_vm0, %v639_v56  ;;  %v7136_v56 = vshrl.u32 %v656_v46, 7 }
 0x176   : > { %5448 = vmatprep.mubr.msk.bf16.mxu1 %vm428_vm0, %v640_v8 }
 0x177   : > { %v658_v59 = vsub.s32 0, %v7136_v56 }
 0x179   : > { %5060 = vmatmul.mubr.msk.bf16.gmra.mrb[20].mxu0 %vm428_vm0, %v643_v39  ;;  %v7146_v0 = vrot.slane %v7142_v58, %v658_v59 }
 0x17a   : > { %819 = vmatprep.mubr.bf16.mxu0 %v6820_v38  ;;  %v662_v38 = vsub.s32 1, %v7136_v56 }
 0x17c   : > { %v7149_v6 = vrot.slane %v7142_v58, %v662_v38 }
 0x17d   : > { %5449 = vmatmul.mubr.msk.bf16.gmra.mrb[8].mxu1 %vm428_vm0, %v641_v43 }
 0x17e   : > { %5452 = vmatprep.mubr.msk.bf16.mxu1 %vm428_vm0, %v642_v10 }
 0x181   : > { %5061 = vmatmul.mubr.msk.bf16.gmra.mrb[24].mxu0 %vm428_vm0, %v644_v47 }
 0x185   : > { %5453 = vmatmul.mubr.msk.bf16.gmra.mrb[12].mxu1 %vm428_vm0, %v643_v39 }
 0x186   : > { %5456 = vmatprep.mubr.msk.bf16.mxu1 %vm428_vm0, %v644_v47 }
 0x18d   : > { %5457 = vmatmul.mubr.msk.bf16.gmra.mrb[16].mxu1 %vm428_vm0, %v645_v15 }
 0x224   : > { %v761_v1 = vpop.f32.mrb[0].mxu0 }
 0x225   : > { %v763_v7 = vpop.f32.mrb[1].mxu0  ;;  %v762_v9 = vadd.f32 %v761_v1, %v7146_v0 }
 0x226   : > { %v765_v53 = vpop.f32.mrb[2].mxu0  ;;  %v764_v19 = vadd.f32 %v763_v7, %v7149_v6 }
 0x227   : > { %v766_v45 = vadd.f32 %v765_v53, %v7146_v0  ;;  %v767_v16 = vpop.f32.mrb[3].mxu0 }
 0x228   : > { %v768_v8 = vadd.f32 %v767_v16, %v7149_v6 }
 0x229   : > { %v1097_v20 = vpack.c.bf16 %v766_v45, %v762_v9  ;;  %v7155_v23 = vpack.i.bf16 %v766_v45, %v762_v9 }
 0x22a   : > { %v7157_v25 = vpack.i.bf16 %v768_v8, %v764_v19  ;;  %v1289_v28 = vpack.c.bf16 %v768_v8, %v764_v19 }
 0x22b   : > { %5468 = vmatprep.mubr.msk.bf16.mxu1 %vm428_vm0, %v1097_v20 }
 0x22c   : > { %5861 = vrot.lane.b32.xlu0 %v7157_v25, %s6821_s22  ;;  %v771_v63 = vpop.f32.mrb[4].mxu0  ;;  %5816 = vmatprep.subr.msk.bf16.mxu1 %vm428_vm0, %v1289_v28  ;;  %v1526_v29 = vsel %vm428_vm0, %v1289_v28, 0 }
 0x22d   : > { %v773_v35 = vpop.f32.mrb[5].mxu0  ;;  %5461 = vmatpush3.bf16.xpose.msra.mxu1 %v1526_v29  ;;  %v7165_v62 = vadd.f32 %v771_v63, %v7146_v0  ;;  %v666_v29 = vsub.s32 2, %v7136_v56 }
 0x22e   : > { %v775_v40 = vpop.f32.mrb[6].mxu0  ;;  %v774_v48 = vadd.f32 %v773_v35, %v7149_v6 }
 0x22f   : > { %v7168_v41 = vadd.f32 %v775_v40, %v7146_v0  ;;  %v777_v43 = vpop.f32.mrb[7].mxu0 }
 0x230   : > { %v778_v44 = vadd.f32 %v777_v43, %v7149_v6 }
 0x231   : > { %v1098_v24 = vpack.c.bf16 %v7168_v41, %v7165_v62  ;;  %v7176_v49 = vpack.i.bf16 %v7168_v41, %v7165_v62 }
 0x232   : > { %v7178_v52 = vpack.i.bf16 %v778_v44, %v774_v48  ;;  %v1290_v51 = vpack.c.bf16 %v778_v44, %v774_v48 }
 0x234   : > { %5866 = vrot.lane.b32.xlu1 %v7178_v52, %s6821_s22  ;;  %v781_v15 = vpop.f32.mrb[8].mxu0  ;;  %5817 = vmatprep.subr.msk.bf16.mxu1 %vm428_vm0, %v1290_v51  ;;  %v1529_v14 = vsel %vm428_vm0, %v1290_v51, 0 }
 0x235   : > { %v783_v50 = vpop.f32.mrb[9].mxu0  ;;  %5463 = vmatpush3.bf16.xpose.msra.mxu1 %v1529_v14  ;;  %v7185_v42 = vadd.f32 %v781_v15, %v7146_v0 }
 0x236   : > { %v785_v54 = vpop.f32.mrb[10].mxu0  ;;  %v784_v33 = vadd.f32 %v783_v50, %v7149_v6 }
 0x237   : > { %v7188_v10 = vadd.f32 %v785_v54, %v7146_v0  ;;  %v787_v13 = vpop.f32.mrb[11].mxu0  ;;  %v7240_v54 = vrot.slane %v7142_v58, %v666_v29 }
 0x238   : > { %v788_v55 = vadd.f32 %v787_v13, %v7149_v6 }
 0x239   : > { %v1099_v30 = vpack.c.bf16 %v7188_v10, %v7185_v42  ;;  %v7196_v39 = vpack.i.bf16 %v7188_v10, %v7185_v42 }
 0x23a   : > { %v7198_v34 = vpack.i.bf16 %v788_v55, %v784_v33  ;;  %v1291_v57 = vpack.c.bf16 %v788_v55, %v784_v33 }
 0x23c   : > { %5871 = vrot.lane.b32.xlu1 %v7198_v34, %s6821_s22  ;;  %v791_v60 = vpop.f32.mrb[12].mxu0  ;;  %5818 = vmatprep.subr.msk.bf16.mxu1 %vm428_vm0, %v1291_v57  ;;  %v1532_v61 = vsel %vm428_vm0, %v1291_v57, 0 }
 0x23d   : > { %v793_v47 = vpop.f32.mrb[13].mxu0  ;;  %5465 = vmatpush3.bf16.xpose.msra.mxu1 %v1532_v61  ;;  %v7205_v59 = vadd.f32 %v791_v60, %v7146_v0 }
 0x23e   : > { %v795_v46 = vpop.f32.mrb[14].mxu0  ;;  %v794_v7 = vadd.f32 %v793_v47, %v7149_v6 }
 0x23f   : > { %v7208_v38 = vadd.f32 %v795_v46, %v7146_v0  ;;  %v797_v1 = vpop.f32.mrb[15].mxu0 }
 0x240   : > { %v798_v53 = vadd.f32 %v797_v1, %v7149_v6  ;;  %v831_v9 = vpop.f32.mrb[0].mxu1 }
 0x241   : > { %v7213_v45 = vadd.f32 %v831_v9, %v7146_v0  ;;  %v833_v16 = vpop.f32.mrb[1].mxu1  ;;  %v1100_v19 = vpack.c.bf16 %v7208_v38, %v7205_v59  ;;  %v7219_v8 = vpack.i.bf16 %v7208_v38, %v7205_v59 }
 0x242   : > { %v835_v20 = vpop.f32.mrb[2].mxu1  ;;  %v7221_v28 = vpack.i.bf16 %v798_v53, %v794_v7  ;;  %v1292_v63 = vpack.c.bf16 %v798_v53, %v794_v7  ;;  %v834_v43 = vadd.f32 %v833_v16, %v7149_v6 }
 0x243   : > { %v7225_v35 = vadd.f32 %v835_v20, %v7146_v0  ;;  %v837_v40 = vpop.f32.mrb[3].mxu1 }
 0x244   : > { %v838_v48 = vadd.f32 %v837_v40, %v7149_v6  ;;  %5881 = vrot.lane.b32.xlu0 %v7221_v28, %s6821_s22  ;;  %v801_v44 = vpop.f32.mrb[16].mxu0  ;;  %5819 = vmatprep.subr.msk.bf16.mxu1 %vm428_vm0, %v1292_v63  ;;  %v1535_v51 = vsel %vm428_vm0, %v1292_v63, 0 }
 0x245   : > { %v803_v15 = vpop.f32.mrb[17].mxu0  ;;  %5467 = vmatpush3.bf16.xpose.msra.mxu1 %v1535_v51  ;;  %v1104_v56 = vpack.c.bf16 %v7225_v35, %v7213_v45  ;;  %v7237_v14 = vpack.i.bf16 %v7225_v35, %v7213_v45  ;;  %v802_v55 = vadd.f32 %v801_v44, %v7146_v0 }
 0x246   : > { %v805_v50 = vpop.f32.mrb[18].mxu0  ;;  %v7242_v13 = vpack.i.bf16 %v838_v48, %v834_v43  ;;  %v7244_v33 = vpack.c.bf16 %v838_v48, %v834_v43  ;;  %v804_v61 = vadd.f32 %v803_v15, %v7149_v6 }
 0x247   : > { %v806_v57 = vadd.f32 %v805_v50, %v7146_v0  ;;  %v807_v60 = vpop.f32.mrb[19].mxu0 }
 0x248   : > { %v808_v47 = vadd.f32 %v807_v60, %v7149_v6  ;;  %5886 = vrot.lane.b32.xlu0 %v7155_v23, %s6821_s22  ;;  %v5446_v46 = vpop.f32.mrb[4].mxu1 }
 0x249   : > { %v874_v1 = vpop.f32.mrb[5].mxu1  ;;  %v1101_v58 = vpack.c.bf16 %v806_v57, %v802_v55  ;;  %v7252_v7 = vpack.i.bf16 %v806_v57, %v802_v55  ;;  %v883_v20 = vadd.f32 %v5446_v46, %v7240_v54 }
 0x24a   : > { %v5447_v53 = vpop.f32.mrb[6].mxu1  ;;  %v7254_v9 = vpack.i.bf16 %v808_v47, %v804_v61  ;;  %v1293_v16 = vpack.c.bf16 %v808_v47, %v804_v61  ;;  %v875_v40 = vadd.f32 %v874_v1, %v7240_v54 }
 0x24b   : > { %v886_v63 = vadd.f32 %v5447_v53, %v7240_v54  ;;  %v877_v29 = vpop.f32.mrb[7].mxu1  ;;  %5484 = vmatprep.mubr.msk.bf16.mxu0 %vm428_vm0, %v1101_v58 }
 0x24c   : > { %v878_v43 = vadd.f32 %v877_v29, %v7240_v54  ;;  %5891 = vrot.lane.b32.xlu0 %v7157_v25, %s6822_s23  ;;  %5876 = vrot.lane.b32.xlu1 %v7254_v9, %s6821_s22  ;;  %v811_v48 = vpop.f32.mrb[20].mxu0  ;;  %v1615_v44 = vsel %vm428_vm0, %v1293_v16, 0 }
 0x24d   : > { %5469 = vmatmul.mubr.msk.bf16.vlgmr.msra.gmra.mrb[20].mxu1 %vm428_vm0, %v1098_v24  ;;  %5820 = vmatprep.subr.msk.bf16.mxu0 %vm428_vm0, %v1293_v16  ;;  %v813_v51 = vpop.f32.mrb[21].mxu0  ;;  %v7271_v15 = vpack.i.bf16 %v886_v63, %v883_v20  ;;  %v7274_v50 = vadd.f32 %v811_v48, %v7146_v0  ;;  %v7291_v42 = vpack.c.bf16 %v886_v63, %v883_v20 }
 0x24e   : > { %5472 = vmatprep.mubr.msk.bf16.mxu1 %vm428_vm0, %v1099_v30  ;;  %5477 = vmatpush3.bf16.xpose.msra.mxu0 %v1615_v44  ;;  %v815_v55 = vpop.f32.mrb[22].mxu0  ;;  %v7280_v57 = vpack.i.bf16 %v878_v43, %v875_v40  ;;  %v7285_v24 = vpack.c.bf16 %v878_v43, %v875_v40  ;;  %v814_v60 = vadd.f32 %v813_v51, %v7149_v6 }
 0x24f   : > { %v7283_v62 = vadd.f32 %v815_v55, %v7146_v0  ;;  %v817_v41 = vpop.f32.mrb[23].mxu0 }
 0x250   : > { %v818_v61 = vadd.f32 %v817_v41, %v7149_v6  ;;  %v5450_v47 = vpop.f32.mrb[8].mxu1  ;;  %5906 = vrot.lane.b32.xlu0 %v7242_v13, %s6821_s22 }
 0x251   : > { %v1102_v10 = vpack.c.bf16 %v7283_v62, %v7274_v50  ;;  %v890_v30 = vpop.f32.mrb[9].mxu1  ;;  %v7297_v46 = vpack.i.bf16 %v7283_v62, %v7274_v50  ;;  %v899_v16 = vadd.f32 %v5450_v47, %v7240_v54 }
 0x252   : > { %v5451_v1 = vpop.f32.mrb[10].mxu1  ;;  %v7299_v58 = vpack.i.bf16 %v818_v61, %v814_v60  ;;  %v1294_v53 = vpack.c.bf16 %v818_v61, %v814_v60  ;;  %v891_v20 = vadd.f32 %v890_v30, %v7240_v54 }
 0x253   : > { %v902_v29 = vadd.f32 %v5451_v1, %v7240_v54  ;;  %v893_v40 = vpop.f32.mrb[11].mxu1 }
 0x254   : > { %v894_v63 = vadd.f32 %v893_v40, %v7240_v54  ;;  %5896 = vrot.lane.b32.xlu1 %v7299_v58, %s6821_s22  ;;  %v821_v43 = vpop.f32.mrb[24].mxu0  ;;  %5821 = vmatprep.subr.msk.bf16.mxu0 %vm428_vm0, %v1294_v53  ;;  %v1618_v48 = vsel %vm428_vm0, %v1294_v53, 0 }
 0x255   : > { %v7310_v44 = vadd.f32 %v821_v43, %v7146_v0  ;;  %5473 = vmatmul.mubr.msk.bf16.gmra.mrb[24].mxu1 %vm428_vm0, %v1100_v19  ;;  %5921 = vrot.lane.b32.xlu0 %v7252_v7, %s6821_s22  ;;  %v823_v51 = vpop.f32.mrb[25].mxu0  ;;  %v7318_v55 = vpack.i.bf16 %v902_v29, %v899_v16  ;;  %v7325_v1 = vpack.c.bf16 %v902_v29, %v899_v16 }
 0x256   : > { %5479 = vmatpush3.bf16.xpose.msra.mxu0 %v1618_v48  ;;  %v825_v41 = vpop.f32.mrb[26].mxu0  ;;  %v7320_v60 = vpack.i.bf16 %v894_v63, %v891_v20  ;;  %v7323_v30 = vpack.c.bf16 %v894_v63, %v891_v20  ;;  %v824_v59 = vadd.f32 %v823_v51, %v7149_v6 }
 0x257   : > { %v826_v61 = vadd.f32 %v825_v41, %v7146_v0  ;;  %v827_v47 = vpop.f32.mrb[27].mxu0 }
 0x258   : > { %v828_v38 = vadd.f32 %v827_v47, %v7149_v6  ;;  %5901 = vrot.lane.b32.xlu1 %v7176_v49, %s6821_s22  ;;  %v5454_v19 = vpop.f32.mrb[12].mxu1 }
 0x259   : > { %5931 = vrot.lane.b32.xlu0 %v7254_v9, %s6822_s23  ;;  %v906_v53 = vpop.f32.mrb[13].mxu1  ;;  %v7334_v40 = vpack.i.bf16 %v826_v61, %v7310_v44  ;;  %v1103_v0 = vpack.c.bf16 %v826_v61, %v7310_v44  ;;  %v915_v63 = vadd.f32 %v5454_v19, %v7240_v54 }
 0x25a   : > { %v5455_v20 = vpop.f32.mrb[14].mxu1  ;;  %v5910_v16 = vpack.i.bf16 %v828_v38, %v824_v59  ;;  %v1295_v29 = vpack.c.bf16 %v828_v38, %v824_v59  ;;  %v907_v48 = vadd.f32 %v906_v53, %v7240_v54 }
 0x25b   : > { %v918_v6 = vadd.f32 %v5455_v20, %v7240_v54  ;;  %v909_v43 = vpop.f32.mrb[15].mxu1 }
 0x25c   : > { %v910_v51 = vadd.f32 %v909_v43, %v7240_v54  ;;  %5911 = vrot.lane.b32.xlu1 %v5910_v16, %s6821_s22  ;;  %5822 = vmatprep.subr.msk.bf16.mxu0 %vm428_vm0, %v1295_v29  ;;  %v1621_v41 = vsel %vm428_vm0, %v1295_v29, 0 }
 0x25d   : > { %5941 = vrot.lane.b32.xlu0 %v7196_v39, %s6821_s22  ;;  %v7346_v44 = vpack.i.bf16 %v918_v6, %v915_v63  ;;  %v7348_v61 = vpack.c.bf16 %v918_v6, %v915_v63 }
 0x25e   : > { %5481 = vmatpush3.bf16.xpose.msra.mxu0 %v1621_v41  ;;  %v7350_v47 = vpack.i.bf16 %v910_v51, %v907_v48  ;;  %v7352_v59 = vpack.c.bf16 %v910_v51, %v907_v48  ;;  %v1624_v48 = vsel %vm428_vm0, %v7244_v33, 0 }
 0x25f   : > { %8983 = vst [vmem:[#allocation18_spill] sm:$0xff] %v7346_v44  ;;  %8984 = vst [vmem:[#allocation19_spill] sm:$0xff] %v7348_v61  ;;  %5823 = vmatprep.subr.msk.bf16.mxu0 %vm428_vm0, %v7244_v33 }
 0x260   : > { %8985 = vst [vmem:[#allocation20_spill] sm:$0xff] %v7350_v47  ;;  %8986 = vst [vmem:[#allocation21_spill] sm:$0xff] %v7352_v59  ;;  %5916 = vrot.lane.b32.xlu1 %v7178_v52, %s6822_s23  ;;  %v5458_v38 = vpop.f32.mrb[16].mxu1 }
 0x261   : > { %5951 = vrot.lane.b32.xlu0 %v7299_v58, %s6822_s23  ;;  %v922_v19 = vpop.f32.mrb[17].mxu1  ;;  %v931_v20 = vadd.f32 %v5458_v38, %v7240_v54 }
 0x262   : > { %v5459_v53 = vpop.f32.mrb[18].mxu1  ;;  %v923_v6 = vadd.f32 %v922_v19, %v7240_v54 }
 0x263   : > { %v934_v29 = vadd.f32 %v5459_v53, %v7240_v54  ;;  %v925_v63 = vpop.f32.mrb[19].mxu1 }
 0x264   : > { %v926_v43 = vadd.f32 %v925_v63, %v7240_v54  ;;  %5926 = vrot.lane.b32.xlu1 %v7198_v34, %s6822_s23 }
 0x265   : > { %5961 = vrot.lane.b32.xlu0 %v7155_v23, %s6822_s23  ;;  %v7370_v51 = vpack.i.bf16 %v934_v29, %v931_v20  ;;  %v7372_v41 = vpack.c.bf16 %v934_v29, %v931_v20 }
 0x266   : > { %5483 = vmatpush3.bf16.xpose.msra.mxu0 %v1624_v48  ;;  %v7374_v38 = vpack.i.bf16 %v926_v43, %v923_v6  ;;  %v7376_v53 = vpack.c.bf16 %v926_v43, %v923_v6 }
 0x267   : > { %8987 = vst [vmem:[#allocation22_spill] sm:$0xff] %v7370_v51  ;;  %8988 = vst [vmem:[#allocation23_spill] sm:$0xff] %v7372_v41 }
 0x268   : > { %8989 = vst [vmem:[#allocation24_spill] sm:$0xff] %v7374_v38  ;;  %8990 = vst [vmem:[#allocation25_spill] sm:$0xff] %v7376_v53  ;;  %5936 = vrot.lane.b32.xlu1 %v7297_v46, %s6821_s22 }
 0x269   : > { %5966 = vrot.lane.b32.xlu0 %v7157_v25, %s6823_s24 }
 0x26c   : > { %5946 = vrot.lane.b32.xlu1 %v7221_v28, %s6822_s23 }
 0x26d   : > { %5976 = vrot.lane.b32.xlu0 %v7334_v40, %s6821_s22  ;;  %5485 = vmatmul.mubr.msk.bf16.vlgmr.msra.gmra.mrb[28].mxu0 %vm428_vm0, %v1102_v10 }
 0x26e   : > { %5488 = vmatprep.mubr.msk.bf16.mxu0 %vm428_vm0, %v1103_v0 }
 0x270   : > { %5956 = vrot.lane.b32.xlu1 %v7219_v8, %s6821_s22 }
 0x271   : > { %5986 = vrot.lane.b32.xlu0 %v7178_v52, %s6823_s24 }
 0x274   : > { %5971 = vrot.lane.b32.xlu1 %v7176_v49, %s6822_s23 }
 0x275   : > { %6001 = vrot.lane.b32.xlu0 %v7252_v7, %s6822_s23  ;;  %5489 = vmatmul.mubr.msk.bf16.gmra.mrb[32].mxu0 %vm428_vm0, %v1104_v56 }
 0x278   : > { %5981 = vrot.lane.b32.xlu1 %v7242_v13, %s6822_s23 }
 0x279   : > { %6011 = vrot.lane.b32.xlu0 %v7254_v9, %s6823_s24 }
 0x27c   : > { %5991 = vrot.lane.b32.xlu1 %v5910_v16, %s6822_s23 }
 0x27d   : > { %6021 = vrot.lane.b32.xlu0 %v7196_v39, %s6822_s23 }
 0x280   : > { %5996 = vrot.lane.b32.xlu1 %v7237_v14, %s6821_s22 }
 0x281   : > { %6031 = vrot.lane.b32.xlu0 %v7221_v28, %s6823_s24 }
 0x284   : > { %6006 = vrot.lane.b32.xlu1 %v7198_v34, %s6823_s24 }
 0x285   : > { %6041 = vrot.lane.b32.xlu0 %v7155_v23, %s6823_s24 }
 0x288   : > { %6016 = vrot.lane.b32.xlu1 %v7297_v46, %s6822_s23 }
 0x289   : > { %6056 = vrot.lane.b32.xlu0 %v5910_v16, %s6823_s24 }
 0x28c   : > { %6026 = vrot.lane.b32.xlu1 %v7219_v8, %s6822_s23 }
 0x28d   : > { %6061 = vrot.lane.b32.xlu0 %v7196_v39, %s6823_s24 }
 0x290   : > { %6036 = vrot.lane.b32.xlu1 %v7299_v58, %s6823_s24 }
 0x291   : > { %6071 = vrot.lane.b32.xlu0 %v7219_v8, %s6823_s24 }
 0x294   : > { %6046 = vrot.lane.b32.xlu1 %v7176_v49, %s6823_s24 }
 0x295   : > { %6081 = vrot.lane.b32.xlu0 %v7252_v7, %s6823_s24 }
 0x298   : > { %6051 = vrot.lane.b32.xlu1 %v7334_v40, %s6822_s23 }
 0x299   : > { %6091 = vrot.lane.b32.xlu0 %v7334_v40, %s6823_s24 }
 0x29c   : > { %6066 = vrot.lane.b32.xlu1 %v7237_v14, %s6822_s23 }
 0x29d   : > { %6101 = vrot.lane.b32.xlu0 %v7280_v57, %s6821_s22 }
 0x29e   : > { %v5862_v23 = vpop.permute.xlu0 %5861 }
 0x29f   : > { %v5864_v25 = vunpack.i.h.bf16 %v5862_v23  ;;  %v5863_v52 = vunpack.i.l.bf16 %v5862_v23 }
 0x2a0   : > { %6076 = vrot.lane.b32.xlu1 %v7242_v13, %s6823_s24 }
 0x2a1   : > { %v1297_v49 = vpack.c.bf16 %v5864_v25, %v5863_v52  ;;  %6111 = vrot.lane.b32.xlu0 %v7320_v60, %s6821_s22 }
 0x2a3   : > { %5824 = vmatprep.subr.msk.bf16.mxu1 %vm428_vm0, %v1297_v49  ;;  %v1704_v39 = vsel %vm428_vm0, %v1297_v49, 0 }
 0x2a4   : > { %6086 = vrot.lane.b32.xlu1 %v7297_v46, %s6823_s24  ;;  %5493 = vmatpush3.bf16.xpose.msra.mxu1 %v1704_v39 }
 0x2a5   : > { %6121 = vrot.lane.b32.xlu0 %v7350_v47, %s6821_s22 }
 0x2a6   : > { %v5867_v34 = vpop.permute.xlu1 %5866 }
 0x2a7   : > { %v5869_v45 = vunpack.i.h.bf16 %v5867_v34  ;;  %v5868_v8 = vunpack.i.l.bf16 %v5867_v34 }
 0x2a8   : > { %6096 = vrot.lane.b32.xlu1 %v7237_v14, %s6823_s24 }
 0x2a9   : > { %v1298_v28 = vpack.c.bf16 %v5869_v45, %v5868_v8  ;;  %6141 = vrot.lane.b32.xlu0 %v7374_v38, %s6821_s22 }
 0x2ab   : > { %5825 = vmatprep.subr.msk.bf16.mxu1 %vm428_vm0, %v1298_v28  ;;  %v1707_v35 = vsel %vm428_vm0, %v1298_v28, 0 }
 0x2ac   : > { %6106 = vrot.lane.b32.xlu1 %v7271_v15, %s6821_s22  ;;  %5495 = vmatpush3.bf16.xpose.msra.mxu1 %v1707_v35 }
 0x2ad   : > { %6161 = vrot.lane.b32.xlu0 %v7350_v47, %s6822_s23 }
 0x2ae   : > { %v5872_v56 = vpop.permute.xlu1 %5871 }
 0x2af   : > { %v5874_v54 = vunpack.i.h.bf16 %v5872_v56  ;;  %v5873_v13 = vunpack.i.l.bf16 %v5872_v56 }
 0x2b0   : > { %6116 = vrot.lane.b32.xlu1 %v7318_v55, %s6821_s22 }
 0x2b1   : > { %v1299_v14 = vpack.c.bf16 %v5874_v54, %v5873_v13  ;;  %6181 = vrot.lane.b32.xlu0 %v7374_v38, %s6822_s23 }
 0x2b3   : > { %5826 = vmatprep.subr.msk.bf16.mxu1 %vm428_vm0, %v1299_v14  ;;  %v1710_v33 = vsel %vm428_vm0, %v1299_v14, 0 }
 0x2b4   : > { %6126 = vrot.lane.b32.xlu1 %v7280_v57, %s6822_s23  ;;  %5497 = vmatpush3.bf16.xpose.msra.mxu1 %v1710_v33 }
 0x2b6   : > { %v5882_v7 = vpop.permute.xlu0 %5881 }
 0x2b7   : > { %v5884_v9 = vunpack.i.h.bf16 %v5882_v7  ;;  %v5883_v50 = vunpack.i.l.bf16 %v5882_v7 }
 0x2b8   : > { %6131 = vrot.lane.b32.xlu1 %v7346_v44, %s6821_s22 }
 0x2b9   : > { %v1300_v62 = vpack.c.bf16 %v5884_v9, %v5883_v50 }
 0x2ba   : > { %v5887_v10 = vpop.permute.xlu0 %5886 }
 0x2bb   : > { %v5889_v46 = vunpack.i.h.bf16 %v5887_v10  ;;  %v5888_v58 = vunpack.i.l.bf16 %v5887_v10  ;;  %5827 = vmatprep.subr.msk.bf16.mxu1 %vm428_vm0, %v1300_v62  ;;  %v1713_v40 = vsel %vm428_vm0, %v1300_v62, 0 }
 0x2bc   : > { %6136 = vrot.lane.b32.xlu1 %v7271_v15, %s6822_s23  ;;  %5499 = vmatpush3.bf16.xpose.msra.mxu1 %v1713_v40 }
 0x2bd   : > { %v1105_v0 = vpack.c.bf16 %v5889_v46, %v5888_v58 }
 0x2be   : > { %v5877_v16 = vpop.permute.xlu1 %5876  ;;  %v5892_v19 = vpop.permute.xlu0 %5891 }
 0x2bf   : > { %v5879_v20 = vunpack.i.h.bf16 %v5877_v16  ;;  %v5878_v29 = vunpack.i.l.bf16 %v5877_v16  ;;  %v5894_v63 = vunpack.i.h.bf16 %v5892_v19  ;;  %v5893_v6 = vunpack.i.l.bf16 %v5892_v19  ;;  %5500 = vmatprep.mubr.msk.bf16.mxu1 %vm428_vm0, %v1105_v0 }
 0x2c0   : > { %6146 = vrot.lane.b32.xlu1 %v7320_v60, %s6822_s23 }
 0x2c1   : > { %v1301_v43 = vpack.c.bf16 %v5879_v20, %v5878_v29  ;;  %v1305_v48 = vpack.c.bf16 %v5894_v63, %v5893_v6 }
 0x2c2   : > { %v5907_v23 = vpop.permute.xlu0 %5906 }
 0x2c3   : > { %5828 = vmatprep.subr.msk.bf16.mxu0 %vm428_vm0, %v1301_v43  ;;  %5832 = vmatprep.subr.msk.bf16.mxu1 %vm428_vm0, %v1305_v48  ;;  %v1793_v25 = vsel %vm428_vm0, %v1301_v43, 0  ;;  %v5909_v9 = vunpack.i.h.bf16 %v5907_v23  ;;  %v5908_v62 = vunpack.i.l.bf16 %v5907_v23  ;;  %v1882_v40 = vsel %vm428_vm0, %v1305_v48, 0 }
 0x2c4   : > { %5509 = vmatpush3.bf16.xpose.msra.mxu0 %v1793_v25  ;;  %6151 = vrot.lane.b32.xlu1 %v7370_v51, %s6821_s22 }
 0x2c6   : > { %v5897_v52 = vpop.permute.xlu1 %5896 }
 0x2c7   : > { %v5899_v49 = vunpack.i.h.bf16 %v5897_v52  ;;  %v5898_v39 = vunpack.i.l.bf16 %v5897_v52  ;;  %v5922_v34 = vpop.permute.xlu0 %5921 }
 0x2c8   : > { %v5924_v45 = vunpack.i.h.bf16 %v5922_v34  ;;  %v5923_v8 = vunpack.i.l.bf16 %v5922_v34  ;;  %6156 = vrot.lane.b32.xlu1 %v7318_v55, %s6822_s23 }
 0x2c9   : > { %v1302_v28 = vpack.c.bf16 %v5899_v49, %v5898_v39 }
 0x2ca   : > { %v1109_v35 = vpack.c.bf16 %v5924_v45, %v5923_v8  ;;  %v5902_v56 = vpop.permute.xlu1 %5901 }
 0x2cb   : > { %v5904_v54 = vunpack.i.h.bf16 %v5902_v56  ;;  %v5903_v13 = vunpack.i.l.bf16 %v5902_v56  ;;  %v5932_v14 = vpop.permute.xlu0 %5931  ;;  %5829 = vmatprep.subr.msk.bf16.mxu0 %vm428_vm0, %v1302_v28  ;;  %v1796_v33 = vsel %vm428_vm0, %v1302_v28, 0 }
 0x2cc   : > { %5516 = vmatprep.mubr.msk.bf16.mxu0 %vm428_vm0, %v1109_v35  ;;  %5511 = vmatpush3.bf16.xpose.msra.mxu0 %v1796_v33  ;;  %v5934_v25 = vunpack.i.h.bf16 %v5932_v14  ;;  %v5933_v49 = vunpack.i.l.bf16 %v5932_v14 }
 0x2cd   : > { %v1106_v7 = vpack.c.bf16 %v5904_v54, %v5903_v13  ;;  %6166 = vrot.lane.b32.xlu1 %v7280_v57, %s6823_s24  ;;  %v1304_v57 = vpack.c.bf16 %v5909_v9, %v5908_v62 }
 0x2ce   : > { %v5912_v50 = vpop.permute.xlu1 %5911  ;;  %v1309_v56 = vpack.c.bf16 %v5934_v25, %v5933_v49 }
 0x2cf   : > { %v5914_v10 = vunpack.i.h.bf16 %v5912_v50  ;;  %v5913_v46 = vunpack.i.l.bf16 %v5912_v50  ;;  %v5942_v58 = vpop.permute.xlu0 %5941  ;;  %5501 = vmatmul.mubr.msk.bf16.vlgmr.msra.gmra.mrb[28].mxu1 %vm428_vm0, %v1106_v7  ;;  %v1802_v54 = vsel %vm428_vm0, %v1304_v57, 0 }
 0x2d0   : > { %v5944_v0 = vunpack.i.h.bf16 %v5942_v58  ;;  %v5943_v16 = vunpack.i.l.bf16 %v5942_v58  ;;  %5525 = vmatpush3.bf16.xpose.msra.mxu1 %v1882_v40 }
 0x2d1   : > { %v1303_v19 = vpack.c.bf16 %v5914_v10, %v5913_v46  ;;  %6171 = vrot.lane.b32.xlu1 %v7346_v44, %s6822_s23 }
 0x2d2   : > { %v1107_v20 = vpack.c.bf16 %v5944_v0, %v5943_v16  ;;  %v5917_v29 = vpop.permute.xlu1 %5916  ;;  %v1971_v16 = vsel %vm428_vm0, %v1309_v56, 0 }
 0x2d3   : > { %v5919_v63 = vunpack.i.h.bf16 %v5917_v29  ;;  %v5918_v6 = vunpack.i.l.bf16 %v5917_v29  ;;  %v5952_v43 = vpop.permute.xlu0 %5951  ;;  %5830 = vmatprep.subr.msk.bf16.mxu0 %vm428_vm0, %v1303_v19  ;;  %v1799_v23 = vsel %vm428_vm0, %v1303_v19, 0 }
 0x2d4   : > { %5504 = vmatprep.mubr.msk.bf16.mxu1 %vm428_vm0, %v1107_v20  ;;  %5513 = vmatpush3.bf16.xpose.msra.mxu0 %v1799_v23  ;;  %v5954_v33 = vunpack.i.h.bf16 %v5952_v43  ;;  %v5953_v7 = vunpack.i.l.bf16 %v5952_v43 }
 0x2d5   : > { %v1306_v48 = vpack.c.bf16 %v5919_v63, %v5918_v6  ;;  %6176 = vrot.lane.b32.xlu1 %v7271_v15, %s6823_s24  ;;  %5831 = vmatprep.subr.msk.bf16.mxu0 %vm428_vm0, %v1304_v57 }
 0x2d6   : > { %v5927_v52 = vpop.permute.xlu1 %5926  ;;  %v1310_v19 = vpack.c.bf16 %v5954_v33, %v5953_v7 }
 0x2d7   : > { %v5929_v39 = vunpack.i.h.bf16 %v5927_v52  ;;  %v5928_v34 = vunpack.i.l.bf16 %v5927_v52  ;;  %v5962_v45 = vpop.permute.xlu0 %5961  ;;  %5833 = vmatprep.subr.msk.bf16.mxu1 %vm428_vm0, %v1306_v48  ;;  %v1885_v8 = vsel %vm428_vm0, %v1306_v48, 0 }
 0x2d8   : > { %5527 = vmatpush3.bf16.xpose.msra.mxu1 %v1885_v8  ;;  %v5964_v20 = vunpack.i.h.bf16 %v5962_v45  ;;  %v5963_v29 = vunpack.i.l.bf16 %v5962_v45 }
 0x2d9   : > { %v1307_v28 = vpack.c.bf16 %v5929_v39, %v5928_v34  ;;  %6186 = vrot.lane.b32.xlu1 %v7320_v60, %s6823_s24 }
 0x2da   : > { %v5937_v35 = vpop.permute.xlu1 %5936  ;;  %v1113_v52 = vpack.c.bf16 %v5964_v20, %v5963_v29 }
 0x2db   : > { %v5967_v15 = vpop.permute.xlu0 %5966  ;;  %5834 = vmatprep.subr.msk.bf16.mxu1 %vm428_vm0, %v1307_v28  ;;  %v5939_v13 = vunpack.i.h.bf16 %v5937_v35  ;;  %v5938_v14 = vunpack.i.l.bf16 %v5937_v35  ;;  %v1888_v10 = vsel %vm428_vm0, %v1307_v28, 0 }
 0x2dc   : > { %5515 = vmatpush3.bf16.xpose.msra.mxu0 %v1802_v54  ;;  %v5969_v6 = vunpack.i.h.bf16 %v5967_v15  ;;  %v5968_v43 = vunpack.i.l.bf16 %v5967_v15 }
 0x2dd   : > { %6191 = vrot.lane.b32.xlu1 %v7370_v51, %s6822_s23  ;;  %5836 = vmatprep.subr.msk.bf16.mxu0 %vm428_vm0, %v1309_v56  ;;  %v1110_v40 = vpack.c.bf16 %v5939_v13, %v5938_v14  ;;  %v1974_v13 = vsel %vm428_vm0, %v1310_v19, 0 }
 0x2de   : > { %v5947_v9 = vpop.permute.xlu1 %5946  ;;  %v1313_v39 = vpack.c.bf16 %v5969_v6, %v5968_v43 }
 0x2df   : > { %v5949_v50 = vunpack.i.h.bf16 %v5947_v9  ;;  %v5948_v60 = vunpack.i.l.bf16 %v5947_v9  ;;  %v5977_v62 = vpop.permute.xlu0 %5976 }
 0x2e0   : > { %v5979_v46 = vunpack.i.h.bf16 %v5977_v62  ;;  %v5978_v58 = vunpack.i.l.bf16 %v5977_v62  ;;  %5529 = vmatpush3.bf16.xpose.msra.mxu1 %v1888_v10  ;;  %v2060_v9 = vsel %vm428_vm0, %v1313_v39, 0 }
 0x2e1   : > { %v1308_v0 = vpack.c.bf16 %v5949_v50, %v5948_v60  ;;  %6196 = vrot.lane.b32.xlu1 %v7318_v55, %s6823_s24 }
 0x2e2   : > { %v1111_v57 = vpack.c.bf16 %v5979_v46, %v5978_v58  ;;  %v5957_v63 = vpop.permute.xlu1 %5956 }
 0x2e3   : > { %v5959_v23 = vunpack.i.h.bf16 %v5957_v63  ;;  %v5958_v48 = vunpack.i.l.bf16 %v5957_v63  ;;  %v5987_v25 = vpop.permute.xlu0 %5986  ;;  %5517 = vmatmul.mubr.msk.bf16.vlgmr.msra.gmra.mrb[36].mxu0 %vm428_vm0, %v1110_v40  ;;  %5835 = vmatprep.subr.msk.bf16.mxu1 %vm428_vm0, %v1308_v0  ;;  %v1891_v45 = vsel %vm428_vm0, %v1308_v0, 0 }
 0x2e4   : > { %5520 = vmatprep.mubr.msk.bf16.mxu0 %vm428_vm0, %v1111_v57  ;;  %5541 = vmatpush3.bf16.xpose.msra.mxu0 %v1971_v16  ;;  %v5989_v35 = vunpack.i.h.bf16 %v5987_v25  ;;  %v5988_v56 = vunpack.i.l.bf16 %v5987_v25 }
 0x2e5   : > { %v1108_v55 = vpack.c.bf16 %v5959_v23, %v5958_v48  ;;  %5837 = vmatprep.subr.msk.bf16.mxu0 %vm428_vm0, %v1310_v19 }
 0x2e6   : > { %v5972_v49 = vpop.permute.xlu1 %5971  ;;  %v1314_v33 = vpack.c.bf16 %v5989_v35, %v5988_v56 }
 0x2e7   : > { %v6002_v34 = vpop.permute.xlu0 %6001  ;;  %5505 = vmatmul.mubr.msk.bf16.gmra.mrb[32].mxu1 %vm428_vm0, %v1108_v55  ;;  %v5974_v8 = vunpack.i.h.bf16 %v5972_v49  ;;  %v5973_v28 = vunpack.i.l.bf16 %v5972_v49 }
 0x2e8   : > { %5531 = vmatpush3.bf16.xpose.msra.mxu1 %v1891_v45  ;;  %5532 = vmatprep.mubr.msk.bf16.mxu1 %vm428_vm0, %v1113_v52  ;;  %v6004_v16 = vunpack.i.h.bf16 %v6002_v34  ;;  %v6003_v19 = vunpack.i.l.bf16 %v6002_v34  ;;  %v2063_v52 = vsel %vm428_vm0, %v1314_v33, 0 }
 0x2e9   : > { %5840 = vmatprep.subr.msk.bf16.mxu1 %vm428_vm0, %v1313_v39  ;;  %v1114_v14 = vpack.c.bf16 %v5974_v8, %v5973_v28 }
 0x2ea   : > { %v5982_v15 = vpop.permute.xlu1 %5981  ;;  %v1117_v25 = vpack.c.bf16 %v6004_v16, %v6003_v19 }
 0x2eb   : > { %v6012_v54 = vpop.permute.xlu0 %6011  ;;  %v5984_v50 = vunpack.i.h.bf16 %v5982_v15  ;;  %v5983_v60 = vunpack.i.l.bf16 %v5982_v15 }
 0x2ec   : > { %5543 = vmatpush3.bf16.xpose.msra.mxu0 %v1974_v13  ;;  %v6014_v49 = vunpack.i.h.bf16 %v6012_v54  ;;  %v6013_v39 = vunpack.i.l.bf16 %v6012_v54 }
 0x2ed   : > { %v1312_v57 = vpack.c.bf16 %v5984_v50, %v5983_v60 }
 0x2ee   : > { %v5992_v7 = vpop.permute.xlu1 %5991  ;;  %v1317_v56 = vpack.c.bf16 %v6014_v49, %v6013_v39 }
 0x2ef   : > { %v5994_v62 = vunpack.i.h.bf16 %v5992_v7  ;;  %v5993_v10 = vunpack.i.l.bf16 %v5992_v7  ;;  %v6022_v46 = vpop.permute.xlu0 %6021  ;;  %5533 = vmatmul.mubr.msk.bf16.vlgmr.msra.gmra.mrb[36].mxu1 %vm428_vm0, %v1114_v14 }
 0x2f0   : > { %v6024_v58 = vunpack.i.h.bf16 %v6022_v46  ;;  %v6023_v40 = vunpack.i.l.bf16 %v6022_v46  ;;  %5557 = vmatpush3.bf16.xpose.msra.mxu1 %v2060_v9 }
 0x2f1   : > { %v1311_v0 = vpack.c.bf16 %v5994_v62, %v5993_v10  ;;  %5841 = vmatprep.subr.msk.bf16.mxu1 %vm428_vm0, %v1314_v33  ;;  %v1980_v33 = vsel %vm428_vm0, %v1312_v57, 0 }
 0x2f2   : > { %v1115_v20 = vpack.c.bf16 %v6024_v58, %v6023_v40  ;;  %v5997_v29 = vpop.permute.xlu1 %5996 }
 0x2f3   : > { %v5999_v63 = vunpack.i.h.bf16 %v5997_v29  ;;  %v5998_v6 = vunpack.i.l.bf16 %v5997_v29  ;;  %v6032_v43 = vpop.permute.xlu0 %6031  ;;  %5838 = vmatprep.subr.msk.bf16.mxu0 %vm428_vm0, %v1311_v0  ;;  %v1977_v23 = vsel %vm428_vm0, %v1311_v0, 0 }
 0x2f4   : > { %5536 = vmatprep.mubr.msk.bf16.mxu1 %vm428_vm0, %v1115_v20  ;;  %5545 = vmatpush3.bf16.xpose.msra.mxu0 %v1977_v23  ;;  %v6034_v15 = vunpack.i.h.bf16 %v6032_v43  ;;  %v6033_v13 = vunpack.i.l.bf16 %v6032_v43 }
 0x2f5   : > { %v1112_v48 = vpack.c.bf16 %v5999_v63, %v5998_v6  ;;  %5839 = vmatprep.subr.msk.bf16.mxu0 %vm428_vm0, %v1312_v57  ;;  %v2149_v6 = vsel %vm428_vm0, %v1317_v56, 0 }
 0x2f6   : > { %v6007_v55 = vpop.permute.xlu1 %6006  ;;  %v1316_v62 = vpack.c.bf16 %v6034_v15, %v6033_v13 }
 0x2f7   : > { %v6009_v34 = vunpack.i.h.bf16 %v6007_v55  ;;  %v6008_v45 = vunpack.i.l.bf16 %v6007_v55  ;;  %v6042_v8 = vpop.permute.xlu0 %6041  ;;  %5521 = vmatmul.mubr.msk.bf16.gmra.mrb[40].mxu0 %vm428_vm0, %v1112_v48 }
 0x2f8   : > { %5548 = vmatprep.mubr.msk.bf16.mxu0 %vm428_vm0, %v1117_v25  ;;  %5559 = vmatpush3.bf16.xpose.msra.mxu1 %v2063_v52  ;;  %v6044_v9 = vunpack.i.h.bf16 %v6042_v8  ;;  %v6043_v50 = vunpack.i.l.bf16 %v6042_v8  ;;  %v2069_v55 = vsel %vm428_vm0, %v1316_v62, 0 }
 0x2f9   : > { %v1315_v28 = vpack.c.bf16 %v6009_v34, %v6008_v45 }
 0x2fa   : > { %v6017_v35 = vpop.permute.xlu1 %6016  ;;  %v1121_v19 = vpack.c.bf16 %v6044_v9, %v6043_v50 }
 0x2fb   : > { %v6057_v14 = vpop.permute.xlu0 %6056  ;;  %5842 = vmatprep.subr.msk.bf16.mxu1 %vm428_vm0, %v1315_v28  ;;  %v6019_v54 = vunpack.i.h.bf16 %v6017_v35  ;;  %v6018_v7 = vunpack.i.l.bf16 %v6017_v35  ;;  %v2066_v40 = vsel %vm428_vm0, %v1315_v28, 0 }
 0x2fc   : > { %5547 = vmatpush3.bf16.xpose.msra.mxu0 %v1980_v33  ;;  %v6059_v48 = vunpack.i.h.bf16 %v6057_v14  ;;  %v6058_v25 = vunpack.i.l.bf16 %v6057_v14 }
 0x2fd   : > { %5844 = vmatprep.subr.msk.bf16.mxu0 %vm428_vm0, %v1317_v56  ;;  %v1118_v0 = vpack.c.bf16 %v6019_v54, %v6018_v7 }
 0x2fe   : > { %v6027_v60 = vpop.permute.xlu1 %6026  ;;  %v1319_v28 = vpack.c.bf16 %v6059_v48, %v6058_v25 }
 0x2ff   : > { %v6029_v10 = vunpack.i.h.bf16 %v6027_v60  ;;  %v6028_v46 = vunpack.i.l.bf16 %v6027_v60  ;;  %v6062_v58 = vpop.permute.xlu0 %6061 }
 0x300   : > { %5561 = vmatpush3.bf16.xpose.msra.mxu1 %v2066_v40  ;;  %v6064_v34 = vunpack.i.h.bf16 %v6062_v58  ;;  %v6063_v45 = vunpack.i.l.bf16 %v6062_v58 }
 0x301   : > { %v1116_v16 = vpack.c.bf16 %v6029_v10, %v6028_v46  ;;  %5843 = vmatprep.subr.msk.bf16.mxu1 %vm428_vm0, %v1316_v62 }
 0x302   : > { %v6037_v20 = vpop.permute.xlu1 %6036  ;;  %v1123_v33 = vpack.c.bf16 %v6064_v34, %v6063_v45 }
 0x303   : > { %v6039_v29 = vunpack.i.h.bf16 %v6037_v20  ;;  %v6038_v57 = vunpack.i.l.bf16 %v6037_v20  ;;  %v6072_v63 = vpop.permute.xlu0 %6071  ;;  %5537 = vmatmul.mubr.msk.bf16.gmra.mrb[40].mxu1 %vm428_vm0, %v1116_v16  ;;  %5549 = vmatmul.mubr.msk.bf16.vlgmr.msra.gmra.mrb[44].mxu0 %vm428_vm0, %v1118_v0  ;;  %v2155_v20 = vsel %vm428_vm0, %v1319_v28, 0 }
 0x304   : > { %5564 = vmatprep.mubr.msk.bf16.mxu1 %vm428_vm0, %v1121_v19  ;;  %5573 = vmatpush3.bf16.xpose.msra.mxu0 %v2149_v6  ;;  %v6074_v10 = vunpack.i.h.bf16 %v6072_v63  ;;  %v6073_v46 = vunpack.i.l.bf16 %v6072_v63 }
 0x305   : > { %v1318_v43 = vpack.c.bf16 %v6039_v29, %v6038_v57 }
 0x306   : > { %v6047_v23 = vpop.permute.xlu1 %6046  ;;  %v1124_v57 = vpack.c.bf16 %v6074_v10, %v6073_v46 }
 0x307   : > { %5845 = vmatprep.subr.msk.bf16.mxu0 %vm428_vm0, %v1318_v43  ;;  %v6082_v52 = vpop.permute.xlu0 %6081  ;;  %v6049_v49 = vunpack.i.h.bf16 %v6047_v23  ;;  %v6048_v39 = vunpack.i.l.bf16 %v6047_v23  ;;  %v2152_v15 = vsel %vm428_vm0, %v1318_v43, 0 }
 0x308   : > { %5563 = vmatpush3.bf16.xpose.msra.mxu1 %v2069_v55  ;;  %v6084_v54 = vunpack.i.h.bf16 %v6082_v52  ;;  %v6083_v7 = vunpack.i.l.bf16 %v6082_v52 }
 0x309   : > { %5588 = vmatprep.subr.bf16.mxu1 %v7285_v24  ;;  %v1122_v13 = vpack.c.bf16 %v6049_v49, %v6048_v39 }
 0x30a   : > { %v6052_v8 = vpop.permute.xlu1 %6051  ;;  %v1125_v40 = vpack.c.bf16 %v6084_v54, %v6083_v7 }
 0x30b   : > { %v6054_v35 = vunpack.i.h.bf16 %v6052_v8  ;;  %v6053_v56 = vunpack.i.l.bf16 %v6052_v8  ;;  %v6092_v9 = vpop.permute.xlu0 %6091 }
 0x30c   : > { %5575 = vmatpush3.bf16.xpose.msra.mxu0 %v2152_v15  ;;  %v6094_v52 = vunpack.i.h.bf16 %v6092_v9  ;;  %v6093_v49 = vunpack.i.l.bf16 %v6092_v9 }
 0x30d   : > { %v1119_v14 = vpack.c.bf16 %v6054_v35, %v6053_v56  ;;  %5846 = vmatprep.subr.msk.bf16.mxu0 %vm428_vm0, %v1319_v28 }
 0x30e   : > { %v6067_v50 = vpop.permute.xlu1 %6066  ;;  %v1127_v15 = vpack.c.bf16 %v6094_v52, %v6093_v49 }
 0x30f   : > { %v6069_v60 = vunpack.i.h.bf16 %v6067_v50  ;;  %v6068_v62 = vunpack.i.l.bf16 %v6067_v50  ;;  %5552 = vmatprep.mubr.msk.bf16.mxu0 %vm428_vm0, %v1119_v14  ;;  %5565 = vmatmul.mubr.msk.bf16.vlgmr.msra.gmra.mrb[44].mxu1 %vm428_vm0, %v1122_v13  ;;  %v6102_v29 = vpop.permute.xlu0 %6101 }
 0x310   : > { %5568 = vmatprep.mubr.msk.bf16.mxu1 %vm428_vm0, %v1123_v33  ;;  %5589 = vmatpush3.bf16.msra.mxu1 %v7285_v24  ;;  %v6104_v63 = vunpack.i.h.bf16 %v6102_v29  ;;  %v6103_v43 = vunpack.i.l.bf16 %v6102_v29 }
 0x311   : > { %v1120_v58 = vpack.c.bf16 %v6069_v60, %v6068_v62  ;;  %5590 = vmatprep.subr.bf16.mxu1 %v7291_v42 }
 0x312   : > { %v6077_v0 = vpop.permute.xlu1 %6076  ;;  %v1489_v25 = vpack.c.bf16 %v6104_v63, %v6103_v43 }
 0x313   : > { %v6079_v16 = vunpack.i.h.bf16 %v6077_v0  ;;  %v6078_v19 = vunpack.i.l.bf16 %v6077_v0  ;;  %5553 = vmatmul.mubr.msk.bf16.gmra.mrb[48].mxu0 %vm428_vm0, %v1120_v58  ;;  %v6112_v45 = vpop.permute.xlu0 %6111 }
 0x314   : > { %5577 = vmatpush3.bf16.xpose.msra.mxu0 %v2155_v20  ;;  %5580 = vmatprep.mubr.msk.bf16.mxu0 %vm428_vm0, %v1125_v40  ;;  %v6114_v14 = vunpack.i.h.bf16 %v6112_v45  ;;  %v6113_v33 = vunpack.i.l.bf16 %v6112_v45 }
 0x315   : > { %v1320_v6 = vpack.c.bf16 %v6079_v16, %v6078_v19  ;;  %5591 = vmatpush3.bf16.msra.mxu1 %v7291_v42 }
 0x316   : > { %5592 = vmatprep.subr.bf16.mxu1 %v7323_v30  ;;  %v6087_v24 = vpop.permute.xlu1 %6086  ;;  %v1491_v58 = vpack.c.bf16 %v6114_v14, %v6113_v33 }
 0x317   : > { %5569 = vmatmul.mubr.msk.bf16.gmra.mrb[48].mxu1 %vm428_vm0, %v1124_v57  ;;  %5847 = vmatprep.subr.msk.bf16.mxu0 %vm428_vm0, %v1320_v6  ;;  %v2158_v48 = vsel %vm428_vm0, %v1320_v6, 0  ;;  %v6089_v55 = vunpack.i.h.bf16 %v6087_v24  ;;  %v6088_v42 = vunpack.i.l.bf16 %v6087_v24 }
 0x319   : > { %5593 = vmatpush3.bf16.msra.mxu1 %v7323_v30  ;;  %v1126_v28 = vpack.c.bf16 %v6089_v55, %v6088_v42 }
 0x31a   : > { %5594 = vmatprep.subr.bf16.mxu1 %v7325_v1  ;;  %v6097_v23 = vpop.permute.xlu1 %6096 }
 0x31b   : > { %v6099_v50 = vunpack.i.h.bf16 %v6097_v23  ;;  %v6098_v60 = vunpack.i.l.bf16 %v6097_v23 }
 0x31c   : > { %5579 = vmatpush3.bf16.xpose.msra.mxu0 %v2158_v48 }
 0x31d   : > { %5595 = vmatpush3.bf16.msra.mxu1 %v7325_v1  ;;  %5620 = vmatprep.subr.bf16.mxu0 %v1489_v25  ;;  %v1128_v16 = vpack.c.bf16 %v6099_v50, %v6098_v60 }
 0x31e   : > { %5604 = vmatprep.subr.bf16.mxu1 %v7352_v59  ;;  %v6107_v39 = vpop.permute.xlu1 %6106 }
 0x31f   : > { %v6109_v34 = vunpack.i.h.bf16 %v6107_v39  ;;  %v6108_v30 = vunpack.i.l.bf16 %v6107_v39 }
 0x320   : > { %v7563_v8 = vpop.f32.mrb[20].mxu1 }
 0x321   : > { %v7565_v35 = vpop.f32.mrb[21].mxu1  ;;  %v2232_v56 = vsel %vm2225_vm1, %v7563_v8, -inf  ;;  %v1490_v7 = vpack.c.bf16 %v6109_v34, %v6108_v30 }
 0x322   : > { %v7569_v1 = vpop.f32.mrb[22].mxu1  ;;  %2233 = vmax.xlane.f32.xlu0 %v2232_v56  ;;  %v6117_v13 = vpop.permute.xlu1 %6116  ;;  %v2226_v62 = vsel %vm2225_vm1, %v7565_v35, -inf }
 0x323   : > { %v7571_v54 = vpop.f32.mrb[23].mxu1  ;;  %5581 = vmatmul.mubr.msk.bf16.vlgmr.msra.gmra.mrb[52].mxu0 %vm428_vm0, %v1126_v28  ;;  %v6119_v10 = vunpack.i.h.bf16 %v6117_v13  ;;  %v6118_v46 = vunpack.i.l.bf16 %v6117_v13  ;;  %v2235_v20 = vsel %vm2225_vm1, %v7569_v1, -inf }
 0x324   : > { %v2229_v9 = vsel %vm2225_vm1, %v7571_v54, -inf  ;;  %5584 = vmatprep.mubr.msk.bf16.mxu0 %vm428_vm0, %v1127_v15  ;;  %5621 = vmatpush3.bf16.msra.mxu0 %v1489_v25 }
 0x325   : > { %2230 = vmax.xlane.f32.xlu1 %v2229_v9  ;;  %5622 = vmatprep.subr.bf16.mxu0 %v1490_v7  ;;  %v1492_v43 = vpack.c.bf16 %v6119_v10, %v6118_v46 }
 0x326   : > { %2227 = vmax.xlane.f32.xlu0 %v2226_v62  ;;  %v6127_v40 = vpop.permute.xlu1 %6126 }
 0x327   : > { %v6129_v57 = vunpack.i.h.bf16 %v6127_v40  ;;  %v6128_v6 = vunpack.i.l.bf16 %v6127_v40 }
 0x328   : > { %v7579_v0 = vpop.f32.mrb[24].mxu1  ;;  %5623 = vmatpush3.bf16.msra.mxu0 %v1490_v7 }
 0x329   : > { %v7581_v19 = vpop.f32.mrb[25].mxu1  ;;  %5624 = vmatprep.subr.bf16.mxu0 %v1491_v58  ;;  %v2244_v23 = vsel %vm2225_vm1, %v7579_v0, -inf  ;;  %v7596_v25 = vpack.c.bf16 %v6129_v57, %v6128_v6 }
 0x32a   : > { %v7585_v29 = vpop.f32.mrb[26].mxu1  ;;  %2236 = vmax.xlane.f32.xlu0 %v2235_v20  ;;  %v2238_v55 = vsel %vm2225_vm1, %v7581_v19, -inf  ;;  %v7633_v60 = vpop.permute.xlu1 %6131 }
 0x32b   : > { %v7587_v24 = vpop.f32.mrb[27].mxu1  ;;  %v2247_v63 = vsel %vm2225_vm1, %v7585_v29, -inf  ;;  %5585 = vmatmul.mubr.msk.bf16.gmra.mrb[56].mxu0 %vm428_vm0, %v1128_v16  ;;  %8991 = vst [vmem:[#allocation26_spill] sm:$0xff] %v7596_v25  ;;  %8992 = vst [vmem:[#allocation27_spill] sm:$0xff] %v7633_v60 }
 0x32c   : > { %2248 = vmax.xlane.f32.xlu1 %v2247_v63  ;;  %5625 = vmatpush3.bf16.msra.mxu0 %v1491_v58  ;;  %v2241_v48 = vsel %vm2225_vm1, %v7587_v24, -inf }
 0x32d   : > { %5626 = vmatprep.subr.bf16.mxu0 %v1492_v43 }
 0x32e   : > { %2245 = vmax.xlane.f32.xlu0 %v2244_v23  ;;  %v7635_v62 = vpop.permute.xlu1 %6136  ;;  %v7657_v23 = vpop.permute.xlu0 %6121 }
 0x32f   : > { %8993 = vst [vmem:[#allocation28_spill] sm:$0xff] %v7635_v62  ;;  %8997 = vst [vmem:[#allocation32_spill] sm:$0xff] %v7657_v23 }
 0x330   : > { %2242 = vmax.xlane.f32.xlu1 %v2241_v48  ;;  %5627 = vmatpush3.bf16.msra.mxu0 %v1492_v43 }
 0x331   : > { %5652 = vmatprep.subr.bf16.mxu0 %v7596_v25 }
 0x332   : > { %2239 = vmax.xlane.f32.xlu0 %v2238_v55  ;;  %v7637_v10 = vpop.permute.xlu1 %6146 }
 0x333   : > { %8994 = vst [vmem:[#allocation29_spill] sm:$0xff] %v7637_v10 }
 0x336   : > { %v7639_v46 = vpop.permute.xlu1 %6151 }
 0x337   : > { %8995 = vst [vmem:[#allocation30_spill] sm:$0xff] %v7639_v46 }
 0x33a   : > { %v7653_v63 = vpop.permute.xlu1 %6156 }
 0x33b   : > { %8996 = vst [vmem:[#allocation31_spill] sm:$0xff] %v7653_v63 }
 0x33f   : > { %v7661_v55 = vpop.permute.xlu1 %6166 }
 0x340   : > { %v7601_v42 = vpop.f32.mrb[28].mxu0  ;;  %8998 = vst [vmem:[#allocation33_spill] sm:$0xff] %v7661_v55 }
 0x341   : > { %v7603_v52 = vpop.f32.mrb[29].mxu0  ;;  %v2256_v49 = vsel %vm2225_vm1, %v7601_v42, -inf }
 0x342   : > { %2257 = vmax.xlane.f32.xlu0 %v2256_v49  ;;  %v7607_v39 = vpop.f32.mrb[30].mxu0  ;;  %v2250_v45 = vsel %vm2225_vm1, %v7603_v52, -inf  ;;  %v7663_v49 = vpop.permute.xlu0 %6141 }
 0x343   : > { %v7609_v34 = vpop.f32.mrb[31].mxu0  ;;  %v2259_v30 = vsel %vm2225_vm1, %v7607_v39, -inf  ;;  %8999 = vst [vmem:[#allocation34_spill] sm:$0xff] %v7663_v49 }
 0x344   : > { %2260 = vmax.xlane.f32.xlu1 %v2259_v30  ;;  %v2253_v28 = vsel %vm2225_vm1, %v7609_v34, -inf  ;;  %v7665_v30 = vpop.permute.xlu1 %6171 }
 0x345   : > { %9000 = vst [vmem:[#allocation35_spill] sm:$0xff] %v7665_v30 }
 0x346   : > { %2251 = vmax.xlane.f32.xlu0 %v2250_v45  ;;  %v7667_v45 = vpop.permute.xlu0 %6161 }
 0x347   : > { %9001 = vst [vmem:[#allocation36_spill] sm:$0xff] %v7667_v45 }
 0x348   : > { %2254 = vmax.xlane.f32.xlu1 %v2253_v28  ;;  %v7617_v56 = vpop.f32.mrb[32].mxu0 }
 0x349   : > { %v7619_v15 = vpop.f32.mrb[33].mxu0  ;;  %v2268_v13 = vsel %vm2225_vm1, %v7617_v56, -inf }
 0x34a   : > { %2269 = vmax.xlane.f32.xlu0 %v2268_v13  ;;  %v7623_v14 = vpop.f32.mrb[34].mxu0  ;;  %v2262_v9 = vsel %vm2225_vm1, %v7619_v15, -inf }
 0x34b   : > { %v7625_v33 = vpop.f32.mrb[35].mxu0  ;;  %v2271_v7 = vsel %vm2225_vm1, %v7623_v14, -inf }
 0x34c   : > { %2272 = vmax.xlane.f32.xlu1 %v2271_v7  ;;  %v2265_v50 = vsel %vm2225_vm1, %v7625_v33, -inf  ;;  %v7673_v7 = vpop.permute.xlu1 %6176 }
 0x34d   : > { %9002 = vst [vmem:[#allocation37_spill] sm:$0xff] %v7673_v7 }
 0x34e   : > { %2263 = vmax.xlane.f32.xlu0 %v2262_v9 }
 0x350   : > { %2266 = vmax.xlane.f32.xlu1 %v2265_v50  ;;  %v7693_v31 = vpop.permute.xlu1 %6186 }
 0x351   : > { %9004 = vst [vmem:[#allocation39_spill] sm:$0xff] %v7693_v31 }
 0x354   : > { %v7705_v12 = vpop.permute.xlu1 %6191 }
 0x355   : > { %9005 = vst [vmem:[#allocation40_spill] sm:$0xff] %v7705_v12 }
 0x358   : > { %v7717_v4 = vpop.permute.xlu1 %6196 }
 0x359   : > { %9006 = vst [vmem:[#allocation41_spill] sm:$0xff] %v7717_v4 }
 0x3a2   : > { %v7641_v58 = vpop.f32.mrb[28].mxu1 }
 0x3a3   : > { %v7643_v40 = vpop.f32.mrb[29].mxu1  ;;  %v2280_v16 = vsel %vm2225_vm1, %v7641_v58, -inf }
 0x3a4   : > { %2281 = vmax.xlane.f32.xlu0 %v2280_v16  ;;  %v7647_v20 = vpop.f32.mrb[30].mxu1  ;;  %v2274_v43 = vsel %vm2225_vm1, %v7643_v40, -inf }
 0x3a5   : > { %v7649_v57 = vpop.f32.mrb[31].mxu1  ;;  %v2283_v6 = vsel %vm2225_vm1, %v7647_v20, -inf }
 0x3a6   : > { %2284 = vmax.xlane.f32.xlu1 %v2283_v6  ;;  %v2277_v48 = vsel %vm2225_vm1, %v7649_v57, -inf  ;;  %v7681_v6 = vpop.permute.xlu0 %6181 }
 0x3a7   : > { %9003 = vst [vmem:[#allocation38_spill] sm:$0xff] %v7681_v6 }
 0x3a8   : > { %2275 = vmax.xlane.f32.xlu0 %v2274_v43 }
 0x3aa   : > { %2278 = vmax.xlane.f32.xlu1 %v2277_v48 }
 0x3af   : > { %v2234_v27 = vpop.xlane.xlu0 %2233 }
 0x3b0   : > { %v2420_v51 = vsub.f32 %v7563_v8, %v2234_v27 }
 0x3b2   : > { %v2231_v4 = vpop.xlane.xlu1 %2230 }
 0x3b3   : > { %v2228_v17 = vpop.xlane.xlu0 %2227  ;;  %v2419_v8 = vsub.f32 %v7571_v54, %v2231_v4 }
 0x3b4   : > { %v2418_v55 = vsub.f32 %v7565_v35, %v2228_v17 }
 0x3b5   : > { %v2484_v54 = vmul.f32 1.442695, %v2419_v8 }
 0x3b6   : > { %v7669_v28 = vpop.f32.mrb[36].mxu0 }
 0x3b7   : > { %v7671_v13 = vpop.f32.mrb[37].mxu0  ;;  %v2304_v18 = vsel %vm2225_vm1, %v7669_v28, -inf }
 0x3b8   : > { %v7675_v9 = vpop.f32.mrb[38].mxu0  ;;  %v2298_v31 = vsel %vm2225_vm1, %v7671_v13, -inf }
 0x3b9   : > { %v7677_v50 = vpop.f32.mrb[39].mxu0  ;;  %v2249_v47 = vpop.xlane.xlu1 %2248 }
 0x3ba   : > { %v7679_v16 = vpop.f32.mrb[32].mxu1 }
 0x3bb   : > { %v7683_v43 = vpop.f32.mrb[33].mxu1  ;;  %v2292_v48 = vsel %vm2225_vm1, %v7679_v16, -inf }
 0x3bc   : > { %2293 = vmax.xlane.f32.xlu0 %v2292_v48  ;;  %v7687_v37 = vpop.f32.mrb[34].mxu1  ;;  %v2286_v22 = vsel %vm2225_vm1, %v7683_v43, -inf }
 0x3bd   : > { %v7689_v32 = vpop.f32.mrb[35].mxu1  ;;  %v2295_v36 = vsel %vm2225_vm1, %v7687_v37, -inf }
 0x3be   : > { %2296 = vmax.xlane.f32.xlu1 %v2295_v36  ;;  %v2289_v26 = vsel %vm2225_vm1, %v7689_v32, -inf }
 0x3c0   : > { %2287 = vmax.xlane.f32.xlu0 %v2286_v22  ;;  %v2307_v22 = vsel %vm2225_vm1, %v7675_v9, -inf }
 0x3c2   : > { %2290 = vmax.xlane.f32.xlu1 %v2289_v26  ;;  %v7699_v48 = vpop.f32.mrb[36].mxu1 }
 0x3c3   : > { %v7701_v21 = vpop.f32.mrb[37].mxu1  ;;  %v2328_v26 = vsel %vm2225_vm1, %v7699_v48, -inf }
 0x3c4   : > { %2305 = vmax.xlane.f32.xlu0 %v2304_v18  ;;  %v7707_v36 = vpop.f32.mrb[38].mxu1  ;;  %v2237_v18 = vpop.xlane.xlu0 %2236 }
 0x3c5   : > { %v7709_v11 = vpop.f32.mrb[39].mxu1  ;;  %v2331_v5 = vsel %vm2225_vm1, %v7707_v36, -inf  ;;  %v2421_v7 = vsub.f32 %v7569_v1, %v2237_v18  ;;  %v2482_v18 = vmul.f32 1.442695, %v2418_v55 }
 0x3c6   : > { %2308 = vmax.xlane.f32.xlu1 %v2307_v22  ;;  %v2325_v30 = vsel %vm2225_vm1, %v7709_v11, -inf }
 0x3c8   : > { %2329 = vmax.xlane.f32.xlu0 %v2328_v26  ;;  %v2301_v26 = vsel %vm2225_vm1, %v7677_v50, -inf  ;;  %v2246_v6 = vpop.xlane.xlu0 %2245 }
 0x3ca   : > { %v7719_v3 = vpop.f32.mrb[40].mxu0  ;;  %2332 = vmax.xlane.f32.xlu1 %v2331_v5  ;;  %v2322_v5 = vsel %vm2225_vm1, %v7701_v21, -inf }
 0x3cb   : > { %v7721_v2 = vpop.f32.mrb[41].mxu0  ;;  %v2316_v27 = vsel %vm2225_vm1, %v7719_v3, -inf }
 0x3cc   : > { %v7725_v12 = vpop.f32.mrb[42].mxu0  ;;  %2299 = vmax.xlane.f32.xlu0 %v2298_v31  ;;  %v2486_v31 = vmul.f32 1.442695, %v2420_v51  ;;  %v2240_v51 = vpop.xlane.xlu0 %2239 }
 0x3cd   : > { %v7727_v22 = vpop.f32.mrb[43].mxu0  ;;  %v2319_v1 = vsel %vm2225_vm1, %v7725_v12, -inf }
 0x3ce   : > { %2302 = vmax.xlane.f32.xlu1 %v2301_v26  ;;  %v2488_v26 = vmul.f32 1.442695, %v2421_v7  ;;  %6396 = vpow2.f32 %v2486_v31 }
 0x3d0   : > { %2323 = vmax.xlane.f32.xlu0 %v2322_v5  ;;  %v2424_v5 = vsub.f32 %v7579_v0, %v2246_v6  ;;  %6398 = vpow2.f32 %v2488_v26  ;;  %v2243_v0 = vpop.xlane.xlu1 %2242  ;;  %v2258_v23 = vpop.xlane.xlu0 %2257 }
 0x3d1   : > { %6400 = vpow2.f32 %v2482_v18  ;;  %v2423_v26 = vsub.f32 %v7587_v24, %v2243_v0 }
 0x3d2   : > { %2326 = vmax.xlane.f32.xlu1 %v2325_v30  ;;  %v2425_v30 = vsub.f32 %v7585_v29, %v2249_v47  ;;  %v2310_v47 = vsel %vm2225_vm1, %v7721_v2, -inf  ;;  %6402 = vpow2.f32 %v2484_v54 }
 0x3d4   : > { %2317 = vmax.xlane.f32.xlu0 %v2316_v27  ;;  %v2494_v27 = vmul.f32 1.442695, %v2424_v5  ;;  %v2496_v29 = vmul.f32 1.442695, %v2425_v30 }
 0x3d6   : > { %v7744_v63 = vpop.f32.mrb[44].mxu0  ;;  %2320 = vmax.xlane.f32.xlu1 %v2319_v1  ;;  %v7746_v17 = vpop.f32.mrb[40].mxu1  ;;  %v2422_v1 = vsub.f32 %v7581_v19, %v2240_v51  ;;  %6404 = vpow2.f32 %v2494_v27  ;;  %v2492_v51 = vmul.f32 1.442695, %v2423_v26 }
 0x3d7   : > { %v7748_v35 = vpop.f32.mrb[41].mxu1  ;;  %v2340_v4 = vsel %vm2225_vm1, %v7746_v17, -inf  ;;  %v7753_v7 = vpop.f32.mrb[45].mxu0  ;;  %6406 = vpow2.f32 %v2496_v29 }
 0x3d8   : > { %9007 = vst [vmem:[#allocation42_spill] sm:$0xff] %v7753_v7  ;;  %2341 = vmax.xlane.f32.xlu0 %v2340_v4  ;;  %v7755_v55 = vpop.f32.mrb[42].mxu1  ;;  %v7757_v6 = vpop.f32.mrb[46].mxu0  ;;  %v2313_v4 = vsel %vm2225_vm1, %v7727_v22, -inf  ;;  %v2490_v18 = vmul.f32 1.442695, %v2422_v1 }
 0x3d9   : > { %9008 = vst [vmem:[#allocation43_spill] sm:$0xff] %v7757_v6  ;;  %v2343_v31 = vsel %vm2225_vm1, %v7755_v55, -inf  ;;  %v7762_v25 = vpop.f32.mrb[43].mxu1  ;;  %v7764_v8 = vpop.f32.mrb[47].mxu0  ;;  %v2334_v19 = vsel %vm2225_vm1, %v7748_v35, -inf  ;;  %v2355_v53 = vsel %vm2225_vm1, %v7757_v6, -inf }
 0x3da   : > { %9009 = vst [vmem:[#allocation44_spill] sm:$0xff] %v7764_v8  ;;  %2344 = vmax.xlane.f32.xlu1 %v2343_v31  ;;  %v7773_v5 = vpop.eup %6396  ;;  %v2337_v54 = vsel %vm2225_vm1, %v7762_v25, -inf  ;;  %6408 = vpow2.f32 %v2490_v18  ;;  %v2346_v61 = vsel %vm2225_vm1, %v7753_v7, -inf  ;;  %v2349_v59 = vsel %vm2225_vm1, %v7764_v8, -inf }
 0x3db   : > { %9010 = vst [vmem:[#allocation45_spill] sm:$0xff] %v7773_v5  ;;  %v7777_v30 = vpop.eup %6398  ;;  %v2616_v31 = vsel %vm2225_vm1, %v7773_v5, 0.0  ;;  %6410 = vpow2.f32 %v2492_v51 }
 0x3dc   : > { %2311 = vmax.xlane.f32.xlu0 %v2310_v47  ;;  %v7785_v27 = vpop.eup %6400  ;;  %v2619_v29 = vsel %vm2225_vm1, %v7777_v30, 0.0 }
 0x3dd   : > { %9013 = vst [vmem:[#allocation48_spill] sm:$0xff] %v7785_v27  ;;  %v7793_v26 = vpop.eup %6402 }
 0x3de   : > { %2314 = vmax.xlane.f32.xlu1 %v2313_v4  ;;  %9015 = vst [vmem:[#allocation50_spill] sm:$0xff] %v7793_v26  ;;  %v2613_v10 = vsel %vm2225_vm1, %v7793_v26, 0.0 }
 0x3e0   : > { %2335 = vmax.xlane.f32.xlu0 %v2334_v19  ;;  %v2610_v19 = vsel %vm2225_vm1, %v7785_v27, 0.0 }
 0x3e2   : > { %2338 = vmax.xlane.f32.xlu1 %v2337_v54  ;;  %v7779_v24 = vpop.f32.mrb[44].mxu1  ;;  %v7801_v54 = vpop.eup %6404 }
 0x3e3   : > { %9011 = vst [vmem:[#allocation46_spill] sm:$0xff] %v7779_v24  ;;  %v7781_v0 = vpop.f32.mrb[45].mxu1  ;;  %9016 = vst [vmem:[#allocation51_spill] sm:$0xff] %v7801_v54  ;;  %v7809_v62 = vpop.eup %6406  ;;  %v2628_v44 = vsel %vm2225_vm1, %v7801_v54, 0.0 }
 0x3e4   : > { %9012 = vst [vmem:[#allocation47_spill] sm:$0xff] %v7781_v0  ;;  %2617 = vadd.xlane.f32.xlu0 %v2616_v31  ;;  %v7787_v1 = vpop.f32.mrb[46].mxu1  ;;  %9017 = vst [vmem:[#allocation52_spill] sm:$0xff] %v7809_v62  ;;  %v7817_v45 = vpop.eup %6408  ;;  %v2631_v49 = vsel %vm2225_vm1, %v7809_v62, 0.0 }
 0x3e5   : > { %9014 = vst [vmem:[#allocation49_spill] sm:$0xff] %v7787_v1  ;;  %v7789_v47 = vpop.f32.mrb[47].mxu1  ;;  %9018 = vst [vmem:[#allocation53_spill] sm:$0xff] %v7817_v45  ;;  %v7825_v60 = vpop.eup %6410 }
 0x3e6   : > { %v7795_v4 = vpop.f32.mrb[48].mxu0  ;;  %2620 = vadd.xlane.f32.xlu1 %v2619_v29  ;;  %9019 = vst [vmem:[#allocation54_spill] sm:$0xff] %v7825_v60  ;;  %v2625_v41 = vsel %vm2225_vm1, %v7825_v60, 0.0  ;;  %v2252_v60 = vpop.xlane.xlu0 %2251  ;;  %v2373_v8 = vsel %vm2225_vm1, %v7789_v47, -inf }
 0x3e7   : > { %v7797_v18 = vpop.f32.mrb[49].mxu0  ;;  %v2364_v26 = vsel %vm2225_vm1, %v7795_v4, -inf }
 0x3e8   : > { %v7803_v51 = vpop.f32.mrb[50].mxu0  ;;  %2611 = vadd.xlane.f32.xlu0 %v2610_v19 }
 0x3e9   : > { %v7805_v31 = vpop.f32.mrb[51].mxu0 }
 0x3ea   : > { %2614 = vadd.xlane.f32.xlu1 %v2613_v10  ;;  %v7811_v38 = vpop.f32.mrb[48].mxu1  ;;  %v2622_v10 = vsel %vm2225_vm1, %v7817_v45, 0.0 }
 0x3eb   : > { %v7813_v29 = vpop.f32.mrb[49].mxu1 }
 0x3ec   : > { %2629 = vadd.xlane.f32.xlu0 %v2628_v44  ;;  %v7819_v46 = vpop.f32.mrb[50].mxu1  ;;  %v2352_v44 = vsel %vm2225_vm1, %v7744_v63, -inf }
 0x3ed   : > { %v7821_v19 = vpop.f32.mrb[51].mxu1 }
 0x3ee   : > { %2632 = vadd.xlane.f32.xlu1 %v2631_v49  ;;  %v2261_v49 = vpop.xlane.xlu1 %2260 }
 0x3f0   : > { %2623 = vadd.xlane.f32.xlu0 %v2622_v10  ;;  %v2376_v10 = vsel %vm2225_vm1, %v7779_v24, -inf  ;;  %v2428_v24 = vsub.f32 %v7601_v42, %v2258_v23  ;;  %v2426_v23 = vsub.f32 %v7603_v52, %v2252_v60  ;;  %v2388_v52 = vsel %vm2225_vm1, %v7811_v38, -inf }
 0x3f2   : > { %2626 = vadd.xlane.f32.xlu1 %v2625_v41  ;;  %v2502_v42 = vmul.f32 1.442695, %v2428_v24 }
 0x3f4   : > { %2353 = vmax.xlane.f32.xlu0 %v2352_v44  ;;  %v2379_v44 = vsel %vm2225_vm1, %v7787_v1, -inf  ;;  %v2370_v1 = vsel %vm2225_vm1, %v7781_v0, -inf  ;;  %6412 = vpow2.f32 %v2502_v42 }
 0x3f6   : > { %v7835_v54 = vpop.f32.mrb[52].mxu0  ;;  %2356 = vmax.xlane.f32.xlu1 %v2355_v53  ;;  %v2255_v53 = vpop.xlane.xlu1 %2254 }
 0x3f7   : > { %v7837_v62 = vpop.f32.mrb[53].mxu0 }
 0x3f8   : > { %v7841_v45 = vpop.f32.mrb[54].mxu0  ;;  %2377 = vmax.xlane.f32.xlu0 %v2376_v10 }
 0x3f9   : > { %v7843_v41 = vpop.f32.mrb[55].mxu0 }
 0x3fa   : > { %2380 = vmax.xlane.f32.xlu1 %v2379_v44  ;;  %v2429_v44 = vsub.f32 %v7607_v39, %v2261_v49  ;;  %v2427_v39 = vsub.f32 %v7609_v34, %v2255_v53  ;;  %v2498_v49 = vmul.f32 1.442695, %v2426_v23  ;;  %v2391_v34 = vsel %vm2225_vm1, %v7819_v46, -inf }
 0x3fc   : > { %2347 = vmax.xlane.f32.xlu0 %v2346_v61  ;;  %v2270_v61 = vpop.xlane.xlu0 %2269  ;;  %v2504_v0 = vmul.f32 1.442695, %v2429_v44  ;;  %v2500_v60 = vmul.f32 1.442695, %v2427_v39 }
 0x3fd   : > { %v2432_v27 = vsub.f32 %v7617_v56, %v2270_v61  ;;  %v2358_v56 = vsel %vm2225_vm1, %v7797_v18, -inf }
 0x3fe   : > { %v7852_v6 = vpop.f32.mrb[56].mxu0  ;;  %2350 = vmax.xlane.f32.xlu1 %v2349_v59  ;;  %v2273_v59 = vpop.xlane.xlu1 %2272  ;;  %6414 = vpow2.f32 %v2504_v0 }
 0x3ff   : > { %v7854_v10 = vpop.f32.mrb[57].mxu0  ;;  %6416 = vpow2.f32 %v2498_v49  ;;  %v7885_v23 = vpop.eup %6412 }
 0x400   : > { %v7859_v5 = vpop.f32.mrb[58].mxu0  ;;  %2371 = vmax.xlane.f32.xlu0 %v2370_v1  ;;  %v2367_v1 = vsel %vm2225_vm1, %v7803_v51, -inf  ;;  %v2264_v24 = vpop.xlane.xlu0 %2263  ;;  %6418 = vpow2.f32 %v2500_v60 }
 0x401   : > { %v7861_v7 = vpop.f32.mrb[59].mxu0  ;;  %v2430_v53 = vsub.f32 %v7619_v15, %v2264_v24 }
 0x402   : > { %9020 = vst [vmem:[#allocation55_spill] sm:$0xff] %v7861_v7  ;;  %2374 = vmax.xlane.f32.xlu1 %v2373_v8  ;;  %v2433_v8 = vsub.f32 %v7623_v14, %v2273_v59  ;;  %v2267_v44 = vpop.xlane.xlu1 %2266  ;;  %v2361_v14 = vsel %vm2225_vm1, %v7805_v31, -inf  ;;  %v2385_v59 = vsel %vm2225_vm1, %v7821_v19, -inf }
 0x403   : > { %v2431_v0 = vsub.f32 %v7625_v33, %v2267_v44  ;;  %v2506_v42 = vmul.f32 1.442695, %v2430_v53  ;;  %v2640_v33 = vsel %vm2225_vm1, %v7885_v23, 0.0 }
 0x404   : > { %2365 = vmax.xlane.f32.xlu0 %v2364_v26  ;;  %v2510_v26 = vmul.f32 1.442695, %v2432_v27  ;;  %v2512_v61 = vmul.f32 1.442695, %v2433_v8  ;;  %v2382_v27 = vsel %vm2225_vm1, %v7813_v29, -inf }
 0x405   : > { %v2508_v15 = vmul.f32 1.442695, %v2431_v0 }
 0x406   : > { %2368 = vmax.xlane.f32.xlu1 %v2367_v1  ;;  %6420 = vpow2.f32 %v2510_v26 }
 0x407   : > { %6422 = vpow2.f32 %v2512_v61 }
 0x408   : > { %2389 = vmax.xlane.f32.xlu0 %v2388_v52  ;;  %v7889_v39 = vpop.eup %6414  ;;  %6424 = vpow2.f32 %v2506_v42  ;;  %v2403_v42 = vsel %vm2225_vm1, %v7841_v45, -inf }
 0x409   : > { %v7893_v1 = vpop.eup %6416  ;;  %6426 = vpow2.f32 %v2508_v15  ;;  %v2643_v49 = vsel %vm2225_vm1, %v7889_v39, 0.0  ;;  %v2397_v15 = vsel %vm2225_vm1, %v7843_v41, -inf }
 0x40a   : > { %2392 = vmax.xlane.f32.xlu1 %v2391_v34  ;;  %v7897_v24 = vpop.eup %6418  ;;  %v2634_v52 = vsel %vm2225_vm1, %v7893_v1, 0.0 }
 0x40b   : > { %v2637_v8 = vsel %vm2225_vm1, %v7897_v24, 0.0 }
 0x40c   : > { %2359 = vmax.xlane.f32.xlu0 %v2358_v56 }
 0x40e   : > { %2362 = vmax.xlane.f32.xlu1 %v2361_v14  ;;  %v2400_v14 = vsel %vm2225_vm1, %v7835_v54, -inf }
 0x410   : > { %2383 = vmax.xlane.f32.xlu0 %v2382_v27  ;;  %v7901_v60 = vpop.eup %6420  ;;  %v2394_v27 = vsel %vm2225_vm1, %v7837_v62, -inf }
 0x411   : > { %v7905_v44 = vpop.eup %6422  ;;  %v2652_v34 = vsel %vm2225_vm1, %v7901_v60, 0.0 }
 0x412   : > { %2386 = vmax.xlane.f32.xlu1 %v2385_v59  ;;  %v7909_v26 = vpop.eup %6424  ;;  %v2655_v53 = vsel %vm2225_vm1, %v7905_v44, 0.0  ;;  %v2412_v59 = vsel %vm2225_vm1, %v7852_v6, -inf }
 0x413   : > { %v7913_v56 = vpop.eup %6426  ;;  %v2646_v61 = vsel %vm2225_vm1, %v7909_v26, 0.0 }
 0x414   : > { %2641 = vadd.xlane.f32.xlu0 %v2640_v33  ;;  %v2649_v0 = vsel %vm2225_vm1, %v7913_v56, 0.0  ;;  %v2415_v33 = vsel %vm2225_vm1, %v7859_v5, -inf }
 0x416   : > { %2644 = vadd.xlane.f32.xlu1 %v2643_v49  ;;  %v2406_v49 = vsel %vm2225_vm1, %v7854_v10, -inf }
 0x418   : > { %2635 = vadd.xlane.f32.xlu0 %v2634_v52 }
 0x41a   : > { %2638 = vadd.xlane.f32.xlu1 %v2637_v8  ;;  %v2409_v8 = vsel %vm2225_vm1, %v7861_v7, -inf }
 0x41c   : > { %2653 = vadd.xlane.f32.xlu0 %v2652_v34 }
 0x41e   : > { %2656 = vadd.xlane.f32.xlu1 %v2655_v53 }
 0x420   : > { %2647 = vadd.xlane.f32.xlu0 %v2646_v61 }
 0x422   : > { %2650 = vadd.xlane.f32.xlu1 %v2649_v0 }
 0x424   : > { %2401 = vmax.xlane.f32.xlu0 %v2400_v14 }
 0x426   : > { %2404 = vmax.xlane.f32.xlu1 %v2403_v42 }
 0x428   : > { %2395 = vmax.xlane.f32.xlu0 %v2394_v27 }
 0x42a   : > { %2398 = vmax.xlane.f32.xlu1 %v2397_v15 }
 0x42c   : > { %2413 = vmax.xlane.f32.xlu0 %v2412_v59 }
 0x42e   : > { %2416 = vmax.xlane.f32.xlu1 %v2415_v33 }
 0x430   : > { %2407 = vmax.xlane.f32.xlu0 %v2406_v49 }
 0x431   : > { %v2282_v52 = vpop.xlane.xlu0 %2281 }
 0x432   : > { %v2436_v34 = vsub.f32 %v7641_v58, %v2282_v52  ;;  %2410 = vmax.xlane.f32.xlu1 %v2409_v8 }
 0x433   : > { %v2285_v53 = vpop.xlane.xlu1 %2284 }
 0x434   : > { %v2518_v61 = vmul.f32 1.442695, %v2436_v34  ;;  %v2437_v0 = vsub.f32 %v7647_v20, %v2285_v53 }
 0x435   : > { %v2276_v14 = vpop.xlane.xlu0 %2275 }
 0x436   : > { %6428 = vpow2.f32 %v2518_v61  ;;  %v2520_v42 = vmul.f32 1.442695, %v2437_v0  ;;  %v2434_v27 = vsub.f32 %v7643_v40, %v2276_v14 }
 0x437   : > { %v2279_v15 = vpop.xlane.xlu1 %2278 }
 0x438   : > { %6430 = vpow2.f32 %v2520_v42  ;;  %v2514_v59 = vmul.f32 1.442695, %v2434_v27  ;;  %v2435_v33 = vsub.f32 %v7649_v57, %v2279_v15 }
 0x43a   : > { %6432 = vpow2.f32 %v2514_v59  ;;  %v2516_v49 = vmul.f32 1.442695, %v2435_v33 }
 0x43c   : > { %6434 = vpow2.f32 %v2516_v49 }
 0x440   : > { %v7939_v7 = vpop.eup %6428 }
 0x441   : > { %v2664_v58 = vsel %vm2225_vm1, %v7939_v7, 0.0 }
 0x442   : > { %v7943_v52 = vpop.eup %6430  ;;  %2665 = vadd.xlane.f32.xlu0 %v2664_v58 }
 0x443   : > { %v2667_v20 = vsel %vm2225_vm1, %v7943_v52, 0.0 }
 0x444   : > { %v7947_v40 = vpop.eup %6432  ;;  %2668 = vadd.xlane.f32.xlu1 %v2667_v20 }
 0x445   : > { %v2658_v57 = vsel %vm2225_vm1, %v7947_v40, 0.0 }
 0x446   : > { %v7951_v8 = vpop.eup %6434  ;;  %2659 = vadd.xlane.f32.xlu0 %v2658_v57 }
 0x447   : > { %v2661_v34 = vsel %vm2225_vm1, %v7951_v8, 0.0 }
 0x448   : > { %2662 = vadd.xlane.f32.xlu1 %v2661_v34 }
 0x449   : > { %v2294_v53 = vpop.xlane.xlu0 %2293 }
 0x44a   : > { %v2440_v61 = vsub.f32 %v7679_v16, %v2294_v53 }
 0x44b   : > { %v2297_v0 = vpop.xlane.xlu1 %2296 }
 0x44c   : > { %v2526_v14 = vmul.f32 1.442695, %v2440_v61  ;;  %v2441_v42 = vsub.f32 %v7687_v37, %v2297_v0 }
 0x44d   : > { %v2288_v27 = vpop.xlane.xlu0 %2287 }
 0x44e   : > { %6436 = vpow2.f32 %v2526_v14  ;;  %v2528_v15 = vmul.f32 1.442695, %v2441_v42  ;;  %v2438_v59 = vsub.f32 %v7683_v43, %v2288_v27 }
 0x44f   : > { %v2291_v33 = vpop.xlane.xlu1 %2290 }
 0x450   : > { %6438 = vpow2.f32 %v2528_v15  ;;  %v2522_v49 = vmul.f32 1.442695, %v2438_v59  ;;  %v2439_v58 = vsub.f32 %v7689_v32, %v2291_v33 }
 0x451   : > { %v2306_v20 = vpop.xlane.xlu0 %2305 }
 0x452   : > { %6440 = vpow2.f32 %v2522_v49  ;;  %v2524_v57 = vmul.f32 1.442695, %v2439_v58  ;;  %v2444_v34 = vsub.f32 %v7669_v28, %v2306_v20 }
 0x453   : > { %v2309_v16 = vpop.xlane.xlu1 %2308 }
 0x454   : > { %6442 = vpow2.f32 %v2524_v57  ;;  %v2534_v53 = vmul.f32 1.442695, %v2444_v34  ;;  %v2445_v43 = vsub.f32 %v7675_v9, %v2309_v16 }
 0x455   : > { %v2330_v61 = vpop.xlane.xlu0 %2329 }
 0x456   : > { %6444 = vpow2.f32 %v2534_v53  ;;  %v2452_v37 = vsub.f32 %v7699_v48, %v2330_v61  ;;  %v2536_v9 = vmul.f32 1.442695, %v2445_v43 }
 0x457   : > { %v2333_v0 = vpop.xlane.xlu1 %2332 }
 0x458   : > { %v7961_v14 = vpop.eup %6436  ;;  %v2550_v42 = vmul.f32 1.442695, %v2452_v37  ;;  %v2453_v59 = vsub.f32 %v7707_v36, %v2333_v0 }
 0x459   : > { %v2300_v27 = vpop.xlane.xlu0 %2299  ;;  %v2676_v32 = vsel %vm2225_vm1, %v7961_v14, 0.0 }
 0x45a   : > { %v7966_v15 = vpop.eup %6438  ;;  %6446 = vpow2.f32 %v2550_v42  ;;  %v2442_v28 = vsub.f32 %v7671_v13, %v2300_v27  ;;  %2677 = vadd.xlane.f32.xlu0 %v2676_v32  ;;  %v2552_v36 = vmul.f32 1.442695, %v2453_v59 }
 0x45b   : > { %v2303_v33 = vpop.xlane.xlu1 %2302  ;;  %v2679_v48 = vsel %vm2225_vm1, %v7966_v15, 0.0 }
 0x45c   : > { %v7972_v49 = vpop.eup %6440  ;;  %v2530_v58 = vmul.f32 1.442695, %v2442_v28  ;;  %v2443_v20 = vsub.f32 %v7677_v50, %v2303_v33  ;;  %2680 = vadd.xlane.f32.xlu1 %v2679_v48 }
 0x45d   : > { %v2324_v57 = vpop.xlane.xlu0 %2323  ;;  %v2670_v34 = vsel %vm2225_vm1, %v7972_v49, 0.0 }
 0x45e   : > { %v7977_v16 = vpop.eup %6442  ;;  %6448 = vpow2.f32 %v2530_v58  ;;  %v2450_v13 = vsub.f32 %v7701_v21, %v2324_v57  ;;  %2671 = vadd.xlane.f32.xlu0 %v2670_v34  ;;  %v2532_v50 = vmul.f32 1.442695, %v2443_v20 }
 0x45f   : > { %v2327_v53 = vpop.xlane.xlu1 %2326  ;;  %v2673_v61 = vsel %vm2225_vm1, %v7977_v16, 0.0  ;;  %6450 = vpow2.f32 %v2536_v9 }
 0x460   : > { %v7982_v37 = vpop.eup %6444  ;;  %v2546_v0 = vmul.f32 1.442695, %v2450_v13  ;;  %v2451_v43 = vsub.f32 %v7709_v11, %v2327_v53  ;;  %2674 = vadd.xlane.f32.xlu1 %v2673_v61 }
 0x461   : > { %v2318_v42 = vpop.xlane.xlu0 %2317  ;;  %v2688_v27 = vsel %vm2225_vm1, %v7982_v37, 0.0 }
 0x462   : > { %6452 = vpow2.f32 %v2546_v0  ;;  %v2448_v21 = vsub.f32 %v7719_v3, %v2318_v42  ;;  %2689 = vadd.xlane.f32.xlu0 %v2688_v27  ;;  %v2548_v32 = vmul.f32 1.442695, %v2451_v43 }
 0x463   : > { %6454 = vpow2.f32 %v2552_v36  ;;  %v2321_v28 = vpop.xlane.xlu1 %2320 }
 0x464   : > { %v7988_v59 = vpop.eup %6446  ;;  %6456 = vpow2.f32 %v2532_v50  ;;  %v2542_v33 = vmul.f32 1.442695, %v2448_v21  ;;  %v2449_v3 = vsub.f32 %v7725_v12, %v2321_v28 }
 0x465   : > { %9021 = vst [vmem:[#allocation56_spill] sm:$0xff] %v7988_v59  ;;  %v2342_v48 = vpop.xlane.xlu0 %2341  ;;  %v2712_v11 = vsel %vm2225_vm1, %v7988_v59, 0.0  ;;  %6458 = vpow2.f32 %v2548_v32 }
 0x466   : > { %v2456_v9 = vsub.f32 %v7746_v17, %v2342_v48  ;;  %2713 = vadd.xlane.f32.xlu0 %v2712_v11  ;;  %6460 = vpow2.f32 %v2542_v33  ;;  %v2544_v0 = vmul.f32 1.442695, %v2449_v3 }
 0x467   : > { %v2345_v58 = vpop.xlane.xlu1 %2344 }
 0x468   : > { %v7993_v20 = vpop.eup %6448  ;;  %v2558_v57 = vmul.f32 1.442695, %v2456_v9  ;;  %v2457_v34 = vsub.f32 %v7755_v55, %v2345_v58 }
 0x469   : > { %v2312_v13 = vpop.xlane.xlu0 %2311  ;;  %v2682_v36 = vsel %vm2225_vm1, %v7993_v20, 0.0  ;;  %v7999_v53 = vpop.eup %6450 }
 0x46a   : > { %v2446_v61 = vsub.f32 %v7721_v2, %v2312_v13  ;;  %2683 = vadd.xlane.f32.xlu1 %v2682_v36  ;;  %6462 = vpow2.f32 %v2558_v57  ;;  %v2560_v55 = vmul.f32 1.442695, %v2457_v34  ;;  %v2691_v32 = vsel %vm2225_vm1, %v7999_v53, 0.0 }
 0x46b   : > { %v2315_v17 = vpop.xlane.xlu1 %2314 }
 0x46c   : > { %v8002_v50 = vpop.eup %6452  ;;  %v2538_v43 = vmul.f32 1.442695, %v2446_v61  ;;  %v2447_v12 = vsub.f32 %v7727_v22, %v2315_v17 }
 0x46d   : > { %v8005_v42 = vpop.eup %6454  ;;  %v2336_v27 = vpop.xlane.xlu0 %2335  ;;  %v2706_v21 = vsel %vm2225_vm1, %v8002_v50, 0.0 }
 0x46e   : > { %v8011_v2 = vpop.eup %6456  ;;  %6464 = vpow2.f32 %v2538_v43  ;;  %v2454_v28 = vsub.f32 %v7748_v35, %v2336_v27  ;;  %2707 = vadd.xlane.f32.xlu0 %v2706_v21  ;;  %2692 = vadd.xlane.f32.xlu1 %v2691_v32  ;;  %v2540_v33 = vmul.f32 1.442695, %v2447_v12  ;;  %v2715_v57 = vsel %vm2225_vm1, %v8005_v42, 0.0 }
 0x46f   : > { %v2339_v48 = vpop.xlane.xlu1 %2338  ;;  %6466 = vpow2.f32 %v2544_v0  ;;  %v8015_v9 = vpop.eup %6458  ;;  %v2685_v3 = vsel %vm2225_vm1, %v8011_v2, 0.0 }
 0x470   : > { %v2554_v22 = vmul.f32 1.442695, %v2454_v28  ;;  %v2455_v11 = vsub.f32 %v7762_v25, %v2339_v48  ;;  %6468 = vpow2.f32 %v2560_v55  ;;  %v8021_v34 = vpop.eup %6460  ;;  %v2709_v61 = vsel %vm2225_vm1, %v8015_v9, 0.0 }
 0x471   : > { %v2618_v58 = vpop.xlane.xlu0 %2617  ;;  %9022 = vst [vmem:[#allocation57_spill] sm:$0xff] %v8021_v34  ;;  %v2700_v36 = vsel %vm2225_vm1, %v8021_v34, 0.0 }
 0x472   : > { %6470 = vpow2.f32 %v2554_v22  ;;  %2686 = vadd.xlane.f32.xlu0 %v2685_v3  ;;  %2716 = vadd.xlane.f32.xlu1 %v2715_v57  ;;  %v2556_v35 = vmul.f32 1.442695, %v2455_v11 }
 0x473   : > { %6472 = vpow2.f32 %v2540_v33  ;;  %v2621_v13 = vpop.xlane.xlu1 %2620 }
 0x474   : > { %6474 = vrcp.f32 %v2618_v58  ;;  %v8027_v17 = vpop.eup %6462 }
 0x475   : > { %6476 = vrcp.f32 %v2621_v13  ;;  %v2612_v25 = vpop.xlane.xlu0 %2611  ;;  %9023 = vst [vmem:[#allocation58_spill] sm:$0xff] %v8027_v17  ;;  %v2724_v55 = vsel %vm2225_vm1, %v8027_v17, 0.0  ;;  %v9031_v17 = vld [vmem:[#allocation45_spill] sm:$0xff] }
 0x476   : > { %6478 = vrcp.f32 %v2612_v25  ;;  %2701 = vadd.xlane.f32.xlu0 %v2700_v36  ;;  %2710 = vadd.xlane.f32.xlu1 %v2709_v61 }
 0x477   : > { %6480 = vpow2.f32 %v2556_v35  ;;  %v2615_v0 = vpop.xlane.xlu1 %2614 }
 0x478   : > { %v8029_v43 = vpop.eup %6464  ;;  %6482 = vrcp.f32 %v2615_v0 }
 0x479   : > { %9024 = vst [vmem:[#allocation59_spill] sm:$0xff] %v8029_v43  ;;  %v2630_v12 = vpop.xlane.xlu0 %2629  ;;  %v2694_v27 = vsel %vm2225_vm1, %v8029_v43, 0.0  ;;  %v8035_v21 = vpop.eup %6466  ;;  %v9032_v43 = vld [vmem:[#allocation43_spill] sm:$0xff] }
 0x47a   : > { %9025 = vst [vmem:[#allocation60_spill] sm:$0xff] %v8035_v21  ;;  %2725 = vadd.xlane.f32.xlu0 %v2724_v55  ;;  %2695 = vadd.xlane.f32.xlu1 %v2694_v27  ;;  %v8037_v32 = vpop.eup %6468  ;;  %v2703_v58 = vsel %vm2225_vm1, %v8035_v21, 0.0 }
 0x47b   : > { %9026 = vst [vmem:[#allocation61_spill] sm:$0xff] %v8037_v32  ;;  %v2633_v28 = vpop.xlane.xlu1 %2632  ;;  %v2727_v0 = vsel %vm2225_vm1, %v8037_v32, 0.0 }
 0x47c   : > { %v8039_v33 = vpop.eup %6470  ;;  %6484 = vrcp.f32 %v2633_v28 }
 0x47d   : > { %9027 = vst [vmem:[#allocation62_spill] sm:$0xff] %v8039_v33  ;;  %v8041_v48 = vpop.eup %6472  ;;  %v2624_v22 = vpop.xlane.xlu0 %2623  ;;  %v2718_v11 = vsel %vm2225_vm1, %v8039_v33, 0.0 }
 0x47e   : > { %9028 = vst [vmem:[#allocation63_spill] sm:$0xff] %v8041_v48  ;;  %v6475_v3 = vpop.eup %6474  ;;  %6486 = vrcp.f32 %v2624_v22  ;;  %2719 = vadd.xlane.f32.xlu0 %v2718_v11  ;;  %2704 = vadd.xlane.f32.xlu1 %v2703_v58  ;;  %v2697_v61 = vsel %vm2225_vm1, %v8041_v48, 0.0  ;;  %v9029_v22 = vld [vmem:[#allocation48_spill] sm:$0xff]  ;;  %v9030_v58 = vld [vmem:[#allocation50_spill] sm:$0xff] }
 0x47f   : > { %v6477_v57 = vpop.eup %6476  ;;  %6488 = vrcp.f32 %v2630_v12  ;;  %v2627_v35 = vpop.xlane.xlu1 %2626  ;;  %v2807_v33 = vmul.f32 %v6475_v3, %v9031_v17  ;;  %v9034_v3 = vld [vmem:[#allocation49_spill] sm:$0xff] }
 0x480   : > { %v6479_v13 = vpop.eup %6478  ;;  %6490 = vrcp.f32 %v2627_v35  ;;  %v2809_v27 = vmul.f32 %v6477_v57, %v7777_v30  ;;  %v9033_v57 = vld [vmem:[#allocation46_spill] sm:$0xff] }
 0x481   : > { %v8047_v25 = vpop.eup %6480  ;;  %v2354_v36 = vpop.xlane.xlu0 %2353  ;;  %v2803_v11 = vmul.f32 %v6479_v13, %v9029_v22 }
 0x482   : > { %v6483_v55 = vpop.eup %6482  ;;  %v2460_v28 = vsub.f32 %v7744_v63, %v2354_v36  ;;  %2698 = vadd.xlane.f32.xlu0 %v2697_v61  ;;  %2728 = vadd.xlane.f32.xlu1 %v2727_v0  ;;  %v2721_v32 = vsel %vm2225_vm1, %v8047_v25, 0.0  ;;  %v2931_v30 = vpack.c.bf16 %v2809_v27, %v2807_v33 }
 0x483   : > { %v2357_v12 = vpop.xlane.xlu1 %2356  ;;  %v2805_v35 = vmul.f32 %v6483_v55, %v9030_v58 }
 0x484   : > { %v2566_v34 = vmul.f32 1.442695, %v2460_v28  ;;  %v2461_v48 = vsub.f32 %v9032_v43, %v2357_v12  ;;  %v9035_v28 = vld [vmem:[#allocation21_spill] sm:$0xff] }
 0x485   : > { %v2378_v21 = vpop.xlane.xlu0 %2377  ;;  %v2930_v59 = vpack.c.bf16 %v2805_v35, %v2803_v11  ;;  %v9039_v11 = vld [vmem:[#allocation53_spill] sm:$0xff]  ;;  %v9040_v35 = vld [vmem:[#allocation54_spill] sm:$0xff] }
 0x486   : > { %6492 = vpow2.f32 %v2566_v34  ;;  %v2568_v63 = vmul.f32 1.442695, %v2461_v48  ;;  %v2468_v36 = vsub.f32 %v9033_v57, %v2378_v21  ;;  %2722 = vadd.xlane.f32.xlu1 %v2721_v32  ;;  %v6485_v61 = vpop.eup %6484  ;;  %v9036_v21 = vld [vmem:[#allocation19_spill] sm:$0xff]  ;;  %v9037_v32 = vld [vmem:[#allocation42_spill] sm:$0xff]  ;;  %v9041_v57 = vld [vmem:[#allocation44_spill] sm:$0xff] }
 0x487   : > { %5596 = vmatprep.mubr.msk.bf16.mxu1 %vm2225_vm1, %v2930_v59  ;;  %v2381_v13 = vpop.xlane.xlu1 %2380  ;;  %v9038_v59 = vld [vmem:[#allocation52_spill] sm:$0xff] }
 0x488   : > { %v6487_v0 = vpop.eup %6486  ;;  %6494 = vpow2.f32 %v2568_v63  ;;  %v2582_v17 = vmul.f32 1.442695, %v2468_v36  ;;  %v2469_v43 = vsub.f32 %v9034_v3, %v2381_v13  ;;  %5597 = vmatmul.mubr.msk.bf16.vlgmr.msra.gmra.mrb[52].mxu1 %vm2225_vm1, %v2931_v30  ;;  %v2817_v12 = vmul.f32 %v6485_v61, %v9038_v59  ;;  %v9042_v13 = vld [vmem:[#allocation51_spill] sm:$0xff] }
 0x489   : > { %v6489_v55 = vpop.eup %6488  ;;  %5605 = vmatpush3.bf16.msra.mxu1 %v9035_v28  ;;  %v2348_v33 = vpop.xlane.xlu0 %2347  ;;  %v2811_v58 = vmul.f32 %v6487_v0, %v9039_v11  ;;  %v9044_v61 = vld [vmem:[#allocation47_spill] sm:$0xff]  ;;  %v9045_v0 = vld [vmem:[#allocation32_spill] sm:$0xff] }
 0x48a   : > { %v6491_v34 = vpop.eup %6490  ;;  %6496 = vpow2.f32 %v2582_v17  ;;  %v2584_v48 = vmul.f32 1.442695, %v2469_v43  ;;  %5606 = vmatprep.subr.bf16.mxu1 %v9036_v21  ;;  %v2458_v27 = vsub.f32 %v9037_v32, %v2348_v33  ;;  %v2815_v3 = vmul.f32 %v6489_v55, %v9042_v13  ;;  %v9043_v33 = vld [vmem:[#allocation25_spill] sm:$0xff] }
 0x48b   : > { %v2351_v22 = vpop.xlane.xlu1 %2350  ;;  %v2813_v63 = vmul.f32 %v6491_v34, %v9040_v35  ;;  %v6124_v11 = vunpack.i.h.bf16 %v9045_v0  ;;  %v6123_v55 = vunpack.i.l.bf16 %v9045_v0 }
 0x48c   : > { %6498 = vpow2.f32 %v2584_v48  ;;  %v2562_v30 = vmul.f32 1.442695, %v2458_v27  ;;  %v2459_v36 = vsub.f32 %v9041_v57, %v2351_v22  ;;  %v2933_v59 = vpack.c.bf16 %v2817_v12, %v2815_v3 }
 0x48d   : > { %5607 = vmatpush3.bf16.msra.mxu1 %v9036_v21  ;;  %v2372_v17 = vpop.xlane.xlu0 %2371  ;;  %v2932_v43 = vpack.c.bf16 %v2813_v63, %v2811_v58  ;;  %v9046_v63 = vld [vmem:[#allocation23_spill] sm:$0xff] }
 0x48e   : > { %6500 = vpow2.f32 %v2562_v30  ;;  %v2564_v28 = vmul.f32 1.442695, %v2459_v36  ;;  %5608 = vmatprep.subr.bf16.mxu1 %v9043_v33  ;;  %v2466_v32 = vsub.f32 %v9044_v61, %v2372_v17  ;;  %v8095_v17 = vpack.c.bf16 %v6124_v11, %v6123_v55 }
 0x48f   : > { %5600 = vmatprep.mubr.msk.bf16.mxu1 %vm2225_vm1, %v2932_v43  ;;  %v2375_v34 = vpop.xlane.xlu1 %2374 }
 0x490   : > { %v8078_v48 = vpop.eup %6492  ;;  %6502 = vpow2.f32 %v2564_v28  ;;  %v2578_v21 = vmul.f32 1.442695, %v2466_v32  ;;  %v2467_v27 = vsub.f32 %v7789_v47, %v2375_v34  ;;  %5601 = vmatmul.mubr.msk.bf16.gmra.mrb[56].mxu1 %vm2225_vm1, %v2933_v59 }
 0x491   : > { %5609 = vmatpush3.bf16.msra.mxu1 %v9043_v33  ;;  %v2366_v22 = vpop.xlane.xlu0 %2365  ;;  %v2736_v12 = vsel %vm2225_vm1, %v8078_v48, 0.0 }
 0x492   : > { %v8086_v58 = vpop.eup %6494  ;;  %6504 = vpow2.f32 %v2578_v21  ;;  %v2580_v35 = vmul.f32 1.442695, %v2467_v27  ;;  %5610 = vmatprep.subr.bf16.mxu1 %v9046_v63  ;;  %v2464_v30 = vsub.f32 %v7795_v4, %v2366_v22  ;;  %2737 = vadd.xlane.f32.xlu0 %v2736_v12 }
 0x493   : > { %v2369_v57 = vpop.xlane.xlu1 %2368  ;;  %v2739_v47 = vsel %vm2225_vm1, %v8086_v58, 0.0 }
 0x494   : > { %v8092_v36 = vpop.eup %6496  ;;  %6506 = vpow2.f32 %v2580_v35  ;;  %v2574_v13 = vmul.f32 1.442695, %v2464_v30  ;;  %v2465_v3 = vsub.f32 %v7803_v51, %v2369_v57  ;;  %2740 = vadd.xlane.f32.xlu1 %v2739_v47 }
 0x495   : > { %5611 = vmatpush3.bf16.msra.mxu1 %v9046_v63  ;;  %v2390_v43 = vpop.xlane.xlu0 %2389  ;;  %v2760_v4 = vsel %vm2225_vm1, %v8092_v36, 0.0 }
 0x496   : > { %v8100_v28 = vpop.eup %6498  ;;  %v2576_v33 = vmul.f32 1.442695, %v2465_v3  ;;  %5636 = vmatprep.subr.bf16.mxu1 %v8095_v17  ;;  %v2472_v61 = vsub.f32 %v7811_v38, %v2390_v43  ;;  %2761 = vadd.xlane.f32.xlu0 %v2760_v4  ;;  %6508 = vpow2.f32 %v2574_v13 }
 0x497   : > { %v2393_v32 = vpop.xlane.xlu1 %2392  ;;  %v2763_v51 = vsel %vm2225_vm1, %v8100_v28, 0.0 }
 0x498   : > { %v8106_v59 = vpop.eup %6500  ;;  %6510 = vpow2.f32 %v2576_v33  ;;  %v2590_v0 = vmul.f32 1.442695, %v2472_v61  ;;  %v2473_v11 = vsub.f32 %v7819_v46, %v2393_v32  ;;  %2764 = vadd.xlane.f32.xlu1 %v2763_v51 }
 0x499   : > { %v2360_v34 = vpop.xlane.xlu0 %2359  ;;  %v2730_v55 = vsel %vm2225_vm1, %v8106_v59, 0.0 }
 0x49a   : > { %v8111_v21 = vpop.eup %6502  ;;  %v2592_v38 = vmul.f32 1.442695, %v2473_v11  ;;  %v2462_v27 = vsub.f32 %v7797_v18, %v2360_v34  ;;  %2731 = vadd.xlane.f32.xlu0 %v2730_v55  ;;  %6512 = vpow2.f32 %v2590_v0 }
 0x49b   : > { %v2363_v22 = vpop.xlane.xlu1 %2362  ;;  %v2733_v12 = vsel %vm2225_vm1, %v8111_v21, 0.0 }
 0x49c   : > { %v8116_v35 = vpop.eup %6504  ;;  %6514 = vpow2.f32 %v2592_v38  ;;  %v2570_v46 = vmul.f32 1.442695, %v2462_v27  ;;  %v2463_v63 = vsub.f32 %v7805_v31, %v2363_v22  ;;  %2734 = vadd.xlane.f32.xlu1 %v2733_v12 }
 0x49d   : > { %v2384_v30 = vpop.xlane.xlu0 %2383  ;;  %v2754_v57 = vsel %vm2225_vm1, %v8116_v35, 0.0 }
 0x49e   : > { %v8121_v47 = vpop.eup %6506  ;;  %v2572_v18 = vmul.f32 1.442695, %v2463_v63  ;;  %v2470_v13 = vsub.f32 %v7813_v29, %v2384_v30  ;;  %2755 = vadd.xlane.f32.xlu0 %v2754_v57  ;;  %6516 = vpow2.f32 %v2570_v46 }
 0x49f   : > { %v2387_v3 = vpop.xlane.xlu1 %2386  ;;  %v2757_v61 = vsel %vm2225_vm1, %v8121_v47, 0.0 }
 0x4a0   : > { %6518 = vpow2.f32 %v2572_v18  ;;  %v2586_v43 = vmul.f32 1.442695, %v2470_v13  ;;  %v2471_v4 = vsub.f32 %v7821_v19, %v2387_v3  ;;  %v8125_v33 = vpop.eup %6508 }
 0x4a1   : > { %v2642_v31 = vpop.xlane.xlu0 %2641  ;;  %v2748_v34 = vsel %vm2225_vm1, %v8125_v33, 0.0 }
 0x4a2   : > { %v8129_v32 = vpop.eup %6510  ;;  %2758 = vadd.xlane.f32.xlu0 %v2757_v61  ;;  %6520 = vpow2.f32 %v2586_v43  ;;  %v2588_v51 = vmul.f32 1.442695, %v2471_v4 }
 0x4a3   : > { %v2645_v0 = vpop.xlane.xlu1 %2644  ;;  %v2751_v29 = vsel %vm2225_vm1, %v8129_v32, 0.0  ;;  %6522 = vrcp.f32 %v2642_v31 }
 0x4a4   : > { %2752 = vadd.xlane.f32.xlu1 %v2751_v29  ;;  %v8133_v11 = vpop.eup %6512  ;;  %6524 = vrcp.f32 %v2645_v0 }
 0x4a5   : > { %9047 = vst [vmem:[#allocation48_spill] sm:$0xff] %v8133_v11  ;;  %v2636_v19 = vpop.xlane.xlu0 %2635  ;;  %v2772_v46 = vsel %vm2225_vm1, %v8133_v11, 0.0 }
 0x4a6   : > { %v8137_v55 = vpop.eup %6514  ;;  %6526 = vrcp.f32 %v2636_v19  ;;  %2749 = vadd.xlane.f32.xlu0 %v2748_v34 }
 0x4a7   : > { %9048 = vst [vmem:[#allocation50_spill] sm:$0xff] %v8137_v55  ;;  %6528 = vpow2.f32 %v2588_v51  ;;  %v2639_v38 = vpop.xlane.xlu1 %2638  ;;  %v2775_v27 = vsel %vm2225_vm1, %v8137_v55, 0.0 }
 0x4a8   : > { %6530 = vrcp.f32 %v2639_v38  ;;  %2776 = vadd.xlane.f32.xlu1 %v2775_v27  ;;  %v8141_v22 = vpop.eup %6516  ;;  %v9050_v27 = vld [vmem:[#allocation27_spill] sm:$0xff] }
 0x4a9   : > { %v2654_v12 = vpop.xlane.xlu0 %2653  ;;  %v2742_v3 = vsel %vm2225_vm1, %v8141_v22, 0.0 }
 0x4aa   : > { %v8145_v63 = vpop.eup %6518  ;;  %2773 = vadd.xlane.f32.xlu0 %v2772_v46  ;;  %v6134_v46 = vunpack.i.h.bf16 %v9050_v27 }
 0x4ab   : > { %v2657_v30 = vpop.xlane.xlu1 %2656  ;;  %v2745_v57 = vsel %vm2225_vm1, %v8145_v63, 0.0 }
 0x4ac   : > { %2746 = vadd.xlane.f32.xlu1 %v2745_v57  ;;  %v8149_v18 = vpop.eup %6520  ;;  %6532 = vrcp.f32 %v2657_v30 }
 0x4ad   : > { %9049 = vst [vmem:[#allocation45_spill] sm:$0xff] %v8149_v18  ;;  %v2648_v13 = vpop.xlane.xlu0 %2647  ;;  %v6523_v43 = vpop.eup %6522  ;;  %v2766_v29 = vsel %vm2225_vm1, %v8149_v18, 0.0  ;;  %v9051_v18 = vld [vmem:[#allocation34_spill] sm:$0xff] }
 0x4ae   : > { %6534 = vrcp.f32 %v2648_v13  ;;  %2743 = vadd.xlane.f32.xlu0 %v2742_v3  ;;  %v6525_v4 = vpop.eup %6524  ;;  %v6133_v13 = vunpack.i.l.bf16 %v9050_v27  ;;  %v2823_v3 = vmul.f32 %v6523_v43, %v7885_v23  ;;  %v6144_v11 = vunpack.i.h.bf16 %v9051_v18 }
 0x4af   : > { %6536 = vrcp.f32 %v2654_v12  ;;  %v2651_v31 = vpop.xlane.xlu1 %2650  ;;  %v2825_v34 = vmul.f32 %v6525_v4, %v7889_v39  ;;  %v6143_v39 = vunpack.i.l.bf16 %v9051_v18 }
 0x4b0   : > { %v6527_v61 = vpop.eup %6526  ;;  %6538 = vrcp.f32 %v2651_v31  ;;  %v1494_v18 = vpack.c.bf16 %v6134_v46, %v6133_v13 }
 0x4b1   : > { %v8153_v51 = vpop.eup %6528  ;;  %v2402_v0 = vpop.xlane.xlu0 %2401  ;;  %v2819_v12 = vmul.f32 %v6527_v61, %v7893_v1  ;;  %v1495_v27 = vpack.c.bf16 %v6144_v11, %v6143_v39 }
 0x4b2   : > { %v6531_v19 = vpop.eup %6530  ;;  %v2476_v38 = vsub.f32 %v7835_v54, %v2402_v0  ;;  %2767 = vadd.xlane.f32.xlu0 %v2766_v29  ;;  %v2769_v4 = vsel %vm2225_vm1, %v8153_v51, 0.0  ;;  %v2935_v29 = vpack.c.bf16 %v2825_v34, %v2823_v3 }
 0x4b3   : > { %v2405_v30 = vpop.xlane.xlu1 %2404  ;;  %v2821_v57 = vmul.f32 %v6531_v19, %v7897_v24 }
 0x4b4   : > { %v2598_v31 = vmul.f32 1.442695, %v2476_v38  ;;  %v2477_v55 = vsub.f32 %v7841_v45, %v2405_v30 }
 0x4b5   : > { %v2396_v54 = vpop.xlane.xlu0 %2395  ;;  %v2934_v0 = vpack.c.bf16 %v2821_v57, %v2819_v12  ;;  %v9052_v57 = vld [vmem:[#allocation30_spill] sm:$0xff] }
 0x4b6   : > { %6540 = vpow2.f32 %v2598_v31  ;;  %v2474_v1 = vsub.f32 %v7837_v62, %v2396_v54  ;;  %2770 = vadd.xlane.f32.xlu0 %v2769_v4  ;;  %v6533_v24 = vpop.eup %6532  ;;  %v2600_v61 = vmul.f32 1.442695, %v2477_v55  ;;  %v6154_v3 = vunpack.i.h.bf16 %v9052_v57  ;;  %v9053_v4 = vld [vmem:[#allocation36_spill] sm:$0xff] }
 0x4b7   : > { %5612 = vmatprep.mubr.msk.bf16.mxu1 %vm2225_vm1, %v2934_v0  ;;  %v2399_v23 = vpop.xlane.xlu1 %2398  ;;  %v2833_v12 = vmul.f32 %v6533_v24, %v7905_v44  ;;  %v6153_v13 = vunpack.i.l.bf16 %v9052_v57  ;;  %v6164_v0 = vunpack.i.h.bf16 %v9053_v4 }
 0x4b8   : > { %v6535_v45 = vpop.eup %6534  ;;  %v2594_v43 = vmul.f32 1.442695, %v2474_v1  ;;  %v2475_v19 = vsub.f32 %v7843_v41, %v2399_v23  ;;  %5613 = vmatmul.mubr.msk.bf16.vlgmr.msra.gmra.mrb[60].mxu1 %vm2225_vm1, %v2935_v29 }
 0x4b9   : > { %v6537_v38 = vpop.eup %6536  ;;  %5637 = vmatpush3.bf16.msra.mxu1 %v8095_v17  ;;  %v2414_v34 = vpop.xlane.xlu0 %2413  ;;  %v2827_v41 = vmul.f32 %v6535_v45, %v7909_v26  ;;  %v6163_v26 = vunpack.i.l.bf16 %v9053_v4  ;;  %v1496_v1 = vpack.c.bf16 %v6154_v3, %v6153_v13  ;;  %v9054_v13 = vld [vmem:[#allocation18_spill] sm:$0xff] }
 0x4ba   : > { %v6539_v30 = vpop.eup %6538  ;;  %6542 = vpow2.f32 %v2594_v43  ;;  %v2596_v62 = vmul.f32 1.442695, %v2475_v19  ;;  %v2480_v55 = vsub.f32 %v7852_v6, %v2414_v34  ;;  %5638 = vmatprep.subr.bf16.mxu1 %v1494_v18  ;;  %v2831_v11 = vmul.f32 %v6537_v38, %v7901_v60 }
 0x4bb   : > { %6544 = vpow2.f32 %v2600_v61  ;;  %v2829_v46 = vmul.f32 %v6539_v30, %v7913_v56  ;;  %v2417_v31 = vpop.xlane.xlu1 %2416  ;;  %v8193_v23 = vpack.c.bf16 %v6164_v0, %v6163_v26  ;;  %v9056_v0 = vld [vmem:[#allocation28_spill] sm:$0xff] }
 0x4bc   : > { %6546 = vpow2.f32 %v2596_v62  ;;  %v2606_v17 = vmul.f32 1.442695, %v2480_v55  ;;  %v2937_v44 = vpack.c.bf16 %v2833_v12, %v2831_v11  ;;  %v2481_v29 = vsub.f32 %v7859_v5, %v2417_v31  ;;  %v9055_v11 = vld [vmem:[#allocation24_spill] sm:$0xff] }
 0x4bd   : > { %5639 = vmatpush3.bf16.msra.mxu1 %v1494_v18  ;;  %v2408_v39 = vpop.xlane.xlu0 %2407  ;;  %v2936_v6 = vpack.c.bf16 %v2829_v46, %v2827_v41  ;;  %v6139_v26 = vunpack.i.h.bf16 %v9056_v0 }
 0x4be   : > { %v2478_v54 = vsub.f32 %v7854_v10, %v2408_v39  ;;  %5640 = vmatprep.subr.bf16.mxu1 %v1495_v27  ;;  %6548 = vpow2.f32 %v2606_v17  ;;  %v2608_v61 = vmul.f32 1.442695, %v2481_v29  ;;  %v6138_v29 = vunpack.i.l.bf16 %v9056_v0 }
 0x4bf   : > { %5616 = vmatprep.mubr.msk.bf16.mxu1 %vm2225_vm1, %v2936_v6  ;;  %v2411_v34 = vpop.xlane.xlu1 %2410 }
 0x4c0   : > { %v8185_v56 = vpop.eup %6540  ;;  %v2602_v60 = vmul.f32 1.442695, %v2478_v54  ;;  %5617 = vmatmul.mubr.msk.bf16.gmra.mrb[64].mxu1 %vm2225_vm1, %v2937_v44 }
 0x4c1   : > { %5641 = vmatpush3.bf16.msra.mxu1 %v1495_v27  ;;  %v2784_v10 = vsel %vm2225_vm1, %v8185_v56, 0.0 }
 0x4c2   : > { %5642 = vmatprep.subr.bf16.mxu1 %v1496_v1  ;;  %2785 = vadd.xlane.f32.xlu0 %v2784_v10  ;;  %6550 = vpow2.f32 %v2602_v60 }
 0x4c3   : > { %6552 = vpow2.f32 %v2608_v61  ;;  %v9057_v61 = vld [vmem:[#allocation29_spill] sm:$0xff] }
 0x4c4   : > { %v8191_v24 = vpop.eup %6542 }
 0x4c5   : > { %v8195_v45 = vpop.eup %6544  ;;  %5643 = vmatpush3.bf16.msra.mxu1 %v1496_v1  ;;  %v2778_v5 = vsel %vm2225_vm1, %v8191_v24, 0.0 }
 0x4c6   : > { %v8199_v43 = vpop.eup %6546  ;;  %5668 = vmatprep.subr.bf16.mxu1 %v8193_v23  ;;  %2779 = vadd.xlane.f32.xlu0 %v2778_v5  ;;  %v2787_v18 = vsel %vm2225_vm1, %v8195_v45, 0.0  ;;  %v6149_v5 = vunpack.i.h.bf16 %v9057_v61 }
 0x4c7   : > { %v2781_v19 = vsel %vm2225_vm1, %v8199_v43, 0.0 }
 0x4c8   : > { %2782 = vadd.xlane.f32.xlu1 %v2781_v19  ;;  %v8206_v38 = vpop.eup %6548  ;;  %v6148_v19 = vunpack.i.l.bf16 %v9057_v61 }
 0x4c9   : > { %v2796_v27 = vsel %vm2225_vm1, %v8206_v38, 0.0 }
 0x4ca   : > { %2788 = vadd.xlane.f32.xlu0 %v2787_v18 }
 0x4cc   : > { %v8210_v30 = vpop.eup %6550 }
 0x4cd   : > { %v2790_v12 = vsel %vm2225_vm1, %v8210_v30, 0.0  ;;  %v8214_v57 = vpop.eup %6552 }
 0x4ce   : > { %2797 = vadd.xlane.f32.xlu0 %v2796_v27  ;;  %v2799_v46 = vsel %vm2225_vm1, %v8214_v57, 0.0  ;;  %v9059_v27 = vld [vmem:[#allocation31_spill] sm:$0xff] }
 0x4cf   : > { %v2666_v62 = vpop.xlane.xlu0 %2665 }
 0x4d1   : > { %v2669_v55 = vpop.xlane.xlu1 %2668 }
 0x4d2   : > { %2791 = vadd.xlane.f32.xlu0 %v2790_v12  ;;  %6554 = vrcp.f32 %v2669_v55  ;;  %v1499_v55 = vpack.c.bf16 %v6149_v5, %v6148_v19  ;;  %v9060_v12 = vld [vmem:[#allocation55_spill] sm:$0xff] }
 0x4d3   : > { %v2660_v3 = vpop.xlane.xlu0 %2659 }
 0x4d4   : > { %6556 = vrcp.f32 %v2660_v3  ;;  %v2479_v3 = vsub.f32 %v9060_v12, %v2411_v34 }
 0x4d5   : > { %6558 = vrcp.f32 %v2666_v62  ;;  %v2663_v41 = vpop.xlane.xlu1 %2662  ;;  %v6159_v62 = vunpack.i.h.bf16 %v9059_v27 }
 0x4d6   : > { %6560 = vrcp.f32 %v2663_v41  ;;  %2800 = vadd.xlane.f32.xlu0 %v2799_v46  ;;  %v9061_v46 = vld [vmem:[#allocation20_spill] sm:$0xff] }
 0x4d9   : > { %6206 = vrot.lane.b32.xlu1 %v9054_v13, %s6823_s24 }
 0x4dc   : > { %v6555_v17 = vpop.eup %6554 }
 0x4dd   : > { %6211 = vrot.lane.b32.xlu1 %v9055_v11, %s6823_s24  ;;  %v2841_v54 = vmul.f32 %v6555_v17, %v7943_v52  ;;  %v1498_v52 = vpack.c.bf16 %v6139_v26, %v6138_v29  ;;  %v9062_v17 = vld [vmem:[#allocation33_spill] sm:$0xff] }
 0x4de   : > { %v6557_v31 = vpop.eup %6556  ;;  %v6169_v11 = vunpack.i.h.bf16 %v9062_v17 }
 0x4df   : > { %v6559_v39 = vpop.eup %6558  ;;  %v2835_v44 = vmul.f32 %v6557_v31, %v7947_v40  ;;  %v9058_v40 = vld [vmem:[#allocation26_spill] sm:$0xff]  ;;  %v6168_v31 = vunpack.i.l.bf16 %v9062_v17 }
 0x4e0   : > { %v6561_v6 = vpop.eup %6560  ;;  %v2839_v60 = vmul.f32 %v6559_v39, %v7939_v7  ;;  %v6158_v7 = vunpack.i.l.bf16 %v9059_v27 }
 0x4e1   : > { %v2837_v4 = vmul.f32 %v6561_v6, %v7951_v8  ;;  %v2604_v6 = vmul.f32 1.442695, %v2479_v3 }
 0x4e2   : > { %v2939_v10 = vpack.c.bf16 %v2841_v54, %v2839_v60  ;;  %v1500_v39 = vpack.c.bf16 %v6159_v62, %v6158_v7  ;;  %v8240_v54 = vpack.c.bf16 %v6169_v11, %v6168_v31 }
 0x4e3   : > { %v2938_v1 = vpack.c.bf16 %v2837_v4, %v2835_v44 }
 0x4e5   : > { %5628 = vmatprep.mubr.msk.bf16.mxu0 %vm2225_vm1, %v2938_v1 }
 0x4e6   : > { %5629 = vmatmul.mubr.msk.bf16.vlgmr.msra.gmra.mrb[60].mxu0 %vm2225_vm1, %v2939_v10 }
 0x4e7   : > { %5653 = vmatpush3.bf16.msra.mxu0 %v9058_v40  ;;  %v2678_v8 = vpop.xlane.xlu0 %2677 }
 0x4e8   : > { %5654 = vmatprep.subr.bf16.mxu0 %v1498_v52 }
 0x4e9   : > { %v2681_v18 = vpop.xlane.xlu1 %2680 }
 0x4ea   : > { %6562 = vrcp.f32 %v2681_v18 }
 0x4eb   : > { %5655 = vmatpush3.bf16.msra.mxu0 %v1498_v52  ;;  %v2672_v41 = vpop.xlane.xlu0 %2671 }
 0x4ec   : > { %6564 = vrcp.f32 %v2672_v41  ;;  %5656 = vmatprep.subr.bf16.mxu0 %v1499_v55  ;;  %6201 = vrot.lane.b32.xlu0 %v9061_v46, %s6823_s24 }
 0x4ed   : > { %6566 = vrcp.f32 %v2678_v8  ;;  %v2675_v13 = vpop.xlane.xlu1 %2674 }
 0x4ee   : > { %6568 = vrcp.f32 %v2675_v13 }
 0x4ef   : > { %5657 = vmatpush3.bf16.msra.mxu0 %v1499_v55  ;;  %v2690_v34 = vpop.xlane.xlu0 %2689  ;;  %6570 = vpow2.f32 %v2604_v6  ;;  %v9063_v6 = vld [vmem:[#allocation35_spill] sm:$0xff] }
 0x4f0   : > { %5658 = vmatprep.subr.bf16.mxu0 %v1500_v39 }
 0x4f3   : > { %5659 = vmatpush3.bf16.msra.mxu0 %v1500_v39  ;;  %v2714_v26 = vpop.xlane.xlu0 %2713 }
 0x4f4   : > { %5684 = vmatprep.subr.bf16.mxu0 %v8240_v54  ;;  %v6563_v44 = vpop.eup %6562 }
 0x4f5   : > { %v2849_v1 = vmul.f32 %v6563_v44, %v7966_v15  ;;  %v6173_v44 = vunpack.i.l.bf16 %v9063_v6 }
 0x4f6   : > { %v6565_v4 = vpop.eup %6564 }
 0x4f7   : > { %v6567_v0 = vpop.eup %6566  ;;  %v2684_v29 = vpop.xlane.xlu1 %2683  ;;  %v2843_v10 = vmul.f32 %v6565_v4, %v7972_v49 }
 0x4f8   : > { %v6569_v60 = vpop.eup %6568  ;;  %v2847_v5 = vmul.f32 %v6567_v0, %v7961_v14 }
 0x4f9   : > { %v2845_v61 = vmul.f32 %v6569_v60, %v7977_v16  ;;  %v8247_v18 = vpop.eup %6570 }
 0x4fa   : > { %v2941_v8 = vpack.c.bf16 %v2849_v1, %v2847_v5  ;;  %v2793_v49 = vsel %vm2225_vm1, %v8247_v18, 0.0  ;;  %v9064_v1 = vld [vmem:[#allocation38_spill] sm:$0xff] }
 0x4fb   : > { %v2708_v19 = vpop.xlane.xlu0 %2707  ;;  %v2693_v52 = vpop.xlane.xlu1 %2692  ;;  %v2940_v40 = vpack.c.bf16 %v2845_v61, %v2843_v10  ;;  %v6184_v10 = vunpack.i.h.bf16 %v9064_v1 }
 0x4fc   : > { %6572 = vrcp.f32 %v2693_v52 }
 0x4fd   : > { %5632 = vmatprep.mubr.msk.bf16.mxu0 %vm2225_vm1, %v2940_v40  ;;  %6574 = vrcp.f32 %v2684_v29  ;;  %v9065_v40 = vld [vmem:[#allocation37_spill] sm:$0xff] }
 0x4fe   : > { %5633 = vmatmul.mubr.msk.bf16.gmra.mrb[64].mxu0 %vm2225_vm1, %v2941_v8  ;;  %6576 = vrcp.f32 %v2690_v34  ;;  %v6174_v34 = vunpack.i.h.bf16 %v9063_v6  ;;  %v6179_v8 = vunpack.i.h.bf16 %v9065_v40 }
 0x4ff   : > { %v2687_v15 = vpop.xlane.xlu0 %2686  ;;  %v2717_v27 = vpop.xlane.xlu1 %2716 }
 0x500   : > { %6578 = vrcp.f32 %v2687_v15  ;;  %v6178_v15 = vunpack.i.l.bf16 %v9065_v40 }
 0x501   : > { %2794 = vadd.xlane.f32.xlu1 %v2793_v49  ;;  %6580 = vrcp.f32 %v2717_v27  ;;  %v9066_v27 = vld [vmem:[#allocation56_spill] sm:$0xff] }
 0x502   : > { %6582 = vrcp.f32 %v2708_v19 }
 0x503   : > { %v2702_v14 = vpop.xlane.xlu0 %2701  ;;  %v2711_v16 = vpop.xlane.xlu1 %2710  ;;  %6584 = vrcp.f32 %v2714_v26 }
 0x504   : > { %6586 = vrcp.f32 %v2711_v16 }
 0x506   : > { %v6573_v62 = vpop.eup %6572 }
 0x507   : > { %v2726_v7 = vpop.xlane.xlu0 %2725  ;;  %v2696_v55 = vpop.xlane.xlu1 %2695  ;;  %v2857_v46 = vmul.f32 %v6573_v62, %v7999_v53  ;;  %v9068_v62 = vld [vmem:[#allocation40_spill] sm:$0xff] }
 0x508   : > { %v6575_v12 = vpop.eup %6574 }
 0x509   : > { %v6577_v3 = vpop.eup %6576  ;;  %v2851_v11 = vmul.f32 %v6575_v12, %v7993_v20  ;;  %v6183_v20 = vunpack.i.l.bf16 %v9064_v1 }
 0x50a   : > { %v6579_v41 = vpop.eup %6578  ;;  %v2855_v4 = vmul.f32 %v6577_v3, %v7982_v37  ;;  %v1502_v37 = vpack.c.bf16 %v6174_v34, %v6173_v44  ;;  %v9069_v3 = vld [vmem:[#allocation39_spill] sm:$0xff] }
 0x50b   : > { %v2720_v13 = vpop.xlane.xlu0 %2719  ;;  %v2705_v17 = vpop.xlane.xlu1 %2704  ;;  %v2853_v31 = vmul.f32 %v6579_v41, %v8011_v2  ;;  %v1503_v12 = vpack.c.bf16 %v6184_v10, %v6183_v20  ;;  %v6189_v41 = vunpack.i.h.bf16 %v9069_v3  ;;  %v9074_v10 = vld [vmem:[#allocation57_spill] sm:$0xff] }
 0x50c   : > { %v6581_v39 = vpop.eup %6580  ;;  %6588 = vrcp.f32 %v2705_v17  ;;  %v2943_v60 = vpack.c.bf16 %v2857_v46, %v2855_v4  ;;  %v1506_v46 = vpack.c.bf16 %v6179_v8, %v6178_v15  ;;  %v9071_v4 = vld [vmem:[#allocation60_spill] sm:$0xff]  ;;  %v9076_v15 = vld [vmem:[#allocation62_spill] sm:$0xff] }
 0x50d   : > { %v6583_v0 = vpop.eup %6582  ;;  %v2942_v26 = vpack.c.bf16 %v2853_v31, %v2851_v11  ;;  %6590 = vrcp.f32 %v2696_v55  ;;  %v2873_v2 = vmul.f32 %v6581_v39, %v8005_v42  ;;  %v9067_v42 = vld [vmem:[#allocation22_spill] sm:$0xff]  ;;  %v6193_v55 = vunpack.i.l.bf16 %v9068_v62  ;;  %v9070_v31 = vld [vmem:[#allocation41_spill] sm:$0xff] }
 0x50e   : > { %v6585_v29 = vpop.eup %6584  ;;  %6592 = vrcp.f32 %v2702_v14  ;;  %v2867_v19 = vmul.f32 %v6583_v0, %v8002_v50  ;;  %v6199_v39 = vunpack.i.h.bf16 %v9070_v31  ;;  %v6198_v6 = vunpack.i.l.bf16 %v9070_v31 }
 0x50f   : > { %v6587_v53 = vpop.eup %6586  ;;  %v2699_v61 = vpop.xlane.xlu0 %2698  ;;  %5644 = vmatprep.mubr.msk.bf16.mxu1 %vm2225_vm1, %v2942_v26  ;;  %v2871_v49 = vmul.f32 %v6585_v29, %v9066_v27 }
 0x510   : > { %v2729_v5 = vpop.xlane.xlu1 %2728  ;;  %6594 = vrcp.f32 %v2699_v61  ;;  %5645 = vmatmul.mubr.msk.bf16.vlgmr.msra.gmra.mrb[68].mxu1 %vm2225_vm1, %v2943_v60  ;;  %v2869_v52 = vmul.f32 %v6587_v53, %v8015_v9  ;;  %v6194_v9 = vunpack.i.h.bf16 %v9068_v62  ;;  %v9073_v60 = vld [vmem:[#allocation63_spill] sm:$0xff]  ;;  %v1508_v61 = vpack.c.bf16 %v6199_v39, %v6198_v6 }
 0x511   : > { %6596 = vrcp.f32 %v2729_v5  ;;  %5669 = vmatpush3.bf16.msra.mxu1 %v8193_v23  ;;  %v2947_v16 = vpack.c.bf16 %v2873_v2, %v2871_v49  ;;  %v6188_v23 = vunpack.i.l.bf16 %v9069_v3 }
 0x512   : > { %6598 = vrcp.f32 %v2720_v13  ;;  %5670 = vmatprep.subr.bf16.mxu1 %v1502_v37  ;;  %6216 = vrot.lane.b32.xlu1 %v9067_v42, %s6823_s24  ;;  %v2946_v14 = vpack.c.bf16 %v2869_v52, %v2867_v19  ;;  %v1504_v17 = vpack.c.bf16 %v6194_v9, %v6193_v55  ;;  %v9075_v52 = vld [vmem:[#allocation61_spill] sm:$0xff]  ;;  %v9077_v42 = vld [vmem:[#allocation58_spill] sm:$0xff] }
 0x513   : > { %6600 = vrcp.f32 %v2726_v7  ;;  %v1507_v34 = vpack.c.bf16 %v6189_v41, %v6188_v23 }
 0x514   : > { %v2723_v50 = vpop.xlane.xlu1 %2722  ;;  %5660 = vmatprep.mubr.msk.bf16.mxu0 %vm2225_vm1, %v2946_v14 }
 0x515   : > { %6602 = vrcp.f32 %v2723_v50  ;;  %5661 = vmatmul.mubr.msk.bf16.vlgmr.msra.gmra.mrb[68].mxu0 %vm2225_vm1, %v2947_v16  ;;  %5671 = vmatpush3.bf16.msra.mxu1 %v1502_v37 }
 0x516   : > { %5685 = vmatpush3.bf16.msra.mxu0 %v8240_v54  ;;  %5672 = vmatprep.subr.bf16.mxu1 %v1503_v12  ;;  %v6589_v7 = vpop.eup %6588  ;;  %v9072_v54 = vld [vmem:[#allocation59_spill] sm:$0xff] }
 0x517   : > { %5686 = vmatprep.subr.bf16.mxu0 %v1506_v46  ;;  %v6591_v13 = vpop.eup %6590  ;;  %v2865_v0 = vmul.f32 %v6589_v7, %v9071_v4 }
 0x518   : > { %v6593_v11 = vpop.eup %6592  ;;  %v2859_v29 = vmul.f32 %v6591_v13, %v9072_v54 }
 0x519   : > { %5673 = vmatpush3.bf16.msra.mxu1 %v1503_v12  ;;  %v2863_v20 = vmul.f32 %v6593_v11, %v9074_v10 }
 0x51a   : > { %v6595_v44 = vpop.eup %6594  ;;  %5687 = vmatpush3.bf16.msra.mxu0 %v1506_v46  ;;  %5674 = vmatprep.subr.bf16.mxu1 %v1504_v17 }
 0x51b   : > { %v6597_v26 = vpop.eup %6596  ;;  %5688 = vmatprep.subr.bf16.mxu0 %v1507_v34  ;;  %v2861_v53 = vmul.f32 %v6595_v44, %v9073_v60  ;;  %v2945_v19 = vpack.c.bf16 %v2865_v0, %v2863_v20 }
 0x51c   : > { %v6599_v1 = vpop.eup %6598  ;;  %v2881_v40 = vmul.f32 %v6597_v26, %v9075_v52 }
 0x51d   : > { %v6601_v2 = vpop.eup %6600  ;;  %5675 = vmatpush3.bf16.msra.mxu1 %v1504_v17  ;;  %v2944_v5 = vpack.c.bf16 %v2861_v53, %v2859_v29  ;;  %v2875_v27 = vmul.f32 %v6599_v1, %v9076_v15 }
 0x51e   : > { %5689 = vmatpush3.bf16.msra.mxu0 %v1507_v34  ;;  %v2879_v14 = vmul.f32 %v6601_v2, %v9077_v42 }
 0x51f   : > { %v6603_v37 = vpop.eup %6602  ;;  %5690 = vmatprep.subr.bf16.mxu0 %v1508_v61  ;;  %v2738_v8 = vpop.xlane.xlu0 %2737  ;;  %5648 = vmatprep.mubr.msk.bf16.mxu1 %vm2225_vm1, %v2944_v5 }
 0x520   : > { %v2877_v49 = vmul.f32 %v6603_v37, %v8047_v25  ;;  %5649 = vmatmul.mubr.msk.bf16.gmra.mrb[72].mxu1 %vm2225_vm1, %v2945_v19  ;;  %v2949_v62 = vpack.c.bf16 %v2881_v40, %v2879_v14 }
 0x521   : > { %v2741_v16 = vpop.xlane.xlu1 %2740 }
 0x522   : > { %v2948_v50 = vpack.c.bf16 %v2877_v49, %v2875_v27  ;;  %5691 = vmatpush3.bf16.msra.mxu0 %v1508_v61  ;;  %6604 = vrcp.f32 %v2741_v16  ;;  %v9078_v16 = vld [vmem:[#allocation48_spill] sm:$0xff] }
 0x523   : > { %v2762_v9 = vpop.xlane.xlu0 %2761 }
 0x524   : > { %5664 = vmatprep.mubr.msk.bf16.mxu0 %vm2225_vm1, %v2948_v50 }
 0x525   : > { %5665 = vmatmul.mubr.msk.bf16.gmra.mrb[72].mxu0 %vm2225_vm1, %v2949_v62  ;;  %v2765_v55 = vpop.xlane.xlu1 %2764 }
 0x527   : > { %v2732_v12 = vpop.xlane.xlu0 %2731 }
 0x528   : > { %6606 = vrcp.f32 %v2732_v12 }
 0x529   : > { %6608 = vrcp.f32 %v2738_v8  ;;  %v2735_v3 = vpop.xlane.xlu1 %2734 }
 0x52a   : > { %6610 = vrcp.f32 %v2735_v3 }
 0x52b   : > { %v2756_v25 = vpop.xlane.xlu0 %2755  ;;  %6612 = vrcp.f32 %v2765_v55 }
 0x52c   : > { %6614 = vrcp.f32 %v2756_v25  ;;  %v6605_v23 = vpop.eup %6604 }
 0x52d   : > { %6616 = vrcp.f32 %v2762_v9  ;;  %v2889_v31 = vmul.f32 %v6605_v23, %v8086_v58 }
 0x52f   : > { %v2759_v41 = vpop.xlane.xlu0 %2758 }
 0x530   : > { %6618 = vrcp.f32 %v2759_v41 }
 0x531   : > { %v2753_v46 = vpop.xlane.xlu1 %2752 }
 0x532   : > { %v6607_v7 = vpop.eup %6606 }
 0x533   : > { %v6609_v13 = vpop.eup %6608  ;;  %v2750_v17 = vpop.xlane.xlu0 %2749  ;;  %v2883_v6 = vmul.f32 %v6607_v7, %v8106_v59 }
 0x534   : > { %v6611_v11 = vpop.eup %6610  ;;  %v2887_v44 = vmul.f32 %v6609_v13, %v8078_v48  ;;  %6620 = vrcp.f32 %v2750_v17 }
 0x535   : > { %v2777_v39 = vpop.xlane.xlu1 %2776  ;;  %v2885_v34 = vmul.f32 %v6611_v11, %v8111_v21  ;;  %v6613_v4 = vpop.eup %6612 }
 0x536   : > { %v6615_v54 = vpop.eup %6614  ;;  %v2951_v29 = vpack.c.bf16 %v2889_v31, %v2887_v44  ;;  %v2905_v58 = vmul.f32 %v6613_v4, %v8100_v28 }
 0x537   : > { %v2774_v0 = vpop.xlane.xlu0 %2773  ;;  %v2950_v26 = vpack.c.bf16 %v2885_v34, %v2883_v6  ;;  %v6617_v60 = vpop.eup %6616  ;;  %v2899_v48 = vmul.f32 %v6615_v54, %v8116_v35 }
 0x538   : > { %v2903_v10 = vmul.f32 %v6617_v60, %v8092_v36 }
 0x539   : > { %5676 = vmatprep.mubr.msk.bf16.mxu1 %vm2225_vm1, %v2950_v26  ;;  %v2747_v53 = vpop.xlane.xlu1 %2746 }
 0x53a   : > { %v6619_v1 = vpop.eup %6618  ;;  %6622 = vrcp.f32 %v2747_v53  ;;  %5677 = vmatmul.mubr.msk.bf16.vlgmr.msra.gmra.mrb[76].mxu1 %vm2225_vm1, %v2951_v29  ;;  %v2955_v2 = vpack.c.bf16 %v2905_v58, %v2903_v10 }
 0x53b   : > { %6624 = vrcp.f32 %v2753_v46  ;;  %v2744_v59 = vpop.xlane.xlu0 %2743  ;;  %v2901_v21 = vmul.f32 %v6619_v1, %v8121_v47 }
 0x53c   : > { %6626 = vrcp.f32 %v2744_v59 }
 0x53d   : > { %v2954_v20 = vpack.c.bf16 %v2901_v21, %v2899_v48  ;;  %6628 = vrcp.f32 %v2774_v0 }
 0x53e   : > { %v6621_v28 = vpop.eup %6620 }
 0x53f   : > { %v2768_v61 = vpop.xlane.xlu0 %2767  ;;  %5692 = vmatprep.mubr.msk.bf16.mxu0 %vm2225_vm1, %v2954_v20  ;;  %v2895_v47 = vmul.f32 %v6621_v28, %v8125_v33  ;;  %v9079_v33 = vld [vmem:[#allocation45_spill] sm:$0xff] }
 0x540   : > { %5693 = vmatmul.mubr.msk.bf16.vlgmr.msra.gmra.mrb[76].mxu0 %vm2225_vm1, %v2955_v2  ;;  %6630 = vrcp.f32 %v2768_v61 }
 0x541   : > { %6632 = vrcp.f32 %v2777_v39 }
 0x543   : > { %v2771_v5 = vpop.xlane.xlu0 %2770 }
 0x544   : > { %v6623_v37 = vpop.eup %6622  ;;  %6634 = vrcp.f32 %v2771_v5 }
 0x545   : > { %v6625_v35 = vpop.eup %6624  ;;  %v2893_v52 = vmul.f32 %v6623_v37, %v8145_v63  ;;  %v9080_v63 = vld [vmem:[#allocation50_spill] sm:$0xff] }
 0x546   : > { %v6627_v19 = vpop.eup %6626  ;;  %v2897_v40 = vmul.f32 %v6625_v35, %v8129_v32 }
 0x547   : > { %v2891_v36 = vmul.f32 %v6627_v19, %v8141_v22  ;;  %v6629_v27 = vpop.eup %6628 }
 0x548   : > { %v2953_v15 = vpack.c.bf16 %v2897_v40, %v2895_v47  ;;  %v2911_v50 = vmul.f32 %v6629_v27, %v9078_v16 }
 0x549   : > { %v2952_v8 = vpack.c.bf16 %v2893_v52, %v2891_v36 }
 0x54a   : > { %v6631_v49 = vpop.eup %6630 }
 0x54b   : > { %5680 = vmatprep.mubr.msk.bf16.mxu1 %vm2225_vm1, %v2952_v8  ;;  %v6633_v42 = vpop.eup %6632  ;;  %v2907_v9 = vmul.f32 %v6631_v49, %v9079_v33 }
 0x54c   : > { %5681 = vmatmul.mubr.msk.bf16.gmra.mrb[80].mxu1 %vm2225_vm1, %v2953_v15  ;;  %v2913_v55 = vmul.f32 %v6633_v42, %v9080_v63 }
 0x54e   : > { %v6635_v14 = vpop.eup %6634  ;;  %v2957_v12 = vpack.c.bf16 %v2913_v55, %v2911_v50 }
 0x54f   : > { %v2786_v62 = vpop.xlane.xlu0 %2785  ;;  %v2909_v22 = vmul.f32 %v6635_v14, %v8153_v51 }
 0x551   : > { %v2956_v32 = vpack.c.bf16 %v2909_v22, %v2907_v9 }
 0x553   : > { %v2780_v3 = vpop.xlane.xlu0 %2779  ;;  %5696 = vmatprep.mubr.msk.bf16.mxu0 %vm2225_vm1, %v2956_v32 }
 0x554   : > { %6636 = vrcp.f32 %v2780_v3  ;;  %5697 = vmatmul.mubr.msk.bf16.gmra.mrb[80].mxu0 %vm2225_vm1, %v2957_v12 }
 0x555   : > { %v2783_v25 = vpop.xlane.xlu1 %2782 }
 0x556   : > { %6638 = vrcp.f32 %v2783_v25 }
 0x557   : > { %v2789_v41 = vpop.xlane.xlu0 %2788 }
 0x558   : > { %6640 = vrcp.f32 %v2789_v41 }
 0x559   : > { %v6207_v34 = vpop.permute.xlu1 %6206  ;;  %6642 = vrcp.f32 %v2786_v62 }
 0x55a   : > { %v6209_v53 = vunpack.i.h.bf16 %v6207_v34  ;;  %v6208_v1 = vunpack.i.l.bf16 %v6207_v34 }
 0x55b   : > { %v8317_v23 = vpop.f32.mrb[52].mxu1  ;;  %v2798_v46 = vpop.xlane.xlu0 %2797 }
 0x55c   : > { %v8319_v7 = vpop.f32.mrb[53].mxu1  ;;  %v1510_v48 = vpack.c.bf16 %v6209_v53, %v6208_v1 }
 0x55d   : > { %v8321_v13 = vpop.f32.mrb[54].mxu1  ;;  %v6212_v59 = vpop.permute.xlu1 %6211 }
 0x55e   : > { %v6637_v51 = vpop.eup %6636  ;;  %v8323_v17 = vpop.f32.mrb[55].mxu1  ;;  %v6214_v21 = vunpack.i.h.bf16 %v6212_v59  ;;  %v6213_v10 = vunpack.i.l.bf16 %v6212_v59 }
 0x55f   : > { %v2792_v11 = vpop.xlane.xlu0 %2791  ;;  %v2915_v39 = vmul.f32 %v6637_v51, %v8191_v24 }
 0x560   : > { %v6639_v31 = vpop.eup %6638  ;;  %v1511_v20 = vpack.c.bf16 %v6214_v21, %v6213_v10  ;;  %6644 = vrcp.f32 %v2792_v11 }
 0x561   : > { %v2917_v6 = vmul.f32 %v6639_v31, %v8199_v43 }
 0x562   : > { %v6641_v35 = vpop.eup %6640 }
 0x563   : > { %v8327_v44 = vpop.f32.mrb[56].mxu1  ;;  %v2801_v4 = vpop.xlane.xlu0 %2800  ;;  %v2958_v0 = vpack.c.bf16 %v2917_v6, %v2915_v39  ;;  %v2921_v15 = vmul.f32 %v6641_v35, %v8195_v45 }
 0x564   : > { %v8329_v26 = vpop.f32.mrb[57].mxu1  ;;  %v6643_v40 = vpop.eup %6642 }
 0x565   : > { %v8331_v54 = vpop.f32.mrb[58].mxu1  ;;  %5708 = vmatprep.mubr.msk.bf16.mxu1 %vm2225_vm1, %v2958_v0  ;;  %v2919_v16 = vmul.f32 %v6643_v40, %v8185_v56 }
 0x566   : > { %v8334_v29 = vpop.f32.mrb[59].mxu1 }
 0x567   : > { %v6202_v60 = vpop.permute.xlu0 %6201  ;;  %v2959_v62 = vpack.c.bf16 %v2921_v15, %v2919_v16  ;;  %v6350_v16 = vld [vmem:[%s8893_s3 + $0x10] sm:$0xff]  }
 0x568   : > { %v6204_v58 = vunpack.i.h.bf16 %v6202_v60  ;;  %v6203_v24 = vunpack.i.l.bf16 %v6202_v60 }
 0x56a   : > { %v1509_v43 = vpack.c.bf16 %v6204_v58, %v6203_v24  ;;  %v6645_v14 = vpop.eup %6644 }
 0x56b   : > { %v2923_v9 = vmul.f32 %v6645_v14, %v8210_v30 }
 0x56c   : > { %5700 = vmatprep.subr.bf16.mxu1 %v1509_v43 }
 0x56d   : > { %5701 = vmatpush3.bf16.msra.mxu1 %v1509_v43 }
 0x56e   : > { %5702 = vmatprep.subr.bf16.mxu1 %v1510_v48 }
 0x571   : > { %5703 = vmatpush3.bf16.msra.mxu1 %v1510_v48  ;;  %v6348_v48 = vld [vmem:[%s8893_s3] sm:$0xff]  }
 0x572   : > { %5704 = vmatprep.subr.bf16.mxu1 %v1511_v20  ;;  %5716 = vmatprep.subr.bf16.mxu0 %v6348_v48 }
 0x573   : > { %5717 = vmatpush3.bf16.msra.mxu0 %v6348_v48 }
 0x575   : > { %5705 = vmatpush3.bf16.msra.mxu1 %v1511_v20 }
 0x58b   : > { %v8336_v2 = vpop.f32.mrb[60].mxu1 }
 0x58c   : > { %v8338_v61 = vpop.f32.mrb[61].mxu1 }
 0x58d   : > { %v8340_v28 = vpop.f32.mrb[62].mxu1 }
 0x58e   : > { %v8342_v5 = vpop.f32.mrb[63].mxu1  ;;  %v2795_v37 = vpop.xlane.xlu1 %2794 }
 0x58f   : > { %6646 = vrcp.f32 %v2795_v37 }
 0x590   : > { %6648 = vrcp.f32 %v2801_v4 }
 0x591   : > { %6650 = vrcp.f32 %v2798_v46 }
 0x592   : > { %v6217_v19 = vpop.permute.xlu1 %6216 }
 0x593   : > { %v6219_v47 = vunpack.i.h.bf16 %v6217_v19  ;;  %v6218_v36 = vunpack.i.l.bf16 %v6217_v19  ;;  %v8344_v52 = vpop.f32.mrb[64].mxu1  ;;  %v6349_v19 = vld [vmem:[%s8893_s3 + $0x8] sm:$0xff]  }
 0x594   : > { %v8346_v8 = vpop.f32.mrb[65].mxu1  ;;  %5718 = vmatprep.subr.bf16.mxu0 %v6349_v19 }
 0x595   : > { %v1512_v27 = vpack.c.bf16 %v6219_v47, %v6218_v36  ;;  %v8349_v49 = vpop.f32.mrb[66].mxu1  ;;  %5719 = vmatpush3.bf16.msra.mxu0 %v6349_v19 }
 0x596   : > { %v8351_v42 = vpop.f32.mrb[67].mxu1  ;;  %5720 = vmatprep.subr.bf16.mxu0 %v6350_v16 }
 0x597   : > { %5706 = vmatprep.subr.bf16.mxu1 %v1512_v27 }
 0x598   : > { %5707 = vmatpush3.bf16.msra.mxu1 %v1512_v27 }
 0x599   : > { %v6647_v50 = vpop.eup %6646  ;;  %5721 = vmatpush3.bf16.msra.mxu0 %v6350_v16 }
 0x59a   : > { %v6649_v33 = vpop.eup %6648  ;;  %v2925_v22 = vmul.f32 %v6647_v50, %v8247_v18 }
 0x59b   : > { %5709 = vmatmul.mubr.msk.bf16.vlgmr.msra.gmra.mrb[84].mxu1 %vm2225_vm1, %v2959_v62  ;;  %v6651_v45 = vpop.eup %6650  ;;  %v2929_v55 = vmul.f32 %v6649_v33, %v8214_v57  ;;  %v6351_v62 = vld [vmem:[%s8893_s3 + $0x18] sm:$0xff]   ;;  %v6352_v33 = vld [vmem:[%s8893_s3 + $0x20] sm:$0xff]  }
 0x59c   : > { %v2960_v63 = vpack.c.bf16 %v2925_v22, %v2923_v9  ;;  %v2927_v32 = vmul.f32 %v6651_v45, %v8206_v38  ;;  %5722 = vmatprep.subr.bf16.mxu0 %v6351_v62  ;;  %v6353_v9 = vld [vmem:[%s8893_s3 + $0x28] sm:$0xff]   ;;  %v6354_v22 = vld [vmem:[%s8893_s3 + $0x30] sm:$0xff]  }
 0x59d   : > { %5723 = vmatpush3.bf16.msra.mxu0 %v6351_v62 }
 0x59e   : > { %5712 = vmatprep.mubr.msk.bf16.mxu1 %vm2225_vm1, %v2960_v63  ;;  %v2961_v56 = vpack.c.bf16 %v2929_v55, %v2927_v32  ;;  %5724 = vmatprep.subr.bf16.mxu0 %v6352_v33  ;;  %v6355_v55 = vld [vmem:[%s8893_s3 + $0x38] sm:$0xff]  }
 0x5a1   : > { %5725 = vmatpush3.bf16.msra.mxu0 %v6352_v33 }
 0x5a2   : > { %5726 = vmatprep.subr.bf16.mxu0 %v6353_v9 }
 0x5a3   : > { %5713 = vmatmul.mubr.msk.bf16.gmra.mrb[88].mxu1 %vm2225_vm1, %v2961_v56 }
 0x5a5   : > { %5727 = vmatpush3.bf16.msra.mxu0 %v6353_v9 }
 0x5a6   : > { %5728 = vmatprep.subr.bf16.mxu0 %v6354_v22 }
 0x5a9   : > { %5729 = vmatpush3.bf16.msra.mxu0 %v6354_v22 }
 0x5aa   : > { %5730 = vmatprep.subr.bf16.mxu0 %v6355_v55 }
 0x5ad   : > { %5731 = vmatpush3.bf16.msra.mxu0 %v6355_v55 }
 0x5b9   : > { %v5630_v12 = vpop.f32.mrb[60].mxu0 }
 0x5ba   : > { %v3162_v3 = vpop.f32.mrb[61].mxu0 }
 0x5bb   : > { %v5631_v25 = vpop.f32.mrb[62].mxu0 }
 0x5bc   : > { %v6220_v41 = vpack.i.bf16 %v5631_v25, %v5630_v12  ;;  %v3165_v30 = vpop.f32.mrb[63].mxu0 }
 0x5bd   : > { %v6225_v46 = vpack.i.bf16 %v3165_v30, %v3162_v3 }
 0x5be   : > { %6221 = vrot.lane.b32.xlu1 %v6220_v41, %s6823_s24 }
 0x5bf   : > { %6226 = vrot.lane.b32.xlu0 %v6225_v46, %s6823_s24 }
 0x5d1   : > { %v5634_v18 = vpop.f32.mrb[64].mxu0 }
 0x5d2   : > { %v3178_v51 = vpop.f32.mrb[65].mxu0 }
 0x5d3   : > { %v5635_v57 = vpop.f32.mrb[66].mxu0 }
 0x5d4   : > { %v6230_v11 = vpack.i.bf16 %v5635_v57, %v5634_v18  ;;  %v3181_v31 = vpop.f32.mrb[67].mxu0 }
 0x5d5   : > { %v6235_v39 = vpack.i.bf16 %v3181_v31, %v3178_v51 }
 0x5d6   : > { %6231 = vrot.lane.b32.xlu1 %v6230_v11, %s6823_s24 }
 0x5d7   : > { %6236 = vrot.lane.b32.xlu0 %v6235_v39, %s6823_s24 }
 0x5e3   : > { %v5646_v38 = vpop.f32.mrb[68].mxu1 }
 0x5e4   : > { %v3239_v6 = vpop.f32.mrb[69].mxu1 }
 0x5e5   : > { %v5647_v34 = vpop.f32.mrb[70].mxu1 }
 0x5e6   : > { %v6245_v4 = vpack.i.bf16 %v5647_v34, %v5646_v38  ;;  %v3242_v0 = vpop.f32.mrb[71].mxu1 }
 0x5e7   : > { %v6255_v60 = vpack.i.bf16 %v3242_v0, %v3239_v6 }
 0x5e8   : > { %v5662_v53 = vpop.f32.mrb[68].mxu0 }
 0x5e9   : > { %v3316_v1 = vpop.f32.mrb[69].mxu0 }
 0x5ea   : > { %v5663_v58 = vpop.f32.mrb[70].mxu0 }
 0x5eb   : > { %v6240_v24 = vpack.i.bf16 %v5663_v58, %v5662_v53  ;;  %v3319_v59 = vpop.f32.mrb[71].mxu0 }
 0x5ec   : > { %v6250_v43 = vpack.i.bf16 %v3319_v59, %v3316_v1 }
 0x5ed   : > { %6241 = vrot.lane.b32.xlu1 %v6240_v24, %s6822_s23 }
 0x5ee   : > { %6251 = vrot.lane.b32.xlu0 %v6250_v43, %s6822_s23 }
 0x5f1   : > { %6246 = vrot.lane.b32.xlu1 %v6245_v4, %s6823_s24 }
 0x5f2   : > { %6256 = vrot.lane.b32.xlu0 %v6255_v60, %s6823_s24 }
 0x5f3   : > { %v8372_v21 = vpop.f32.mrb[72].mxu1 }
 0x5f4   : > { %v8374_v10 = vpop.f32.mrb[73].mxu1 }
 0x5f5   : > { %v8376_v20 = vpop.f32.mrb[74].mxu1 }
 0x5f6   : > { %v6305_v37 = vpack.i.bf16 %v8376_v20, %v8372_v21  ;;  %v3258_v35 = vpop.f32.mrb[75].mxu1 }
 0x5f7   : > { %v6300_v47 = vpack.i.bf16 %v3258_v35, %v8374_v10 }
 0x5f8   : > { %v5666_v36 = vpop.f32.mrb[72].mxu0 }
 0x5f9   : > { %v3332_v40 = vpop.f32.mrb[73].mxu0 }
 0x5fa   : > { %v5667_v15 = vpop.f32.mrb[74].mxu0 }
 0x5fb   : > { %v6260_v27 = vpack.i.bf16 %v5667_v15, %v5666_v36  ;;  %v3335_v14 = vpop.f32.mrb[75].mxu0 }
 0x5fc   : > { %v6265_v50 = vpack.i.bf16 %v3335_v14, %v3332_v40 }
 0x5fd   : > { %6261 = vrot.lane.b32.xlu1 %v6260_v27, %s6822_s23 }
 0x5fe   : > { %6266 = vrot.lane.b32.xlu0 %v6265_v50, %s6822_s23 }
 0x60d   : > { %v5678_v45 = vpop.f32.mrb[76].mxu1 }
 0x60e   : > { %v3393_v63 = vpop.f32.mrb[77].mxu1 }
 0x60f   : > { %v5679_v32 = vpop.f32.mrb[78].mxu1 }
 0x610   : > { %v6275_v56 = vpack.i.bf16 %v5679_v32, %v5678_v45  ;;  %v3396_v12 = vpop.f32.mrb[79].mxu1 }
 0x611   : > { %v6285_v3 = vpack.i.bf16 %v3396_v12, %v3393_v63 }
 0x613   : > { %v5694_v25 = vpop.f32.mrb[76].mxu0 }
 0x614   : > { %v3470_v41 = vpop.f32.mrb[77].mxu0 }
 0x615   : > { %v5695_v30 = vpop.f32.mrb[78].mxu0 }
 0x616   : > { %v6270_v46 = vpack.i.bf16 %v5695_v30, %v5694_v25  ;;  %v3473_v18 = vpop.f32.mrb[79].mxu0 }
 0x617   : > { %v6280_v51 = vpack.i.bf16 %v3473_v18, %v3470_v41 }
 0x618   : > { %6271 = vrot.lane.b32.xlu1 %v6270_v46, %s6821_s22 }
 0x619   : > { %6281 = vrot.lane.b32.xlu0 %v6280_v51, %s6821_s22 }
 0x61c   : > { %6276 = vrot.lane.b32.xlu1 %v6275_v56, %s6822_s23 }
 0x61d   : > { %6286 = vrot.lane.b32.xlu0 %v6285_v3, %s6822_s23 }
 0x61f   : > { %v5682_v57 = vpop.f32.mrb[80].mxu1 }
 0x620   : > { %v3409_v11 = vpop.f32.mrb[81].mxu1 }
 0x621   : > { %v5683_v31 = vpop.f32.mrb[82].mxu1 }
 0x622   : > { %v6325_v39 = vpack.i.bf16 %v5683_v31, %v5682_v57  ;;  %v3412_v38 = vpop.f32.mrb[83].mxu1 }
 0x623   : > { %v6320_v6 = vpack.i.bf16 %v3412_v38, %v3409_v11 }
 0x627   : > { %v5698_v34 = vpop.f32.mrb[80].mxu0 }
 0x628   : > { %v3486_v4 = vpop.f32.mrb[81].mxu0 }
 0x629   : > { %v5699_v0 = vpop.f32.mrb[82].mxu0 }
 0x62a   : > { %v6290_v60 = vpack.i.bf16 %v5699_v0, %v5698_v34  ;;  %v3489_v53 = vpop.f32.mrb[83].mxu0 }
 0x62b   : > { %v6295_v1 = vpack.i.bf16 %v3489_v53, %v3486_v4 }
 0x62c   : > { %6291 = vrot.lane.b32.xlu1 %v6290_v60, %s6821_s22 }
 0x62d   : > { %6296 = vrot.lane.b32.xlu0 %v6295_v1, %s6821_s22 }
 0x630   : > { %6306 = vrot.lane.b32.xlu1 %v6305_v37, %s6823_s24  ;;  %v6222_v58 = vpop.permute.xlu1 %6221 }
 0x631   : > { %6301 = vrot.lane.b32.xlu0 %v6300_v47, %s6823_s24  ;;  %v6227_v24 = vpop.permute.xlu0 %6226  ;;  %v6224_v63 = vunpack.i.h.bf16 %v6222_v58  ;;  %v6223_v55 = vunpack.i.l.bf16 %v6222_v58 }
 0x632   : > { %v6229_v56 = vunpack.i.h.bf16 %v6227_v24  ;;  %v6228_v12 = vunpack.i.l.bf16 %v6227_v24 }
 0x633   : > { %v3773_v18 = vsel %vm428_vm0, %v8321_v13, %v6224_v63  ;;  %v3772_v51 = vsel %vm428_vm0, %v8317_v23, %v6223_v55 }
 0x634   : > { %v3771_v11 = vsel %vm428_vm0, %v8323_v17, %v6229_v56  ;;  %v3770_v31 = vsel %vm428_vm0, %v8319_v7, %v6228_v12 }
 0x648   : > { %v8412_v59 = vpop.permute.xlu1 %6231 }
 0x649   : > { %v8414_v43 = vpop.permute.xlu0 %6236 }
 0x65f   : > { %v6242_v48 = vpop.permute.xlu1 %6241 }
 0x660   : > { %v6252_v21 = vpop.permute.xlu0 %6251  ;;  %v6244_v25 = vunpack.i.h.bf16 %v6242_v48  ;;  %v6243_v41 = vunpack.i.l.bf16 %v6242_v48 }
 0x661   : > { %v6254_v30 = vunpack.i.h.bf16 %v6252_v21  ;;  %v6253_v46 = vunpack.i.l.bf16 %v6252_v21 }
 0x662   : > { %v3788_v34 = vsel %vm2225_vm1, %v3772_v51, %v6243_v41  ;;  %v3789_v4 = vsel %vm2225_vm1, %v3773_v18, %v6244_v25 }
 0x663   : > { %v6247_v10 = vpop.permute.xlu1 %6246  ;;  %v3787_v60 = vsel %vm2225_vm1, %v3771_v11, %v6254_v30  ;;  %v3786_v23 = vsel %vm2225_vm1, %v3770_v31, %v6253_v46 }
 0x664   : > { %v6249_v20 = vunpack.i.h.bf16 %v6247_v10  ;;  %v6248_v35 = vunpack.i.l.bf16 %v6247_v10  ;;  %v6257_v19 = vpop.permute.xlu0 %6256 }
 0x665   : > { %v6259_v36 = vunpack.i.h.bf16 %v6257_v19  ;;  %v6258_v40 = vunpack.i.l.bf16 %v6257_v19 }
 0x666   : > { %v3781_v15 = vsel %vm428_vm0, %v8340_v28, %v6249_v20  ;;  %v3780_v37 = vsel %vm428_vm0, %v8336_v2, %v6248_v35 }
 0x667   : > { %v3779_v47 = vsel %vm428_vm0, %v8342_v5, %v6259_v36  ;;  %v3778_v27 = vsel %vm428_vm0, %v8338_v61, %v6258_v40 }
 0x66e   : > { %v5710_v14 = vpop.f32.mrb[84].mxu1 }
 0x66f   : > { %v3547_v16 = vpop.f32.mrb[85].mxu1  ;;  %v6262_v32 = vpop.permute.xlu1 %6261 }
 0x670   : > { %v5711_v50 = vpop.f32.mrb[86].mxu1  ;;  %v6267_v3 = vpop.permute.xlu0 %6266 }
 0x671   : > { %v6310_v62 = vpack.i.bf16 %v5711_v50, %v5710_v14  ;;  %v3550_v33 = vpop.f32.mrb[87].mxu1  ;;  %v6234_v50 = vunpack.i.h.bf16 %v8412_v59 }
 0x672   : > { %v6315_v9 = vpack.i.bf16 %v3550_v33, %v3547_v16  ;;  %v6239_v33 = vunpack.i.h.bf16 %v8414_v43 }
 0x673   : > { %6311 = vrot.lane.b32.xlu1 %v6310_v62, %s6821_s22  ;;  %v6233_v62 = vunpack.i.l.bf16 %v8412_v59 }
 0x674   : > { %6316 = vrot.lane.b32.xlu0 %v6315_v9, %s6821_s22  ;;  %v6238_v9 = vunpack.i.l.bf16 %v8414_v43 }
 0x676   : > { %v5714_v28 = vpop.f32.mrb[88].mxu1  ;;  %v3774_v59 = vsel %vm428_vm0, %v8329_v26, %v6238_v9 }
 0x677   : > { %6326 = vrot.lane.b32.xlu1 %v6325_v39, %s6822_s23  ;;  %v3563_v2 = vpop.f32.mrb[89].mxu1 }
 0x678   : > { %6321 = vrot.lane.b32.xlu0 %v6320_v6, %s6822_s23  ;;  %v5715_v5 = vpop.f32.mrb[90].mxu1 }
 0x679   : > { %v6335_v22 = vpack.i.bf16 %v5715_v5, %v5714_v28  ;;  %v3566_v45 = vpop.f32.mrb[91].mxu1  ;;  %v6264_v28 = vunpack.i.h.bf16 %v6262_v32  ;;  %v6269_v5 = vunpack.i.h.bf16 %v6267_v3 }
 0x67a   : > { %v6330_v61 = vpack.i.bf16 %v3566_v45, %v3563_v2  ;;  %v6263_v2 = vunpack.i.l.bf16 %v6262_v32 }
 0x67b   : > { %6336 = vrot.lane.b32.xlu1 %v6335_v22, %s6821_s22  ;;  %v3775_v22 = vsel %vm428_vm0, %v8334_v29, %v6239_v33 }
 0x67c   : > { %6331 = vrot.lane.b32.xlu0 %v6330_v61, %s6821_s22 }
 0x68a   : > { %v6272_v57 = vpop.permute.xlu1 %6271 }
 0x68b   : > { %v6274_v39 = vunpack.i.h.bf16 %v6272_v57  ;;  %v6273_v38 = vunpack.i.l.bf16 %v6272_v57  ;;  %v6282_v6 = vpop.permute.xlu0 %6281 }
 0x68c   : > { %v6284_v0 = vunpack.i.h.bf16 %v6282_v6  ;;  %v6283_v13 = vunpack.i.l.bf16 %v6282_v6 }
 0x68d   : > { %v3805_v53 = vsel %vm3802_vm2, %v3788_v34, %v6273_v38  ;;  %v3806_v17 = vsel %vm3802_vm2, %v3789_v4, %v6274_v39 }
 0x68e   : > { %v3820_v1 = vpack.c.bf16 %v3806_v17, %v3805_v53  ;;  %v6277_v58 = vpop.permute.xlu1 %6276  ;;  %v3803_v7 = vsel %vm3802_vm2, %v3786_v23, %v6283_v13  ;;  %v3804_v24 = vsel %vm3802_vm2, %v3787_v60, %v6284_v0 }
 0x68f   : > { %v6279_v48 = vunpack.i.h.bf16 %v6277_v58  ;;  %v6278_v21 = vunpack.i.l.bf16 %v6277_v58  ;;  %v6287_v10 = vpop.permute.xlu0 %6286  ;;  %v3819_v20 = vpack.c.bf16 %v3804_v24, %v3803_v7 }
 0x690   : > { %v6289_v35 = vunpack.i.h.bf16 %v6287_v10  ;;  %v6288_v19 = vunpack.i.l.bf16 %v6287_v10 }
 0x691   : > { %v3796_v36 = vsel %vm2225_vm1, %v3780_v37, %v6278_v21  ;;  %v3797_v40 = vsel %vm2225_vm1, %v3781_v15, %v6279_v48  ;;  %5732 = vmatprep.mubr.bf16.mxu0 %v3819_v20  ;;  %v6268_v37 = vunpack.i.l.bf16 %v6267_v3  ;;  %v3777_v15 = vsel %vm428_vm0, %v8331_v54, %v6234_v50 }
 0x692   : > { %v3795_v14 = vsel %vm2225_vm1, %v3779_v47, %v6289_v35  ;;  %v3794_v16 = vsel %vm2225_vm1, %v3778_v27, %v6288_v19  ;;  %5733 = vmatmul.mubr.bf16.vlgmr.msra.gmra.mrb[84].mxu0 %v3820_v1  ;;  %v3776_v47 = vsel %vm428_vm0, %v8327_v44, %v6233_v62  ;;  %v3793_v55 = vsel %vm2225_vm1, %v3777_v15, %v6264_v28  ;;  %v8493_v15 = vld [vmem:[%s8894_s4] ss:$0 sm:$0xff] }
 0x693   : > { %v3792_v63 = vsel %vm2225_vm1, %v3776_v47, %v6263_v2  ;;  %v3791_v54 = vsel %vm2225_vm1, %v3775_v22, %v6269_v5  ;;  %v3790_v44 = vsel %vm2225_vm1, %v3774_v59, %v6268_v37 }
 0x69e   : > { %v6292_v27 = vpop.permute.xlu1 %6291 }
 0x69f   : > { %v6294_v45 = vunpack.i.h.bf16 %v6292_v27  ;;  %v6293_v61 = vunpack.i.l.bf16 %v6292_v27  ;;  %v6297_v43 = vpop.permute.xlu0 %6296 }
 0x6a0   : > { %v6299_v32 = vunpack.i.h.bf16 %v6297_v43  ;;  %v6298_v56 = vunpack.i.l.bf16 %v6297_v43  ;;  %v9081_v43 = vld [vmem:[#allocation2_spill] sm:$0xff] }
 0x6a1   : > { %v3809_v12 = vsel %vm3802_vm2, %v3792_v63, %v6293_v61  ;;  %v3810_v29 = vsel %vm3802_vm2, %v3793_v55, %v6294_v45 }
 0x6a2   : > { %v3807_v3 = vsel %vm3802_vm2, %v3790_v44, %v6298_v56  ;;  %v3808_v26 = vsel %vm3802_vm2, %v3791_v54, %v6299_v32  ;;  %v3822_v25 = vpack.c.bf16 %v3810_v29, %v3809_v12  ;;  %v6307_v30 = vpop.permute.xlu1 %6306  ;;  %v9082_v32 = vld [vmem:[#allocation3_spill] sm:$0xff]  ;;  %v9083_v44 = vld [vmem:[#allocation4_spill] sm:$0xff] }
 0x6a3   : > { %v3821_v41 = vpack.c.bf16 %v3808_v26, %v3807_v3  ;;  %v6302_v46 = vpop.permute.xlu0 %6301  ;;  %v6309_v38 = vunpack.i.h.bf16 %v6307_v30  ;;  %v6308_v4 = vunpack.i.l.bf16 %v6307_v30  ;;  %v9084_v26 = vld [vmem:[#allocation5_spill] sm:$0xff] }
 0x6a4   : > { %v6304_v53 = vunpack.i.h.bf16 %v6302_v46  ;;  %v6303_v17 = vunpack.i.l.bf16 %v6302_v46 }
 0x6a5   : > { %5736 = vmatprep.mubr.bf16.mxu0 %v3821_v41  ;;  %v3785_v10 = vsel %vm428_vm0, %v8349_v49, %v6309_v38  ;;  %v3784_v20 = vsel %vm428_vm0, %v8344_v52, %v6308_v4  ;;  %v9086_v4 = vld [vmem:[#allocation8_spill] sm:$0xff] }
 0x6a6   : > { %5737 = vmatmul.mubr.bf16.gmra.mrb[88].mxu0 %v3822_v25  ;;  %v3783_v19 = vsel %vm428_vm0, %v8351_v42, %v6304_v53  ;;  %v9088_v53 = vld [vmem:[#allocation9_spill] sm:$0xff] }
 0x6e5   : > { %v6312_v18 = vpop.permute.xlu1 %6311 }
 0x6e6   : > { %v6314_v51 = vunpack.i.h.bf16 %v6312_v18  ;;  %v6313_v57 = vunpack.i.l.bf16 %v6312_v18  ;;  %v6317_v11 = vpop.permute.xlu0 %6316 }
 0x6e7   : > { %v6319_v31 = vunpack.i.h.bf16 %v6317_v11  ;;  %v6318_v39 = vunpack.i.l.bf16 %v6317_v11 }
 0x6e8   : > { %v3813_v6 = vsel %vm3802_vm2, %v3796_v36, %v6313_v57  ;;  %v3814_v34 = vsel %vm3802_vm2, %v3797_v40, %v6314_v51  ;;  %v3782_v36 = vsel %vm428_vm0, %v8346_v8, %v6303_v17 }
 0x6e9   : > { %v6327_v0 = vpop.permute.xlu1 %6326  ;;  %v3811_v13 = vsel %vm3802_vm2, %v3794_v16, %v6318_v39  ;;  %v3812_v60 = vsel %vm3802_vm2, %v3795_v14, %v6319_v31  ;;  %v3824_v23 = vpack.c.bf16 %v3814_v34, %v3813_v6  ;;  %v9085_v39 = vld [vmem:[#allocation6_spill] sm:$0xff] }
 0x6ea   : > { %v6322_v1 = vpop.permute.xlu0 %6321  ;;  %v3823_v58 = vpack.c.bf16 %v3812_v60, %v3811_v13  ;;  %v6329_v7 = vunpack.i.h.bf16 %v6327_v0  ;;  %v6328_v24 = vunpack.i.l.bf16 %v6327_v0  ;;  %v9087_v13 = vld [vmem:[#allocation7_spill] sm:$0xff] }
 0x6eb   : > { %v6324_v48 = vunpack.i.h.bf16 %v6322_v1  ;;  %v6323_v21 = vunpack.i.l.bf16 %v6322_v1 }
 0x6ec   : > { %5740 = vmatprep.mubr.bf16.mxu0 %v3823_v58  ;;  %v3801_v50 = vsel %vm2225_vm1, %v3785_v10, %v6329_v7  ;;  %v3800_v62 = vsel %vm2225_vm1, %v3784_v20, %v6328_v24 }
 0x6ed   : > { %5741 = vmatmul.mubr.bf16.gmra.mrb[92].mxu0 %v3824_v23  ;;  %v6337_v35 = vpop.permute.xlu1 %6336  ;;  %v3799_v9 = vsel %vm2225_vm1, %v3783_v19, %v6324_v48  ;;  %v3798_v52 = vsel %vm2225_vm1, %v3782_v36, %v6323_v21  ;;  %v9089_v19 = vld [vmem:[#allocation10_spill] sm:$0xff] }
 0x6ee   : > { %v6339_v40 = vunpack.i.h.bf16 %v6337_v35  ;;  %v6338_v14 = vunpack.i.l.bf16 %v6337_v35  ;;  %v6332_v16 = vpop.permute.xlu0 %6331 }
 0x6ef   : > { %v6334_v33 = vunpack.i.h.bf16 %v6332_v16  ;;  %v6333_v49 = vunpack.i.l.bf16 %v6332_v16  ;;  %v9090_v16 = vld [vmem:[#allocation12_spill] sm:$0xff] }
 0x6f0   : > { %v3817_v28 = vsel %vm3802_vm2, %v3800_v62, %v6338_v14  ;;  %v3818_v42 = vsel %vm3802_vm2, %v3801_v50, %v6339_v40  ;;  %v9091_v62 = vld [vmem:[#allocation11_spill] sm:$0xff] }
 0x6f1   : > { %v3815_v2 = vsel %vm3802_vm2, %v3798_v52, %v6333_v49  ;;  %v3816_v8 = vsel %vm3802_vm2, %v3799_v9, %v6334_v33  ;;  %v3826_v5 = vpack.c.bf16 %v3818_v42, %v3817_v28  ;;  %v9092_v9 = vld [vmem:[#allocation13_spill] sm:$0xff] }
 0x6f2   : > { %v3825_v37 = vpack.c.bf16 %v3816_v8, %v3815_v2 }
 0x6f4   : > { %5744 = vmatprep.mubr.bf16.mxu0 %v3825_v37 }
 0x6f5   : > { %5745 = vmatmul.mubr.bf16.gmra.mrb[96].mxu0 %v3826_v5 }
 0x765   : > { %v5734_v47 = vpop.f32.mrb[84].mxu0 }
 0x766   : > { %v3932_v27 = vpop.f32.mrb[85].mxu0  ;;  %v3941_v22 = vadd.f32 %v5734_v47, %v8493_v15 }
 0x767   : > { %v3933_v59 = vadd.f32 %v8493_v15, %v3932_v27  ;;  %v5735_v45 = vpop.f32.mrb[86].mxu0 }
 0x768   : > { %v3935_v61 = vpop.f32.mrb[87].mxu0  ;;  %v8502_v56 = vadd.f32 %v9082_v32, %v3941_v22  ;;  %v3944_v54 = vadd.f32 %v5735_v45, %v8493_v15  ;;  %v9093_v22 = vld [vmem:[#allocation14_spill] sm:$0xff] }
 0x769   : > { %v8498_v63 = vadd.f32 %v9081_v43, %v3933_v59  ;;  %v3936_v55 = vadd.f32 %v8493_v15, %v3935_v61 }
 0x76a   : > { %v8513_v25 = vadd.f32 %v9084_v26, %v3944_v54  ;;  %v4017_v41 = vsel %vm428_vm0, %v8502_v56, 0.0  ;;  %v9095_v54 = vld [vmem:[#allocation15_spill] sm:$0xff] }
 0x76b   : > { %v8506_v12 = vadd.f32 %v9083_v44, %v3936_v55  ;;  %v4011_v29 = vsel %vm428_vm0, %v8498_v63, 0.0  ;;  %v9094_v55 = vld [vmem:[#allocation16_spill] sm:$0xff] }
 0x76c   : > { %4012 = vadd.xlane.f32.xlu0 %v4011_v29  ;;  %v4020_v30 = vsel %vm428_vm0, %v8513_v25, 0.0 }
 0x76d   : > { %v4014_v3 = vsel %vm428_vm0, %v8506_v12, 0.0 }
 0x76e   : > { %4015 = vadd.xlane.f32.xlu1 %v4014_v3  ;;  %v9096_v3 = vld [vmem:[#allocation17_spill] sm:$0xff] }
 0x770   : > { %4018 = vadd.xlane.f32.xlu0 %v4017_v41 }
 0x774   : > { %4021 = vadd.xlane.f32.xlu0 %v4020_v30 }
 0x779   : > { %v5738_v46 = vpop.f32.mrb[88].mxu0 }
 0x77a   : > { %v3948_v18 = vpop.f32.mrb[89].mxu0  ;;  %v3957_v51 = vadd.f32 %v5738_v46, %v8493_v15 }
 0x77b   : > { %v3949_v57 = vadd.f32 %v8493_v15, %v3948_v18  ;;  %v5739_v11 = vpop.f32.mrb[90].mxu0 }
 0x77c   : > { %v3951_v31 = vpop.f32.mrb[91].mxu0  ;;  %v3960_v6 = vadd.f32 %v5739_v11, %v8493_v15  ;;  %v8527_v0 = vadd.f32 %v9086_v4, %v3957_v51 }
 0x77d   : > { %v8522_v38 = vadd.f32 %v9085_v39, %v3949_v57  ;;  %v3952_v34 = vadd.f32 %v8493_v15, %v3951_v31 }
 0x77e   : > { %v8535_v17 = vadd.f32 %v9088_v53, %v3960_v6  ;;  %v4029_v58 = vsel %vm428_vm0, %v8527_v0, 0.0 }
 0x77f   : > { %v8530_v60 = vadd.f32 %v9087_v13, %v3952_v34  ;;  %v4023_v23 = vsel %vm428_vm0, %v8522_v38, 0.0 }
 0x780   : > { %4024 = vadd.xlane.f32.xlu0 %v4023_v23  ;;  %v4032_v7 = vsel %vm428_vm0, %v8535_v17, 0.0 }
 0x781   : > { %v4026_v1 = vsel %vm428_vm0, %v8530_v60, 0.0 }
 0x782   : > { %4027 = vadd.xlane.f32.xlu1 %v4026_v1 }
 0x784   : > { %4030 = vadd.xlane.f32.xlu0 %v4029_v58 }
 0x786   : > { %4033 = vadd.xlane.f32.xlu1 %v4032_v7 }
 0x7c0   : > { %v5742_v24 = vpop.f32.mrb[92].mxu0 }
 0x7c1   : > { %v3964_v48 = vpop.f32.mrb[93].mxu0  ;;  %v3973_v21 = vadd.f32 %v5742_v24, %v8493_v15 }
 0x7c2   : > { %v3965_v10 = vadd.f32 %v8493_v15, %v3964_v48  ;;  %v5743_v20 = vpop.f32.mrb[94].mxu0 }
 0x7c3   : > { %v3967_v35 = vpop.f32.mrb[95].mxu0  ;;  %v3976_v40 = vadd.f32 %v5743_v20, %v8493_v15  ;;  %v8551_v50 = vadd.f32 %v9090_v16, %v3973_v21 }
 0x7c4   : > { %v8546_v36 = vadd.f32 %v9089_v19, %v3965_v10  ;;  %v3968_v14 = vadd.f32 %v8493_v15, %v3967_v35 }
 0x7c5   : > { %v8559_v52 = vadd.f32 %v9092_v9, %v3976_v40  ;;  %v4041_v47 = vsel %vm428_vm0, %v8551_v50, 0.0 }
 0x7c6   : > { %v8554_v33 = vadd.f32 %v9091_v62, %v3968_v14  ;;  %v4035_v49 = vsel %vm428_vm0, %v8546_v36, 0.0 }
 0x7c7   : > { %4036 = vadd.xlane.f32.xlu0 %v4035_v49  ;;  %v4044_v43 = vsel %vm428_vm0, %v8559_v52, 0.0 }
 0x7c8   : > { %v5746_v28 = vpop.f32.mrb[96].mxu0  ;;  %v4038_v42 = vsel %vm428_vm0, %v8554_v33, 0.0 }
 0x7c9   : > { %4039 = vadd.xlane.f32.xlu1 %v4038_v42  ;;  %v3980_v2 = vpop.f32.mrb[97].mxu0  ;;  %v3989_v8 = vadd.f32 %v5746_v28, %v8493_v15 }
 0x7ca   : > { %v3981_v5 = vadd.f32 %v8493_v15, %v3980_v2  ;;  %v5747_v37 = vpop.f32.mrb[98].mxu0 }
 0x7cb   : > { %4042 = vadd.xlane.f32.xlu0 %v4041_v47  ;;  %v3983_v27 = vpop.f32.mrb[99].mxu0  ;;  %v3992_v45 = vadd.f32 %v5747_v37, %v8493_v15  ;;  %v8575_v32 = vadd.f32 %v9094_v55, %v3989_v8  ;;  %v6357_v55 = vld [vmem:[%s8895_s5 + $0x8] sm:$0xff]  }
 0x7cc   : > { %v8568_v59 = vadd.f32 %v9093_v22, %v3981_v5  ;;  %v3984_v61 = vadd.f32 %v8493_v15, %v3983_v27 }
 0x7cd   : > { %4045 = vadd.xlane.f32.xlu1 %v4044_v43  ;;  %v8583_v26 = vadd.f32 %v9096_v3, %v3992_v45  ;;  %v4053_v41 = vsel %vm428_vm0, %v8575_v32, 0.0  ;;  %v6356_v43 = vld [vmem:[%s8895_s5] sm:$0xff]  }
 0x7ce   : > { %v8578_v44 = vadd.f32 %v9095_v54, %v3984_v61  ;;  %v4047_v29 = vsel %vm428_vm0, %v8568_v59, 0.0  ;;  %5748 = vmatprep.subr.bf16.mxu1 %v6356_v43 }
 0x7cf   : > { %4048 = vadd.xlane.f32.xlu0 %v4047_v29  ;;  %v4056_v30 = vsel %vm428_vm0, %v8583_v26, 0.0  ;;  %5749 = vmatpush3.bf16.msra.mxu1 %v6356_v43 }
 0x7d0   : > { %v4050_v15 = vsel %vm428_vm0, %v8578_v44, 0.0  ;;  %5750 = vmatprep.subr.bf16.mxu1 %v6357_v55 }
 0x7d1   : > { %4051 = vadd.xlane.f32.xlu1 %v4050_v15 }
 0x7d3   : > { %4054 = vadd.xlane.f32.xlu0 %v4053_v41  ;;  %5751 = vmatpush3.bf16.msra.mxu1 %v6357_v55 }
 0x7d5   : > { %4057 = vadd.xlane.f32.xlu1 %v4056_v30 }
 0x7f9   : > { %v4013_v46 = vpop.xlane.xlu0 %4012 }
 0x7fa   : > { %v4059_v18 = vmul.f32 0.03125, %v4013_v46 }
 0x7fb   : > { %v4016_v51 = vpop.xlane.xlu1 %4015 }
 0x7fc   : > { %v8592_v57 = vsub.f32 %v8498_v63, %v4059_v18  ;;  %v4060_v11 = vmul.f32 0.03125, %v4016_v51 }
 0x7fd   : > { %v4019_v31 = vpop.xlane.xlu0 %4018 }
 0x7fe   : > { %v8595_v39 = vsub.f32 %v8506_v12, %v4060_v11  ;;  %v4061_v6 = vmul.f32 0.03125, %v4019_v31  ;;  %v4091_v34 = vmul.f32 %v8592_v57, %v8592_v57 }
 0x800   : > { %v8600_v4 = vsub.f32 %v8502_v56, %v4061_v6  ;;  %v4107_v13 = vsel %vm428_vm0, %v4091_v34, 0.0  ;;  %v4092_v23 = vmul.f32 %v8595_v39, %v8595_v39 }
 0x801   : > { %v4022_v53 = vpop.xlane.xlu0 %4021  ;;  %4108 = vadd.xlane.f32.xlu0 %v4107_v13 }
 0x802   : > { %v4062_v1 = vmul.f32 0.03125, %v4022_v53  ;;  %v4110_v58 = vsel %vm428_vm0, %v4092_v23, 0.0  ;;  %v4093_v7 = vmul.f32 %v8600_v4, %v8600_v4 }
 0x803   : > { %4111 = vadd.xlane.f32.xlu1 %v4110_v58 }
 0x804   : > { %v8609_v24 = vsub.f32 %v8513_v25, %v4062_v1  ;;  %v4113_v48 = vsel %vm428_vm0, %v4093_v7, 0.0 }
 0x805   : > { %4114 = vadd.xlane.f32.xlu0 %v4113_v48 }
 0x806   : > { %v4094_v21 = vmul.f32 %v8609_v24, %v8609_v24 }
 0x808   : > { %v4116_v10 = vsel %vm428_vm0, %v4094_v21, 0.0 }
 0x809   : > { %4117 = vadd.xlane.f32.xlu1 %v4116_v10 }
 0x80d   : > { %v4025_v20 = vpop.xlane.xlu0 %4024 }
 0x80e   : > { %v4063_v35 = vmul.f32 0.03125, %v4025_v20 }
 0x80f   : > { %v4028_v19 = vpop.xlane.xlu1 %4027 }
 0x810   : > { %v8616_v40 = vsub.f32 %v8522_v38, %v4063_v35  ;;  %v4064_v14 = vmul.f32 0.03125, %v4028_v19 }
 0x811   : > { %v4031_v16 = vpop.xlane.xlu0 %4030 }
 0x812   : > { %v8619_v62 = vsub.f32 %v8530_v60, %v4064_v14  ;;  %v4065_v49 = vmul.f32 0.03125, %v4031_v16  ;;  %v4095_v9 = vmul.f32 %v8616_v40, %v8616_v40 }
 0x813   : > { %v4034_v28 = vpop.xlane.xlu1 %4033 }
 0x814   : > { %v8624_v42 = vsub.f32 %v8527_v0, %v4065_v49  ;;  %v4066_v2 = vmul.f32 0.03125, %v4034_v28  ;;  %v4119_v8 = vsel %vm428_vm0, %v4095_v9, 0.0  ;;  %v4096_v5 = vmul.f32 %v8619_v62, %v8619_v62 }
 0x815   : > { %4120 = vadd.xlane.f32.xlu0 %v4119_v8 }
 0x816   : > { %v8630_v37 = vsub.f32 %v8535_v17, %v4066_v2  ;;  %v4122_v47 = vsel %vm428_vm0, %v4096_v5, 0.0  ;;  %v4097_v27 = vmul.f32 %v8624_v42, %v8624_v42 }
 0x817   : > { %4123 = vadd.xlane.f32.xlu1 %v4122_v47 }
 0x818   : > { %v4125_v22 = vsel %vm428_vm0, %v4097_v27, 0.0  ;;  %v4098_v45 = vmul.f32 %v8630_v37, %v8630_v37 }
 0x819   : > { %4126 = vadd.xlane.f32.xlu0 %v4125_v22 }
 0x81a   : > { %v4128_v61 = vsel %vm428_vm0, %v4098_v45, 0.0 }
 0x81b   : > { %4129 = vadd.xlane.f32.xlu1 %v4128_v61 }
 0x854   : > { %v4037_v54 = vpop.xlane.xlu0 %4036 }
 0x855   : > { %v4067_v29 = vmul.f32 0.03125, %v4037_v54 }
 0x856   : > { %v4040_v3 = vpop.xlane.xlu1 %4039 }
 0x857   : > { %v8646_v15 = vsub.f32 %v8546_v36, %v4067_v29  ;;  %v4068_v41 = vmul.f32 0.03125, %v4040_v3 }
 0x858   : > { %v4043_v30 = vpop.xlane.xlu0 %4042 }
 0x859   : > { %v8649_v46 = vsub.f32 %v8554_v33, %v4068_v41  ;;  %v4069_v18 = vmul.f32 0.03125, %v4043_v30  ;;  %v4099_v51 = vmul.f32 %v8646_v15, %v8646_v15 }
 0x85a   : > { %v4046_v11 = vpop.xlane.xlu1 %4045 }
 0x85b   : > { %v8654_v31 = vsub.f32 %v8551_v50, %v4069_v18  ;;  %v4070_v6 = vmul.f32 0.03125, %v4046_v11  ;;  %v4131_v34 = vsel %vm428_vm0, %v4099_v51, 0.0  ;;  %v4100_v13 = vmul.f32 %v8649_v46, %v8649_v46 }
 0x85c   : > { %4132 = vadd.xlane.f32.xlu0 %v4131_v34  ;;  %v4049_v23 = vpop.xlane.xlu0 %4048 }
 0x85d   : > { %v8660_v53 = vsub.f32 %v8559_v52, %v4070_v6  ;;  %v4071_v1 = vmul.f32 0.03125, %v4049_v23  ;;  %v4134_v58 = vsel %vm428_vm0, %v4100_v13, 0.0  ;;  %v4101_v7 = vmul.f32 %v8654_v31, %v8654_v31 }
 0x85e   : > { %4135 = vadd.xlane.f32.xlu1 %v4134_v58  ;;  %v4052_v48 = vpop.xlane.xlu1 %4051 }
 0x85f   : > { %v8666_v21 = vsub.f32 %v8568_v59, %v4071_v1  ;;  %v4072_v10 = vmul.f32 0.03125, %v4052_v48  ;;  %v4137_v20 = vsel %vm428_vm0, %v4101_v7, 0.0  ;;  %v4102_v35 = vmul.f32 %v8660_v53, %v8660_v53 }
 0x860   : > { %4138 = vadd.xlane.f32.xlu0 %v4137_v20  ;;  %v4055_v19 = vpop.xlane.xlu0 %4054 }
 0x861   : > { %v8672_v14 = vsub.f32 %v8578_v44, %v4072_v10  ;;  %v4073_v16 = vmul.f32 0.03125, %v4055_v19  ;;  %v4140_v49 = vsel %vm428_vm0, %v4102_v35, 0.0  ;;  %v4103_v9 = vmul.f32 %v8666_v21, %v8666_v21 }
 0x862   : > { %4141 = vadd.xlane.f32.xlu1 %v4140_v49  ;;  %v4058_v28 = vpop.xlane.xlu1 %4057 }
 0x863   : > { %v8678_v2 = vsub.f32 %v8575_v32, %v4073_v16  ;;  %v4074_v8 = vmul.f32 0.03125, %v4058_v28  ;;  %v4143_v5 = vsel %vm428_vm0, %v4103_v9, 0.0  ;;  %v4104_v47 = vmul.f32 %v8672_v14, %v8672_v14 }
 0x864   : > { %4144 = vadd.xlane.f32.xlu0 %v4143_v5 }
 0x865   : > { %v8684_v27 = vsub.f32 %v8583_v26, %v4074_v8  ;;  %v4146_v22 = vsel %vm428_vm0, %v4104_v47, 0.0  ;;  %v4105_v45 = vmul.f32 %v8678_v2, %v8678_v2 }
 0x866   : > { %4147 = vadd.xlane.f32.xlu1 %v4146_v22 }
 0x867   : > { %v4149_v61 = vsel %vm428_vm0, %v4105_v45, 0.0  ;;  %v4106_v43 = vmul.f32 %v8684_v27, %v8684_v27 }
 0x868   : > { %4150 = vadd.xlane.f32.xlu0 %v4149_v61 }
 0x869   : > { %v4152_v55 = vsel %vm428_vm0, %v4106_v43, 0.0 }
 0x86a   : > { %4153 = vadd.xlane.f32.xlu1 %v4152_v55 }
 0x88e   : > { %v4109_v54 = vpop.xlane.xlu0 %4108 }
 0x88f   : > { %v4155_v29 = vmul.f32 0.03125, %v4109_v54 }
 0x890   : > { %v4112_v3 = vpop.xlane.xlu1 %4111 }
 0x891   : > { %v4171_v41 = vadd.f32 1e-05, %v4155_v29  ;;  %v4156_v30 = vmul.f32 0.03125, %v4112_v3 }
 0x892   : > { %v4115_v18 = vpop.xlane.xlu0 %4114 }
 0x893   : > { %6652 = vrsqrt.f32 %v4171_v41  ;;  %v4172_v51 = vadd.f32 1e-05, %v4156_v30  ;;  %v4157_v11 = vmul.f32 0.03125, %v4115_v18 }
 0x895   : > { %6654 = vrsqrt.f32 %v4172_v51  ;;  %v4173_v6 = vadd.f32 1e-05, %v4157_v11 }
 0x896   : > { %v4118_v34 = vpop.xlane.xlu1 %4117 }
 0x897   : > { %v4158_v13 = vmul.f32 0.03125, %v4118_v34  ;;  %6656 = vrsqrt.f32 %v4173_v6 }
 0x899   : > { %v4174_v23 = vadd.f32 1e-05, %v4158_v13 }
 0x89b   : > { %6658 = vrsqrt.f32 %v4174_v23 }
 0x89d   : > { %v6653_v1 = vpop.eup %6652 }
 0x89e   : > { %v4203_v7 = vmul.f32 %v6653_v1, %v8592_v57 }
 0x89f   : > { %v6655_v58 = vpop.eup %6654 }
 0x8a0   : > { %v4204_v48 = vmul.f32 %v6655_v58, %v8595_v39 }
 0x8a1   : > { %v6657_v35 = vpop.eup %6656 }
 0x8a2   : > { %v4121_v10 = vpop.xlane.xlu0 %4120  ;;  %v4219_v20 = vpack.c.bf16 %v4204_v48, %v4203_v7  ;;  %v4205_v8 = vmul.f32 %v6657_v35, %v8600_v4 }
 0x8a3   : > { %v4159_v19 = vmul.f32 0.03125, %v4121_v10 }
 0x8a4   : > { %v4124_v16 = vpop.xlane.xlu1 %4123  ;;  %5752 = vmatprep.mubr.msk.bf16.mxu1 %vm428_vm0, %v4219_v20 }
 0x8a5   : > { %v6659_v49 = vpop.eup %6658  ;;  %v4175_v9 = vadd.f32 1e-05, %v4159_v19  ;;  %v4160_v28 = vmul.f32 0.03125, %v4124_v16 }
 0x8a6   : > { %v4206_v5 = vmul.f32 %v6659_v49, %v8609_v24  ;;  %v4127_v47 = vpop.xlane.xlu0 %4126 }
 0x8a7   : > { %6660 = vrsqrt.f32 %v4175_v9  ;;  %v4176_v22 = vadd.f32 1e-05, %v4160_v28  ;;  %v4161_v57 = vmul.f32 0.03125, %v4127_v47 }
 0x8a8   : > { %v4220_v45 = vpack.c.bf16 %v4206_v5, %v4205_v8  ;;  %v4130_v39 = vpop.xlane.xlu1 %4129 }
 0x8a9   : > { %6662 = vrsqrt.f32 %v4176_v22  ;;  %v4177_v61 = vadd.f32 1e-05, %v4161_v57  ;;  %v4162_v43 = vmul.f32 0.03125, %v4130_v39 }
 0x8aa   : > { %5753 = vmatmul.mubr.msk.bf16.vlgmr.msra.gmra.mrb[92].mxu1 %vm428_vm0, %v4220_v45 }
 0x8ab   : > { %6664 = vrsqrt.f32 %v4177_v61  ;;  %v4178_v55 = vadd.f32 1e-05, %v4162_v43 }
 0x8ad   : > { %6666 = vrsqrt.f32 %v4178_v55 }
 0x8b1   : > { %v6661_v54 = vpop.eup %6660 }
 0x8b2   : > { %v4207_v4 = vmul.f32 %v6661_v54, %v8616_v40 }
 0x8b3   : > { %v6663_v29 = vpop.eup %6662 }
 0x8b4   : > { %v4208_v24 = vmul.f32 %v6663_v29, %v8619_v62 }
 0x8b5   : > { %v6665_v3 = vpop.eup %6664 }
 0x8b6   : > { %v4221_v41 = vpack.c.bf16 %v4208_v24, %v4207_v4  ;;  %v4209_v18 = vmul.f32 %v6665_v3, %v8624_v42 }
 0x8b7   : > { %v6667_v30 = vpop.eup %6666 }
 0x8b8   : > { %5756 = vmatprep.mubr.msk.bf16.mxu1 %vm428_vm0, %v4221_v41  ;;  %v4210_v51 = vmul.f32 %v6667_v30, %v8630_v37 }
 0x8ba   : > { %v4222_v11 = vpack.c.bf16 %v4210_v51, %v4209_v18 }
 0x8bc   : > { %5757 = vmatmul.mubr.msk.bf16.gmra.mrb[96].mxu1 %vm428_vm0, %v4222_v11 }
 0x8e9   : > { %v4133_v6 = vpop.xlane.xlu0 %4132 }
 0x8ea   : > { %v4163_v34 = vmul.f32 0.03125, %v4133_v6 }
 0x8eb   : > { %v4136_v13 = vpop.xlane.xlu1 %4135 }
 0x8ec   : > { %v4179_v23 = vadd.f32 1e-05, %v4163_v34  ;;  %v4164_v1 = vmul.f32 0.03125, %v4136_v13 }
 0x8ed   : > { %v4139_v40 = vpop.xlane.xlu0 %4138 }
 0x8ee   : > { %6668 = vrsqrt.f32 %v4179_v23  ;;  %v4180_v62 = vadd.f32 1e-05, %v4164_v1  ;;  %v4165_v58 = vmul.f32 0.03125, %v4139_v40 }
 0x8ef   : > { %v4142_v7 = vpop.xlane.xlu1 %4141 }
 0x8f0   : > { %6670 = vrsqrt.f32 %v4180_v62  ;;  %v4181_v48 = vadd.f32 1e-05, %v4165_v58  ;;  %v4166_v10 = vmul.f32 0.03125, %v4142_v7 }
 0x8f1   : > { %v4145_v20 = vpop.xlane.xlu0 %4144 }
 0x8f2   : > { %6672 = vrsqrt.f32 %v4181_v48  ;;  %v4182_v42 = vadd.f32 1e-05, %v4166_v10  ;;  %v4167_v37 = vmul.f32 0.03125, %v4145_v20 }
 0x8f3   : > { %v4148_v35 = vpop.xlane.xlu1 %4147 }
 0x8f4   : > { %6674 = vrsqrt.f32 %v4182_v42  ;;  %v4183_v19 = vadd.f32 1e-05, %v4167_v37  ;;  %v4168_v16 = vmul.f32 0.03125, %v4148_v35 }
 0x8f5   : > { %v4151_v49 = vpop.xlane.xlu0 %4150 }
 0x8f6   : > { %6676 = vrsqrt.f32 %v4183_v19  ;;  %v4184_v9 = vadd.f32 1e-05, %v4168_v16  ;;  %v4169_v28 = vmul.f32 0.03125, %v4151_v49 }
 0x8f7   : > { %v4154_v8 = vpop.xlane.xlu1 %4153 }
 0x8f8   : > { %v6669_v5 = vpop.eup %6668  ;;  %6678 = vrsqrt.f32 %v4184_v9  ;;  %v4185_v47 = vadd.f32 1e-05, %v4169_v28  ;;  %v4170_v22 = vmul.f32 0.03125, %v4154_v8 }
 0x8f9   : > { %v4211_v39 = vmul.f32 %v6669_v5, %v8646_v15 }
 0x8fa   : > { %v6671_v57 = vpop.eup %6670  ;;  %6680 = vrsqrt.f32 %v4185_v47  ;;  %v4186_v45 = vadd.f32 1e-05, %v4170_v22 }
 0x8fb   : > { %v4212_v61 = vmul.f32 %v6671_v57, %v8649_v46 }
 0x8fc   : > { %v6673_v43 = vpop.eup %6672  ;;  %6682 = vrsqrt.f32 %v4186_v45 }
 0x8fd   : > { %v4223_v55 = vpack.c.bf16 %v4212_v61, %v4211_v39  ;;  %v4213_v29 = vmul.f32 %v6673_v43, %v8654_v31 }
 0x8fe   : > { %v6675_v54 = vpop.eup %6674 }
 0x8ff   : > { %5760 = vmatprep.mubr.msk.bf16.mxu1 %vm428_vm0, %v4223_v55  ;;  %v4214_v4 = vmul.f32 %v6675_v54, %v8660_v53  ;;  %v6358_v53 = vld [vmem:[%s8897_s7] sm:$0xff]  }
 0x900   : > { %v6677_v24 = vpop.eup %6676  ;;  %5768 = vmatprep.subr.bf16.mxu1 %v6358_v53 }
 0x901   : > { %v4224_v3 = vpack.c.bf16 %v4214_v4, %v4213_v29  ;;  %v4215_v30 = vmul.f32 %v6677_v24, %v8666_v21  ;;  %5769 = vmatpush3.bf16.msra.mxu1 %v6358_v53  ;;  %v6359_v21 = vld [vmem:[%s8897_s7 + $0x8] sm:$0xff]  }
 0x902   : > { %v6679_v41 = vpop.eup %6678  ;;  %5770 = vmatprep.subr.bf16.mxu1 %v6359_v21 }
 0x903   : > { %5761 = vmatmul.mubr.msk.bf16.gmra.mrb[100].mxu1 %vm428_vm0, %v4224_v3  ;;  %v4216_v15 = vmul.f32 %v6679_v41, %v8672_v14  ;;  %v6360_v14 = vld [vmem:[%s8897_s7 + $0x10] sm:$0xff]  }
 0x904   : > { %v6681_v46 = vpop.eup %6680 }
 0x905   : > { %v4225_v18 = vpack.c.bf16 %v4216_v15, %v4215_v30  ;;  %v4217_v11 = vmul.f32 %v6681_v46, %v8678_v2  ;;  %5771 = vmatpush3.bf16.msra.mxu1 %v6359_v21  ;;  %v6361_v2 = vld [vmem:[%s8897_s7 + $0x18] sm:$0xff]  }
 0x906   : > { %v6683_v51 = vpop.eup %6682  ;;  %5772 = vmatprep.subr.bf16.mxu1 %v6360_v14 }
 0x907   : > { %5764 = vmatprep.mubr.msk.bf16.mxu1 %vm428_vm0, %v4225_v18  ;;  %v4218_v31 = vmul.f32 %v6683_v51, %v8684_v27  ;;  %v8732_v27 = vld [vmem:[%s8896_s6] ss:$0 sm:$0xff] }
 0x909   : > { %v4226_v6 = vpack.c.bf16 %v4218_v31, %v4217_v11  ;;  %5773 = vmatpush3.bf16.msra.mxu1 %v6360_v14 }
 0x90a   : > { %5774 = vmatprep.subr.bf16.mxu1 %v6361_v2 }
 0x90b   : > { %5765 = vmatmul.mubr.msk.bf16.gmra.mrb[104].mxu1 %vm428_vm0, %v4226_v6 }
 0x90d   : > { %5775 = vmatpush3.bf16.msra.mxu1 %v6361_v2 }
 0x97d   : > { %v5754_v34 = vpop.f32.mrb[92].mxu1 }
 0x97e   : > { %v4317_v13 = vadd.f32 %v5754_v34, %v8732_v27  ;;  %v4308_v23 = vpop.f32.mrb[93].mxu1 }
 0x97f   : > { %v4309_v1 = vadd.f32 %v8732_v27, %v4308_v23  ;;  %v5755_v40 = vpop.f32.mrb[94].mxu1 }
 0x980   : > { %v4373_v62 = vsub.f32 0.0, %v4317_v13  ;;  %v4320_v58 = vadd.f32 %v5755_v40, %v8732_v27  ;;  %v4311_v7 = vpop.f32.mrb[95].mxu1 }
 0x981   : > { %v4371_v48 = vsub.f32 0.0, %v4309_v1  ;;  %v4312_v10 = vadd.f32 %v8732_v27, %v4311_v7 }
 0x982   : > { %v4391_v20 = vmul.f32 1.442695, %v4373_v62  ;;  %v4374_v42 = vsub.f32 0.0, %v4320_v58 }
 0x983   : > { %v4387_v37 = vmul.f32 1.442695, %v4371_v48  ;;  %v4372_v35 = vsub.f32 0.0, %v4312_v10 }
 0x984   : > { %6684 = vpow2.f32 %v4391_v20  ;;  %v4393_v19 = vmul.f32 1.442695, %v4374_v42 }
 0x985   : > { %6686 = vpow2.f32 %v4387_v37  ;;  %v4389_v16 = vmul.f32 1.442695, %v4372_v35 }
 0x986   : > { %6688 = vpow2.f32 %v4393_v19 }
 0x987   : > { %6690 = vpow2.f32 %v4389_v16 }
 0x98e   : > { %v6685_v49 = vpop.eup %6684 }
 0x98f   : > { %v6687_v9 = vpop.eup %6686  ;;  %v4421_v28 = vadd.f32 1.0, %v6685_v49  ;;  %v5758_v8 = vpop.f32.mrb[96].mxu1 }
 0x990   : > { %v6689_v5 = vpop.eup %6688  ;;  %v4419_v47 = vadd.f32 1.0, %v6687_v9  ;;  %v4333_v22 = vadd.f32 %v5758_v8, %v8732_v27  ;;  %v4324_v57 = vpop.f32.mrb[97].mxu1 }
 0x991   : > { %v6691_v45 = vpop.eup %6690  ;;  %6692 = vrcp.f32 %v4421_v28  ;;  %v4422_v39 = vadd.f32 1.0, %v6689_v5  ;;  %v4325_v61 = vadd.f32 %v8732_v27, %v4324_v57  ;;  %v5759_v43 = vpop.f32.mrb[98].mxu1 }
 0x992   : > { %6694 = vrcp.f32 %v4419_v47  ;;  %v4420_v55 = vadd.f32 1.0, %v6691_v45  ;;  %v4377_v54 = vsub.f32 0.0, %v4333_v22  ;;  %v4336_v29 = vadd.f32 %v5759_v43, %v8732_v27  ;;  %v4327_v4 = vpop.f32.mrb[99].mxu1 }
 0x993   : > { %6696 = vrcp.f32 %v4422_v39  ;;  %v4375_v24 = vsub.f32 0.0, %v4325_v61  ;;  %v4328_v3 = vadd.f32 %v8732_v27, %v4327_v4 }
 0x994   : > { %6698 = vrcp.f32 %v4420_v55  ;;  %v4399_v41 = vmul.f32 1.442695, %v4377_v54  ;;  %v4378_v30 = vsub.f32 0.0, %v4336_v29 }
 0x995   : > { %v4395_v15 = vmul.f32 1.442695, %v4375_v24  ;;  %v4376_v46 = vsub.f32 0.0, %v4328_v3 }
 0x996   : > { %6700 = vpow2.f32 %v4399_v41  ;;  %v4401_v18 = vmul.f32 1.442695, %v4378_v30 }
 0x997   : > { %6702 = vpow2.f32 %v4395_v15  ;;  %v4397_v51 = vmul.f32 1.442695, %v4376_v46 }
 0x998   : > { %6704 = vpow2.f32 %v4401_v18 }
 0x999   : > { %6706 = vpow2.f32 %v4397_v51 }
 0x99b   : > { %v6693_v11 = vpop.eup %6692 }
 0x99c   : > { %v6695_v31 = vpop.eup %6694  ;;  %v4453_v21 = vmul.f32 %v6693_v11, %v4317_v13 }
 0x99d   : > { %v6697_v6 = vpop.eup %6696  ;;  %v4451_v2 = vmul.f32 %v6695_v31, %v4309_v1 }
 0x99e   : > { %v6699_v53 = vpop.eup %6698  ;;  %v4454_v14 = vmul.f32 %v6697_v6, %v4320_v58 }
 0x99f   : > { %v4452_v34 = vmul.f32 %v6699_v53, %v4312_v10 }
 0x9a0   : > { %v6701_v23 = vpop.eup %6700  ;;  %v4468_v40 = vpack.c.bf16 %v4454_v14, %v4453_v21 }
 0x9a1   : > { %v6703_v62 = vpop.eup %6702  ;;  %v4467_v7 = vpack.c.bf16 %v4452_v34, %v4451_v2  ;;  %v4425_v48 = vadd.f32 1.0, %v6701_v23 }
 0x9a2   : > { %v6705_v20 = vpop.eup %6704  ;;  %v4423_v42 = vadd.f32 1.0, %v6703_v62 }
 0x9a3   : > { %v6707_v37 = vpop.eup %6706  ;;  %6708 = vrcp.f32 %v4425_v48  ;;  %v4426_v35 = vadd.f32 1.0, %v6705_v20  ;;  %5776 = vmatprep.mubr.msk.bf16.mxu1 %vm2225_vm1, %v4467_v7 }
 0x9a4   : > { %6710 = vrcp.f32 %v4423_v42  ;;  %v4424_v19 = vadd.f32 1.0, %v6707_v37  ;;  %5777 = vmatmul.mubr.msk.bf16.vlgmr.msra.gmra.mrb[108].mxu1 %vm2225_vm1, %v4468_v40 }
 0x9a5   : > { %6712 = vrcp.f32 %v4426_v35 }
 0x9a6   : > { %6714 = vrcp.f32 %v4424_v19 }
 0x9ad   : > { %v6709_v13 = vpop.eup %6708 }
 0x9ae   : > { %v6711_v1 = vpop.eup %6710  ;;  %v4457_v16 = vmul.f32 %v6709_v13, %v4333_v22 }
 0x9af   : > { %v6713_v58 = vpop.eup %6712  ;;  %v4455_v9 = vmul.f32 %v6711_v1, %v4325_v61 }
 0x9b0   : > { %v6715_v10 = vpop.eup %6714  ;;  %v4458_v49 = vmul.f32 %v6713_v58, %v4336_v29 }
 0x9b1   : > { %v4456_v28 = vmul.f32 %v6715_v10, %v4328_v3 }
 0x9b2   : > { %v4470_v8 = vpack.c.bf16 %v4458_v49, %v4457_v16 }
 0x9b3   : > { %v4469_v5 = vpack.c.bf16 %v4456_v28, %v4455_v9 }
 0x9b5   : > { %5780 = vmatprep.mubr.msk.bf16.mxu1 %vm2225_vm1, %v4469_v5 }
 0x9b6   : > { %5781 = vmatmul.mubr.msk.bf16.gmra.mrb[112].mxu1 %vm2225_vm1, %v4470_v8 }
 0x9d6   : > { %v5762_v47 = vpop.f32.mrb[100].mxu1 }
 0x9d7   : > { %v8747_v57 = vadd.f32 %v5762_v47, %v8732_v27  ;;  %v4340_v45 = vpop.f32.mrb[101].mxu1 }
 0x9d8   : > { %v8750_v39 = vadd.f32 %v8732_v27, %v4340_v45  ;;  %v5763_v43 = vpop.f32.mrb[102].mxu1 }
 0x9d9   : > { %v4381_v22 = vsub.f32 0.0, %v8747_v57  ;;  %v8754_v61 = vadd.f32 %v5763_v43, %v8732_v27  ;;  %v4343_v55 = vpop.f32.mrb[103].mxu1 }
 0x9da   : > { %v4379_v54 = vsub.f32 0.0, %v8750_v39  ;;  %v4344_v29 = vadd.f32 %v8732_v27, %v4343_v55 }
 0x9db   : > { %v4407_v4 = vmul.f32 1.442695, %v4381_v22  ;;  %v4382_v24 = vsub.f32 0.0, %v8754_v61 }
 0x9dc   : > { %v4403_v3 = vmul.f32 1.442695, %v4379_v54  ;;  %v4380_v41 = vsub.f32 0.0, %v4344_v29 }
 0x9dd   : > { %6716 = vpow2.f32 %v4407_v4  ;;  %v4409_v30 = vmul.f32 1.442695, %v4382_v24 }
 0x9de   : > { %6718 = vpow2.f32 %v4403_v3  ;;  %v4405_v15 = vmul.f32 1.442695, %v4380_v41  ;;  %v5766_v46 = vpop.f32.mrb[104].mxu1 }
 0x9df   : > { %6720 = vpow2.f32 %v4409_v30  ;;  %v8760_v18 = vadd.f32 %v5766_v46, %v8732_v27  ;;  %v4356_v51 = vpop.f32.mrb[105].mxu1  ;;  %v6362_v30 = vld [vmem:[%s8899_s9] sm:$0xff]  }
 0x9e0   : > { %6722 = vpow2.f32 %v4405_v15  ;;  %v8763_v11 = vadd.f32 %v8732_v27, %v4356_v51  ;;  %v5767_v31 = vpop.f32.mrb[106].mxu1  ;;  %5792 = vmatprep.subr.bf16.mxu0 %v6362_v30 }
 0x9e1   : > { %v4385_v6 = vsub.f32 0.0, %v8760_v18  ;;  %v4368_v53 = vadd.f32 %v5767_v31, %v8732_v27  ;;  %v4359_v21 = vpop.f32.mrb[107].mxu1  ;;  %5793 = vmatpush3.bf16.msra.mxu0 %v6362_v30 }
 0x9e2   : > { %v4383_v14 = vsub.f32 0.0, %v8763_v11  ;;  %v4360_v2 = vadd.f32 %v8732_v27, %v4359_v21 }
 0x9e3   : > { %v4415_v34 = vmul.f32 1.442695, %v4385_v6  ;;  %v4386_v23 = vsub.f32 0.0, %v4368_v53 }
 0x9e4   : > { %v4411_v40 = vmul.f32 1.442695, %v4383_v14  ;;  %v4384_v62 = vsub.f32 0.0, %v4360_v2 }
 0x9e5   : > { %6724 = vpow2.f32 %v4415_v34  ;;  %v4417_v7 = vmul.f32 1.442695, %v4386_v23 }
 0x9e6   : > { %6726 = vpow2.f32 %v4411_v40  ;;  %v4413_v48 = vmul.f32 1.442695, %v4384_v62 }
 0x9e7   : > { %v6717_v20 = vpop.eup %6716  ;;  %6728 = vpow2.f32 %v4417_v7 }
 0x9e8   : > { %v6719_v42 = vpop.eup %6718  ;;  %v4429_v37 = vadd.f32 1.0, %v6717_v20  ;;  %6730 = vpow2.f32 %v4413_v48 }
 0x9e9   : > { %v6721_v35 = vpop.eup %6720  ;;  %v4427_v19 = vadd.f32 1.0, %v6719_v42 }
 0x9ea   : > { %v6723_v13 = vpop.eup %6722  ;;  %6732 = vrcp.f32 %v4429_v37  ;;  %v4430_v1 = vadd.f32 1.0, %v6721_v35 }
 0x9eb   : > { %6734 = vrcp.f32 %v4427_v19  ;;  %v4428_v27 = vadd.f32 1.0, %v6723_v13 }
 0x9ec   : > { %6736 = vrcp.f32 %v4430_v1 }
 0x9ed   : > { %6738 = vrcp.f32 %v4428_v27 }
 0x9ef   : > { %v6725_v58 = vpop.eup %6724 }
 0x9f0   : > { %v6727_v10 = vpop.eup %6726  ;;  %v4433_v16 = vadd.f32 1.0, %v6725_v58 }
 0x9f1   : > { %v6729_v49 = vpop.eup %6728  ;;  %v4431_v9 = vadd.f32 1.0, %v6727_v10 }
 0x9f2   : > { %v6731_v28 = vpop.eup %6730  ;;  %6740 = vrcp.f32 %v4433_v16  ;;  %v4434_v8 = vadd.f32 1.0, %v6729_v49 }
 0x9f3   : > { %6742 = vrcp.f32 %v4431_v9  ;;  %v4432_v5 = vadd.f32 1.0, %v6731_v28 }
 0x9f4   : > { %v6733_v47 = vpop.eup %6732  ;;  %6744 = vrcp.f32 %v4434_v8 }
 0x9f5   : > { %v6735_v45 = vpop.eup %6734  ;;  %6746 = vrcp.f32 %v4432_v5  ;;  %v4461_v55 = vmul.f32 %v6733_v47, %v8747_v57 }
 0x9f6   : > { %v6737_v43 = vpop.eup %6736  ;;  %v4459_v4 = vmul.f32 %v6735_v45, %v8750_v39 }
 0x9f7   : > { %v6739_v22 = vpop.eup %6738  ;;  %v4462_v54 = vmul.f32 %v6737_v43, %v8754_v61 }
 0x9f8   : > { %v4460_v24 = vmul.f32 %v6739_v22, %v4344_v29  ;;  %v6363_v29 = vld [vmem:[%s8899_s9 + $0x8] sm:$0xff]  }
 0x9f9   : > { %v4472_v3 = vpack.c.bf16 %v4462_v54, %v4461_v55  ;;  %5794 = vmatprep.subr.bf16.mxu0 %v6363_v29 }
 0x9fa   : > { %v4471_v41 = vpack.c.bf16 %v4460_v24, %v4459_v4  ;;  %5795 = vmatpush3.bf16.msra.mxu0 %v6363_v29 }
 0x9fc   : > { %v6741_v15 = vpop.eup %6740  ;;  %5784 = vmatprep.mubr.msk.bf16.mxu1 %vm2225_vm1, %v4471_v41 }
 0x9fd   : > { %v6743_v46 = vpop.eup %6742  ;;  %5785 = vmatmul.mubr.msk.bf16.gmra.mrb[116].mxu1 %vm2225_vm1, %v4472_v3  ;;  %v4465_v61 = vmul.f32 %v6741_v15, %v8760_v18  ;;  %v5155_v18 = vld [vmem:[%s8898_s8] ss:$0 sm:$0xff] }
 0x9fe   : > { %v6745_v51 = vpop.eup %6744  ;;  %v4463_v31 = vmul.f32 %v6743_v46, %v8763_v11 }
 0x9ff   : > { %v6747_v57 = vpop.eup %6746  ;;  %v4466_v39 = vmul.f32 %v6745_v51, %v4368_v53 }
 0xa00   : > { %v4464_v6 = vmul.f32 %v6747_v57, %v4360_v2 }
 0xa01   : > { %v4474_v21 = vpack.c.bf16 %v4466_v39, %v4465_v61 }
 0xa02   : > { %v4473_v14 = vpack.c.bf16 %v4464_v6, %v4463_v31  ;;  %v8814_v6 = vld [vmem:[%s8900_s10] ss:$0 sm:$0xff] }
 0xa04   : > { %5788 = vmatprep.mubr.msk.bf16.mxu1 %vm2225_vm1, %v4473_v14 }
 0xa05   : > { %5789 = vmatmul.mubr.msk.bf16.gmra.mrb[120].mxu1 %vm2225_vm1, %v4474_v21 }
 0xa77   : > { %v5778_v53 = vpop.f32.mrb[108].mxu1 }
 0xa78   : > { %v4581_v34 = vadd.f32 %v5778_v53, %v5155_v18  ;;  %v4572_v23 = vpop.f32.mrb[109].mxu1 }
 0xa79   : > { %v4573_v40 = vadd.f32 %v5155_v18, %v4572_v23  ;;  %v5779_v62 = vpop.f32.mrb[110].mxu1 }
 0xa7a   : > { %v4584_v7 = vadd.f32 %v5779_v62, %v5155_v18  ;;  %v4575_v11 = vpop.f32.mrb[111].mxu1  ;;  %v4637_v48 = vadd.f32 %v4581_v34, %v8502_v56 }
 0xa7b   : > { %v4576_v2 = vadd.f32 %v5155_v18, %v4575_v11  ;;  %v4635_v42 = vadd.f32 %v4573_v40, %v8498_v63 }
 0xa7c   : > { %v4638_v20 = vadd.f32 %v4584_v7, %v8513_v25 }
 0xa7d   : > { %v4636_v37 = vadd.f32 %v4576_v2, %v8506_v12 }
 0xa7e   : > { %v4652_v35 = vpack.c.bf16 %v4638_v20, %v4637_v48 }
 0xa7f   : > { %v4651_v19 = vpack.c.bf16 %v4636_v37, %v4635_v42 }
 0xa81   : > { %5796 = vmatprep.mubr.msk.bf16.mxu0 %vm428_vm0, %v4651_v19 }
 0xa82   : > { %5797 = vmatmul.mubr.msk.bf16.vlgmr.msra.gmra.mrb[100].mxu0 %vm428_vm0, %v4652_v35 }
 0xa89   : > { %v5782_v13 = vpop.f32.mrb[112].mxu1 }
 0xa8a   : > { %v4597_v1 = vadd.f32 %v5782_v13, %v5155_v18  ;;  %v4588_v27 = vpop.f32.mrb[113].mxu1 }
 0xa8b   : > { %v4589_v58 = vadd.f32 %v5155_v18, %v4588_v27  ;;  %v5783_v10 = vpop.f32.mrb[114].mxu1 }
 0xa8c   : > { %v4600_v16 = vadd.f32 %v5783_v10, %v5155_v18  ;;  %v4591_v49 = vpop.f32.mrb[115].mxu1  ;;  %v4641_v25 = vadd.f32 %v4597_v1, %v8527_v0 }
 0xa8d   : > { %v4592_v56 = vadd.f32 %v5155_v18, %v4591_v49  ;;  %v4639_v12 = vadd.f32 %v4589_v58, %v8522_v38 }
 0xa8e   : > { %v4642_v63 = vadd.f32 %v4600_v16, %v8535_v17 }
 0xa8f   : > { %v4640_v9 = vadd.f32 %v4592_v56, %v8530_v60 }
 0xa90   : > { %v4654_v28 = vpack.c.bf16 %v4642_v63, %v4641_v25 }
 0xa91   : > { %v4653_v8 = vpack.c.bf16 %v4640_v9, %v4639_v12 }
 0xa93   : > { %5800 = vmatprep.mubr.msk.bf16.mxu0 %vm428_vm0, %v4653_v8 }
 0xa94   : > { %5801 = vmatmul.mubr.msk.bf16.gmra.mrb[104].mxu0 %vm428_vm0, %v4654_v28 }
 0xad0   : > { %v5786_v5 = vpop.f32.mrb[116].mxu1 }
 0xad1   : > { %v4613_v47 = vadd.f32 %v5786_v5, %v5155_v18  ;;  %v4604_v45 = vpop.f32.mrb[117].mxu1 }
 0xad2   : > { %v4605_v43 = vadd.f32 %v5155_v18, %v4604_v45  ;;  %v5787_v22 = vpop.f32.mrb[118].mxu1 }
 0xad3   : > { %v4616_v55 = vadd.f32 %v5787_v22, %v5155_v18  ;;  %v4607_v54 = vpop.f32.mrb[119].mxu1  ;;  %v4645_v17 = vadd.f32 %v4613_v47, %v8551_v50 }
 0xad4   : > { %v4608_v0 = vadd.f32 %v5155_v18, %v4607_v54  ;;  %v4643_v60 = vadd.f32 %v4605_v43, %v8546_v36 }
 0xad5   : > { %v4646_v38 = vadd.f32 %v4616_v55, %v8559_v52 }
 0xad6   : > { %v4644_v4 = vadd.f32 %v4608_v0, %v8554_v33 }
 0xad7   : > { %v4656_v24 = vpack.c.bf16 %v4646_v38, %v4645_v17 }
 0xad8   : > { %v4655_v3 = vpack.c.bf16 %v4644_v4, %v4643_v60  ;;  %v5790_v41 = vpop.f32.mrb[120].mxu1 }
 0xad9   : > { %v4629_v30 = vadd.f32 %v5790_v41, %v5155_v18  ;;  %v4620_v15 = vpop.f32.mrb[121].mxu1 }
 0xada   : > { %v4621_v46 = vadd.f32 %v5155_v18, %v4620_v15  ;;  %v5791_v51 = vpop.f32.mrb[122].mxu1  ;;  %5804 = vmatprep.mubr.msk.bf16.mxu0 %vm428_vm0, %v4655_v3 }
 0xadb   : > { %v4632_v57 = vadd.f32 %v5791_v51, %v5155_v18  ;;  %v4623_v61 = vpop.f32.mrb[123].mxu1  ;;  %5805 = vmatmul.mubr.msk.bf16.gmra.mrb[108].mxu0 %vm428_vm0, %v4656_v24  ;;  %v4649_v52 = vadd.f32 %v4629_v30, %v8575_v32 }
 0xadc   : > { %v4624_v50 = vadd.f32 %v5155_v18, %v4623_v61  ;;  %v4647_v33 = vadd.f32 %v4621_v46, %v8568_v59 }
 0xadd   : > { %v4650_v36 = vadd.f32 %v4632_v57, %v8583_v26 }
 0xade   : > { %v4648_v39 = vadd.f32 %v4624_v50, %v8578_v44 }
 0xadf   : > { %v4658_v29 = vpack.c.bf16 %v4650_v36, %v4649_v52 }
 0xae0   : > { %v4657_v31 = vpack.c.bf16 %v4648_v39, %v4647_v33 }
 0xae2   : > { %5808 = vmatprep.mubr.msk.bf16.mxu0 %vm428_vm0, %v4657_v31 }
 0xae3   : > { %5809 = vmatmul.mubr.msk.bf16.gmra.mrb[112].mxu0 %vm428_vm0, %v4658_v29 }
 0xb55   : > { %v5798_v21 = vpop.f32.mrb[100].mxu0 }
 0xb56   : > { %v4749_v32 = vadd.f32 %v5798_v21, %v8814_v6  ;;  %v4740_v14 = vpop.f32.mrb[101].mxu0 }
 0xb57   : > { %v4741_v26 = vadd.f32 %v8814_v6, %v4740_v14  ;;  %v5799_v59 = vpop.f32.mrb[102].mxu0 }
 0xb58   : > { %v4805_v18 = vsub.f32 0.0, %v4749_v32  ;;  %v4752_v44 = vadd.f32 %v5799_v59, %v8814_v6  ;;  %v4743_v53 = vpop.f32.mrb[103].mxu0 }
 0xb59   : > { %v4803_v34 = vsub.f32 0.0, %v4741_v26  ;;  %v4744_v23 = vadd.f32 %v8814_v6, %v4743_v53 }
 0xb5a   : > { %v4823_v40 = vmul.f32 1.442695, %v4805_v18  ;;  %v4806_v62 = vsub.f32 0.0, %v4752_v44 }
 0xb5b   : > { %v4819_v7 = vmul.f32 1.442695, %v4803_v34  ;;  %v4804_v11 = vsub.f32 0.0, %v4744_v23 }
 0xb5c   : > { %6748 = vpow2.f32 %v4823_v40  ;;  %v4825_v2 = vmul.f32 1.442695, %v4806_v62 }
 0xb5d   : > { %6750 = vpow2.f32 %v4819_v7  ;;  %v4821_v48 = vmul.f32 1.442695, %v4804_v11 }
 0xb5e   : > { %6752 = vpow2.f32 %v4825_v2 }
 0xb5f   : > { %6754 = vpow2.f32 %v4821_v48 }
 0xb66   : > { %v6749_v20 = vpop.eup %6748 }
 0xb67   : > { %v6751_v42 = vpop.eup %6750  ;;  %v4853_v37 = vadd.f32 1.0, %v6749_v20  ;;  %v5802_v35 = vpop.f32.mrb[104].mxu0 }
 0xb68   : > { %v6753_v19 = vpop.eup %6752  ;;  %v4851_v13 = vadd.f32 1.0, %v6751_v42  ;;  %v4765_v1 = vadd.f32 %v5802_v35, %v8814_v6  ;;  %v4756_v27 = vpop.f32.mrb[105].mxu0 }
 0xb69   : > { %v6755_v58 = vpop.eup %6754  ;;  %6756 = vrcp.f32 %v4853_v37  ;;  %v4854_v10 = vadd.f32 1.0, %v6753_v19  ;;  %v4757_v16 = vadd.f32 %v8814_v6, %v4756_v27  ;;  %v5803_v49 = vpop.f32.mrb[106].mxu0 }
 0xb6a   : > { %6758 = vrcp.f32 %v4851_v13  ;;  %v4852_v56 = vadd.f32 1.0, %v6755_v58  ;;  %v4809_v25 = vsub.f32 0.0, %v4765_v1  ;;  %v4768_v63 = vadd.f32 %v5803_v49, %v8814_v6  ;;  %v4759_v12 = vpop.f32.mrb[107].mxu0 }
 0xb6b   : > { %6760 = vrcp.f32 %v4854_v10  ;;  %v4807_v9 = vsub.f32 0.0, %v4757_v16  ;;  %v4760_v28 = vadd.f32 %v8814_v6, %v4759_v12 }
 0xb6c   : > { %6762 = vrcp.f32 %v4852_v56  ;;  %v4831_v8 = vmul.f32 1.442695, %v4809_v25  ;;  %v4810_v5 = vsub.f32 0.0, %v4768_v63 }
 0xb6d   : > { %v4827_v47 = vmul.f32 1.442695, %v4807_v9  ;;  %v4808_v45 = vsub.f32 0.0, %v4760_v28 }
 0xb6e   : > { %6764 = vpow2.f32 %v4831_v8  ;;  %v4833_v43 = vmul.f32 1.442695, %v4810_v5 }
 0xb6f   : > { %6766 = vpow2.f32 %v4827_v47  ;;  %v4829_v22 = vmul.f32 1.442695, %v4808_v45 }
 0xb70   : > { %6768 = vpow2.f32 %v4833_v43 }
 0xb71   : > { %6770 = vpow2.f32 %v4829_v22 }
 0xb73   : > { %v6757_v55 = vpop.eup %6756 }
 0xb74   : > { %v6759_v54 = vpop.eup %6758  ;;  %v4885_v0 = vmul.f32 %v6757_v55, %v4749_v32 }
 0xb75   : > { %v6761_v17 = vpop.eup %6760  ;;  %v4883_v38 = vmul.f32 %v6759_v54, %v4741_v26 }
 0xb76   : > { %v6763_v60 = vpop.eup %6762  ;;  %v5201_v4 = vpack.c.bf16 %v4885_v0, %v4885_v0  ;;  %v4886_v24 = vmul.f32 %v6761_v17, %v4752_v44 }
 0xb77   : > { %v5199_v3 = vpack.c.bf16 %v4883_v38, %v4883_v38  ;;  %v4884_v41 = vmul.f32 %v6763_v60, %v4744_v23 }
 0xb78   : > { %v6765_v30 = vpop.eup %6764  ;;  %4966 = vst.msk [vmem:[%s8829_s16 + $0x8] sm:$0xf] %vm4963_vm3, %v5201_v4  ;;  %v5202_v15 = vpack.c.bf16 %v4886_v24, %v4886_v24 }
 0xb79   : > { %v6767_v46 = vpop.eup %6766  ;;  %4964 = vst.msk [vmem:[%s8829_s16] sm:$0xf] %vm4963_vm3, %v5199_v3  ;;  %v5200_v51 = vpack.c.bf16 %v4884_v41, %v4884_v41  ;;  %v4857_v57 = vadd.f32 1.0, %v6765_v30 }
 0xb7a   : > { %v6769_v61 = vpop.eup %6768  ;;  %4967 = vst.msk [vmem:[%s8829_s16 + $0xc] sm:$0xf] %vm4963_vm3, %v5202_v15  ;;  %v4855_v50 = vadd.f32 1.0, %v6767_v46 }
 0xb7b   : > { %v6771_v52 = vpop.eup %6770  ;;  %4965 = vst.msk [vmem:[%s8829_s16 + $0x4] sm:$0xf] %vm4963_vm3, %v5200_v51  ;;  %6772 = vrcp.f32 %v4857_v57  ;;  %v4858_v36 = vadd.f32 1.0, %v6769_v61 }
 0xb7c   : > { %6774 = vrcp.f32 %v4855_v50  ;;  %v4856_v33 = vadd.f32 1.0, %v6771_v52 }
 0xb7d   : > { %6776 = vrcp.f32 %v4858_v36 }
 0xb7e   : > { %6778 = vrcp.f32 %v4856_v33 }
 0xb85   : > { %v6773_v39 = vpop.eup %6772 }
 0xb86   : > { %v6775_v29 = vpop.eup %6774  ;;  %v4889_v31 = vmul.f32 %v6773_v39, %v4765_v1 }
 0xb87   : > { %v6777_v21 = vpop.eup %6776  ;;  %v4887_v32 = vmul.f32 %v6775_v29, %v4757_v16 }
 0xb88   : > { %v6779_v14 = vpop.eup %6778  ;;  %v5205_v26 = vpack.c.bf16 %v4889_v31, %v4889_v31  ;;  %v4890_v59 = vmul.f32 %v6777_v21, %v4768_v63 }
 0xb89   : > { %v5203_v18 = vpack.c.bf16 %v4887_v32, %v4887_v32  ;;  %v4888_v44 = vmul.f32 %v6779_v14, %v4760_v28 }
 0xb8a   : > { %4970 = vst.msk [vmem:[%s8829_s16 + $0x18] sm:$0xf] %vm4963_vm3, %v5205_v26  ;;  %v5206_v53 = vpack.c.bf16 %v4890_v59, %v4890_v59 }
 0xb8b   : > { %4968 = vst.msk [vmem:[%s8829_s16 + $0x10] sm:$0xf] %vm4963_vm3, %v5203_v18  ;;  %v5204_v34 = vpack.c.bf16 %v4888_v44, %v4888_v44 }
 0xb8c   : > { %4971 = vst.msk [vmem:[%s8829_s16 + $0x1c] sm:$0xf] %vm4963_vm3, %v5206_v53 }
 0xb8d   : > { %4969 = vst.msk [vmem:[%s8829_s16 + $0x14] sm:$0xf] %vm4963_vm3, %v5204_v34 }
 0xbae   : > { %v5806_v23 = vpop.f32.mrb[108].mxu0 }
 0xbaf   : > { %v8848_v40 = vadd.f32 %v5806_v23, %v8814_v6  ;;  %v4772_v62 = vpop.f32.mrb[109].mxu0 }
 0xbb0   : > { %v8851_v7 = vadd.f32 %v8814_v6, %v4772_v62  ;;  %v5807_v11 = vpop.f32.mrb[110].mxu0 }
 0xbb1   : > { %v4813_v2 = vsub.f32 0.0, %v8848_v40  ;;  %v8855_v48 = vadd.f32 %v5807_v11, %v8814_v6  ;;  %v4775_v20 = vpop.f32.mrb[111].mxu0 }
 0xbb2   : > { %v4811_v42 = vsub.f32 0.0, %v8851_v7  ;;  %v8859_v37 = vadd.f32 %v8814_v6, %v4775_v20 }
 0xbb3   : > { %v4839_v35 = vmul.f32 1.442695, %v4813_v2  ;;  %v4814_v19 = vsub.f32 0.0, %v8855_v48 }
 0xbb4   : > { %v4835_v13 = vmul.f32 1.442695, %v4811_v42  ;;  %v4812_v1 = vsub.f32 0.0, %v8859_v37 }
 0xbb5   : > { %6780 = vpow2.f32 %v4839_v35  ;;  %v4841_v27 = vmul.f32 1.442695, %v4814_v19 }
 0xbb6   : > { %6782 = vpow2.f32 %v4835_v13  ;;  %v4837_v58 = vmul.f32 1.442695, %v4812_v1  ;;  %v5810_v10 = vpop.f32.mrb[112].mxu0 }
 0xbb7   : > { %6784 = vpow2.f32 %v4841_v27  ;;  %v4797_v16 = vadd.f32 %v5810_v10, %v8814_v6  ;;  %v4788_v49 = vpop.f32.mrb[113].mxu0 }
 0xbb8   : > { %6786 = vpow2.f32 %v4837_v58  ;;  %v4789_v56 = vadd.f32 %v8814_v6, %v4788_v49  ;;  %v5811_v25 = vpop.f32.mrb[114].mxu0 }
 0xbb9   : > { %v4817_v63 = vsub.f32 0.0, %v4797_v16  ;;  %v4800_v12 = vadd.f32 %v5811_v25, %v8814_v6  ;;  %v4791_v9 = vpop.f32.mrb[115].mxu0 }
 0xbba   : > { %v4815_v28 = vsub.f32 0.0, %v4789_v56  ;;  %v4792_v8 = vadd.f32 %v8814_v6, %v4791_v9 }
 0xbbb   : > { %v4847_v5 = vmul.f32 1.442695, %v4817_v63  ;;  %v4818_v47 = vsub.f32 0.0, %v4800_v12 }
 0xbbc   : > { %v4843_v45 = vmul.f32 1.442695, %v4815_v28  ;;  %v4816_v43 = vsub.f32 0.0, %v4792_v8 }
 0xbbd   : > { %6788 = vpow2.f32 %v4847_v5  ;;  %v4849_v22 = vmul.f32 1.442695, %v4818_v47 }
 0xbbe   : > { %6790 = vpow2.f32 %v4843_v45  ;;  %v4845_v55 = vmul.f32 1.442695, %v4816_v43 }
 0xbbf   : > { %v6781_v54 = vpop.eup %6780  ;;  %6792 = vpow2.f32 %v4849_v22 }
 0xbc0   : > { %v6783_v0 = vpop.eup %6782  ;;  %v4861_v17 = vadd.f32 1.0, %v6781_v54  ;;  %6794 = vpow2.f32 %v4845_v55 }
 0xbc1   : > { %v6785_v38 = vpop.eup %6784  ;;  %v4859_v60 = vadd.f32 1.0, %v6783_v0 }
 0xbc2   : > { %v6787_v4 = vpop.eup %6786  ;;  %6796 = vrcp.f32 %v4861_v17  ;;  %v4862_v24 = vadd.f32 1.0, %v6785_v38 }
 0xbc3   : > { %6798 = vrcp.f32 %v4859_v60  ;;  %v4860_v6 = vadd.f32 1.0, %v6787_v4 }
 0xbc4   : > { %6800 = vrcp.f32 %v4862_v24 }
 0xbc5   : > { %6802 = vrcp.f32 %v4860_v6 }
 0xbc7   : > { %v6789_v3 = vpop.eup %6788 }
 0xbc8   : > { %v6791_v41 = vpop.eup %6790  ;;  %v4865_v30 = vadd.f32 1.0, %v6789_v3 }
 0xbc9   : > { %v6793_v15 = vpop.eup %6792  ;;  %v4863_v46 = vadd.f32 1.0, %v6791_v41 }
 0xbca   : > { %v6795_v51 = vpop.eup %6794  ;;  %6804 = vrcp.f32 %v4865_v30  ;;  %v4866_v57 = vadd.f32 1.0, %v6793_v15 }
 0xbcb   : > { %6806 = vrcp.f32 %v4863_v46  ;;  %v4864_v61 = vadd.f32 1.0, %v6795_v51 }
 0xbcc   : > { %v6797_v50 = vpop.eup %6796  ;;  %6808 = vrcp.f32 %v4866_v57 }
 0xbcd   : > { %v6799_v52 = vpop.eup %6798  ;;  %v4893_v36 = vmul.f32 %v6797_v50, %v8848_v40  ;;  %6810 = vrcp.f32 %v4864_v61 }
 0xbce   : > { %v6801_v33 = vpop.eup %6800  ;;  %v4891_v39 = vmul.f32 %v6799_v52, %v8851_v7 }
 0xbcf   : > { %v6803_v29 = vpop.eup %6802  ;;  %v5209_v31 = vpack.c.bf16 %v4893_v36, %v4893_v36  ;;  %v4894_v21 = vmul.f32 %v6801_v33, %v8855_v48 }
 0xbd0   : > { %v5207_v32 = vpack.c.bf16 %v4891_v39, %v4891_v39  ;;  %v4892_v14 = vmul.f32 %v6803_v29, %v8859_v37 }
 0xbd1   : > { %4974 = vst.msk [vmem:[%s8829_s16 + $0x28] sm:$0xf] %vm4963_vm3, %v5209_v31  ;;  %v5210_v26 = vpack.c.bf16 %v4894_v21, %v4894_v21 }
 0xbd2   : > { %4972 = vst.msk [vmem:[%s8829_s16 + $0x20] sm:$0xf] %vm4963_vm3, %v5207_v32  ;;  %v5208_v59 = vpack.c.bf16 %v4892_v14, %v4892_v14 }
 0xbd3   : > { %4975 = vst.msk [vmem:[%s8829_s16 + $0x2c] sm:$0xf] %vm4963_vm3, %v5210_v26 }
 0xbd4   : > { %v6805_v18 = vpop.eup %6804  ;;  %4973 = vst.msk [vmem:[%s8829_s16 + $0x24] sm:$0xf] %vm4963_vm3, %v5208_v59 }
 0xbd5   : > { %v6807_v44 = vpop.eup %6806  ;;  %v4897_v53 = vmul.f32 %v6805_v18, %v4797_v16 }
 0xbd6   : > { %v6809_v34 = vpop.eup %6808  ;;  %v4895_v23 = vmul.f32 %v6807_v44, %v4789_v56 }
 0xbd7   : > { %v6811_v40 = vpop.eup %6810  ;;  %v5213_v62 = vpack.c.bf16 %v4897_v53, %v4897_v53  ;;  %v4898_v7 = vmul.f32 %v6809_v34, %v4800_v12 }
 0xbd8   : > { %v5211_v11 = vpack.c.bf16 %v4895_v23, %v4895_v23  ;;  %v4896_v2 = vmul.f32 %v6811_v40, %v4792_v8 }
 0xbd9   : > { %4978 = vst.msk [vmem:[%s8829_s16 + $0x38] sm:$0xf] %vm4963_vm3, %v5213_v62  ;;  %v5214_v48 = vpack.c.bf16 %v4898_v7, %v4898_v7 }
 0xbda   : > { %4976 = vst.msk [vmem:[%s8829_s16 + $0x30] sm:$0xf] %vm4963_vm3, %v5211_v11  ;;  %v5212_v20 = vpack.c.bf16 %v4896_v2, %v4896_v2 }
 0xbdb   : > { %4979 = vst.msk [vmem:[%s8829_s16 + $0x3c] sm:$0xf] %vm4963_vm3, %v5214_v48 }
 0xbdc   : > { %4977 = vst.msk [vmem:[%s8829_s16 + $0x34] sm:$0xf] %vm4963_vm3, %v5212_v20 }
 0xbdd PF: > { %s21_s17 = sadd.s32 1, %s6818_s17  }
 0xbde   : > { %p18_p4 = scmp.ge.s32.totalorder %s21_s17, 6  }
 0xbe0   :  { %20 = sbr.rel (!%p18_p4) target bundleno = 1 (0x1), region = 94 }

// kernel: global_block_forward.5
= control target key start
LH: loop header
LB: loop body
LE: loop exit
PB: predicated region body
PF: predicated region fallthrough
CT: control target
= control target key end

     0   :  { %s8242_s18 = smov 0   ;;  %s10288_s0 = inlined_call_operand.vmem [shape: bf16[2,18,18,4], index: 0, kind: input, shape index: {}]   ;;  %s10289_s1 = inlined_call_operand.vmem [shape: bf16[2,18,18,4], index: 1, kind: input, shape index: {}]   ;;  %s10290_s2 = inlined_call_operand.vmem [shape: bf16[9,4,4], index: 2, kind: input, shape index: {}]   ;;  %s10291_s3 = inlined_call_operand.vmem [shape: bf16[9,4,4], index: 3, kind: input, shape index: {}]   ;;  %s10292_s4 = inlined_call_operand.vmem [shape: f32[1,4], index: 4, kind: input, shape index: {}]   ;;  %s10293_s5 = inlined_call_operand.vmem [shape: f32[2,256,4], index: 5, kind: output, shape index: {}]  }
   0x1 LB: > { %s6030_s19 = sadd.s32 4294967295, %s8210_s18   ;;  %p6034_p0 = scmp.ge.s32.totalorder %s8210_s18, 1  ;;  %s8210_s18 = sphi %s8242_s18, %s15_s18  }
   0x2   : > { %p197_p1 = scmp.lt.s32.totalorder %s8210_s18, 3 }
   0x4   : > { %p198_p2 = pnand %p6034_p0, %p197_p1 }
   0x6   : > { %201 = sbr.rel (%p198_p2) target bundleno = 927 (0x39f), region = 40 }
   0xd   : > { %v6039_v0 = vld [vmem:[%s10290_s2 + $0x2] sm:$0x3]  ;;  %vm787_vm0 = vcmask 1041408   ;;  %p230_p3 = scmp.lt.s32.totalorder %s6030_s19, 1  ;;  %v8265_v4 = vld [vmem:[%s10290_s2] sm:$0x3] }
   0xe   : > { %v6263_v1 = vld [vmem:[%s10291_s3 + $0x2] sm:$0x3]  ;;  %7953 = vmatprep.subr.msk.bf16.mxu1 %vm787_vm0, %v6039_v0  ;;  %v789_v2 = vsel %vm787_vm0, %v6039_v0, 0  ;;  %v8270_v5 = vld [vmem:[%s10291_s3] sm:$0x3]  ;;  %v10442_v31 = vmov 0 }
   0xf   : > { %7962 = vmatprep.subr.msk.bf16.mxu0 %vm787_vm0, %v6263_v1  ;;  %v3499_v3 = vsel %vm787_vm0, %v6263_v1, 0  ;;  %6798 = vmatpush3.bf16.msra.mxu1 %v789_v2  ;;  %s10658_s19 = smov (!%p230_p3, %s6030_s19), 1  ;;  %vm301_vm1 = vsmask.f32 3328  ;;  %vm302_vm2 = vsmask.f32 7440 }
  0x10   : > { %7104 = vmatpush3.bf16.msra.mxu0 %v3499_v3  ;;  %7954 = vmatprep.subr.msk.bf16.mxu1 %vm787_vm0, %v8265_v4  ;;  %s7971_s28 = smul.u32 216, %s10658_s19  ;;  %vm8297_vm3 = vmor %vm301_vm1, %vm302_vm2  ;;  %vm738_vm4 = vcmask 31744   ;;  %v1081_v60 = vsel %vm787_vm0, %v8265_v4, 0  ;;  %vm1260_vm5 = vcmask 1042432   ;;  %vm1261_vm6 = vcmask 1046532   ;;  %s6490_s17 = sshll.u32 %s10658_s19, 8 }
  0x11   : > { %7963 = vmatprep.subr.msk.bf16.mxu0 %vm787_vm0, %v8270_v5  ;;  %v10443_v31 = vsel %vm8297_vm3, 4294967295, %v10442_v31  ;;  %vm9112_vm7 = vmor %vm1260_vm5, %vm1261_vm6  ;;  %s10122_s21 = scalar_lea.vmem %s10293_s5, %s6490_s17 }
  0x12   : > { %s8280_s6 = scalar_lea.vmem %s10288_s0, %s7971_s28  ;;  %s8285_s9 = scalar_lea.vmem %s10289_s1, %s7971_s28  ;;  %10444 = vst [vmem:[#allocation2_spill] sm:$0xff] %v10443_v31 }
  0x13   : > { %v246_v6 = vld [vmem:[%s8280_s6] sm:$0xf]  ;;  %v247_v7 = vld [vmem:[%s8280_s6 + $0x4] sm:$0xf]  ;;  %v248_v8 = vld [vmem:[%s8280_s6 + $0x8] sm:$0x1] }
  0x14   : > { %v305_v9 = vshrl.u32 %v246_v6, 16  ;;  %v308_v10 = vshll.u32 %v246_v6, 16  ;;  %v314_v11 = vshll.u32 %v247_v7, 16  ;;  %v318_v12 = vshrl.u32 %v247_v7, 16  ;;  %v2961_v13 = vld [vmem:[%s8285_s9] sm:$0xf] }
  0x15   : > { %v324_v14 = vshll.u32 %v248_v8, 16  ;;  %v2962_v15 = vld [vmem:[%s8285_s9 + $0x4] sm:$0xf]  ;;  %v2963_v16 = vld [vmem:[%s8285_s9 + $0x8] sm:$0x1]  ;;  %v3017_v22 = vshrl.u32 %v2961_v13, 16 }
  0x16   : > { %v307_v17 = vrot.slane %v305_v9, 4  ;;  %v310_v18 = vrot.slane %v308_v10, 5  ;;  %v316_v19 = vrot.slane %v314_v11, 5  ;;  %v320_v20 = vrot.slane %v318_v12, 4  ;;  %v249_v29 = vld [vmem:[%s8280_s6 + $0xc] sm:$0xf] }
  0x17   : > { %v326_v21 = vrot.slane %v324_v14, 5  ;;  %v3020_v23 = vshll.u32 %v2961_v13, 16  ;;  %v3026_v24 = vshll.u32 %v2962_v15, 16  ;;  %v3030_v27 = vshrl.u32 %v2962_v15, 16  ;;  %v250_v30 = vld [vmem:[%s8280_s6 + $0x10] sm:$0xf] }
  0x18   : > { %v311_v25 = vor.u32 %v310_v18, %v307_v17  ;;  %v321_v26 = vor.u32 %v320_v20, %v316_v19  ;;  %v3036_v28 = vshll.u32 %v2963_v16, 16  ;;  %v3019_v32 = vrot.slane %v3017_v22, 4  ;;  %v251_v40 = vld [vmem:[%s8280_s6 + $0x14] sm:$0x1]  ;;  %v2964_v52 = vld [vmem:[%s8285_s9 + $0xc] sm:$0xf] }
  0x19   : > { %v3022_v33 = vrot.slane %v3020_v23, 5  ;;  %v3028_v34 = vrot.slane %v3026_v24, 5  ;;  %v3032_v37 = vrot.slane %v3030_v27, 4  ;;  %v329_v41 = vshrl.u32 %v249_v29, 16  ;;  %v2965_v57 = vld [vmem:[%s8285_s9 + $0x10] sm:$0xf] }
  0x1a   : > { %v312_v35 = vrot.slane %v311_v25, 4  ;;  %v322_v36 = vrot.slane %v321_v26, 4  ;;  %v3038_v38 = vrot.slane %v3036_v28, 5  ;;  %v332_v42 = vshll.u32 %v249_v29, 16  ;;  %v2966_v61 = vld [vmem:[%s8285_s9 + $0x14] sm:$0x1] }
  0x1b   : > { %v3023_v39 = vor.u32 %v3022_v33, %v3019_v32  ;;  %v338_v43 = vshll.u32 %v250_v30, 16  ;;  %v3033_v46 = vor.u32 %v3032_v37, %v3028_v34  ;;  %v342_v47 = vshrl.u32 %v250_v30, 16  ;;  %v252_v12 = vld [vmem:[%s8280_s6 + $0x18] sm:$0xf]  ;;  %v253_v15 = vld [vmem:[%s8280_s6 + $0x1c] sm:$0xf] }
  0x1c   : > { %v317_v44 = vsel %vm8297_vm3, %v312_v35, %v316_v19  ;;  %v327_v45 = vsel %vm8297_vm3, %v322_v36, %v326_v21  ;;  %v331_v50 = vrot.slane %v329_v41, 4  ;;  %v334_v51 = vrot.slane %v332_v42, 5  ;;  %v254_v16 = vld [vmem:[%s8280_s6 + $0x20] sm:$0x1]  ;;  %v2967_v21 = vld [vmem:[%s8285_s9 + $0x18] sm:$0xf] }
  0x1d   : > { %v6040_v48 = vcombine.low %v317_v44, %v327_v45  ;;  %v3024_v49 = vrot.slane %v3023_v39, 4  ;;  %v3034_v53 = vrot.slane %v3033_v46, 4  ;;  %v340_v54 = vrot.slane %v338_v43, 5  ;;  %v2969_v39 = vld [vmem:[%s8285_s9 + $0x20] sm:$0x1] }
  0x1e   : > { %v344_v55 = vrot.slane %v342_v47, 4  ;;  %v348_v56 = vshll.u32 %v251_v40, 16  ;;  %v335_v59 = vor.u32 %v334_v51, %v331_v50  ;;  %v3041_v1 = vshrl.u32 %v2964_v52, 16  ;;  %v255_v44 = vld [vmem:[%s8280_s6 + $0x24] sm:$0xf] }
  0x1f   : > { %6799 = vmatprep.mubr.msk.bf16.mxu1 %vm738_vm4, %v6040_v48  ;;  %v3029_v58 = vsel %vm8297_vm3, %v3024_v49, %v3028_v34  ;;  %v3039_v62 = vsel %vm8297_vm3, %v3034_v53, %v3038_v38  ;;  %v3044_v6 = vshll.u32 %v2964_v52, 16  ;;  %v3050_v7 = vshll.u32 %v2965_v57, 16  ;;  %v2968_v34 = vld [vmem:[%s8285_s9 + $0x1c] sm:$0xf]  ;;  %v256_v53 = vld [vmem:[%s8280_s6 + $0x28] sm:$0xf] }
  0x20   : > { %v345_v63 = vor.u32 %v344_v55, %v340_v54  ;;  %v350_v0 = vrot.slane %v348_v56, 5  ;;  %v6264_v2 = vcombine.low %v3029_v58, %v3039_v62  ;;  %v336_v3 = vrot.slane %v335_v59, 4  ;;  %v8958_v31 = vld [vmem:[%s8280_s6 + $0x30] sm:$0xf] }
  0x21   : > { %v3043_v9 = vrot.slane %v3041_v1, 4  ;;  %v3054_v10 = vshrl.u32 %v2965_v57, 16  ;;  %v3060_v11 = vshll.u32 %v2966_v61, 16  ;;  %v3046_v13 = vrot.slane %v3044_v6, 5  ;;  %v257_v61 = vld [vmem:[%s8280_s6 + $0x2c] sm:$0x1] }
  0x22   : > { %v346_v8 = vrot.slane %v345_v63, 4  ;;  %7105 = vmatprep.mubr.msk.bf16.mxu0 %vm738_vm4, %v6264_v2  ;;  %v341_v4 = vsel %vm8297_vm3, %v336_v3, %v340_v54  ;;  %v3052_v14 = vrot.slane %v3050_v7, 5  ;;  %v3791_v20 = vsel %vm787_vm0, %v8270_v5, 0  ;;  %v2970_v63 = vld [vmem:[%s8285_s9 + $0x24] sm:$0xf]  ;;  %10497 = vst [vmem:[#allocation55_spill] sm:$0xff] %v8958_v31 }
  0x23   : > { %v3056_v18 = vrot.slane %v3054_v10, 4  ;;  %v3062_v19 = vrot.slane %v3060_v11, 5  ;;  %v3047_v23 = vor.u32 %v3046_v13, %v3043_v9  ;;  %v353_v24 = vshrl.u32 %v252_v12, 16  ;;  %v2971_v10 = vld [vmem:[%s8285_s9 + $0x28] sm:$0xf] }
  0x24   : > { %v351_v17 = vsel %vm8297_vm3, %v346_v8, %v350_v0  ;;  %v356_v25 = vshll.u32 %v252_v12, 16  ;;  %v362_v27 = vshll.u32 %v253_v15, 16  ;;  %v366_v28 = vshrl.u32 %v253_v15, 16 }
  0x25   : > { %v8327_v22 = vcombine.low %v341_v4, %v351_v17  ;;  %v3057_v26 = vor.u32 %v3056_v18, %v3052_v14  ;;  %v372_v29 = vshll.u32 %v254_v16, 16  ;;  %v3048_v30 = vrot.slane %v3047_v23, 4  ;;  %v2972_v17 = vld [vmem:[%s8285_s9 + $0x2c] sm:$0x1] }
  0x26   : > { %v355_v32 = vrot.slane %v353_v24, 4  ;;  %v358_v33 = vrot.slane %v356_v25, 5  ;;  %v3065_v5 = vshrl.u32 %v2967_v21, 16  ;;  %v364_v36 = vrot.slane %v362_v27, 5 }
  0x27   : > { %10445 = vst [vmem:[#allocation3_spill] sm:$0xff] %v8327_v22  ;;  %6800 = vmatmul.mubr.msk.bf16.vlgmr.msra.gmra.mrb[0].mxu1 %vm738_vm4, %v8327_v22  ;;  %v3058_v35 = vrot.slane %v3057_v26, 4  ;;  %v368_v37 = vrot.slane %v366_v28, 4  ;;  %v374_v38 = vrot.slane %v372_v29, 5  ;;  %v3053_v40 = vsel %vm8297_vm3, %v3048_v30, %v3052_v14  ;;  %v259_v29 = vld [vmem:[%s8280_s6 + $0x34] sm:$0xf] }
  0x28   : > { %6832 = vmatpush3.bf16.msra.mxu1 %v1081_v60  ;;  %v359_v41 = vor.u32 %v358_v33, %v355_v32  ;;  %v3067_v42 = vrot.slane %v3065_v5, 4  ;;  %v3068_v43 = vshll.u32 %v2967_v21, 16  ;;  %v3074_v47 = vshll.u32 %v2968_v34, 16 }
  0x29   : > { %v3063_v45 = vsel %vm8297_vm3, %v3058_v35, %v3062_v19  ;;  %v369_v46 = vor.u32 %v368_v37, %v364_v36  ;;  %v3078_v48 = vshrl.u32 %v2968_v34, 16  ;;  %v3084_v52 = vshll.u32 %v2969_v39, 16  ;;  %v258_v19 = vld [vmem:[%s8280_s6 + $0x30] sm:$0xf]  ;;  %v260_v37 = vld [vmem:[%s8280_s6 + $0x38] sm:$0x1] }
  0x2a   : > { %v8338_v49 = vcombine.low %v3053_v40, %v3063_v45  ;;  %v360_v50 = vrot.slane %v359_v41, 4  ;;  %v3070_v51 = vrot.slane %v3068_v43, 5  ;;  %v3076_v55 = vrot.slane %v3074_v47, 5  ;;  %v2973_v43 = vld [vmem:[%s8285_s9 + $0x30] sm:$0xf] }
  0x2b   : > { %v370_v54 = vrot.slane %v369_v46, 4  ;;  %v3080_v56 = vrot.slane %v3078_v48, 4  ;;  %v377_v57 = vshrl.u32 %v255_v44, 16  ;;  %v3086_v60 = vrot.slane %v3084_v52, 5  ;;  %v2974_v48 = vld [vmem:[%s8285_s9 + $0x34] sm:$0xf] }
  0x2c   : > { %10446 = vst [vmem:[#allocation4_spill] sm:$0xff] %v8338_v49  ;;  %7106 = vmatmul.mubr.msk.bf16.vlgmr.msra.gmra.mrb[0].mxu0 %vm738_vm4, %v8338_v49  ;;  %v365_v58 = vsel %vm8297_vm3, %v360_v50, %v364_v36  ;;  %v3071_v59 = vor.u32 %v3070_v51, %v3067_v42  ;;  %v380_v62 = vshll.u32 %v255_v44, 16  ;;  %v386_v3 = vshll.u32 %v256_v53, 16 }
  0x2d   : > { %7138 = vmatpush3.bf16.msra.mxu0 %v3791_v20  ;;  %v375_v0 = vsel %vm8297_vm3, %v370_v54, %v374_v38  ;;  %v3081_v1 = vor.u32 %v3080_v56, %v3076_v55  ;;  %v379_v2 = vrot.slane %v377_v57, 4  ;;  %v390_v9 = vshrl.u32 %v256_v53, 16  ;;  %v2975_v57 = vld [vmem:[%s8285_s9 + $0x38] sm:$0x1] }
  0x2e   : > { %v8349_v6 = vcombine.low %v365_v58, %v375_v0  ;;  %v3072_v7 = vrot.slane %v3071_v59, 4  ;;  %v382_v8 = vrot.slane %v380_v62, 5  ;;  %v388_v12 = vrot.slane %v386_v3, 5  ;;  %v261_v3 = vld [vmem:[%s8280_s6 + $0x3c] sm:$0xf] }
  0x2f   : > { %v3082_v11 = vrot.slane %v3081_v1, 4  ;;  %v396_v4 = vshll.u32 %v257_v61, 16  ;;  %v3089_v13 = vshrl.u32 %v2970_v63, 16  ;;  %v392_v16 = vrot.slane %v390_v9, 4 }
  0x30   : > { %10447 = vst [vmem:[#allocation5_spill] sm:$0xff] %v8349_v6  ;;  %6803 = vmatprep.mubr.msk.bf16.mxu1 %vm738_vm4, %v8349_v6  ;;  %v3077_v14 = vsel %vm8297_vm3, %v3072_v7, %v3076_v55  ;;  %v383_v15 = vor.u32 %v382_v8, %v379_v2  ;;  %v3092_v18 = vshll.u32 %v2970_v63, 16  ;;  %v3098_v24 = vshll.u32 %v2971_v10, 16 }
  0x31   : > { %v3087_v20 = vsel %vm8297_vm3, %v3082_v11, %v3086_v60  ;;  %v398_v21 = vrot.slane %v396_v4, 5  ;;  %v3091_v23 = vrot.slane %v3089_v13, 4  ;;  %v393_v27 = vor.u32 %v392_v16, %v388_v12  ;;  %v8383_v11 = vld [vmem:[%s8280_s6 + $0x40] sm:$0xf] }
  0x32   : > { %v8360_v25 = vcombine.low %v3077_v14, %v3087_v20  ;;  %v384_v26 = vrot.slane %v383_v15, 4  ;;  %v3094_v28 = vrot.slane %v3092_v18, 5  ;;  %v3100_v30 = vrot.slane %v3098_v24, 5 }
  0x33   : > { %v3102_v32 = vshrl.u32 %v2971_v10, 16  ;;  %v3108_v33 = vshll.u32 %v2972_v17, 16  ;;  %v401_v34 = vshrl.u32 %v258_v19, 16  ;;  %v394_v35 = vrot.slane %v393_v27, 4  ;;  %v263_v17 = vld [vmem:[%s8280_s6 + $0x44] sm:$0x1] }
  0x34   : > { %10448 = vst [vmem:[#allocation6_spill] sm:$0xff] %v8360_v25  ;;  %7109 = vmatprep.mubr.msk.bf16.mxu0 %vm738_vm4, %v8360_v25  ;;  %v389_v5 = vsel %vm8297_vm3, %v384_v26, %v388_v12  ;;  %v3095_v36 = vor.u32 %v3094_v28, %v3091_v23  ;;  %v404_v38 = vshll.u32 %v258_v19, 16  ;;  %v410_v42 = vshll.u32 %v259_v29, 16  ;;  %v8397_v26 = vld [vmem:[%s8285_s9 + $0x3c] sm:$0xf] }
  0x35   : > { %v3104_v39 = vrot.slane %v3102_v32, 4  ;;  %v3110_v40 = vrot.slane %v3108_v33, 5  ;;  %v403_v41 = vrot.slane %v401_v34, 4  ;;  %v399_v44 = vsel %vm8297_vm3, %v394_v35, %v398_v21  ;;  %v8402_v32 = vld [vmem:[%s8285_s9 + $0x40] sm:$0xf] }
  0x36   : > { %v3096_v45 = vrot.slane %v3095_v36, 4  ;;  %v406_v46 = vrot.slane %v404_v38, 5  ;;  %v414_v47 = vshrl.u32 %v259_v29, 16  ;;  %v8372_v50 = vcombine.low %v389_v5, %v399_v44  ;;  %v2978_v38 = vld [vmem:[%s8285_s9 + $0x44] sm:$0x1] }
  0x37   : > { %v3105_v51 = vor.u32 %v3104_v39, %v3100_v30  ;;  %v412_v52 = vrot.slane %v410_v42, 5  ;;  %v420_v53 = vshll.u32 %v260_v37, 16  ;;  %v3113_v58 = vshrl.u32 %v2973_v43, 16 }
  0x38   : > { %10449 = vst [vmem:[#allocation7_spill] sm:$0xff] %v8372_v50  ;;  %v3101_v54 = vsel %vm8297_vm3, %v3096_v45, %v3100_v30  ;;  %v407_v55 = vor.u32 %v406_v46, %v403_v41  ;;  %v416_v56 = vrot.slane %v414_v47, 4  ;;  %6804 = vmatmul.mubr.msk.bf16.gmra.mrb[4].mxu1 %vm738_vm4, %v8372_v50  ;;  %v3116_v61 = vshll.u32 %v2973_v43, 16  ;;  %v8415_v45 = vld [vmem:[%s8280_s6 + $0x48] sm:$0xf] }
  0x39   : > { %v3106_v59 = vrot.slane %v3105_v51, 4  ;;  %v422_v60 = vrot.slane %v420_v53, 5  ;;  %v3122_v62 = vshll.u32 %v2974_v48, 16  ;;  %v3115_v1 = vrot.slane %v3113_v58, 4 }
  0x3a   : > { %v408_v63 = vrot.slane %v407_v55, 4  ;;  %v417_v0 = vor.u32 %v416_v56, %v412_v52  ;;  %v3126_v2 = vshrl.u32 %v2974_v48, 16  ;;  %v3118_v8 = vrot.slane %v3116_v61, 5 }
  0x3b   : > { %v3111_v7 = vsel %vm8297_vm3, %v3106_v59, %v3110_v40  ;;  %v3124_v9 = vrot.slane %v3122_v62, 5  ;;  %v3132_v10 = vshll.u32 %v2975_v57, 16  ;;  %v425_v18 = vshrl.u32 %v261_v3, 16  ;;  %v266_v59 = vld [vmem:[%s8280_s6 + $0x50] sm:$0x1] }
  0x3c   : > { %v8385_v12 = vcombine.low %v3101_v54, %v3111_v7  ;;  %v413_v4 = vsel %vm8297_vm3, %v408_v63, %v412_v52  ;;  %v418_v13 = vrot.slane %v417_v0, 4  ;;  %v3128_v14 = vrot.slane %v3126_v2, 4  ;;  %v8420_v52 = vld [vmem:[%s8280_s6 + $0x4c] sm:$0xf]  ;;  %v8434_v2 = vld [vmem:[%s8285_s9 + $0x48] sm:$0xf] }
  0x3d   : > { %v3119_v15 = vor.u32 %v3118_v8, %v3115_v1  ;;  %v3134_v16 = vrot.slane %v3132_v10, 5  ;;  %v428_v19 = vshll.u32 %v261_v3, 16  ;;  %v434_v23 = vshll.u32 %v8383_v11, 16  ;;  %v8439_v10 = vld [vmem:[%s8285_s9 + $0x4c] sm:$0xf] }
  0x3e   : > { %10450 = vst [vmem:[#allocation8_spill] sm:$0xff] %v8385_v12  ;;  %7110 = vmatmul.mubr.msk.bf16.gmra.mrb[4].mxu0 %vm738_vm4, %v8385_v12  ;;  %v423_v20 = vsel %vm8297_vm3, %v418_v13, %v422_v60  ;;  %v3129_v21 = vor.u32 %v3128_v14, %v3124_v9  ;;  %v438_v24 = vshrl.u32 %v8383_v11, 16  ;;  %v427_v29 = vrot.slane %v425_v18, 4  ;;  %v2981_v18 = vld [vmem:[%s8285_s9 + $0x50] sm:$0x1] }
  0x3f   : > { %v8399_v27 = vcombine.low %v413_v4, %v423_v20  ;;  %v3120_v28 = vrot.slane %v3119_v15, 4  ;;  %v430_v30 = vrot.slane %v428_v19, 5  ;;  %v436_v34 = vrot.slane %v434_v23, 5 }
  0x40   : > { %v3130_v33 = vrot.slane %v3129_v21, 4  ;;  %v440_v5 = vrot.slane %v438_v24, 4  ;;  %v444_v35 = vshll.u32 %v263_v17, 16  ;;  %v3137_v39 = vshrl.u32 %v8397_v26, 16 }
  0x41   : > { %10451 = vst [vmem:[#allocation9_spill] sm:$0xff] %v8399_v27  ;;  %6807 = vmatprep.mubr.msk.bf16.mxu1 %vm738_vm4, %v8399_v27  ;;  %v3125_v36 = vsel %vm8297_vm3, %v3120_v28, %v3124_v9  ;;  %v431_v37 = vor.u32 %v430_v30, %v427_v29  ;;  %v3140_v40 = vshll.u32 %v8397_v26, 16  ;;  %v3146_v44 = vshll.u32 %v8402_v32, 16 }
  0x42   : > { %v3135_v41 = vsel %vm8297_vm3, %v3130_v33, %v3134_v16  ;;  %v441_v42 = vor.u32 %v440_v5, %v436_v34  ;;  %v446_v43 = vrot.slane %v444_v35, 5  ;;  %v3139_v48 = vrot.slane %v3137_v39, 4  ;;  %v8452_v5 = vld [vmem:[%s8280_s6 + $0x54] sm:$0xf]  ;;  %v8457_v39 = vld [vmem:[%s8280_s6 + $0x58] sm:$0xf] }
  0x43   : > { %v8417_v46 = vcombine.low %v3125_v36, %v3135_v41  ;;  %v432_v47 = vrot.slane %v431_v37, 4  ;;  %v3142_v51 = vrot.slane %v3140_v40, 5  ;;  %v3148_v54 = vrot.slane %v3146_v44, 5  ;;  %v269_v44 = vld [vmem:[%s8280_s6 + $0x5c] sm:$0x1] }
  0x44   : > { %v442_v53 = vrot.slane %v441_v42, 4  ;;  %v3150_v55 = vshrl.u32 %v8402_v32, 16  ;;  %v3156_v56 = vshll.u32 %v2978_v38, 16  ;;  %v449_v60 = vshrl.u32 %v8415_v45, 16 }
  0x45   : > { %10452 = vst [vmem:[#allocation10_spill] sm:$0xff] %v8417_v46  ;;  %7113 = vmatprep.mubr.msk.bf16.mxu0 %vm738_vm4, %v8417_v46  ;;  %v437_v57 = vsel %vm8297_vm3, %v432_v47, %v436_v34  ;;  %v3143_v58 = vor.u32 %v3142_v51, %v3139_v48  ;;  %v452_v61 = vshll.u32 %v8415_v45, 16  ;;  %v458_v1 = vshll.u32 %v8420_v52, 16 }
  0x46   : > { %v447_v62 = vsel %vm8297_vm3, %v442_v53, %v446_v43  ;;  %v3152_v63 = vrot.slane %v3150_v55, 4  ;;  %v3158_v0 = vrot.slane %v3156_v56, 5  ;;  %v451_v8 = vrot.slane %v449_v60, 4 }
  0x47   : > { %v8436_v3 = vcombine.low %v437_v57, %v447_v62  ;;  %v3144_v7 = vrot.slane %v3143_v58, 4  ;;  %v454_v9 = vrot.slane %v452_v61, 5  ;;  %v460_v13 = vrot.slane %v458_v1, 5  ;;  %v8471_v58 = vld [vmem:[%s8285_s9 + $0x54] sm:$0xf] }
  0x48   : > { %v3153_v4 = vor.u32 %v3152_v63, %v3148_v54  ;;  %v462_v14 = vshrl.u32 %v8420_v52, 16  ;;  %v468_v15 = vshll.u32 %v266_v59, 16  ;;  %v3161_v19 = vshrl.u32 %v8434_v2, 16  ;;  %v8476_v63 = vld [vmem:[%s8285_s9 + $0x58] sm:$0xf] }
  0x49   : > { %10453 = vst [vmem:[#allocation11_spill] sm:$0xff] %v8436_v3  ;;  %6808 = vmatmul.mubr.msk.bf16.gmra.mrb[8].mxu1 %vm738_vm4, %v8436_v3  ;;  %v3149_v16 = vsel %vm8297_vm3, %v3144_v7, %v3148_v54  ;;  %v455_v17 = vor.u32 %v454_v9, %v451_v8  ;;  %v3164_v20 = vshll.u32 %v8434_v2, 16  ;;  %v3170_v28 = vshll.u32 %v8439_v10, 16 }
  0x4a   : > { %v3154_v21 = vrot.slane %v3153_v4, 4  ;;  %v464_v23 = vrot.slane %v462_v14, 4  ;;  %v470_v24 = vrot.slane %v468_v15, 5  ;;  %v3163_v30 = vrot.slane %v3161_v19, 4  ;;  %v2984_v14 = vld [vmem:[%s8285_s9 + $0x5c] sm:$0x1] }
  0x4b   : > { %v456_v29 = vrot.slane %v455_v17, 4  ;;  %v3166_v33 = vrot.slane %v3164_v20, 5  ;;  %v3174_v34 = vshrl.u32 %v8439_v10, 16  ;;  %v3172_v37 = vrot.slane %v3170_v28, 5  ;;  %v8492_v20 = vld [vmem:[%s8280_s6 + $0x60] sm:$0xf] }
  0x4c   : > { %v3159_v35 = vsel %vm8297_vm3, %v3154_v21, %v3158_v0  ;;  %v465_v36 = vor.u32 %v464_v23, %v460_v13  ;;  %v3180_v38 = vshll.u32 %v2981_v18, 16  ;;  %v473_v51 = vshrl.u32 %v8452_v5, 16 }
  0x4d   : > { %v8459_v40 = vcombine.low %v3149_v16, %v3159_v35  ;;  %v461_v41 = vsel %vm8297_vm3, %v456_v29, %v460_v13  ;;  %v3167_v42 = vor.u32 %v3166_v33, %v3163_v30  ;;  %v3176_v43 = vrot.slane %v3174_v34, 4  ;;  %v8497_v29 = vld [vmem:[%s8280_s6 + $0x64] sm:$0xf] }
  0x4e   : > { %v466_v47 = vrot.slane %v465_v36, 4  ;;  %v3182_v48 = vrot.slane %v3180_v38, 5  ;;  %v476_v53 = vshll.u32 %v8452_v5, 16  ;;  %v482_v56 = vshll.u32 %v8457_v39, 16  ;;  %v272_v36 = vld [vmem:[%s8280_s6 + $0x68] sm:$0x1] }
  0x4f   : > { %10454 = vst [vmem:[#allocation12_spill] sm:$0xff] %v8459_v40  ;;  %7114 = vmatmul.mubr.msk.bf16.gmra.mrb[8].mxu0 %vm738_vm4, %v8459_v40  ;;  %v3168_v54 = vrot.slane %v3167_v42, 4  ;;  %v3177_v55 = vor.u32 %v3176_v43, %v3172_v37  ;;  %v486_v57 = vshrl.u32 %v8457_v39, 16  ;;  %v475_v60 = vrot.slane %v473_v51, 4  ;;  %v8507_v43 = vld [vmem:[%s8285_s9 + $0x60] sm:$0xf] }
  0x50   : > { %v471_v59 = vsel %vm8297_vm3, %v466_v47, %v470_v24  ;;  %v478_v61 = vrot.slane %v476_v53, 5  ;;  %v492_v62 = vshll.u32 %v269_v44, 16  ;;  %v484_v8 = vrot.slane %v482_v56, 5  ;;  %v8513_v53 = vld [vmem:[%s10290_s2 + $0x4] sm:$0x3] }
  0x51   : > { %v8478_v0 = vcombine.low %v461_v41, %v471_v59  ;;  %v3173_v1 = vsel %vm8297_vm3, %v3168_v54, %v3172_v37  ;;  %v3178_v7 = vrot.slane %v3177_v55, 4  ;;  %v488_v4 = vrot.slane %v486_v57, 4  ;;  %v8518_v54 = vld [vmem:[%s10291_s3 + $0x4] sm:$0x3]  ;;  %7955 = vmatprep.subr.msk.bf16.mxu1 %vm787_vm0, %v8513_v53 }
  0x52   : > { %v479_v9 = vor.u32 %v478_v61, %v475_v60  ;;  %v494_v13 = vrot.slane %v492_v62, 5  ;;  %v3185_v15 = vshrl.u32 %v8471_v58, 16  ;;  %v3188_v17 = vshll.u32 %v8471_v58, 16  ;;  %v8524_v60 = vld [vmem:[%s8285_s9 + $0x64] sm:$0xf]  ;;  %7964 = vmatprep.subr.msk.bf16.mxu0 %vm787_vm0, %v8518_v54 }
  0x53   : > { %10455 = vst [vmem:[#allocation13_spill] sm:$0xff] %v8478_v0  ;;  %6811 = vmatprep.mubr.msk.bf16.mxu1 %vm738_vm4, %v8478_v0  ;;  %v3183_v16 = vsel %vm8297_vm3, %v3178_v7, %v3182_v48  ;;  %v3194_v18 = vshll.u32 %v8476_v63, 16  ;;  %v3198_v19 = vshrl.u32 %v8476_v63, 16  ;;  %v489_v24 = vor.u32 %v488_v4, %v484_v8  ;;  %v8658_v0 = vld [vmem:[%s8285_s9 + $0x8c] sm:$0x1] }
  0x54   : > { %v8494_v21 = vcombine.low %v3173_v1, %v3183_v16  ;;  %v480_v23 = vrot.slane %v479_v9, 4  ;;  %v3187_v28 = vrot.slane %v3185_v15, 4  ;;  %v3190_v30 = vrot.slane %v3188_v17, 5  ;;  %v2987_v16 = vld [vmem:[%s8285_s9 + $0x68] sm:$0x1]  ;;  %10467 = vst [vmem:[#allocation25_spill] sm:$0xff] %v8658_v0 }
  0x55   : > { %v3196_v33 = vrot.slane %v3194_v18, 5  ;;  %v3200_v34 = vrot.slane %v3198_v19, 4  ;;  %v3204_v35 = vshll.u32 %v2984_v14, 16  ;;  %v490_v38 = vrot.slane %v489_v24, 4  ;;  %v8543_v19 = vld [vmem:[%s8280_s6 + $0x6c] sm:$0xf] }
  0x56   : > { %10456 = vst [vmem:[#allocation14_spill] sm:$0xff] %v8494_v21  ;;  %7117 = vmatprep.mubr.msk.bf16.mxu0 %vm738_vm4, %v8494_v21  ;;  %v485_v37 = vsel %vm8297_vm3, %v480_v23, %v484_v8  ;;  %v497_v41 = vshrl.u32 %v8492_v20, 16  ;;  %v500_v42 = vshll.u32 %v8492_v20, 16  ;;  %v3191_v44 = vor.u32 %v3190_v30, %v3187_v28 }
  0x57   : > { %v3201_v47 = vor.u32 %v3200_v34, %v3196_v33  ;;  %v3206_v48 = vrot.slane %v3204_v35, 5  ;;  %v506_v51 = vshll.u32 %v8497_v29, 16  ;;  %v495_v55 = vsel %vm8297_vm3, %v490_v38, %v494_v13  ;;  %v8548_v34 = vld [vmem:[%s8280_s6 + $0x70] sm:$0xf] }
  0x58   : > { %v499_v56 = vrot.slane %v497_v41, 4  ;;  %v502_v57 = vrot.slane %v500_v42, 5  ;;  %v510_v59 = vshrl.u32 %v8497_v29, 16  ;;  %v8530_v61 = vcombine.low %v485_v37, %v495_v55 }
  0x59   : > { %v3192_v62 = vrot.slane %v3191_v44, 4  ;;  %v3202_v1 = vrot.slane %v3201_v47, 4  ;;  %v508_v7 = vrot.slane %v506_v51, 5  ;;  %v516_v4 = vshll.u32 %v272_v36, 16  ;;  %v275_v44 = vld [vmem:[%s8280_s6 + $0x74] sm:$0x1] }
  0x5a   : > { %10457 = vst [vmem:[#allocation15_spill] sm:$0xff] %v8530_v61  ;;  %v503_v8 = vor.u32 %v502_v57, %v499_v56  ;;  %v512_v9 = vrot.slane %v510_v59, 4  ;;  %v3209_v13 = vshrl.u32 %v8507_v43, 16  ;;  %6812 = vmatmul.mubr.msk.bf16.gmra.mrb[12].mxu1 %vm738_vm4, %v8530_v61  ;;  %v3212_v17 = vshll.u32 %v8507_v43, 16  ;;  %v8560_v57 = vld [vmem:[%s8285_s9 + $0x6c] sm:$0xf] }
  0x5b   : > { %v3197_v14 = vsel %vm8297_vm3, %v3192_v62, %v3196_v33  ;;  %v3207_v15 = vsel %vm8297_vm3, %v3202_v1, %v3206_v48  ;;  %v3218_v18 = vshll.u32 %v8524_v60, 16  ;;  %v518_v30 = vrot.slane %v516_v4, 5 }
  0x5c   : > { %v8545_v23 = vcombine.low %v3197_v14, %v3207_v15  ;;  %v504_v24 = vrot.slane %v503_v8, 4  ;;  %v513_v28 = vor.u32 %v512_v9, %v508_v7  ;;  %v3211_v33 = vrot.slane %v3209_v13, 4  ;;  %v8568_v14 = vld [vmem:[%s8285_s9 + $0x70] sm:$0xf] }
  0x5d   : > { %v3214_v35 = vrot.slane %v3212_v17, 5  ;;  %v3220_v36 = vrot.slane %v3218_v18, 5  ;;  %v3222_v37 = vshrl.u32 %v8524_v60, 16  ;;  %v3228_v42 = vshll.u32 %v2987_v16, 16 }
  0x5e   : > { %10458 = vst [vmem:[#allocation16_spill] sm:$0xff] %v8545_v23  ;;  %7118 = vmatmul.mubr.msk.bf16.gmra.mrb[12].mxu0 %vm738_vm4, %v8545_v23  ;;  %v509_v38 = vsel %vm8297_vm3, %v504_v24, %v508_v7  ;;  %v514_v41 = vrot.slane %v513_v28, 4  ;;  %v521_v47 = vshrl.u32 %v8543_v19, 16  ;;  %v524_v55 = vshll.u32 %v8543_v19, 16 }
  0x5f   : > { %v3215_v48 = vor.u32 %v3214_v35, %v3211_v33  ;;  %v3224_v51 = vrot.slane %v3222_v37, 4  ;;  %v530_v56 = vshll.u32 %v8548_v34, 16  ;;  %v3230_v62 = vrot.slane %v3228_v42, 5  ;;  %v2990_v33 = vld [vmem:[%s8285_s9 + $0x74] sm:$0x1] }
  0x60   : > { %v519_v59 = vsel %vm8297_vm3, %v514_v41, %v518_v30  ;;  %v523_v1 = vrot.slane %v521_v47, 4  ;;  %v534_v7 = vshrl.u32 %v8548_v34, 16  ;;  %v526_v13 = vrot.slane %v524_v55, 5  ;;  %v8585_v55 = vld [vmem:[%s8280_s6 + $0x7c] sm:$0xf] }
  0x61   : > { %v8565_v8 = vcombine.low %v509_v38, %v519_v59  ;;  %v3216_v9 = vrot.slane %v3215_v48, 4  ;;  %v3225_v4 = vor.u32 %v3224_v51, %v3220_v36  ;;  %v532_v15 = vrot.slane %v530_v56, 5 }
  0x62   : > { %v536_v16 = vrot.slane %v534_v7, 4  ;;  %v540_v17 = vshll.u32 %v275_v44, 16  ;;  %v3233_v18 = vshrl.u32 %v8560_v57, 16  ;;  %v527_v30 = vor.u32 %v526_v13, %v523_v1  ;;  %v8579_v44 = vld [vmem:[%s8280_s6 + $0x78] sm:$0xf] }
  0x63   : > { %10459 = vst [vmem:[#allocation17_spill] sm:$0xff] %v8565_v8  ;;  %6815 = vmatprep.mubr.msk.bf16.mxu1 %vm738_vm4, %v8565_v8  ;;  %v3221_v24 = vsel %vm8297_vm3, %v3216_v9, %v3220_v36  ;;  %v3226_v28 = vrot.slane %v3225_v4, 4  ;;  %v3236_v35 = vshll.u32 %v8560_v57, 16  ;;  %v3242_v42 = vshll.u32 %v8568_v14, 16 }
  0x64   : > { %v537_v37 = vor.u32 %v536_v16, %v532_v15  ;;  %v542_v38 = vrot.slane %v540_v17, 5  ;;  %v3235_v41 = vrot.slane %v3233_v18, 4  ;;  %v528_v48 = vrot.slane %v527_v30, 4  ;;  %v8592_v16 = vld [vmem:[%s8280_s6 + $0x80] sm:$0x1] }
  0x65   : > { %v3231_v47 = vsel %vm8297_vm3, %v3226_v28, %v3230_v62  ;;  %v3238_v51 = vrot.slane %v3236_v35, 5  ;;  %v3246_v36 = vshrl.u32 %v8568_v14, 16  ;;  %v3244_v1 = vrot.slane %v3242_v42, 5  ;;  %10461 = vst [vmem:[#allocation19_spill] sm:$0xff] %v8592_v16  ;;  %v8602_v30 = vld [vmem:[%s8285_s9 + $0x78] sm:$0xf] }
  0x66   : > { %v8587_v56 = vcombine.low %v3221_v24, %v3231_v47  ;;  %v538_v59 = vrot.slane %v537_v37, 4  ;;  %v3252_v7 = vshll.u32 %v2990_v33, 16  ;;  %v533_v9 = vsel %vm8297_vm3, %v528_v48, %v532_v15 }
  0x67   : > { %v3239_v4 = vor.u32 %v3238_v51, %v3235_v41  ;;  %v3248_v13 = vrot.slane %v3246_v36, 4  ;;  %v545_v62 = vshrl.u32 %v8579_v44, 16  ;;  %v548_v24 = vshll.u32 %v8579_v44, 16  ;;  %v8607_v41 = vld [vmem:[%s8285_s9 + $0x7c] sm:$0xf] }
  0x68   : > { %10460 = vst [vmem:[#allocation18_spill] sm:$0xff] %v8587_v56  ;;  %7121 = vmatprep.mubr.msk.bf16.mxu0 %vm738_vm4, %v8587_v56  ;;  %v543_v17 = vsel %vm8297_vm3, %v538_v59, %v542_v38  ;;  %v3254_v18 = vrot.slane %v3252_v7, 5  ;;  %v554_v28 = vshll.u32 %v8585_v55, 16  ;;  %v558_v38 = vshrl.u32 %v8585_v55, 16  ;;  %v8616_v59 = vld [vmem:[%s8285_s9 + $0x80] sm:$0x1] }
  0x69   : > { %v8604_v15 = vcombine.low %v533_v9, %v543_v17  ;;  %v3240_v33 = vrot.slane %v3239_v4, 4  ;;  %v3249_v35 = vor.u32 %v3248_v13, %v3244_v1  ;;  %v547_v37 = vrot.slane %v545_v62, 4  ;;  %10463 = vst [vmem:[#allocation21_spill] sm:$0xff] %v8616_v59 }
  0x6a   : > { %v550_v42 = vrot.slane %v548_v24, 5  ;;  %v556_v47 = vrot.slane %v554_v28, 5  ;;  %v564_v48 = vshll.u32 %v8592_v16, 16  ;;  %v3257_v7 = vshrl.u32 %v8602_v30, 16  ;;  %v8622_v24 = vld [vmem:[%s8280_s6 + $0x84] sm:$0xf] }
  0x6b   : > { %10462 = vst [vmem:[#allocation20_spill] sm:$0xff] %v8604_v15  ;;  %6816 = vmatmul.mubr.msk.bf16.gmra.mrb[16].mxu1 %vm738_vm4, %v8604_v15  ;;  %v3245_v51 = vsel %vm8297_vm3, %v3240_v33, %v3244_v1  ;;  %v3250_v36 = vrot.slane %v3249_v35, 4  ;;  %v3260_v9 = vshll.u32 %v8602_v30, 16  ;;  %v560_v13 = vrot.slane %v558_v38, 4  ;;  %v8628_v35 = vld [vmem:[%s8280_s6 + $0x88] sm:$0xf] }
  0x6c   : > { %v551_v4 = vor.u32 %v550_v42, %v547_v37  ;;  %v566_v62 = vrot.slane %v564_v48, 5  ;;  %v3266_v17 = vshll.u32 %v8607_v41, 16  ;;  %v3259_v56 = vrot.slane %v3257_v7, 4 }
  0x6d   : > { %v3255_v28 = vsel %vm8297_vm3, %v3250_v36, %v3254_v18  ;;  %v3262_v1 = vrot.slane %v3260_v9, 5  ;;  %v3270_v33 = vshrl.u32 %v8607_v41, 16  ;;  %v561_v37 = vor.u32 %v560_v13, %v556_v47 }
  0x6e   : > { %v8630_v15 = vcombine.low %v3245_v51, %v3255_v28  ;;  %v552_v8 = vrot.slane %v551_v4, 4  ;;  %v3268_v42 = vrot.slane %v3266_v17, 5  ;;  %v3276_v23 = vshll.u32 %v8616_v59, 16  ;;  %v8639_v51 = vld [vmem:[%s8280_s6 + $0x8c] sm:$0x1] }
  0x6f   : > { %v3263_v38 = vor.u32 %v3262_v1, %v3259_v56  ;;  %v3272_v48 = vrot.slane %v3270_v33, 4  ;;  %v569_v21 = vshrl.u32 %v8622_v24, 16  ;;  %v562_v36 = vrot.slane %v561_v37, 4  ;;  %10465 = vst [vmem:[#allocation23_spill] sm:$0xff] %v8639_v51  ;;  %v8644_v28 = vld [vmem:[%s8285_s9 + $0x84] sm:$0xf] }
  0x70   : > { %10464 = vst [vmem:[#allocation22_spill] sm:$0xff] %v8630_v15  ;;  %7122 = vmatmul.mubr.msk.bf16.gmra.mrb[16].mxu0 %vm738_vm4, %v8630_v15  ;;  %v557_v18 = vsel %vm8297_vm3, %v552_v8, %v556_v47  ;;  %v572_v7 = vshll.u32 %v8622_v24, 16  ;;  %v578_v9 = vshll.u32 %v8628_v35, 16  ;;  %v3278_v13 = vrot.slane %v3276_v23, 5  ;;  %v8650_v47 = vld [vmem:[%s8285_s9 + $0x88] sm:$0xf] }
  0x71   : > { %v3264_v56 = vrot.slane %v3263_v38, 4  ;;  %v3273_v4 = vor.u32 %v3272_v48, %v3268_v42  ;;  %v571_v17 = vrot.slane %v569_v21, 4  ;;  %v567_v1 = vsel %vm8297_vm3, %v562_v36, %v566_v62 }
  0x72   : > { %v574_v33 = vrot.slane %v572_v7, 5  ;;  %v580_v15 = vrot.slane %v578_v9, 5  ;;  %v582_v8 = vshrl.u32 %v8628_v35, 16  ;;  %v8652_v37 = vcombine.low %v557_v18, %v567_v1 }
  0x73   : > { %v3269_v38 = vsel %vm8297_vm3, %v3264_v56, %v3268_v42  ;;  %v3274_v48 = vrot.slane %v3273_v4, 4  ;;  %v588_v21 = vshll.u32 %v8639_v51, 16  ;;  %v3281_v62 = vshrl.u32 %v8644_v28, 16  ;;  %v8669_v56 = vld [vmem:[%s8280_s6 + $0x90] sm:$0xf] }
  0x74   : > { %10466 = vst [vmem:[#allocation24_spill] sm:$0xff] %v8652_v37  ;;  %v575_v23 = vor.u32 %v574_v33, %v571_v17  ;;  %v584_v61 = vrot.slane %v582_v8, 4  ;;  %v3284_v36 = vshll.u32 %v8644_v28, 16  ;;  %6819 = vmatprep.mubr.msk.bf16.mxu1 %vm738_vm4, %v8652_v37  ;;  %v3290_v42 = vshll.u32 %v8650_v47, 16  ;;  %v8674_v8 = vld [vmem:[%s8280_s6 + $0x94] sm:$0xf] }
  0x75   : > { %v3279_v18 = vsel %vm8297_vm3, %v3274_v48, %v3278_v13  ;;  %v590_v7 = vrot.slane %v588_v21, 5  ;;  %v3294_v9 = vshrl.u32 %v8650_v47, 16  ;;  %v3283_v33 = vrot.slane %v3281_v62, 4 }
  0x76   : > { %v8671_v4 = vcombine.low %v3269_v38, %v3279_v18  ;;  %v576_v17 = vrot.slane %v575_v23, 4  ;;  %v585_v1 = vor.u32 %v584_v61, %v580_v15  ;;  %v3286_v37 = vrot.slane %v3284_v36, 5  ;;  %v8684_v36 = vld [vmem:[%s8280_s6 + $0x98] sm:$0x1] }
  0x77   : > { %v3292_v40 = vrot.slane %v3290_v42, 5  ;;  %v3296_v46 = vrot.slane %v3294_v9, 4  ;;  %v3300_v13 = vshll.u32 %v8658_v0, 16  ;;  %v593_v21 = vshrl.u32 %v8669_v56, 16  ;;  %10469 = vst [vmem:[#allocation27_spill] sm:$0xff] %v8684_v36 }
  0x78   : > { %10468 = vst [vmem:[#allocation26_spill] sm:$0xff] %v8671_v4  ;;  %7125 = vmatprep.mubr.msk.bf16.mxu0 %vm738_vm4, %v8671_v4  ;;  %v581_v38 = vsel %vm8297_vm3, %v576_v17, %v580_v15  ;;  %v586_v48 = vrot.slane %v585_v1, 4  ;;  %v596_v61 = vshll.u32 %v8669_v56, 16  ;;  %v3287_v23 = vor.u32 %v3286_v37, %v3283_v33  ;;  %v8688_v9 = vld [vmem:[%s8285_s9 + $0x90] sm:$0xf] }
  0x79   : > { %v3297_v62 = vor.u32 %v3296_v46, %v3292_v40  ;;  %v3302_v18 = vrot.slane %v3300_v13, 5  ;;  %v602_v42 = vshll.u32 %v8674_v8, 16  ;;  %v595_v3 = vrot.slane %v593_v21, 4  ;;  %v8694_v1 = vld [vmem:[%s8285_s9 + $0x94] sm:$0xf] }
  0x7a   : > { %v591_v4 = vsel %vm8297_vm3, %v586_v48, %v590_v7  ;;  %v598_v15 = vrot.slane %v596_v61, 5  ;;  %v606_v17 = vshrl.u32 %v8674_v8, 16  ;;  %v3288_v46 = vrot.slane %v3287_v23, 4  ;;  %v8712_v61 = vld [vmem:[%s8280_s6 + $0x9c] sm:$0xf] }
  0x7b   : > { %v8696_v37 = vcombine.low %v581_v38, %v591_v4  ;;  %v3298_v33 = vrot.slane %v3297_v62, 4  ;;  %v604_v13 = vrot.slane %v602_v42, 5  ;;  %v612_v25 = vshll.u32 %v8684_v36, 16  ;;  %v8707_v38 = vld [vmem:[%s8285_s9 + $0x98] sm:$0x1] }
  0x7c   : > { %v599_v27 = vor.u32 %v598_v15, %v595_v3  ;;  %v608_v12 = vrot.slane %v606_v17, 4  ;;  %v3305_v7 = vshrl.u32 %v8688_v9, 16  ;;  %v3293_v48 = vsel %vm8297_vm3, %v3288_v46, %v3292_v40  ;;  %10471 = vst [vmem:[#allocation29_spill] sm:$0xff] %v8707_v38  ;;  %v8717_v17 = vld [vmem:[%s8280_s6 + $0xa0] sm:$0xf] }
  0x7d   : > { %10470 = vst [vmem:[#allocation28_spill] sm:$0xff] %v8696_v37  ;;  %6820 = vmatmul.mubr.msk.bf16.gmra.mrb[20].mxu1 %vm738_vm4, %v8696_v37  ;;  %v3303_v4 = vsel %vm8297_vm3, %v3298_v33, %v3302_v18  ;;  %v3308_v21 = vshll.u32 %v8688_v9, 16  ;;  %v3314_v3 = vshll.u32 %v8694_v1, 16  ;;  %v614_v15 = vrot.slane %v612_v25, 5 }
  0x7e   : > { %v8714_v23 = vcombine.low %v3293_v48, %v3303_v4  ;;  %v600_v62 = vrot.slane %v599_v27, 4  ;;  %v609_v42 = vor.u32 %v608_v12, %v604_v13  ;;  %v3307_v40 = vrot.slane %v3305_v7, 4  ;;  %v8726_v12 = vld [vmem:[%s8280_s6 + $0xa4] sm:$0x1] }
  0x7f   : > { %v3310_v46 = vrot.slane %v3308_v21, 5  ;;  %v3316_v18 = vrot.slane %v3314_v3, 5  ;;  %v3318_v33 = vshrl.u32 %v8694_v1, 16  ;;  %v3324_v48 = vshll.u32 %v8707_v38, 16  ;;  %10473 = vst [vmem:[#allocation31_spill] sm:$0xff] %v8726_v12 }
  0x80   : > { %10472 = vst [vmem:[#allocation30_spill] sm:$0xff] %v8714_v23  ;;  %7126 = vmatmul.mubr.msk.bf16.gmra.mrb[20].mxu0 %vm738_vm4, %v8714_v23  ;;  %v605_v37 = vsel %vm8297_vm3, %v600_v62, %v604_v13  ;;  %v610_v50 = vrot.slane %v609_v42, 4  ;;  %v617_v25 = vshrl.u32 %v8712_v61, 16  ;;  %v620_v4 = vshll.u32 %v8712_v61, 16  ;;  %v8732_v3 = vld [vmem:[%s8285_s9 + $0x9c] sm:$0xf] }
  0x81   : > { %v3311_v27 = vor.u32 %v3310_v46, %v3307_v40  ;;  %v3320_v7 = vrot.slane %v3318_v33, 4  ;;  %v626_v21 = vshll.u32 %v8717_v17, 16  ;;  %10474 = vst [vmem:[#allocation32_spill] sm:$0xff] %v8732_v3  ;;  %v3326_v13 = vrot.slane %v3324_v48, 5  ;;  %v8740_v46 = vld [vmem:[%s8285_s9 + $0xa0] sm:$0xf] }
  0x82   : > { %v615_v23 = vsel %vm8297_vm3, %v610_v50, %v614_v15  ;;  %v619_v62 = vrot.slane %v617_v25, 4  ;;  %v630_v42 = vshrl.u32 %v8717_v17, 16  ;;  %v622_v40 = vrot.slane %v620_v4, 5  ;;  %10476 = vst [vmem:[#allocation34_spill] sm:$0xff] %v8740_v46  ;;  %v8749_v15 = vld [vmem:[%s8285_s9 + $0xa4] sm:$0x1] }
  0x83   : > { %v8737_v6 = vcombine.low %v605_v37, %v615_v23  ;;  %v3312_v49 = vrot.slane %v3311_v27, 4  ;;  %v3321_v22 = vor.u32 %v3320_v7, %v3316_v18  ;;  %v628_v33 = vrot.slane %v626_v21, 5  ;;  %10477 = vst [vmem:[#allocation35_spill] sm:$0xff] %v8749_v15  ;;  %v8754_v21 = vld [vmem:[%s8280_s6 + $0xa8] sm:$0xf] }
  0x84   : > { %v632_v38 = vrot.slane %v630_v42, 4  ;;  %v636_v0 = vshll.u32 %v8726_v12, 16  ;;  %v3329_v36 = vshrl.u32 %v8732_v3, 16  ;;  %v623_v23 = vor.u32 %v622_v40, %v619_v62 }
  0x85   : > { %10475 = vst [vmem:[#allocation33_spill] sm:$0xff] %v8737_v6  ;;  %6823 = vmatprep.mubr.msk.bf16.mxu1 %vm738_vm4, %v8737_v6  ;;  %v3317_v50 = vsel %vm8297_vm3, %v3312_v49, %v3316_v18  ;;  %v3322_v37 = vrot.slane %v3321_v22, 4  ;;  %v3332_v48 = vshll.u32 %v8732_v3, 16  ;;  %v3338_v4 = vshll.u32 %v8740_v46, 16  ;;  %v8760_v49 = vld [vmem:[%s8280_s6 + $0xac] sm:$0xf] }
  0x86   : > { %v633_v25 = vor.u32 %v632_v38, %v628_v33  ;;  %v638_v27 = vrot.slane %v636_v0, 5  ;;  %v3331_v7 = vrot.slane %v3329_v36, 4  ;;  %v624_v6 = vrot.slane %v623_v23, 4 }
  0x87   : > { %v3327_v42 = vsel %vm8297_vm3, %v3322_v37, %v3326_v13  ;;  %v3334_v12 = vrot.slane %v3332_v48, 5  ;;  %v3342_v22 = vshrl.u32 %v8740_v46, 16  ;;  %v3340_v0 = vrot.slane %v3338_v4, 5  ;;  %v8768_v13 = vld [vmem:[%s8280_s6 + $0xb0] sm:$0x1] }
  0x88   : > { %v8762_v18 = vcombine.low %v3317_v50, %v3327_v42  ;;  %v634_v38 = vrot.slane %v633_v25, 4  ;;  %v3348_v36 = vshll.u32 %v8749_v15, 16  ;;  %v629_v62 = vsel %vm8297_vm3, %v624_v6, %v628_v33  ;;  %10479 = vst [vmem:[#allocation37_spill] sm:$0xff] %v8768_v13  ;;  %v8778_v4 = vld [vmem:[%s8285_s9 + $0xa8] sm:$0xf] }
  0x89   : > { %v3335_v40 = vor.u32 %v3334_v12, %v3331_v7  ;;  %v3344_v51 = vrot.slane %v3342_v22, 4  ;;  %v641_v37 = vshrl.u32 %v8754_v21, 16  ;;  %v644_v48 = vshll.u32 %v8754_v21, 16  ;;  %10480 = vst [vmem:[#allocation38_spill] sm:$0xff] %v8778_v4  ;;  %v8783_v42 = vld [vmem:[%s8285_s9 + $0xac] sm:$0xf] }
  0x8a   : > { %10478 = vst [vmem:[#allocation36_spill] sm:$0xff] %v8762_v18  ;;  %7129 = vmatprep.mubr.msk.bf16.mxu0 %vm738_vm4, %v8762_v18  ;;  %v639_v50 = vsel %vm8297_vm3, %v634_v38, %v638_v27  ;;  %v3350_v23 = vrot.slane %v3348_v36, 5  ;;  %v650_v25 = vshll.u32 %v8760_v49, 16  ;;  %v654_v27 = vshrl.u32 %v8760_v49, 16 }
  0x8b   : > { %v8780_v6 = vcombine.low %v629_v62, %v639_v50  ;;  %v3336_v12 = vrot.slane %v3335_v40, 4  ;;  %v3345_v33 = vor.u32 %v3344_v51, %v3340_v0  ;;  %v643_v7 = vrot.slane %v641_v37, 4  ;;  %v8792_v40 = vld [vmem:[%s8285_s9 + $0xb0] sm:$0x1] }
  0x8c   : > { %v646_v22 = vrot.slane %v644_v48, 5  ;;  %v652_v18 = vrot.slane %v650_v25, 5  ;;  %v660_v38 = vshll.u32 %v8768_v13, 16  ;;  %10482 = vst [vmem:[#allocation40_spill] sm:$0xff] %v8792_v40  ;;  %v3353_v51 = vshrl.u32 %v8778_v4, 16 }
  0x8d   : > { %10481 = vst [vmem:[#allocation39_spill] sm:$0xff] %v8780_v6  ;;  %6824 = vmatmul.mubr.msk.bf16.gmra.mrb[24].mxu1 %vm738_vm4, %v8780_v6  ;;  %v3341_v36 = vsel %vm8297_vm3, %v3336_v12, %v3340_v0  ;;  %v3346_v62 = vrot.slane %v3345_v33, 4  ;;  %v3356_v37 = vshll.u32 %v8778_v4, 16  ;;  %v656_v48 = vrot.slane %v654_v27, 4  ;;  %v8798_v13 = vld [vmem:[%s8280_s6 + $0xb4] sm:$0xf] }
  0x8e   : > { %v647_v50 = vor.u32 %v646_v22, %v643_v7  ;;  %v662_v25 = vrot.slane %v660_v38, 5  ;;  %v3362_v15 = vshll.u32 %v8783_v42, 16  ;;  %10483 = vst [vmem:[#allocation41_spill] sm:$0xff] %v8798_v13  ;;  %v3355_v59 = vrot.slane %v3353_v51, 4  ;;  %v8804_v33 = vld [vmem:[%s8280_s6 + $0xb8] sm:$0xf] }
  0x8f   : > { %v3351_v6 = vsel %vm8297_vm3, %v3346_v62, %v3350_v23  ;;  %v3358_v0 = vrot.slane %v3356_v37, 5  ;;  %v3366_v12 = vshrl.u32 %v8783_v42, 16  ;;  %v657_v7 = vor.u32 %v656_v48, %v652_v18  ;;  %v8820_v48 = vld [vmem:[%s8285_s9 + $0xb4] sm:$0xf] }
  0x90   : > { %v8806_v16 = vcombine.low %v3341_v36, %v3351_v6  ;;  %v648_v4 = vrot.slane %v647_v50, 4  ;;  %v3364_v22 = vrot.slane %v3362_v15, 5  ;;  %v3372_v3 = vshll.u32 %v8792_v40, 16  ;;  %v8815_v6 = vld [vmem:[%s8280_s6 + $0xbc] sm:$0x1] }
  0x91   : > { %v3359_v27 = vor.u32 %v3358_v0, %v3355_v59  ;;  %v3368_v38 = vrot.slane %v3366_v12, 4  ;;  %v665_v46 = vshrl.u32 %v8798_v13, 16  ;;  %v658_v62 = vrot.slane %v657_v7, 4  ;;  %10485 = vst [vmem:[#allocation43_spill] sm:$0xff] %v8815_v6 }
  0x92   : > { %10484 = vst [vmem:[#allocation42_spill] sm:$0xff] %v8806_v16  ;;  %7130 = vmatmul.mubr.msk.bf16.gmra.mrb[24].mxu0 %vm738_vm4, %v8806_v16  ;;  %v653_v23 = vsel %vm8297_vm3, %v648_v4, %v652_v18  ;;  %v668_v36 = vshll.u32 %v8798_v13, 16  ;;  %v674_v15 = vshll.u32 %v8804_v33, 16  ;;  %v3374_v37 = vrot.slane %v3372_v3, 5  ;;  %v8826_v4 = vld [vmem:[%s8285_s9 + $0xb8] sm:$0xf] }
  0x93   : > { %v3360_v59 = vrot.slane %v3359_v27, 4  ;;  %v3369_v51 = vor.u32 %v3368_v38, %v3364_v22  ;;  %v667_v50 = vrot.slane %v665_v46, 4  ;;  %v663_v0 = vsel %vm8297_vm3, %v658_v62, %v662_v25  ;;  %v8834_v13 = vld [vmem:[%s8285_s9 + $0xbc] sm:$0x1] }
  0x94   : > { %v670_v12 = vrot.slane %v668_v36, 5  ;;  %v676_v16 = vrot.slane %v674_v15, 5  ;;  %v678_v18 = vshrl.u32 %v8804_v33, 16  ;;  %v8828_v7 = vcombine.low %v653_v23, %v663_v0  ;;  %10487 = vst [vmem:[#allocation45_spill] sm:$0xff] %v8834_v13 }
  0x95   : > { %v3365_v27 = vsel %vm8297_vm3, %v3360_v59, %v3364_v22  ;;  %v3370_v40 = vrot.slane %v3369_v51, 4  ;;  %v684_v3 = vshll.u32 %v8815_v6, 16  ;;  %v3377_v25 = vshrl.u32 %v8820_v48, 16 }
  0x96   : > { %10486 = vst [vmem:[#allocation44_spill] sm:$0xff] %v8828_v7  ;;  %v671_v46 = vor.u32 %v670_v12, %v667_v50  ;;  %v680_v38 = vrot.slane %v678_v18, 4  ;;  %v3380_v62 = vshll.u32 %v8820_v48, 16  ;;  %6827 = vmatprep.mubr.msk.bf16.mxu1 %vm738_vm4, %v8828_v7  ;;  %v3386_v22 = vshll.u32 %v8826_v4, 16 }
  0x97   : > { %v3375_v23 = vsel %vm8297_vm3, %v3370_v40, %v3374_v37  ;;  %v686_v36 = vrot.slane %v684_v3, 5  ;;  %v3390_v15 = vshrl.u32 %v8826_v4, 16  ;;  %v3379_v0 = vrot.slane %v3377_v25, 4  ;;  %v8857_v25 = vld [vmem:[%s8280_s6 + $0x4] sm:$0xf] }
  0x98   : > { %v8844_v59 = vcombine.low %v3365_v27, %v3375_v23  ;;  %v672_v51 = vrot.slane %v671_v46, 4  ;;  %v681_v50 = vor.u32 %v680_v38, %v676_v16  ;;  %v3382_v12 = vrot.slane %v3380_v62, 5  ;;  %v8854_v38 = vld [vmem:[%s8280_s6] sm:$0xf] }
  0x99   : > { %v3388_v18 = vrot.slane %v3386_v22, 5  ;;  %v3392_v6 = vrot.slane %v3390_v15, 4  ;;  %v3396_v7 = vshll.u32 %v8834_v13, 16  ;;  %v6072_v62 = vcombine.low %v8854_v38, %v8857_v25  ;;  %v8985_v13 = vld [vmem:[%s8285_s9 + $0x34] sm:$0xf] }
  0x9a   : > { %10488 = vst [vmem:[#allocation46_spill] sm:$0xff] %v8844_v59  ;;  %7133 = vmatprep.mubr.msk.bf16.mxu0 %vm738_vm4, %v8844_v59  ;;  %v677_v40 = vsel %vm8297_vm3, %v672_v51, %v676_v16  ;;  %v682_v37 = vrot.slane %v681_v50, 4  ;;  %v3383_v27 = vor.u32 %v3382_v12, %v3379_v0  ;;  %v8873_v51 = vld [vmem:[%s8285_s9 + $0x4] sm:$0xf]  ;;  %v8884_v12 = vld [vmem:[%s8280_s6 + $0xc] sm:$0xf] }
  0x9b   : > { %v3393_v3 = vor.u32 %v3392_v6, %v3388_v18  ;;  %v3398_v23 = vrot.slane %v3396_v7, 5 }
  0x9c   : > { %v687_v46 = vsel %vm8297_vm3, %v682_v37, %v686_v36  ;;  %v3384_v16 = vrot.slane %v3383_v27, 4  ;;  %v8870_v36 = vld [vmem:[%s8285_s9] sm:$0xf]  ;;  %v8894_v37 = vld [vmem:[%s8280_s6 + $0x18] sm:$0xf] }
  0x9d   : > { %v8861_v22 = vcombine.low %v677_v40, %v687_v46  ;;  %v3394_v15 = vrot.slane %v3393_v3, 4  ;;  %v6296_v50 = vcombine.low %v8870_v36, %v8873_v51  ;;  %v8897_v27 = vld [vmem:[%s8280_s6 + $0x1c] sm:$0xf]  ;;  %v8906_v46 = vld [vmem:[%s8285_s9 + $0xc] sm:$0xf] }
  0x9e   : > { %v3389_v6 = vsel %vm8297_vm3, %v3384_v16, %v3388_v18  ;;  %v8887_v18 = vld [vmem:[%s8280_s6 + $0x10] sm:$0xf]  ;;  %v8901_v3 = vcombine.low %v8894_v37, %v8897_v27 }
  0x9f   : > { %10489 = vst [vmem:[#allocation47_spill] sm:$0xff] %v8861_v22  ;;  %6828 = vmatmul.mubr.msk.bf16.gmra.mrb[28].mxu1 %vm738_vm4, %v8861_v22  ;;  %v3399_v7 = vsel %vm8297_vm3, %v3394_v15, %v3398_v23  ;;  %v8891_v40 = vcombine.low %v8884_v12, %v8887_v18  ;;  %v1474_v23 = vsel %vm787_vm0, %v8513_v53, 0  ;;  %v8918_v15 = vld [vmem:[%s10290_s2 + $0x6] sm:$0x3]  ;;  %v8923_v53 = vld [vmem:[%s8285_s9 + $0x18] sm:$0xf] }
  0xa0   : > { %v8877_v0 = vcombine.low %v3389_v6, %v3399_v7  ;;  %6833 = vmatprep.mubr.msk.bf16.mxu1 %vm738_vm4, %v6072_v62  ;;  %10492 = vst [vmem:[#allocation50_spill] sm:$0xff] %v8901_v3  ;;  %v8909_v62 = vld [vmem:[%s8285_s9 + $0x10] sm:$0xf]  ;;  %v8926_v6 = vld [vmem:[%s8285_s9 + $0x1c] sm:$0xf] }
  0xa1   : > { %10491 = vst [vmem:[#allocation49_spill] sm:$0xff] %v8891_v40  ;;  %v8913_v16 = vcombine.low %v8906_v46, %v8909_v62  ;;  %v8930_v7 = vcombine.low %v8923_v53, %v8926_v6  ;;  %v8961_v22 = vld [vmem:[%s8280_s6 + $0x34] sm:$0xf] }
  0xa2   : > { %10490 = vst [vmem:[#allocation48_spill] sm:$0xff] %v8877_v0  ;;  %7134 = vmatmul.mubr.msk.bf16.gmra.mrb[28].mxu0 %vm738_vm4, %v8877_v0  ;;  %v8941_v0 = vld [vmem:[%s10291_s3 + $0x6] sm:$0x3] }
  0xa3   : > { %7139 = vmatprep.mubr.msk.bf16.mxu0 %vm738_vm4, %v6296_v50  ;;  %10493 = vst [vmem:[#allocation51_spill] sm:$0xff] %v8913_v16  ;;  %10494 = vst [vmem:[#allocation52_spill] sm:$0xff] %v8930_v7  ;;  %v4181_v50 = vsel %vm787_vm0, %v8518_v54, 0  ;;  %v8948_v54 = vld [vmem:[%s8280_s6 + $0x24] sm:$0xf] }
  0xa4   : > { %10495 = vst [vmem:[#allocation53_spill] sm:$0xff] %v8941_v0 }
  0xa7   : > { %6834 = vmatmul.mubr.msk.bf16.vlgmr.msra.gmra.mrb[0].mxu1 %vm738_vm4, %v8891_v40  ;;  %v8982_v40 = vld [vmem:[%s8285_s9 + $0x30] sm:$0xf] }
  0xa8   : > { %6866 = vmatpush3.bf16.msra.mxu1 %v1474_v23  ;;  %6837 = vmatprep.mubr.msk.bf16.mxu1 %vm738_vm4, %v8901_v3  ;;  %v8951_v23 = vld [vmem:[%s8280_s6 + $0x28] sm:$0xf]  ;;  %v8965_v3 = vcombine.low %v8958_v31, %v8961_v22  ;;  %10499 = vst [vmem:[#allocation57_spill] sm:$0xff] %v8982_v40  ;;  %v8989_v31 = vcombine.low %v8982_v40, %v8985_v13 }
  0xa9   : > { %7956 = vmatprep.subr.msk.bf16.mxu1 %vm787_vm0, %v8918_v15  ;;  %v8955_v59 = vcombine.low %v8948_v54, %v8951_v23  ;;  %v9010_v40 = vcombine.low %v8397_v26, %v8402_v32  ;;  %v9030_v26 = vcombine.low %v8492_v20, %v8497_v29  ;;  %v9034_v32 = vcombine.low %v8471_v58, %v8476_v63 }
  0xaa   : > { %7140 = vmatmul.mubr.msk.bf16.vlgmr.msra.gmra.mrb[0].mxu0 %vm738_vm4, %v8913_v16  ;;  %10500 = vst [vmem:[#allocation58_spill] sm:$0xff] %v8989_v31  ;;  %v9078_v58 = vcombine.low %v8669_v56, %v8674_v8  ;;  %v9082_v63 = vcombine.low %v8644_v28, %v8650_v47  ;;  %v9088_v20 = vcombine.low %v8688_v9, %v8694_v1  ;;  %v1265_v29 = vrot.slane %v8857_v25, 5 }
  0xab   : > { %7172 = vmatpush3.bf16.msra.mxu0 %v4181_v50  ;;  %7143 = vmatprep.mubr.msk.bf16.mxu0 %vm738_vm4, %v8930_v7  ;;  %10496 = vst [vmem:[#allocation54_spill] sm:$0xff] %v8955_v59  ;;  %v8970_v50 = vld [vmem:[%s8285_s9 + $0x24] sm:$0xf]  ;;  %v8973_v7 = vld [vmem:[%s8285_s9 + $0x28] sm:$0xf]  ;;  %10504 = vst [vmem:[#allocation62_spill] sm:$0xff] %v9030_v26 }
  0xac   : > { %7965 = vmatprep.subr.msk.bf16.mxu0 %vm787_vm0, %v8941_v0  ;;  %10498 = vst [vmem:[#allocation56_spill] sm:$0xff] %v8970_v50  ;;  %v8977_v16 = vcombine.low %v8970_v50, %v8973_v7  ;;  %v8998_v0 = vld [vmem:[%s8280_s6 + $0x3c] sm:$0xf]  ;;  %v9006_v50 = vcombine.low %v8415_v45, %v8420_v52  ;;  %10505 = vst [vmem:[#allocation63_spill] sm:$0xff] %v9034_v32  ;;  %v9040_v45 = vcombine.low %v8507_v43, %v8524_v60 }
  0xad   : > { %v9050_v52 = vcombine.low %v8543_v19, %v8548_v34  ;;  %10512 = vst [vmem:[#allocation70_spill] sm:$0xff] %v9078_v58  ;;  %10513 = vst [vmem:[#allocation71_spill] sm:$0xff] %v9082_v63  ;;  %v9099_v43 = vcombine.low %v8712_v61, %v8717_v17  ;;  %v9103_v60 = vcombine.low %v8754_v21, %v8760_v49  ;;  %v3972_v19 = vrot.slane %v8873_v51, 5  ;;  %v8165_v34 = vld [vmem:[%s8280_s6 + $0x8] sm:$0x1]  ;;  %v10522_v51 = vld [vmem:[#allocation38_spill] sm:$0xff] }
  0xae   : > { %10501 = vst [vmem:[#allocation59_spill] sm:$0xff] %v9006_v50  ;;  %10506 = vst [vmem:[#allocation64_spill] sm:$0xff] %v9040_v45  ;;  %v1267_v25 = vrot.slane %v1265_v29, 4 }
  0xaf   : > { %6838 = vmatmul.mubr.msk.bf16.gmra.mrb[4].mxu1 %vm738_vm4, %v8955_v59  ;;  %v9002_v59 = vcombine.low %v8998_v0, %v8383_v11  ;;  %v9026_v11 = vcombine.low %v8452_v5, %v8457_v39  ;;  %10507 = vst [vmem:[#allocation65_spill] sm:$0xff] %v9050_v52  ;;  %v9064_v5 = vcombine.low %v8602_v30, %v8607_v41  ;;  %10514 = vst [vmem:[#allocation72_spill] sm:$0xff] %v9088_v20 }
  0xb0   : > { %6841 = vmatprep.mubr.msk.bf16.mxu1 %vm738_vm4, %v8965_v3  ;;  %v9074_v39 = vcombine.low %v8622_v24, %v8628_v35  ;;  %10515 = vst [vmem:[#allocation73_spill] sm:$0xff] %v9099_v43  ;;  %10516 = vst [vmem:[#allocation74_spill] sm:$0xff] %v9103_v60 }
  0xb1   : > { %10503 = vst [vmem:[#allocation61_spill] sm:$0xff] %v9026_v11  ;;  %10510 = vst [vmem:[#allocation68_spill] sm:$0xff] %v9064_v5 }
  0xb2   : > { %7144 = vmatmul.mubr.msk.bf16.gmra.mrb[4].mxu0 %vm738_vm4, %v8977_v16  ;;  %10511 = vst [vmem:[#allocation69_spill] sm:$0xff] %v9074_v39 }
  0xb3   : > { %7147 = vmatprep.mubr.msk.bf16.mxu0 %vm738_vm4, %v8989_v31  ;;  %v9016_v31 = vcombine.low %v8434_v2, %v8439_v10  ;;  %v9054_v2 = vcombine.low %v8579_v44, %v8585_v55  ;;  %v9058_v10 = vcombine.low %v8560_v57, %v8568_v14  ;;  %v1268_v57 = vrot.slane %v8165_v34, 5 }
  0xb4   : > { %v6104_v14 = vrot.slane %v8854_v38, 9  ;;  %v9121_v34 = vcombine.low %v10522_v51, %v8783_v42  ;;  %v8166_v38 = vld [vmem:[%s8285_s9 + $0x8] sm:$0x1] }
  0xb5   : > { %10502 = vst [vmem:[#allocation60_spill] sm:$0xff] %v9016_v31  ;;  %10508 = vst [vmem:[#allocation66_spill] sm:$0xff] %v9054_v2 }
  0xb6   : > { %10509 = vst [vmem:[#allocation67_spill] sm:$0xff] %v9058_v10 }
  0xb7   : > { %6842 = vmatmul.mubr.msk.bf16.gmra.mrb[8].mxu1 %vm738_vm4, %v9002_v59 }
  0xb8   : > { %6845 = vmatprep.mubr.msk.bf16.mxu1 %vm738_vm4, %v9006_v50  ;;  %v9153_v50 = vcombine.low %v8820_v48, %v8826_v4 }
  0xba   : > { %7148 = vmatmul.mubr.msk.bf16.gmra.mrb[8].mxu0 %vm738_vm4, %v9010_v40 }
  0xbb   : > { %7151 = vmatprep.mubr.msk.bf16.mxu0 %vm738_vm4, %v9016_v31  ;;  %v8169_v31 = vld [vmem:[%s8285_s9 + $0x14] sm:$0x1] }
  0xbf   : > { %6846 = vmatmul.mubr.msk.bf16.gmra.mrb[12].mxu1 %vm738_vm4, %v9026_v11  ;;  %v3982_v11 = vrot.slane %v8169_v31, 5  ;;  %v6330_v31 = vrot.slane %v8923_v53, 9 }
  0xc0   : > { %6849 = vmatprep.mubr.msk.bf16.mxu1 %vm738_vm4, %v9030_v26  ;;  %v8167_v26 = vld [vmem:[%s8280_s6 + $0x14] sm:$0x1] }
  0xc2   : > { %7152 = vmatmul.mubr.msk.bf16.gmra.mrb[12].mxu0 %vm738_vm4, %v9034_v32  ;;  %v8168_v32 = vld [vmem:[%s8280_s6 + $0x20] sm:$0x1] }
  0xc3   : > { %7155 = vmatprep.mubr.msk.bf16.mxu0 %vm738_vm4, %v9040_v45  ;;  %v3974_v45 = vrot.slane %v3972_v19, 4 }
  0xc7   : > { %6850 = vmatmul.mubr.msk.bf16.gmra.mrb[16].mxu1 %vm738_vm4, %v9050_v52  ;;  %v1266_v52 = vsel %vm9112_vm7, %v6104_v14, %v1265_v29  ;;  %v10524_v29 = vld [vmem:[#allocation41_spill] sm:$0xff] }
  0xc8   : > { %6853 = vmatprep.mubr.msk.bf16.mxu1 %vm738_vm4, %v9054_v2  ;;  %v3975_v2 = vrot.slane %v8166_v38, 5  ;;  %v6105_v38 = vrot.slane %v8884_v12, 9  ;;  %v9141_v14 = vcombine.low %v10524_v29, %v8804_v33  ;;  %v3986_v12 = vrot.slane %v8926_v6, 5  ;;  %10526 = vst [vmem:[#allocation41_spill] sm:$0xff] %v9153_v50 }
  0xca   : > { %7156 = vmatmul.mubr.msk.bf16.gmra.mrb[16].mxu0 %vm738_vm4, %v9058_v10  ;;  %v6328_v10 = vrot.slane %v8870_v36, 9  ;;  %v3979_v36 = vrot.slane %v8909_v62, 5  ;;  %10525 = vst [vmem:[#allocation38_spill] sm:$0xff] %v9141_v14 }
  0xcb   : > { %7159 = vmatprep.mubr.msk.bf16.mxu0 %vm738_vm4, %v9064_v5 }
  0xcf   : > { %6854 = vmatmul.mubr.msk.bf16.gmra.mrb[20].mxu1 %vm738_vm4, %v9074_v39  ;;  %v1272_v39 = vrot.slane %v8887_v18, 5  ;;  %v1269_v18 = vsel %vm9112_vm7, %v1267_v25, %v1268_v57 }
  0xd0   : > { %6857 = vmatprep.mubr.msk.bf16.mxu1 %vm738_vm4, %v9078_v58  ;;  %v10517_v58 = vld [vmem:[#allocation34_spill] sm:$0xff]  ;;  %v6121_v25 = vcombine.low %v1266_v52, %v1269_v18  ;;  %v1293_v18 = vrot.slane %v8961_v22, 5 }
  0xd1   : > { %v1274_v57 = vrot.slane %v1272_v39, 4  ;;  %v1273_v52 = vsel %vm9112_vm7, %v6105_v38, %v1272_v39 }
  0xd2   : > { %7160 = vmatmul.mubr.msk.bf16.gmra.mrb[20].mxu0 %vm738_vm4, %v9082_v63  ;;  %v10518_v63 = vld [vmem:[#allocation32_spill] sm:$0xff] }
  0xd3   : > { %7163 = vmatprep.mubr.msk.bf16.mxu0 %vm738_vm4, %v9088_v20  ;;  %v9110_v20 = vcombine.low %v10518_v63, %v10517_v58  ;;  %10523 = vst [vmem:[#allocation32_spill] sm:$0xff] %v9121_v34 }
  0xd5   : > { %10519 = vst [vmem:[#allocation34_spill] sm:$0xff] %v9110_v20 }
  0xd7   : > { %6858 = vmatmul.mubr.msk.bf16.gmra.mrb[24].mxu1 %vm738_vm4, %v9099_v43  ;;  %v1279_v43 = vrot.slane %v8897_v27, 5  ;;  %v3973_v27 = vsel %vm9112_vm7, %v6328_v10, %v3972_v19  ;;  %v6329_v10 = vrot.slane %v8906_v46, 9  ;;  %v8170_v19 = vld [vmem:[%s8285_s9 + $0x20] sm:$0x1] }
  0xd8   : > { %6861 = vmatprep.mubr.msk.bf16.mxu1 %vm738_vm4, %v9103_v60  ;;  %v1275_v60 = vrot.slane %v8167_v26, 5  ;;  %v6106_v26 = vrot.slane %v8894_v37, 9  ;;  %v3989_v39 = vrot.slane %v8170_v19, 5 }
  0xd9   : > { %v1281_v62 = vrot.slane %v1279_v43, 4  ;;  %v3980_v53 = vsel %vm9112_vm7, %v6329_v10, %v3979_v36  ;;  %v8172_v10 = vld [vmem:[%s8280_s6 + $0x38] sm:$0x1] }
  0xda   : > { %7164 = vmatmul.mubr.msk.bf16.gmra.mrb[24].mxu0 %vm738_vm4, %v9110_v20  ;;  %v3976_v20 = vsel %vm9112_vm7, %v3974_v45, %v3975_v2  ;;  %v1276_v37 = vsel %vm9112_vm7, %v1274_v57, %v1275_v60  ;;  %v3981_v45 = vrot.slane %v3979_v36, 4  ;;  %v3988_v2 = vrot.slane %v3986_v12, 4 }
  0xdb   : > { %7167 = vmatprep.mubr.msk.bf16.mxu0 %vm738_vm4, %v9121_v34  ;;  %v1282_v34 = vrot.slane %v8168_v32, 5  ;;  %v6345_v6 = vcombine.low %v3973_v27, %v3976_v20  ;;  %v1286_v32 = vrot.slane %v8951_v23, 5  ;;  %v1280_v46 = vsel %vm9112_vm7, %v6106_v26, %v1279_v43  ;;  %v10527_v26 = vld [vmem:[#allocation55_spill] sm:$0xff] }
  0xdc   : > { %v9173_v23 = vcombine.low %v1273_v52, %v1276_v37  ;;  %v6107_v60 = vrot.slane %v8948_v54, 9  ;;  %v3983_v43 = vsel %vm9112_vm7, %v3981_v45, %v3982_v11  ;;  %v3993_v57 = vrot.slane %v8973_v7, 5 }
  0xdd   : > { %v1283_v20 = vsel %vm9112_vm7, %v1281_v62, %v1282_v34  ;;  %v1288_v38 = vrot.slane %v1286_v32, 4  ;;  %v8171_v34 = vld [vmem:[%s8280_s6 + $0x2c] sm:$0x1]  ;;  %v3987_v27 = vsel %vm9112_vm7, %v6330_v31, %v3986_v12  ;;  %v3990_v36 = vsel %vm9112_vm7, %v3988_v2, %v3989_v39  ;;  %v10528_v12 = vld [vmem:[#allocation56_spill] sm:$0xff]  ;;  %v8174_v39 = vld [vmem:[%s8280_s6 + $0x40] sm:$0xf] }
  0xde   : > { %v1289_v22 = vrot.slane %v8171_v34, 5  ;;  %v4000_v54 = vrot.slane %v8985_v13, 5  ;;  %v1680_v11 = vsel %vm787_vm0, %v8918_v15, 0  ;;  %v6108_v62 = vrot.slane %v10527_v26, 9  ;;  %v8173_v31 = vld [vmem:[%s8285_s9 + $0x2c] sm:$0x1] }
  0xdf   : > { %6862 = vmatmul.mubr.msk.bf16.gmra.mrb[28].mxu1 %vm738_vm4, %v9141_v14  ;;  %v1295_v52 = vrot.slane %v1293_v18, 4  ;;  %v9194_v7 = vcombine.low %v3980_v53, %v3983_v43  ;;  %v1287_v37 = vsel %vm9112_vm7, %v6107_v60, %v1286_v32  ;;  %v6331_v45 = vrot.slane %v10528_v12, 9  ;;  %v9203_v13 = vld [vmem:[%s10290_s2 + $0x8] sm:$0x3]  ;;  %v10531_v60 = vld [vmem:[#allocation57_spill] sm:$0xff] }
  0xe0   : > { %6867 = vmatprep.mubr.msk.bf16.mxu1 %vm738_vm4, %v6121_v25  ;;  %v9183_v25 = vcombine.low %v1280_v46, %v1283_v20  ;;  %v3996_v2 = vrot.slane %v8173_v31, 5  ;;  %v9207_v15 = vcombine.low %v3987_v27, %v3990_v36  ;;  %v1290_v19 = vsel %vm9112_vm7, %v1288_v38, %v1289_v22  ;;  %v10530_v20 = vld [vmem:[#allocation53_spill] sm:$0xff]  ;;  %v8176_v22 = vld [vmem:[%s8280_s6 + $0x4c] sm:$0xf]  ;;  %v8177_v31 = vld [vmem:[%s8280_s6 + $0x44] sm:$0x1] }
  0xe1   : > { %v3995_v32 = vrot.slane %v3993_v57, 4  ;;  %v1300_v46 = vrot.slane %v8174_v39, 5  ;;  %v4387_v53 = vsel %vm787_vm0, %v10530_v20, 0  ;;  %v6332_v43 = vrot.slane %v10531_v60, 9  ;;  %v8175_v26 = vld [vmem:[%s8285_s9 + $0x38] sm:$0x1] }
  0xe2   : > { %7168 = vmatmul.mubr.msk.bf16.gmra.mrb[28].mxu0 %vm738_vm4, %v9153_v50  ;;  %10529 = vst [vmem:[#allocation55_spill] sm:$0xff] %v9207_v15  ;;  %v4002_v34 = vrot.slane %v4000_v54, 4  ;;  %v4003_v27 = vrot.slane %v8175_v26, 5  ;;  %v1294_v36 = vsel %vm9112_vm7, %v6108_v62, %v1293_v18  ;;  %v9232_v12 = vcombine.low %v1287_v37, %v1290_v19  ;;  %v8178_v37 = vld [vmem:[%s8285_s9 + $0x40] sm:$0xf] }
  0xe3   : > { %7173 = vmatprep.mubr.msk.bf16.mxu0 %vm738_vm4, %v6345_v6  ;;  %v1296_v6 = vrot.slane %v8172_v10, 5  ;;  %v9228_v10 = vld [vmem:[%s10291_s3 + $0x8] sm:$0x3]  ;;  %v3994_v18 = vsel %vm9112_vm7, %v6331_v45, %v3993_v57  ;;  %v6109_v62 = vrot.slane %v8998_v0, 9  ;;  %v1303_v39 = vrot.slane %v8177_v31, 5 }
  0xe4   : > { %v4007_v19 = vrot.slane %v8178_v37, 5  ;;  %v4001_v0 = vsel %vm9112_vm7, %v6332_v43, %v4000_v54  ;;  %v4004_v57 = vsel %vm9112_vm7, %v4002_v34, %v4003_v27  ;;  %v8179_v45 = vld [vmem:[%s8285_s9 + $0x4c] sm:$0xf]  ;;  %v8181_v26 = vld [vmem:[%s8280_s6 + $0x50] sm:$0x1] }
  0xe5   : > { %v1297_v38 = vsel %vm9112_vm7, %v1295_v52, %v1296_v6  ;;  %v3997_v52 = vsel %vm9112_vm7, %v3995_v32, %v3996_v2  ;;  %v1302_v6 = vrot.slane %v1300_v46, 4  ;;  %v8180_v2 = vld [vmem:[%s8280_s6 + $0x48] sm:$0xf]  ;;  %v1301_v54 = vsel %vm9112_vm7, %v6109_v62, %v1300_v46  ;;  %v8182_v43 = vld [vmem:[%s8285_s9 + $0x3c] sm:$0xf] }
  0xe6   : > { %v9243_v20 = vcombine.low %v1294_v36, %v1297_v38  ;;  %v6110_v32 = vrot.slane %v8180_v2, 9  ;;  %v9254_v36 = vcombine.low %v3994_v18, %v3997_v52  ;;  %v6333_v34 = vrot.slane %v8182_v43, 9  ;;  %v8183_v27 = vld [vmem:[%s8285_s9 + $0x44] sm:$0x1]  ;;  %v8184_v18 = vld [vmem:[%s8280_s6 + $0x58] sm:$0xf] }
  0xe7   : > { %6868 = vmatmul.mubr.msk.bf16.vlgmr.msra.gmra.mrb[0].mxu1 %vm738_vm4, %v9173_v23  ;;  %v4010_v38 = vrot.slane %v8183_v27, 5  ;;  %v9262_v31 = vcombine.low %v4001_v0, %v4004_v57  ;;  %v1304_v37 = vsel %vm9112_vm7, %v1302_v6, %v1303_v39  ;;  %v1314_v52 = vrot.slane %v8184_v18, 5  ;;  %v8185_v46 = vld [vmem:[%s8285_s9 + $0x48] sm:$0xf]  ;;  %v8187_v39 = vld [vmem:[%s8280_s6 + $0x64] sm:$0xf] }
  0xe8   : > { %6900 = vmatpush3.bf16.msra.mxu1 %v1680_v11  ;;  %6871 = vmatprep.mubr.msk.bf16.mxu1 %vm738_vm4, %v9183_v25  ;;  %v1307_v11 = vrot.slane %v8176_v22, 5  ;;  %10532 = vst [vmem:[#allocation56_spill] sm:$0xff] %v9243_v20  ;;  %v1310_v22 = vrot.slane %v8181_v26, 5  ;;  %10533 = vst [vmem:[#allocation53_spill] sm:$0xff] %v9254_v36  ;;  %v6334_v62 = vrot.slane %v8185_v46, 9  ;;  %v1321_v57 = vrot.slane %v8187_v39, 5 }
  0xe9   : > { %7957 = vmatprep.subr.msk.bf16.mxu1 %vm787_vm0, %v9203_v13  ;;  %10534 = vst [vmem:[#allocation57_spill] sm:$0xff] %v9262_v31  ;;  %v8186_v26 = vld [vmem:[%s8285_s9 + $0x50] sm:$0x1]  ;;  %v9278_v27 = vcombine.low %v1301_v54, %v1304_v37  ;;  %v4008_v18 = vsel %vm9112_vm7, %v6333_v34, %v4007_v19  ;;  %v8188_v46 = vld [vmem:[%s8280_s6 + $0x54] sm:$0xf] }
  0xea   : > { %7174 = vmatmul.mubr.msk.bf16.vlgmr.msra.gmra.mrb[0].mxu0 %vm738_vm4, %v9194_v7  ;;  %v1309_v60 = vrot.slane %v1307_v11, 4  ;;  %v4017_v43 = vrot.slane %v8186_v26, 5  ;;  %v1308_v0 = vsel %vm9112_vm7, %v6110_v32, %v1307_v11  ;;  %v6111_v26 = vrot.slane %v8188_v46, 9  ;;  %v8190_v39 = vld [vmem:[%s8285_s9 + $0x58] sm:$0xf] }
  0xeb   : > { %7206 = vmatpush3.bf16.msra.mxu0 %v4387_v53  ;;  %7177 = vmatprep.mubr.msk.bf16.mxu0 %vm738_vm4, %v9207_v15  ;;  %v4014_v53 = vrot.slane %v8179_v45, 5  ;;  %v4009_v45 = vrot.slane %v4007_v19, 4  ;;  %v1316_v32 = vrot.slane %v1314_v52, 4  ;;  %v4021_v54 = vrot.slane %v8190_v39, 5  ;;  %v8191_v46 = vld [vmem:[%s8285_s9 + $0x64] sm:$0xf] }
  0xec   : > { %7966 = vmatprep.subr.msk.bf16.mxu0 %vm787_vm0, %v9228_v10  ;;  %v1311_v6 = vsel %vm9112_vm7, %v1309_v60, %v1310_v22  ;;  %v8189_v60 = vld [vmem:[%s8280_s6 + $0x5c] sm:$0x1] }
  0xed   : > { %v4016_v2 = vrot.slane %v4014_v53, 4  ;;  %v4011_v11 = vsel %vm9112_vm7, %v4009_v45, %v4010_v38  ;;  %v1317_v22 = vrot.slane %v8189_v60, 5  ;;  %v9289_v37 = vcombine.low %v1308_v0, %v1311_v6  ;;  %v8194_v6 = vld [vmem:[%s8285_s9 + $0x54] sm:$0xf] }
  0xee   : > { %v4015_v19 = vsel %vm9112_vm7, %v6334_v62, %v4014_v53  ;;  %v1323_v45 = vrot.slane %v1321_v57, 4  ;;  %v9298_v15 = vcombine.low %v4008_v18, %v4011_v11  ;;  %v1315_v0 = vsel %vm9112_vm7, %v6111_v26, %v1314_v52  ;;  %v8195_v62 = vld [vmem:[%s8285_s9 + $0x5c] sm:$0x1]  ;;  %v8197_v52 = vld [vmem:[%s8285_s9 + $0x60] sm:$0xf] }
  0xef   : > { %6872 = vmatmul.mubr.msk.bf16.gmra.mrb[4].mxu1 %vm738_vm4, %v9232_v12  ;;  %10535 = vst [vmem:[#allocation75_spill] sm:$0xff] %v9289_v37  ;;  %v4018_v34 = vsel %vm9112_vm7, %v4016_v2, %v4017_v43  ;;  %v6335_v53 = vrot.slane %v8194_v6, 9  ;;  %v4024_v39 = vrot.slane %v8195_v62, 5  ;;  %v8196_v43 = vld [vmem:[%s8280_s6 + $0x70] sm:$0xf]  ;;  %v6336_v26 = vrot.slane %v8197_v52, 9 }
  0xf0   : > { %6875 = vmatprep.mubr.msk.bf16.mxu1 %vm738_vm4, %v9243_v20  ;;  %v8192_v20 = vld [vmem:[%s8280_s6 + $0x60] sm:$0xf]  ;;  %10536 = vst [vmem:[#allocation76_spill] sm:$0xff] %v9298_v15  ;;  %v9306_v2 = vcombine.low %v4015_v19, %v4018_v34  ;;  %v1328_v18 = vrot.slane %v8196_v43, 5  ;;  %v8199_v43 = vld [vmem:[%s8280_s6 + $0x6c] sm:$0xf] }
  0xf1   : > { %v6112_v38 = vrot.slane %v8192_v20, 9  ;;  %v1318_v20 = vsel %vm9112_vm7, %v1316_v32, %v1317_v22  ;;  %v1335_v22 = vrot.slane %v8585_v55, 5  ;;  %v4022_v62 = vsel %vm9112_vm7, %v6335_v53, %v4021_v54  ;;  %v8200_v55 = vld [vmem:[%s8280_s6 + $0x74] sm:$0x1] }
  0xf2   : > { %7178 = vmatmul.mubr.msk.bf16.gmra.mrb[4].mxu0 %vm738_vm4, %v9254_v36  ;;  %v8193_v36 = vld [vmem:[%s8280_s6 + $0x68] sm:$0x1]  ;;  %10537 = vst [vmem:[#allocation77_spill] sm:$0xff] %v9306_v2  ;;  %v9322_v34 = vcombine.low %v1315_v0, %v1318_v20  ;;  %v6113_v52 = vrot.slane %v8199_v43, 9  ;;  %v4042_v20 = vrot.slane %v8607_v41, 5  ;;  %v6114_v43 = vrot.slane %v8579_v44, 9 }
  0xf3   : > { %7181 = vmatprep.mubr.msk.bf16.mxu0 %vm738_vm4, %v9262_v31  ;;  %v4028_v31 = vrot.slane %v8191_v46, 5  ;;  %v1324_v60 = vrot.slane %v8193_v36, 5  ;;  %v4023_v36 = vrot.slane %v4021_v54, 4  ;;  %v8198_v46 = vld [vmem:[%s8285_s9 + $0x68] sm:$0x1]  ;;  %v1322_v19 = vsel %vm9112_vm7, %v6112_v38, %v1321_v57 }
  0xf4   : > { %v4031_v6 = vrot.slane %v8198_v46, 5  ;;  %v1330_v38 = vrot.slane %v1328_v18, 4 }
  0xf5   : > { %v4030_v11 = vrot.slane %v4028_v31, 4  ;;  %v1325_v32 = vsel %vm9112_vm7, %v1323_v45, %v1324_v60  ;;  %v4025_v57 = vsel %vm9112_vm7, %v4023_v36, %v4024_v39  ;;  %v1331_v45 = vrot.slane %v8200_v55, 5  ;;  %v8201_v60 = vld [vmem:[%s8285_s9 + $0x70] sm:$0xf]  ;;  %v10538_v39 = vld [vmem:[#allocation19_spill] sm:$0xff] }
  0xf6   : > { %v4035_v46 = vrot.slane %v8201_v60, 5  ;;  %v9333_v0 = vcombine.low %v1322_v19, %v1325_v32  ;;  %v4029_v54 = vsel %vm9112_vm7, %v6336_v26, %v4028_v31  ;;  %v1338_v36 = vrot.slane %v10538_v39, 5  ;;  %v8202_v19 = vld [vmem:[%s8285_s9 + $0x6c] sm:$0xf]  ;;  %v8203_v60 = vld [vmem:[%s8285_s9 + $0x74] sm:$0x1] }
  0xf7   : > { %6876 = vmatmul.mubr.msk.bf16.gmra.mrb[8].mxu1 %vm738_vm4, %v9278_v27  ;;  %v4032_v53 = vsel %vm9112_vm7, %v4030_v11, %v4031_v6  ;;  %v1329_v55 = vsel %vm9112_vm7, %v6113_v52, %v1328_v18  ;;  %v6337_v32 = vrot.slane %v8202_v19, 9  ;;  %v1332_v44 = vsel %vm9112_vm7, %v1330_v38, %v1331_v45  ;;  %v10539_v6 = vld [vmem:[#allocation21_spill] sm:$0xff]  ;;  %v10541_v19 = vld [vmem:[#allocation27_spill] sm:$0xff] }
  0xf8   : > { %6879 = vmatprep.mubr.msk.bf16.mxu1 %vm738_vm4, %v9289_v37  ;;  %v9342_v37 = vcombine.low %v4022_v62, %v4025_v57  ;;  %v9350_v31 = vcombine.low %v4029_v54, %v4032_v53  ;;  %v4037_v41 = vrot.slane %v4035_v46, 4  ;;  %v1342_v26 = vrot.slane %v8628_v35, 5 }
  0xf9   : > { %v6338_v18 = vrot.slane %v8602_v30, 9  ;;  %v4044_v11 = vrot.slane %v4042_v20, 4  ;;  %v4045_v62 = vrot.slane %v10539_v6, 5  ;;  %v1336_v52 = vsel %vm9112_vm7, %v6114_v43, %v1335_v22 }
  0xfa   : > { %7182 = vmatmul.mubr.msk.bf16.gmra.mrb[8].mxu0 %vm738_vm4, %v9298_v15  ;;  %v4038_v15 = vrot.slane %v8203_v60, 5  ;;  %v1349_v54 = vrot.slane %v8674_v8, 5  ;;  %v9366_v35 = vcombine.low %v1329_v55, %v1332_v44  ;;  %v4036_v38 = vsel %vm9112_vm7, %v6337_v32, %v4035_v46  ;;  %v10542_v44 = vld [vmem:[#allocation25_spill] sm:$0xff] }
  0xfb   : > { %7185 = vmatprep.mubr.msk.bf16.mxu0 %vm738_vm4, %v9306_v2  ;;  %v1337_v2 = vrot.slane %v1335_v22, 4  ;;  %v6115_v30 = vrot.slane %v8622_v24, 9  ;;  %v1344_v45 = vrot.slane %v1342_v26, 4  ;;  %v4049_v8 = vrot.slane %v8650_v47, 5 }
  0xfc   : > { %v4039_v22 = vsel %vm9112_vm7, %v4037_v41, %v4038_v15  ;;  %v4043_v39 = vsel %vm9112_vm7, %v6338_v18, %v4042_v20  ;;  %v4046_v46 = vsel %vm9112_vm7, %v4044_v11, %v4045_v62  ;;  %v4056_v24 = vrot.slane %v8694_v1, 5 }
  0xfd   : > { %v1339_v57 = vsel %vm9112_vm7, %v1337_v2, %v1338_v36  ;;  %v10540_v2 = vld [vmem:[#allocation23_spill] sm:$0xff]  ;;  %v6116_v36 = vrot.slane %v8669_v56, 9  ;;  %v1351_v55 = vrot.slane %v1349_v54, 4  ;;  %v1352_v15 = vrot.slane %v10541_v19, 5 }
  0xfe   : > { %v1345_v53 = vrot.slane %v10540_v2, 5  ;;  %v9377_v43 = vcombine.low %v1336_v52, %v1339_v57  ;;  %v9386_v32 = vcombine.low %v4036_v38, %v4039_v22  ;;  %v1343_v47 = vsel %vm9112_vm7, %v6115_v30, %v1342_v26  ;;  %v10544_v22 = vld [vmem:[#allocation31_spill] sm:$0xff] }
  0xff   : > { %6880 = vmatmul.mubr.msk.bf16.gmra.mrb[12].mxu1 %vm738_vm4, %v9322_v34  ;;  %v6339_v60 = vrot.slane %v8644_v28, 9  ;;  %v4052_v41 = vrot.slane %v10542_v44, 5  ;;  %v9394_v20 = vcombine.low %v4043_v39, %v4046_v46  ;;  %v4051_v1 = vrot.slane %v4049_v8, 4  ;;  %v10543_v28 = vld [vmem:[#allocation29_spill] sm:$0xff] }
 0x100   : > { %6883 = vmatprep.mubr.msk.bf16.mxu1 %vm738_vm4, %v9333_v0  ;;  %v1346_v56 = vsel %vm9112_vm7, %v1344_v45, %v1345_v53  ;;  %v1356_v18 = vrot.slane %v8717_v17, 5  ;;  %v6340_v26 = vrot.slane %v8688_v9, 9  ;;  %v4058_v11 = vrot.slane %v4056_v24, 4 }
 0x101   : > { %v4059_v6 = vrot.slane %v10543_v28, 5  ;;  %v1350_v62 = vsel %vm9112_vm7, %v6116_v36, %v1349_v54  ;;  %v1353_v52 = vsel %vm9112_vm7, %v1351_v55, %v1352_v15  ;;  %v1363_v57 = vrot.slane %v8760_v49, 5  ;;  %v10545_v36 = vld [vmem:[#allocation37_spill] sm:$0xff] }
 0x102   : > { %7186 = vmatmul.mubr.msk.bf16.gmra.mrb[12].mxu0 %vm738_vm4, %v9342_v37  ;;  %v9410_v17 = vcombine.low %v1343_v47, %v1346_v56  ;;  %v4050_v38 = vsel %vm9112_vm7, %v6339_v60, %v4049_v8  ;;  %v6117_v9 = vrot.slane %v8712_v61, 9  ;;  %v4053_v54 = vsel %vm9112_vm7, %v4051_v1, %v4052_v41  ;;  %v10547_v56 = vld [vmem:[#allocation40_spill] sm:$0xff] }
 0x103   : > { %7189 = vmatprep.mubr.msk.bf16.mxu0 %vm738_vm4, %v9350_v31  ;;  %v1358_v30 = vrot.slane %v1356_v18, 4  ;;  %v1359_v45 = vrot.slane %v10544_v22, 5  ;;  %v4063_v49 = vrot.slane %v10517_v58, 5  ;;  %v9421_v2 = vcombine.low %v1350_v62, %v1353_v52 }
 0x104   : > { %v4057_v53 = vsel %vm9112_vm7, %v6340_v26, %v4056_v24  ;;  %v4060_v8 = vsel %vm9112_vm7, %v4058_v11, %v4059_v6  ;;  %v4070_v61 = vrot.slane %v8783_v42, 5  ;;  %v6118_v39 = vrot.slane %v8754_v21, 9  ;;  %v10546_v21 = vld [vmem:[#allocation35_spill] sm:$0xff] }
 0x105   : > { %v1365_v46 = vrot.slane %v1363_v57, 4  ;;  %v1366_v55 = vrot.slane %v10545_v36, 5  ;;  %v9430_v19 = vcombine.low %v4050_v38, %v4053_v54  ;;  %v1357_v58 = vsel %vm9112_vm7, %v6117_v9, %v1356_v18  ;;  %v10548_v6 = vld [vmem:[#allocation43_spill] sm:$0xff]  ;;  %v10550_v36 = vld [vmem:[#allocation49_spill] sm:$0xff] }
 0x106   : > { %v6341_v15 = vrot.slane %v10518_v63, 9  ;;  %v9437_v24 = vcombine.low %v4057_v53, %v4060_v8  ;;  %v1360_v42 = vsel %vm9112_vm7, %v1358_v30, %v1359_v45  ;;  %v4065_v47 = vrot.slane %v4063_v49, 4 }
 0x107   : > { %6884 = vmatmul.mubr.msk.bf16.gmra.mrb[16].mxu1 %vm738_vm4, %v9366_v35  ;;  %v4066_v60 = vrot.slane %v10546_v21, 5  ;;  %v6342_v44 = vrot.slane %v10522_v51, 9  ;;  %v4072_v41 = vrot.slane %v4070_v61, 4  ;;  %v4073_v1 = vrot.slane %v10547_v56, 5  ;;  %v10553_v21 = vld [vmem:[#allocation54_spill] sm:$0xff]  ;;  %v10558_v56 = vld [vmem:[#allocation60_spill] sm:$0xff] }
 0x108   : > { %6887 = vmatprep.mubr.msk.bf16.mxu1 %vm738_vm4, %v9377_v43  ;;  %v1370_v63 = vrot.slane %v8804_v33, 5  ;;  %v1364_v18 = vsel %vm9112_vm7, %v6118_v39, %v1363_v57  ;;  %v1367_v26 = vsel %vm9112_vm7, %v1365_v46, %v1366_v55  ;;  %v9453_v11 = vcombine.low %v1357_v58, %v1360_v42  ;;  %v10551_v55 = vld [vmem:[#allocation51_spill] sm:$0xff]  ;;  %v10552_v42 = vld [vmem:[#allocation50_spill] sm:$0xff] }
 0x109   : > { %v4064_v28 = vsel %vm9112_vm7, %v6341_v15, %v4063_v49  ;;  %v4067_v33 = vsel %vm9112_vm7, %v4065_v47, %v4066_v60  ;;  %v6119_v51 = vrot.slane %v10524_v29, 9  ;;  %v1373_v62 = vrot.slane %v10548_v6, 5  ;;  %v6190_v15 = vld [vmem:[%s10290_s2 + $0xa] sm:$0x3]  ;;  %v10554_v60 = vld [vmem:[#allocation52_spill] sm:$0xff] }
 0x10a   : > { %7190 = vmatmul.mubr.msk.bf16.gmra.mrb[16].mxu0 %vm738_vm4, %v9386_v32  ;;  %v4077_v52 = vrot.slane %v8826_v4, 5  ;;  %v9464_v57 = vcombine.low %v1364_v18, %v1367_v26  ;;  %v4071_v38 = vsel %vm9112_vm7, %v6342_v44, %v4070_v61  ;;  %v4074_v9 = vsel %vm9112_vm7, %v4072_v41, %v4073_v1  ;;  %v10549_v4 = vld [vmem:[#allocation45_spill] sm:$0xff]  ;;  %v10556_v44 = vld [vmem:[#allocation59_spill] sm:$0xff]  ;;  %v10562_v26 = vld [vmem:[#allocation64_spill] sm:$0xff] }
 0x10b   : > { %7193 = vmatprep.mubr.msk.bf16.mxu0 %vm738_vm4, %v9394_v20  ;;  %v1372_v54 = vrot.slane %v1370_v63, 4  ;;  %v9470_v30 = vcombine.low %v4064_v28, %v4067_v33  ;;  %v9474_v22 = vcombine.low %v4071_v38, %v4074_v9  ;;  %v6343_v29 = vrot.slane %v8820_v48, 9  ;;  %v10557_v41 = vld [vmem:[#allocation61_spill] sm:$0xff]  ;;  %v10559_v1 = vld [vmem:[#allocation63_spill] sm:$0xff]  ;;  %v10564_v33 = vld [vmem:[#allocation66_spill] sm:$0xff] }
 0x10c   : > { %v4079_v45 = vrot.slane %v4077_v52, 4  ;;  %v4080_v49 = vrot.slane %v10549_v4, 5  ;;  %v1371_v53 = vsel %vm9112_vm7, %v6119_v51, %v1370_v63  ;;  %v1908_v58 = vsel %vm787_vm0, %v9203_v13, 0  ;;  %v6414_v13 = vld [vmem:[%s10291_s3 + $0xa] sm:$0x3]  ;;  %v10560_v63 = vld [vmem:[#allocation62_spill] sm:$0xff] }
 0x10d   : > { %v1374_v8 = vsel %vm9112_vm7, %v1372_v54, %v1373_v62  ;;  %v4078_v48 = vsel %vm9112_vm7, %v6343_v29, %v4077_v52  ;;  %v4615_v47 = vsel %vm787_vm0, %v9228_v10, 0  ;;  %v10555_v10 = vld [vmem:[#allocation58_spill] sm:$0xff]  ;;  %v10561_v18 = vld [vmem:[#allocation65_spill] sm:$0xff]  ;;  %v10563_v28 = vld [vmem:[#allocation67_spill] sm:$0xff] }
 0x10e   : > { %v9488_v61 = vcombine.low %v1371_v53, %v1374_v8  ;;  %v4081_v39 = vsel %vm9112_vm7, %v4079_v45, %v4080_v49  ;;  %v10565_v51 = vld [vmem:[#allocation69_spill] sm:$0xff]  ;;  %v10566_v6 = vld [vmem:[#allocation68_spill] sm:$0xff]  ;;  %v10567_v62 = vld [vmem:[#allocation71_spill] sm:$0xff] }
 0x10f   : > { %6888 = vmatmul.mubr.msk.bf16.gmra.mrb[20].mxu1 %vm738_vm4, %v9410_v17  ;;  %v9494_v46 = vcombine.low %v4078_v48, %v4081_v39  ;;  %v10568_v52 = vld [vmem:[#allocation70_spill] sm:$0xff]  ;;  %v10569_v38 = vld [vmem:[#allocation73_spill] sm:$0xff]  ;;  %v10570_v9 = vld [vmem:[#allocation72_spill] sm:$0xff] }
 0x110   : > { %6891 = vmatprep.mubr.msk.bf16.mxu1 %vm738_vm4, %v9421_v2  ;;  %v10571_v54 = vld [vmem:[#allocation34_spill] sm:$0xff]  ;;  %v10573_v49 = vld [vmem:[#allocation32_spill] sm:$0xff] }
 0x111   : > { %v10572_v29 = vld [vmem:[#allocation74_spill] sm:$0xff] }
 0x112   : > { %7194 = vmatmul.mubr.msk.bf16.gmra.mrb[20].mxu0 %vm738_vm4, %v9430_v19  ;;  %v9569_v45 = vld [vmem:[%s8280_s6 + $0xc0] sm:$0xf]  ;;  %v9572_v4 = vld [vmem:[%s8280_s6 + $0xc4] sm:$0xf] }
 0x113   : > { %7197 = vmatprep.mubr.msk.bf16.mxu0 %vm738_vm4, %v9437_v24  ;;  %v9580_v53 = vcombine.low %v9569_v45, %v9572_v4  ;;  %v9583_v8 = vld [vmem:[%s8285_s9 + $0xc0] sm:$0xf]  ;;  %v9586_v48 = vld [vmem:[%s8285_s9 + $0xc4] sm:$0xf] }
 0x114   : > { %v9590_v39 = vcombine.low %v9583_v8, %v9586_v48 }
 0x115   : > { %10574 = vst [vmem:[#allocation19_spill] sm:$0xff] %v9580_v53 }
 0x116   : > { %10575 = vst [vmem:[#allocation21_spill] sm:$0xff] %v9590_v39 }
 0x117   : > { %6892 = vmatmul.mubr.msk.bf16.gmra.mrb[24].mxu1 %vm738_vm4, %v9453_v11 }
 0x118   : > { %6895 = vmatprep.mubr.msk.bf16.mxu1 %vm738_vm4, %v9464_v57 }
 0x11a   : > { %7198 = vmatmul.mubr.msk.bf16.gmra.mrb[24].mxu0 %vm738_vm4, %v9470_v30 }
 0x11b   : > { %7201 = vmatprep.mubr.msk.bf16.mxu0 %vm738_vm4, %v9474_v22 }
 0x11f   : > { %6896 = vmatmul.mubr.msk.bf16.gmra.mrb[28].mxu1 %vm738_vm4, %v9488_v61 }
 0x120   : > { %6901 = vmatprep.mubr.msk.bf16.mxu1 %vm738_vm4, %v10550_v36  ;;  %v10576_v36 = vld [vmem:[#allocation3_spill] sm:$0xff] }
 0x122   : > { %7202 = vmatmul.mubr.msk.bf16.gmra.mrb[28].mxu0 %vm738_vm4, %v9494_v46 }
 0x123   : > { %7207 = vmatprep.mubr.msk.bf16.mxu0 %vm738_vm4, %v10551_v55  ;;  %v10577_v55 = vld [vmem:[#allocation4_spill] sm:$0xff] }
 0x127   : > { %6902 = vmatmul.mubr.msk.bf16.vlgmr.msra.gmra.mrb[0].mxu1 %vm738_vm4, %v10552_v42 }
 0x128   : > { %6934 = vmatpush3.bf16.msra.mxu1 %v1908_v58  ;;  %6905 = vmatprep.mubr.msk.bf16.mxu1 %vm738_vm4, %v10553_v21  ;;  %v2120_v58 = vsel %vm787_vm0, %v6190_v15, 0 }
 0x129   : > { %7958 = vmatprep.subr.msk.bf16.mxu1 %vm787_vm0, %v6190_v15  ;;  %v9616_v15 = vld [vmem:[%s10291_s3 + $0xc] sm:$0x3] }
 0x12a   : > { %7208 = vmatmul.mubr.msk.bf16.vlgmr.msra.gmra.mrb[0].mxu0 %vm738_vm4, %v10554_v60 }
 0x12b   : > { %7240 = vmatpush3.bf16.msra.mxu0 %v4615_v47  ;;  %7211 = vmatprep.mubr.msk.bf16.mxu0 %vm738_vm4, %v8977_v16  ;;  %v9604_v47 = vld [vmem:[%s10290_s2 + $0xc] sm:$0x3] }
 0x12c   : > { %7967 = vmatprep.subr.msk.bf16.mxu0 %vm787_vm0, %v6414_v13 }
 0x12f   : > { %6906 = vmatmul.mubr.msk.bf16.gmra.mrb[4].mxu1 %vm738_vm4, %v8965_v3 }
 0x130   : > { %6909 = vmatprep.mubr.msk.bf16.mxu1 %vm738_vm4, %v9002_v59 }
 0x132   : > { %7212 = vmatmul.mubr.msk.bf16.gmra.mrb[4].mxu0 %vm738_vm4, %v10555_v10 }
 0x133   : > { %7215 = vmatprep.mubr.msk.bf16.mxu0 %vm738_vm4, %v9010_v40 }
 0x137   : > { %6910 = vmatmul.mubr.msk.bf16.gmra.mrb[8].mxu1 %vm738_vm4, %v10556_v44 }
 0x138   : > { %6913 = vmatprep.mubr.msk.bf16.mxu1 %vm738_vm4, %v10557_v41 }
 0x13a   : > { %7216 = vmatmul.mubr.msk.bf16.gmra.mrb[8].mxu0 %vm738_vm4, %v10558_v56 }
 0x13b   : > { %7219 = vmatprep.mubr.msk.bf16.mxu0 %vm738_vm4, %v10559_v1 }
 0x13f   : > { %6914 = vmatmul.mubr.msk.bf16.gmra.mrb[12].mxu1 %vm738_vm4, %v10560_v63  ;;  %v10603_v63 = vld [vmem:[#allocation47_spill] sm:$0xff] }
 0x140   : > { %6917 = vmatprep.mubr.msk.bf16.mxu1 %vm738_vm4, %v10561_v18  ;;  %v10599_v18 = vld [vmem:[#allocation39_spill] sm:$0xff] }
 0x142   : > { %7220 = vmatmul.mubr.msk.bf16.gmra.mrb[12].mxu0 %vm738_vm4, %v10562_v26 }
 0x143   : > { %7223 = vmatprep.mubr.msk.bf16.mxu0 %vm738_vm4, %v10563_v28 }
 0x147   : > { %6918 = vmatmul.mubr.msk.bf16.gmra.mrb[16].mxu1 %vm738_vm4, %v10564_v33 }
 0x148   : > { %6921 = vmatprep.mubr.msk.bf16.mxu1 %vm738_vm4, %v10565_v51  ;;  %v10598_v51 = vld [vmem:[#allocation33_spill] sm:$0xff] }
 0x14a   : > { %7224 = vmatmul.mubr.msk.bf16.gmra.mrb[16].mxu0 %vm738_vm4, %v10566_v6 }
 0x14b   : > { %7227 = vmatprep.mubr.msk.bf16.mxu0 %vm738_vm4, %v10567_v62 }
 0x14f   : > { %6922 = vmatmul.mubr.msk.bf16.gmra.mrb[20].mxu1 %vm738_vm4, %v10568_v52  ;;  %v9665_v52 = vld [vmem:[%s8280_s6 + $0xc8] sm:$0x1] }
 0x150   : > { %6925 = vmatprep.mubr.msk.bf16.mxu1 %vm738_vm4, %v10569_v38  ;;  %v1895_v1 = vshll.u32 %v9665_v52, 16 }
 0x152   : > { %7228 = vmatmul.mubr.msk.bf16.gmra.mrb[20].mxu0 %vm738_vm4, %v10570_v9 }
 0x153   : > { %7231 = vmatprep.mubr.msk.bf16.mxu0 %vm738_vm4, %v10571_v54  ;;  %v10597_v54 = vld [vmem:[#allocation30_spill] sm:$0xff] }
 0x157   : > { %6926 = vmatmul.mubr.msk.bf16.gmra.mrb[24].mxu1 %vm738_vm4, %v10572_v29  ;;  %v4592_v29 = vshll.u32 %v9586_v48, 16 }
 0x158   : > { %6929 = vmatprep.mubr.msk.bf16.mxu1 %vm738_vm4, %v9141_v14  ;;  %v10589_v14 = vld [vmem:[#allocation16_spill] sm:$0xff] }
 0x159   : > { %v4594_v28 = vrot.slane %v4592_v29, 5 }
 0x15a   : > { %7232 = vmatmul.mubr.msk.bf16.gmra.mrb[24].mxu0 %vm738_vm4, %v10573_v49  ;;  %v10596_v49 = vld [vmem:[#allocation26_spill] sm:$0xff] }
 0x15b   : > { %7235 = vmatprep.mubr.msk.bf16.mxu0 %vm738_vm4, %v9153_v50  ;;  %v10578_v50 = vld [vmem:[#allocation5_spill] sm:$0xff] }
 0x15f   : > { %6930 = vmatmul.mubr.msk.bf16.gmra.mrb[28].mxu1 %vm738_vm4, %v9580_v53  ;;  %v4827_v53 = vsel %vm787_vm0, %v6414_v13, 0  ;;  %v10582_v13 = vld [vmem:[#allocation9_spill] sm:$0xff] }
 0x160   : > { %6935 = vmatprep.mubr.msk.bf16.mxu1 %vm738_vm4, %v10576_v36  ;;  %v10579_v36 = vld [vmem:[#allocation7_spill] sm:$0xff] }
 0x162   : > { %7236 = vmatmul.mubr.msk.bf16.gmra.mrb[28].mxu0 %vm738_vm4, %v9590_v39  ;;  %v10581_v39 = vld [vmem:[#allocation8_spill] sm:$0xff] }
 0x163   : > { %7241 = vmatprep.mubr.msk.bf16.mxu0 %vm738_vm4, %v10577_v55  ;;  %v10580_v55 = vld [vmem:[#allocation6_spill] sm:$0xff] }
 0x167   : > { %6936 = vmatmul.mubr.msk.bf16.vlgmr.msra.gmra.mrb[0].mxu1 %vm738_vm4, %v10578_v50  ;;  %v10585_v50 = vld [vmem:[#allocation12_spill] sm:$0xff] }
 0x168   : > { %6968 = vmatpush3.bf16.msra.mxu1 %v2120_v58  ;;  %6939 = vmatprep.mubr.msk.bf16.mxu1 %vm738_vm4, %v10579_v36  ;;  %v10583_v58 = vld [vmem:[#allocation11_spill] sm:$0xff]  ;;  %v10584_v36 = vld [vmem:[#allocation10_spill] sm:$0xff] }
 0x169   : > { %7959 = vmatprep.subr.msk.bf16.mxu1 %vm787_vm0, %v9604_v47 }
 0x16a   : > { %7242 = vmatmul.mubr.msk.bf16.vlgmr.msra.gmra.mrb[0].mxu0 %vm738_vm4, %v10580_v55  ;;  %v10586_v55 = vld [vmem:[#allocation13_spill] sm:$0xff] }
 0x16b   : > { %7274 = vmatpush3.bf16.msra.mxu0 %v4827_v53  ;;  %7245 = vmatprep.mubr.msk.bf16.mxu0 %vm738_vm4, %v10581_v39  ;;  %v10587_v53 = vld [vmem:[#allocation15_spill] sm:$0xff]  ;;  %v10588_v39 = vld [vmem:[#allocation14_spill] sm:$0xff] }
 0x16c   : > { %7968 = vmatprep.subr.msk.bf16.mxu0 %vm787_vm0, %v9616_v15 }
 0x16f   : > { %6940 = vmatmul.mubr.msk.bf16.gmra.mrb[4].mxu1 %vm738_vm4, %v10582_v13  ;;  %v10590_v13 = vld [vmem:[#allocation17_spill] sm:$0xff] }
 0x170   : > { %6943 = vmatprep.mubr.msk.bf16.mxu1 %vm738_vm4, %v10583_v58  ;;  %v10591_v58 = vld [vmem:[#allocation20_spill] sm:$0xff] }
 0x172   : > { %7246 = vmatmul.mubr.msk.bf16.gmra.mrb[4].mxu0 %vm738_vm4, %v10584_v36  ;;  %v10592_v36 = vld [vmem:[#allocation18_spill] sm:$0xff] }
 0x173   : > { %7249 = vmatprep.mubr.msk.bf16.mxu0 %vm738_vm4, %v10585_v50  ;;  %v10593_v50 = vld [vmem:[#allocation22_spill] sm:$0xff] }
 0x177   : > { %6944 = vmatmul.mubr.msk.bf16.gmra.mrb[8].mxu1 %vm738_vm4, %v10586_v55  ;;  %v10594_v55 = vld [vmem:[#allocation24_spill] sm:$0xff] }
 0x178   : > { %6947 = vmatprep.mubr.msk.bf16.mxu1 %vm738_vm4, %v10587_v53  ;;  %v1876_v53 = vshrl.u32 %v9569_v45, 16 }
 0x17a   : > { %7250 = vmatmul.mubr.msk.bf16.gmra.mrb[8].mxu0 %vm738_vm4, %v10588_v39  ;;  %v1889_v39 = vshrl.u32 %v9572_v4, 16  ;;  %v1878_v38 = vrot.slane %v1876_v53, 4  ;;  %v9673_v53 = vld [vmem:[%s8285_s9 + $0xc8] sm:$0x1] }
 0x17b   : > { %7253 = vmatprep.mubr.msk.bf16.mxu0 %vm738_vm4, %v10589_v14  ;;  %v1879_v14 = vshll.u32 %v9569_v45, 16  ;;  %v4602_v29 = vshll.u32 %v9673_v53, 16 }
 0x17c   : > { %v1891_v62 = vrot.slane %v1889_v39, 4  ;;  %v10601_v39 = vld [vmem:[#allocation42_spill] sm:$0xff] }
 0x17d   : > { %v1881_v9 = vrot.slane %v1879_v14, 5  ;;  %v10600_v14 = vld [vmem:[#allocation36_spill] sm:$0xff] }
 0x17f   : > { %6948 = vmatmul.mubr.msk.bf16.gmra.mrb[12].mxu1 %vm738_vm4, %v10590_v13  ;;  %v10595_v13 = vld [vmem:[#allocation28_spill] sm:$0xff] }
 0x180   : > { %6951 = vmatprep.mubr.msk.bf16.mxu1 %vm738_vm4, %v10591_v58  ;;  %v1885_v58 = vshll.u32 %v9572_v4, 16 }
 0x182   : > { %7254 = vmatmul.mubr.msk.bf16.gmra.mrb[12].mxu0 %vm738_vm4, %v10592_v36  ;;  %v4586_v36 = vshll.u32 %v9583_v8, 16 }
 0x183   : > { %7257 = vmatprep.mubr.msk.bf16.mxu0 %vm738_vm4, %v10593_v50  ;;  %v4583_v50 = vshrl.u32 %v9583_v8, 16 }
 0x184   : > { %v4588_v6 = vrot.slane %v4586_v36, 5 }
 0x187   : > { %6952 = vmatmul.mubr.msk.bf16.gmra.mrb[16].mxu1 %vm738_vm4, %v10594_v55  ;;  %v4596_v55 = vshrl.u32 %v9586_v48, 16 }
 0x188   : > { %6955 = vmatprep.mubr.msk.bf16.mxu1 %vm738_vm4, %v10595_v13  ;;  %v1887_v13 = vrot.slane %v1885_v58, 5 }
 0x189   : > { %v4598_v33 = vrot.slane %v4596_v55, 4 }
 0x18a   : > { %7258 = vmatmul.mubr.msk.bf16.gmra.mrb[16].mxu0 %vm738_vm4, %v10596_v49  ;;  %v4585_v49 = vrot.slane %v4583_v50, 4  ;;  %v1892_v26 = vor.u32 %v1891_v62, %v1887_v13 }
 0x18b   : > { %7261 = vmatprep.mubr.msk.bf16.mxu0 %vm738_vm4, %v10597_v54  ;;  %v1882_v54 = vor.u32 %v1881_v9, %v1878_v38  ;;  %v4599_v50 = vor.u32 %v4598_v33, %v4594_v28  ;;  %v4604_v9 = vrot.slane %v4602_v29, 5  ;;  %v10612_v29 = vld [vmem:[#allocation75_spill] sm:$0xff] }
 0x18c   : > { %v4589_v58 = vor.u32 %v4588_v6, %v4585_v49  ;;  %v1893_v55 = vrot.slane %v1892_v26, 4  ;;  %v10605_v6 = vld [vmem:[#allocation46_spill] sm:$0xff]  ;;  %v10606_v26 = vld [vmem:[#allocation48_spill] sm:$0xff] }
 0x18d   : > { %v1883_v36 = vrot.slane %v1882_v54, 4  ;;  %v4600_v38 = vrot.slane %v4599_v50, 4  ;;  %v10611_v50 = vld [vmem:[#allocation76_spill] sm:$0xff] }
 0x18e   : > { %v4590_v62 = vrot.slane %v4589_v58, 4 }
 0x18f   : > { %6956 = vmatmul.mubr.msk.bf16.gmra.mrb[20].mxu1 %vm738_vm4, %v10598_v51  ;;  %v1897_v51 = vrot.slane %v1895_v1, 5  ;;  %v1888_v41 = vsel %vm8297_vm3, %v1883_v36, %v1887_v13  ;;  %v4605_v49 = vsel %vm8297_vm3, %v4600_v38, %v4604_v9  ;;  %v10609_v13 = vld [vmem:[#allocation56_spill] sm:$0xff]  ;;  %v10613_v36 = vld [vmem:[#allocation77_spill] sm:$0xff]  ;;  %v6189_v38 = vrot.slane %v9569_v45, 9 }
 0x190   : > { %6959 = vmatprep.mubr.msk.bf16.mxu1 %vm738_vm4, %v10599_v18  ;;  %v10602_v18 = vld [vmem:[#allocation44_spill] sm:$0xff]  ;;  %v4595_v54 = vsel %vm8297_vm3, %v4590_v62, %v4594_v28  ;;  %v6226_v28 = vld [vmem:[%s10290_s2 + $0xe] sm:$0x3]  ;;  %v4813_v62 = vrot.slane %v9586_v48, 5 }
 0x191   : > { %v1898_v33 = vsel %vm8297_vm3, %v1893_v55, %v1897_v51  ;;  %v9698_v58 = vcombine.low %v4595_v54, %v4605_v49  ;;  %v10607_v51 = vld [vmem:[#allocation55_spill] sm:$0xff]  ;;  %v2106_v55 = vrot.slane %v9572_v4, 5  ;;  %v6413_v54 = vrot.slane %v9583_v8, 9 }
 0x192   : > { %7262 = vmatmul.mubr.msk.bf16.gmra.mrb[20].mxu0 %vm738_vm4, %v10600_v14  ;;  %v9692_v1 = vcombine.low %v1888_v41, %v1898_v33  ;;  %v2326_v41 = vsel %vm787_vm0, %v9604_v47, 0  ;;  %v10608_v47 = vld [vmem:[#allocation53_spill] sm:$0xff]  ;;  %v2109_v33 = vrot.slane %v9665_v52, 5  ;;  %v4815_v49 = vrot.slane %v4813_v62, 4 }
 0x193   : > { %7265 = vmatprep.mubr.msk.bf16.mxu0 %vm738_vm4, %v10601_v39  ;;  %v2108_v9 = vrot.slane %v2106_v55, 4  ;;  %v4816_v4 = vrot.slane %v9673_v53, 5  ;;  %v4814_v8 = vsel %vm9112_vm7, %v6413_v54, %v4813_v62  ;;  %v10628_v54 = vld [vmem:[#allocation34_spill] sm:$0xff] }
 0x195   : > { %v2110_v45 = vsel %vm9112_vm7, %v2108_v9, %v2109_v33  ;;  %v4817_v48 = vsel %vm9112_vm7, %v4815_v49, %v4816_v4  ;;  %v10626_v9 = vld [vmem:[#allocation73_spill] sm:$0xff]  ;;  %v10627_v33 = vld [vmem:[#allocation74_spill] sm:$0xff]  ;;  %v10629_v49 = vld [vmem:[#allocation32_spill] sm:$0xff] }
 0x196   : > { %v9792_v53 = vcombine.low %v4814_v8, %v4817_v48  ;;  %v10630_v4 = vld [vmem:[#allocation38_spill] sm:$0xff]  ;;  %v9868_v8 = vld [vmem:[%s8280_s6 + $0xd0] sm:$0xf]  ;;  %v10632_v48 = vld [vmem:[#allocation41_spill] sm:$0xff] }
 0x197   : > { %6960 = vmatmul.mubr.msk.bf16.gmra.mrb[24].mxu1 %vm738_vm4, %v10602_v18 }
 0x198   : > { %6963 = vmatprep.mubr.msk.bf16.mxu1 %vm738_vm4, %v10603_v63 }
 0x19a   : > { %7266 = vmatmul.mubr.msk.bf16.gmra.mrb[24].mxu0 %vm738_vm4, %v10605_v6 }
 0x19b   : > { %7269 = vmatprep.mubr.msk.bf16.mxu0 %vm738_vm4, %v10606_v26 }
 0x19f   : > { %6964 = vmatmul.mubr.msk.bf16.gmra.mrb[28].mxu1 %vm738_vm4, %v9692_v1 }
 0x1a0   : > { %6969 = vmatprep.mubr.msk.bf16.mxu1 %vm738_vm4, %v9173_v23  ;;  %v5033_v23 = vsel %vm787_vm0, %v9616_v15, 0  ;;  %v10610_v15 = vld [vmem:[#allocation57_spill] sm:$0xff] }
 0x1a2   : > { %7270 = vmatmul.mubr.msk.bf16.gmra.mrb[28].mxu0 %vm738_vm4, %v9698_v58 }
 0x1a3   : > { %7275 = vmatprep.mubr.msk.bf16.mxu0 %vm738_vm4, %v9194_v7  ;;  %v6450_v7 = vld [vmem:[%s10291_s3 + $0xe] sm:$0x3] }
 0x1a4   : > { %v5261_v62 = vsel %vm787_vm0, %v6450_v7, 0 }
 0x1a7   : > { %6970 = vmatmul.mubr.msk.bf16.vlgmr.msra.gmra.mrb[0].mxu1 %vm738_vm4, %v9183_v25 }
 0x1a8   : > { %7002 = vmatpush3.bf16.msra.mxu1 %v2326_v41  ;;  %6973 = vmatprep.mubr.msk.bf16.mxu1 %vm738_vm4, %v9232_v12  ;;  %v2107_v41 = vsel %vm9112_vm7, %v6189_v38, %v2106_v55  ;;  %v6245_v55 = vld [vmem:[%s10290_s2 + $0x10] sm:$0x3] }
 0x1a9   : > { %7960 = vmatprep.subr.msk.bf16.mxu1 %vm787_vm0, %v6226_v28  ;;  %v9786_v52 = vcombine.low %v2107_v41, %v2110_v45  ;;  %v10625_v38 = vld [vmem:[#allocation72_spill] sm:$0xff]  ;;  %v10631_v41 = vld [vmem:[#allocation19_spill] sm:$0xff] }
 0x1aa   : > { %7276 = vmatmul.mubr.msk.bf16.vlgmr.msra.gmra.mrb[0].mxu0 %vm738_vm4, %v10607_v51  ;;  %v9865_v45 = vld [vmem:[%s8280_s6 + $0xcc] sm:$0xf] }
 0x1ab   : > { %7308 = vmatpush3.bf16.msra.mxu0 %v5033_v23  ;;  %7279 = vmatprep.mubr.msk.bf16.mxu0 %vm738_vm4, %v10608_v47  ;;  %v2554_v23 = vsel %vm787_vm0, %v6226_v28, 0  ;;  %v10623_v28 = vld [vmem:[#allocation70_spill] sm:$0xff] }
 0x1ac   : > { %7969 = vmatprep.subr.msk.bf16.mxu0 %vm787_vm0, %v6450_v7  ;;  %v10624_v7 = vld [vmem:[#allocation71_spill] sm:$0xff] }
 0x1af   : > { %6974 = vmatmul.mubr.msk.bf16.gmra.mrb[4].mxu1 %vm738_vm4, %v10609_v13 }
 0x1b0   : > { %6977 = vmatprep.mubr.msk.bf16.mxu1 %vm738_vm4, %v9278_v27 }
 0x1b2   : > { %7280 = vmatmul.mubr.msk.bf16.gmra.mrb[4].mxu0 %vm738_vm4, %v10610_v15 }
 0x1b3   : > { %7283 = vmatprep.mubr.msk.bf16.mxu0 %vm738_vm4, %v10611_v50 }
 0x1b7   : > { %6978 = vmatmul.mubr.msk.bf16.gmra.mrb[8].mxu1 %vm738_vm4, %v10612_v29 }
 0x1b8   : > { %6981 = vmatprep.mubr.msk.bf16.mxu1 %vm738_vm4, %v9322_v34 }
 0x1ba   : > { %7284 = vmatmul.mubr.msk.bf16.gmra.mrb[8].mxu0 %vm738_vm4, %v10613_v36 }
 0x1bb   : > { %7287 = vmatprep.mubr.msk.bf16.mxu0 %vm738_vm4, %v9342_v37 }
 0x1bf   : > { %6982 = vmatmul.mubr.msk.bf16.gmra.mrb[12].mxu1 %vm738_vm4, %v9333_v0 }
 0x1c0   : > { %6985 = vmatprep.mubr.msk.bf16.mxu1 %vm738_vm4, %v9366_v35 }
 0x1c2   : > { %7288 = vmatmul.mubr.msk.bf16.gmra.mrb[12].mxu0 %vm738_vm4, %v9350_v31 }
 0x1c3   : > { %7291 = vmatprep.mubr.msk.bf16.mxu0 %vm738_vm4, %v9386_v32 }
 0x1c7   : > { %6986 = vmatmul.mubr.msk.bf16.gmra.mrb[16].mxu1 %vm738_vm4, %v9377_v43 }
 0x1c8   : > { %6989 = vmatprep.mubr.msk.bf16.mxu1 %vm738_vm4, %v9410_v17 }
 0x1ca   : > { %7292 = vmatmul.mubr.msk.bf16.gmra.mrb[16].mxu0 %vm738_vm4, %v9394_v20 }
 0x1cb   : > { %7295 = vmatprep.mubr.msk.bf16.mxu0 %vm738_vm4, %v9430_v19 }
 0x1cf   : > { %6990 = vmatmul.mubr.msk.bf16.gmra.mrb[20].mxu1 %vm738_vm4, %v9421_v2 }
 0x1d0   : > { %6993 = vmatprep.mubr.msk.bf16.mxu1 %vm738_vm4, %v9453_v11 }
 0x1d2   : > { %7296 = vmatmul.mubr.msk.bf16.gmra.mrb[20].mxu0 %vm738_vm4, %v9437_v24 }
 0x1d3   : > { %7299 = vmatprep.mubr.msk.bf16.mxu0 %vm738_vm4, %v9470_v30 }
 0x1d7   : > { %6994 = vmatmul.mubr.msk.bf16.gmra.mrb[24].mxu1 %vm738_vm4, %v9464_v57 }
 0x1d8   : > { %6997 = vmatprep.mubr.msk.bf16.mxu1 %vm738_vm4, %v9488_v61 }
 0x1da   : > { %7300 = vmatmul.mubr.msk.bf16.gmra.mrb[24].mxu0 %vm738_vm4, %v9474_v22 }
 0x1db   : > { %7303 = vmatprep.mubr.msk.bf16.mxu0 %vm738_vm4, %v9494_v46 }
 0x1df   : > { %6998 = vmatmul.mubr.msk.bf16.gmra.mrb[28].mxu1 %vm738_vm4, %v9786_v52 }
 0x1e0   : > { %7003 = vmatprep.mubr.msk.bf16.mxu1 %vm738_vm4, %v10552_v42  ;;  %v6469_v42 = vld [vmem:[%s10291_s3 + $0x10] sm:$0x3] }
 0x1e2   : > { %7304 = vmatmul.mubr.msk.bf16.gmra.mrb[28].mxu0 %vm738_vm4, %v9792_v53 }
 0x1e3   : > { %7309 = vmatprep.mubr.msk.bf16.mxu0 %vm738_vm4, %v10554_v60  ;;  %v10617_v60 = vld [vmem:[#allocation64_spill] sm:$0xff] }
 0x1e7   : > { %7004 = vmatmul.mubr.msk.bf16.vlgmr.msra.gmra.mrb[0].mxu1 %vm738_vm4, %v10553_v21  ;;  %v10616_v21 = vld [vmem:[#allocation63_spill] sm:$0xff] }
 0x1e8   : > { %7036 = vmatpush3.bf16.msra.mxu1 %v2554_v23  ;;  %7007 = vmatprep.mubr.msk.bf16.mxu1 %vm738_vm4, %v8965_v3  ;;  %v10614_v3 = vld [vmem:[#allocation61_spill] sm:$0xff] }
 0x1e9   : > { %7961 = vmatprep.subr.msk.bf16.mxu1 %vm787_vm0, %v6245_v55  ;;  %v10633_v23 = vld [vmem:[#allocation21_spill] sm:$0xff] }
 0x1ea   : > { %7310 = vmatmul.mubr.msk.bf16.vlgmr.msra.gmra.mrb[0].mxu0 %vm738_vm4, %v8977_v16  ;;  %v10615_v16 = vld [vmem:[#allocation62_spill] sm:$0xff] }
 0x1eb   : > { %7342 = vmatpush3.bf16.msra.mxu0 %v5261_v62  ;;  %7313 = vmatprep.mubr.msk.bf16.mxu0 %vm738_vm4, %v10555_v10  ;;  %v10620_v10 = vld [vmem:[#allocation67_spill] sm:$0xff]  ;;  %v6209_v62 = vcombine.low %v9865_v45, %v9868_v8 }
 0x1ec   : > { %7970 = vmatprep.subr.msk.bf16.mxu0 %vm787_vm0, %v6469_v42 }
 0x1ef   : > { %7008 = vmatmul.mubr.msk.bf16.gmra.mrb[4].mxu1 %vm738_vm4, %v9002_v59  ;;  %v10618_v59 = vld [vmem:[#allocation65_spill] sm:$0xff] }
 0x1f0   : > { %7011 = vmatprep.mubr.msk.bf16.mxu1 %vm738_vm4, %v10556_v44  ;;  %v10621_v44 = vld [vmem:[#allocation68_spill] sm:$0xff] }
 0x1f2   : > { %7314 = vmatmul.mubr.msk.bf16.gmra.mrb[4].mxu0 %vm738_vm4, %v9010_v40  ;;  %v10619_v40 = vld [vmem:[#allocation66_spill] sm:$0xff] }
 0x1f3   : > { %7317 = vmatprep.mubr.msk.bf16.mxu0 %vm738_vm4, %v10558_v56  ;;  %v10622_v56 = vld [vmem:[#allocation69_spill] sm:$0xff] }
 0x1f7   : > { %7012 = vmatmul.mubr.msk.bf16.gmra.mrb[8].mxu1 %vm738_vm4, %v10614_v3  ;;  %v9877_v3 = vld [vmem:[%s8285_s9 + $0xcc] sm:$0xf] }
 0x1f8   : > { %7015 = vmatprep.mubr.msk.bf16.mxu1 %vm738_vm4, %v10615_v16  ;;  %v9880_v16 = vld [vmem:[%s8285_s9 + $0xd0] sm:$0xf] }
 0x1fa   : > { %7318 = vmatmul.mubr.msk.bf16.gmra.mrb[8].mxu0 %vm738_vm4, %v10616_v21  ;;  %v6433_v21 = vcombine.low %v9877_v3, %v9880_v16 }
 0x1fb   : > { %7321 = vmatprep.mubr.msk.bf16.mxu0 %vm738_vm4, %v10617_v60  ;;  %v10634_v60 = vld [vmem:[#allocation5_spill] sm:$0xff] }
 0x1ff   : > { %7016 = vmatmul.mubr.msk.bf16.gmra.mrb[12].mxu1 %vm738_vm4, %v10618_v59  ;;  %v10635_v59 = vld [vmem:[#allocation6_spill] sm:$0xff] }
 0x200   : > { %7019 = vmatprep.mubr.msk.bf16.mxu1 %vm738_vm4, %v10619_v40  ;;  %v2766_v40 = vsel %vm787_vm0, %v6245_v55, 0  ;;  %v10641_v55 = vld [vmem:[#allocation13_spill] sm:$0xff] }
 0x202   : > { %7322 = vmatmul.mubr.msk.bf16.gmra.mrb[12].mxu0 %vm738_vm4, %v10620_v10  ;;  %v10636_v10 = vld [vmem:[#allocation7_spill] sm:$0xff] }
 0x203   : > { %7325 = vmatprep.mubr.msk.bf16.mxu0 %vm738_vm4, %v10621_v44  ;;  %v5473_v44 = vsel %vm787_vm0, %v6469_v42, 0  ;;  %v10643_v42 = vld [vmem:[#allocation14_spill] sm:$0xff] }
 0x207   : > { %7020 = vmatmul.mubr.msk.bf16.gmra.mrb[16].mxu1 %vm738_vm4, %v10622_v56  ;;  %v10637_v56 = vld [vmem:[#allocation9_spill] sm:$0xff] }
 0x208   : > { %7023 = vmatprep.mubr.msk.bf16.mxu1 %vm738_vm4, %v10623_v28  ;;  %v10638_v28 = vld [vmem:[#allocation8_spill] sm:$0xff] }
 0x20a   : > { %7326 = vmatmul.mubr.msk.bf16.gmra.mrb[16].mxu0 %vm738_vm4, %v10624_v7  ;;  %v10639_v7 = vld [vmem:[#allocation10_spill] sm:$0xff] }
 0x20b   : > { %7329 = vmatprep.mubr.msk.bf16.mxu0 %vm738_vm4, %v10625_v38  ;;  %v10640_v38 = vld [vmem:[#allocation11_spill] sm:$0xff] }
 0x20f   : > { %7024 = vmatmul.mubr.msk.bf16.gmra.mrb[20].mxu1 %vm738_vm4, %v10626_v9  ;;  %v10642_v9 = vld [vmem:[#allocation12_spill] sm:$0xff] }
 0x210   : > { %7027 = vmatprep.mubr.msk.bf16.mxu1 %vm738_vm4, %v10627_v33  ;;  %v10644_v33 = vld [vmem:[#allocation15_spill] sm:$0xff] }
 0x212   : > { %7330 = vmatmul.mubr.msk.bf16.gmra.mrb[20].mxu0 %vm738_vm4, %v10628_v54  ;;  %v10645_v54 = vld [vmem:[#allocation17_spill] sm:$0xff] }
 0x213   : > { %7333 = vmatprep.mubr.msk.bf16.mxu0 %vm738_vm4, %v10629_v49  ;;  %v10646_v49 = vld [vmem:[#allocation16_spill] sm:$0xff] }
 0x217   : > { %7028 = vmatmul.mubr.msk.bf16.gmra.mrb[24].mxu1 %vm738_vm4, %v10630_v4  ;;  %v10647_v4 = vld [vmem:[#allocation18_spill] sm:$0xff] }
 0x218   : > { %7031 = vmatprep.mubr.msk.bf16.mxu1 %vm738_vm4, %v10631_v41  ;;  %v10648_v41 = vld [vmem:[#allocation20_spill] sm:$0xff] }
 0x21a   : > { %7334 = vmatmul.mubr.msk.bf16.gmra.mrb[24].mxu0 %vm738_vm4, %v10632_v48  ;;  %v10649_v48 = vld [vmem:[#allocation24_spill] sm:$0xff] }
 0x21b   : > { %7337 = vmatprep.mubr.msk.bf16.mxu0 %vm738_vm4, %v10633_v23  ;;  %v10650_v23 = vld [vmem:[#allocation22_spill] sm:$0xff] }
 0x21f   : > { %7032 = vmatmul.mubr.msk.bf16.gmra.mrb[28].mxu1 %vm738_vm4, %v6209_v62  ;;  %v10651_v62 = vld [vmem:[#allocation26_spill] sm:$0xff] }
 0x220   : > { %7037 = vmatprep.mubr.msk.bf16.mxu1 %vm738_vm4, %v10634_v60  ;;  %v2522_v60 = vshrl.u32 %v9865_v45, 16 }
 0x222   : > { %7338 = vmatmul.mubr.msk.bf16.gmra.mrb[28].mxu0 %vm738_vm4, %v6433_v21  ;;  %v10652_v21 = vld [vmem:[#allocation28_spill] sm:$0xff] }
 0x223   : > { %7343 = vmatprep.mubr.msk.bf16.mxu0 %vm738_vm4, %v10635_v59  ;;  %v2525_v59 = vshll.u32 %v9865_v45, 16 }
 0x227   : > { %7038 = vmatmul.mubr.msk.bf16.vlgmr.msra.gmra.mrb[0].mxu1 %vm738_vm4, %v10636_v10  ;;  %v10653_v10 = vld [vmem:[#allocation33_spill] sm:$0xff] }
 0x228   : > { %7070 = vmatpush3.bf16.msra.mxu1 %v2766_v40  ;;  %7041 = vmatprep.mubr.msk.bf16.mxu1 %vm738_vm4, %v10637_v56  ;;  %v2535_v40 = vshrl.u32 %v9868_v8, 16  ;;  %v10654_v56 = vld [vmem:[#allocation30_spill] sm:$0xff] }
 0x22a   : > { %7344 = vmatmul.mubr.msk.bf16.vlgmr.msra.gmra.mrb[0].mxu0 %vm738_vm4, %v10638_v28  ;;  %v5229_v28 = vshrl.u32 %v9877_v3, 16 }
 0x22b   : > { %7376 = vmatpush3.bf16.msra.mxu0 %v5473_v44  ;;  %7347 = vmatprep.mubr.msk.bf16.mxu0 %vm738_vm4, %v10639_v7  ;;  %v2531_v44 = vshll.u32 %v9868_v8, 16  ;;  %v5232_v7 = vshll.u32 %v9877_v3, 16 }
 0x22f   : > { %7042 = vmatmul.mubr.msk.bf16.gmra.mrb[4].mxu1 %vm738_vm4, %v10640_v38  ;;  %v5242_v38 = vshrl.u32 %v9880_v16, 16 }
 0x230   : > { %7045 = vmatprep.mubr.msk.bf16.mxu1 %vm738_vm4, %v10641_v55  ;;  %v10655_v55 = vld [vmem:[#allocation36_spill] sm:$0xff] }
 0x232   : > { %7348 = vmatmul.mubr.msk.bf16.gmra.mrb[4].mxu0 %vm738_vm4, %v10642_v9  ;;  %v5238_v9 = vshll.u32 %v9880_v16, 16 }
 0x233   : > { %7351 = vmatprep.mubr.msk.bf16.mxu0 %vm738_vm4, %v10643_v42  ;;  %v2524_v42 = vrot.slane %v2522_v60, 4  ;;  %v9949_v60 = vld [vmem:[%s8285_s9 + $0xd4] sm:$0x1] }
 0x237   : > { %7046 = vmatmul.mubr.msk.bf16.gmra.mrb[8].mxu1 %vm738_vm4, %v10644_v33  ;;  %v2527_v33 = vrot.slane %v2525_v59, 5 }
 0x238   : > { %7049 = vmatprep.mubr.msk.bf16.mxu1 %vm738_vm4, %v10645_v54  ;;  %v2533_v54 = vrot.slane %v2531_v44, 5  ;;  %v5248_v44 = vshll.u32 %v9949_v60, 16 }
 0x23a   : > { %7352 = vmatmul.mubr.msk.bf16.gmra.mrb[8].mxu0 %vm738_vm4, %v10646_v49  ;;  %v2537_v49 = vrot.slane %v2535_v40, 4 }
 0x23b   : > { %7355 = vmatprep.mubr.msk.bf16.mxu0 %vm738_vm4, %v10647_v4  ;;  %v9941_v4 = vld [vmem:[%s8280_s6 + $0xd4] sm:$0x1] }
 0x23f   : > { %7050 = vmatmul.mubr.msk.bf16.gmra.mrb[12].mxu1 %vm738_vm4, %v10648_v41  ;;  %v10656_v41 = vld [vmem:[#allocation39_spill] sm:$0xff] }
 0x240   : > { %7053 = vmatprep.mubr.msk.bf16.mxu1 %vm738_vm4, %v10649_v48  ;;  %v5231_v48 = vrot.slane %v5229_v28, 4 }
 0x242   : > { %7356 = vmatmul.mubr.msk.bf16.gmra.mrb[12].mxu0 %vm738_vm4, %v10650_v23  ;;  %v5234_v23 = vrot.slane %v5232_v7, 5 }
 0x243   : > { %7359 = vmatprep.mubr.msk.bf16.mxu0 %vm738_vm4, %v10651_v62  ;;  %v5240_v62 = vrot.slane %v5238_v9, 5 }
 0x244   : > { %v5235_v59 = vor.u32 %v5234_v23, %v5231_v48 }
 0x247   : > { %7054 = vmatmul.mubr.msk.bf16.gmra.mrb[16].mxu1 %vm738_vm4, %v10652_v21  ;;  %v5244_v21 = vrot.slane %v5242_v38, 4 }
 0x248   : > { %7057 = vmatprep.mubr.msk.bf16.mxu1 %vm738_vm4, %v10653_v10  ;;  %v2528_v10 = vor.u32 %v2527_v33, %v2524_v42  ;;  %v5250_v42 = vrot.slane %v5248_v44, 5 }
 0x249   : > { %v5245_v40 = vor.u32 %v5244_v21, %v5240_v62 }
 0x24a   : > { %7360 = vmatmul.mubr.msk.bf16.gmra.mrb[16].mxu0 %vm738_vm4, %v10654_v56  ;;  %v2538_v56 = vor.u32 %v2537_v49, %v2533_v54  ;;  %v2529_v28 = vrot.slane %v2528_v10, 4 }
 0x24b   : > { %7363 = vmatprep.mubr.msk.bf16.mxu0 %vm738_vm4, %v10655_v55  ;;  %v2541_v55 = vshll.u32 %v9941_v4, 16  ;;  %v5246_v9 = vrot.slane %v5245_v40, 4 }
 0x24c   : > { %v2539_v7 = vrot.slane %v2538_v56, 4 }
 0x24d   : > { %v2543_v38 = vrot.slane %v2541_v55, 5  ;;  %v5251_v49 = vsel %vm8297_vm3, %v5246_v9, %v5250_v42 }
 0x24f   : > { %7058 = vmatmul.mubr.msk.bf16.gmra.mrb[20].mxu1 %vm738_vm4, %v10656_v41 }
 0x250   : > { %7061 = vmatprep.mubr.msk.bf16.mxu1 %vm738_vm4, %v10602_v18  ;;  %v5236_v18 = vrot.slane %v5235_v59, 4 }
 0x252   : > { %7364 = vmatmul.mubr.msk.bf16.gmra.mrb[20].mxu0 %vm738_vm4, %v10601_v39  ;;  %v2534_v39 = vsel %vm8297_vm3, %v2529_v28, %v2533_v54 }
 0x253   : > { %7367 = vmatprep.mubr.msk.bf16.mxu0 %vm738_vm4, %v10605_v6  ;;  %v2544_v6 = vsel %vm8297_vm3, %v2539_v7, %v2543_v38 }
 0x254   : > { %v6227_v33 = vcombine.low %v2534_v39, %v2544_v6 }
 0x257   : > { %7062 = vmatmul.mubr.msk.bf16.gmra.mrb[24].mxu1 %vm738_vm4, %v10603_v63  ;;  %v5241_v63 = vsel %vm8297_vm3, %v5236_v18, %v5240_v62 }
 0x258   : > { %7065 = vmatprep.mubr.msk.bf16.mxu1 %vm738_vm4, %v9692_v1  ;;  %v6451_v1 = vcombine.low %v5241_v63, %v5251_v49 }
 0x25a   : > { %7368 = vmatmul.mubr.msk.bf16.gmra.mrb[24].mxu0 %vm738_vm4, %v10606_v26 }
 0x25b   : > { %7371 = vmatprep.mubr.msk.bf16.mxu0 %vm738_vm4, %v9698_v58 }
 0x25f   : > { %7066 = vmatmul.mubr.msk.bf16.gmra.mrb[28].mxu1 %vm738_vm4, %v6227_v33 }
 0x260   : > { %7071 = vmatprep.mubr.msk.bf16.mxu1 %vm738_vm4, %v9183_v25  ;;  %v2752_v25 = vrot.slane %v9868_v8, 5 }
 0x262   : > { %7372 = vmatmul.mubr.msk.bf16.gmra.mrb[28].mxu0 %vm738_vm4, %v6451_v1 }
 0x263   : > { %7377 = vmatprep.mubr.msk.bf16.mxu0 %vm738_vm4, %v10607_v51 }
 0x267   : > { %7072 = vmatmul.mubr.msk.bf16.vlgmr.msra.gmra.mrb[0].mxu1 %vm738_vm4, %v9232_v12  ;;  %v5459_v12 = vrot.slane %v9880_v16, 5 }
 0x268   : > { %7075 = vmatprep.mubr.msk.bf16.mxu1 %vm738_vm4, %v10609_v13 }
 0x26a   : > { %7378 = vmatmul.mubr.msk.bf16.vlgmr.msra.gmra.mrb[0].mxu0 %vm738_vm4, %v10608_v47 }
 0x26b   : > { %7381 = vmatprep.mubr.msk.bf16.mxu0 %vm738_vm4, %v10610_v15 }
 0x26f   : > { %7076 = vmatmul.mubr.msk.bf16.gmra.mrb[4].mxu1 %vm738_vm4, %v9278_v27  ;;  %v6244_v27 = vrot.slane %v9865_v45, 9 }
 0x270   : > { %7079 = vmatprep.mubr.msk.bf16.mxu1 %vm738_vm4, %v10612_v29 }
 0x272   : > { %7382 = vmatmul.mubr.msk.bf16.gmra.mrb[4].mxu0 %vm738_vm4, %v10611_v50 }
 0x273   : > { %7385 = vmatprep.mubr.msk.bf16.mxu0 %vm738_vm4, %v10613_v36 }
 0x277   : > { %7080 = vmatmul.mubr.msk.bf16.gmra.mrb[8].mxu1 %vm738_vm4, %v9322_v34  ;;  %v2755_v34 = vrot.slane %v9941_v4, 5 }
 0x278   : > { %7083 = vmatprep.mubr.msk.bf16.mxu1 %vm738_vm4, %v9333_v0  ;;  %v6468_v0 = vrot.slane %v9877_v3, 9 }
 0x27a   : > { %7386 = vmatmul.mubr.msk.bf16.gmra.mrb[8].mxu0 %vm738_vm4, %v9342_v37  ;;  %v2754_v37 = vrot.slane %v2752_v25, 4 }
 0x27b   : > { %7389 = vmatprep.mubr.msk.bf16.mxu0 %vm738_vm4, %v9350_v31  ;;  %v5461_v31 = vrot.slane %v5459_v12, 4 }
 0x27f   : > { %7084 = vmatmul.mubr.msk.bf16.gmra.mrb[12].mxu1 %vm738_vm4, %v9366_v35  ;;  %v5462_v35 = vrot.slane %v9949_v60, 5 }
 0x280   : > { %7087 = vmatprep.mubr.msk.bf16.mxu1 %vm738_vm4, %v9377_v43  ;;  %v2753_v43 = vsel %vm9112_vm7, %v6244_v27, %v2752_v25 }
 0x282   : > { %7390 = vmatmul.mubr.msk.bf16.gmra.mrb[12].mxu0 %vm738_vm4, %v9386_v32  ;;  %v2756_v32 = vsel %vm9112_vm7, %v2754_v37, %v2755_v34 }
 0x283   : > { %7393 = vmatprep.mubr.msk.bf16.mxu0 %vm738_vm4, %v9394_v20  ;;  %v6246_v20 = vcombine.low %v2753_v43, %v2756_v32 }
 0x287   : > { %7088 = vmatmul.mubr.msk.bf16.gmra.mrb[16].mxu1 %vm738_vm4, %v9410_v17  ;;  %v5460_v17 = vsel %vm9112_vm7, %v6468_v0, %v5459_v12 }
 0x288   : > { %7091 = vmatprep.mubr.msk.bf16.mxu1 %vm738_vm4, %v9421_v2  ;;  %v5463_v2 = vsel %vm9112_vm7, %v5461_v31, %v5462_v35 }
 0x28a   : > { %7394 = vmatmul.mubr.msk.bf16.gmra.mrb[16].mxu0 %vm738_vm4, %v9430_v19  ;;  %v6470_v19 = vcombine.low %v5460_v17, %v5463_v2 }
 0x28b   : > { %7397 = vmatprep.mubr.msk.bf16.mxu0 %vm738_vm4, %v9437_v24 }
 0x28f   : > { %7092 = vmatmul.mubr.msk.bf16.gmra.mrb[20].mxu1 %vm738_vm4, %v9453_v11 }
 0x290   : > { %7095 = vmatprep.mubr.msk.bf16.mxu1 %vm738_vm4, %v9464_v57 }
 0x292   : > { %7398 = vmatmul.mubr.msk.bf16.gmra.mrb[20].mxu0 %vm738_vm4, %v9470_v30 }
 0x293   : > { %7401 = vmatprep.mubr.msk.bf16.mxu0 %vm738_vm4, %v9474_v22  ;;  %v10053_v22 = vld [vmem:[%s10292_s4] ss:$0 sm:$0xff] }
 0x297   : > { %7096 = vmatmul.mubr.msk.bf16.gmra.mrb[24].mxu1 %vm738_vm4, %v9488_v61 }
 0x298   : > { %7099 = vmatprep.mubr.msk.bf16.mxu1 %vm738_vm4, %v9786_v52 }
 0x29a   : > { %7402 = vmatmul.mubr.msk.bf16.gmra.mrb[24].mxu0 %vm738_vm4, %v9494_v46 }
 0x29b   : > { %7405 = vmatprep.mubr.msk.bf16.mxu0 %vm738_vm4, %v9792_v53 }
 0x29f   : > { %7100 = vmatmul.mubr.msk.bf16.gmra.mrb[28].mxu1 %vm738_vm4, %v6246_v20 }
 0x2a2   : > { %7406 = vmatmul.mubr.msk.bf16.gmra.mrb[28].mxu0 %vm738_vm4, %v6470_v19 }
 0x33a   : > { %v7073_v24 = vpop.f32.mrb[0].mxu1 }
 0x33b   : > { %v2802_v11 = vpop.f32.mrb[1].mxu1 }
 0x33c   : > { %v7074_v57 = vpop.f32.mrb[2].mxu1 }
 0x33d   : > { %v7379_v30 = vpop.f32.mrb[0].mxu0  ;;  %v2805_v61 = vpop.f32.mrb[3].mxu1 }
 0x33e   : > { %v7409_v46 = vadd.f32 %v7379_v30, %v7073_v24  ;;  %v5509_v14 = vpop.f32.mrb[1].mxu0 }
 0x33f   : > { %v7410_v26 = vadd.f32 %v5509_v14, %v2802_v11  ;;  %v7380_v5 = vpop.f32.mrb[2].mxu0 }
 0x340   : > { %v10056_v58 = vadd.f32 %v7409_v46, %v10053_v22  ;;  %v7411_v51 = vadd.f32 %v7380_v5, %v7074_v57  ;;  %v5512_v47 = vpop.f32.mrb[3].mxu0 }
 0x341   : > { %v10059_v13 = vadd.f32 %v7410_v26, %v10053_v22  ;;  %v7412_v15 = vadd.f32 %v5512_v47, %v2805_v61 }
 0x342   : > { %v5741_v50 = vsub.f32 0.0, %v10056_v58  ;;  %v10063_v29 = vadd.f32 %v7411_v51, %v10053_v22  ;;  %v7077_v36 = vpop.f32.mrb[4].mxu1 }
 0x343   : > { %v5739_v52 = vsub.f32 0.0, %v10059_v13  ;;  %v10067_v53 = vadd.f32 %v7412_v15, %v10053_v22  ;;  %v2818_v45 = vpop.f32.mrb[5].mxu1 }
 0x344   : > { %v5775_v8 = vmul.f32 1.442695, %v5741_v50  ;;  %v5742_v3 = vsub.f32 0.0, %v10063_v29  ;;  %v7078_v16 = vpop.f32.mrb[6].mxu1 }
 0x345   : > { %v5771_v54 = vmul.f32 1.442695, %v5739_v52  ;;  %v5740_v4 = vsub.f32 0.0, %v10067_v53  ;;  %v7383_v41 = vpop.f32.mrb[4].mxu0  ;;  %v2821_v48 = vpop.f32.mrb[7].mxu1 }
 0x346   : > { %8016 = vpow2.f32 %v5775_v8  ;;  %v5777_v23 = vmul.f32 1.442695, %v5742_v3  ;;  %v7413_v62 = vadd.f32 %v7383_v41, %v7077_v36  ;;  %v5525_v21 = vpop.f32.mrb[5].mxu0 }
 0x347   : > { %8018 = vpow2.f32 %v5771_v54  ;;  %v5773_v10 = vmul.f32 1.442695, %v5740_v4  ;;  %v7414_v56 = vadd.f32 %v5525_v21, %v2818_v45  ;;  %v7384_v55 = vpop.f32.mrb[6].mxu0 }
 0x348   : > { %8020 = vpow2.f32 %v5777_v23  ;;  %v10072_v60 = vadd.f32 %v7413_v62, %v10053_v22  ;;  %v7415_v59 = vadd.f32 %v7384_v55, %v7078_v16  ;;  %v5528_v40 = vpop.f32.mrb[7].mxu0 }
 0x349   : > { %8022 = vpow2.f32 %v5773_v10  ;;  %v10075_v44 = vadd.f32 %v7414_v56, %v10053_v22  ;;  %v7416_v28 = vadd.f32 %v5528_v40, %v2821_v48 }
 0x34a   : > { %v5745_v7 = vsub.f32 0.0, %v10072_v60  ;;  %v10079_v38 = vadd.f32 %v7415_v59, %v10053_v22  ;;  %v7081_v18 = vpop.f32.mrb[8].mxu1 }
 0x34b   : > { %v5743_v9 = vsub.f32 0.0, %v10075_v44  ;;  %v10083_v42 = vadd.f32 %v7416_v28, %v10053_v22  ;;  %v2834_v39 = vpop.f32.mrb[9].mxu1 }
 0x34c   : > { %v5783_v6 = vmul.f32 1.442695, %v5745_v7  ;;  %v5746_v33 = vsub.f32 0.0, %v10079_v38  ;;  %v7082_v63 = vpop.f32.mrb[10].mxu1 }
 0x34d   : > { %v5779_v49 = vmul.f32 1.442695, %v5743_v9  ;;  %v5744_v1 = vsub.f32 0.0, %v10083_v42  ;;  %v7387_v25 = vpop.f32.mrb[8].mxu0  ;;  %v2837_v12 = vpop.f32.mrb[11].mxu1 }
 0x34e   : > { %8024 = vpow2.f32 %v5783_v6  ;;  %v5785_v27 = vmul.f32 1.442695, %v5746_v33  ;;  %v7417_v37 = vadd.f32 %v7387_v25, %v7081_v18  ;;  %v5541_v34 = vpop.f32.mrb[9].mxu0 }
 0x34f   : > { %8026 = vpow2.f32 %v5779_v49  ;;  %v5781_v0 = vmul.f32 1.442695, %v5744_v1  ;;  %v7418_v31 = vadd.f32 %v5541_v34, %v2834_v39  ;;  %v7388_v35 = vpop.f32.mrb[10].mxu0 }
 0x350   : > { %v8017_v43 = vpop.eup %8016  ;;  %8028 = vpow2.f32 %v5785_v27  ;;  %v10088_v32 = vadd.f32 %v7417_v37, %v10053_v22  ;;  %v7419_v20 = vadd.f32 %v7388_v35, %v7082_v63  ;;  %v5544_v17 = vpop.f32.mrb[11].mxu0 }
 0x351   : > { %v8019_v2 = vpop.eup %8018  ;;  %v5837_v19 = vadd.f32 1.0, %v8017_v43  ;;  %8030 = vpow2.f32 %v5781_v0  ;;  %v10091_v24 = vadd.f32 %v7418_v31, %v10053_v22  ;;  %v7420_v11 = vadd.f32 %v5544_v17, %v2837_v12 }
 0x352   : > { %v8021_v57 = vpop.eup %8020  ;;  %v5835_v30 = vadd.f32 1.0, %v8019_v2  ;;  %v5749_v61 = vsub.f32 0.0, %v10088_v32  ;;  %v10095_v46 = vadd.f32 %v7419_v20, %v10053_v22  ;;  %v7085_v14 = vpop.f32.mrb[12].mxu1 }
 0x353   : > { %v8023_v26 = vpop.eup %8022  ;;  %8032 = vrcp.f32 %v5837_v19  ;;  %v5838_v5 = vadd.f32 1.0, %v8021_v57  ;;  %v5747_v51 = vsub.f32 0.0, %v10091_v24  ;;  %v10099_v47 = vadd.f32 %v7420_v11, %v10053_v22  ;;  %v2850_v15 = vpop.f32.mrb[13].mxu1 }
 0x354   : > { %8034 = vrcp.f32 %v5835_v30  ;;  %v5836_v50 = vadd.f32 1.0, %v8023_v26  ;;  %v5791_v36 = vmul.f32 1.442695, %v5749_v61  ;;  %v5750_v52 = vsub.f32 0.0, %v10095_v46  ;;  %v7086_v45 = vpop.f32.mrb[14].mxu1 }
 0x355   : > { %8036 = vrcp.f32 %v5838_v5  ;;  %v5787_v8 = vmul.f32 1.442695, %v5747_v51  ;;  %v5748_v3 = vsub.f32 0.0, %v10099_v47  ;;  %v7391_v16 = vpop.f32.mrb[12].mxu0  ;;  %v2853_v54 = vpop.f32.mrb[15].mxu1 }
 0x356   : > { %8038 = vrcp.f32 %v5836_v50  ;;  %v5793_v4 = vmul.f32 1.442695, %v5750_v52  ;;  %v7421_v41 = vadd.f32 %v7391_v16, %v7085_v14  ;;  %v5557_v48 = vpop.f32.mrb[13].mxu0 }
 0x357   : > { %8040 = vpow2.f32 %v5791_v36  ;;  %v5789_v23 = vmul.f32 1.442695, %v5748_v3  ;;  %v7422_v62 = vadd.f32 %v5557_v48, %v2850_v15  ;;  %v7392_v21 = vpop.f32.mrb[14].mxu0 }
 0x358   : > { %v8025_v10 = vpop.eup %8024  ;;  %8042 = vpow2.f32 %v5787_v8  ;;  %v10104_v56 = vadd.f32 %v7421_v41, %v10053_v22  ;;  %v7423_v55 = vadd.f32 %v7392_v21, %v7086_v45  ;;  %v5560_v59 = vpop.f32.mrb[15].mxu0 }
 0x359   : > { %v8027_v40 = vpop.eup %8026  ;;  %v5841_v28 = vadd.f32 1.0, %v8025_v10  ;;  %8044 = vpow2.f32 %v5793_v4  ;;  %v10107_v7 = vadd.f32 %v7422_v62, %v10053_v22  ;;  %v7424_v18 = vadd.f32 %v5560_v59, %v2853_v54 }
 0x35a   : > { %v8029_v9 = vpop.eup %8028  ;;  %v5839_v39 = vadd.f32 1.0, %v8027_v40  ;;  %8046 = vpow2.f32 %v5789_v23  ;;  %v5753_v6 = vsub.f32 0.0, %v10104_v56  ;;  %v10112_v33 = vadd.f32 %v7423_v55, %v10053_v22  ;;  %v7089_v63 = vpop.f32.mrb[16].mxu1 }
 0x35b   : > { %v8031_v49 = vpop.eup %8030  ;;  %8048 = vrcp.f32 %v5841_v28  ;;  %v5842_v1 = vadd.f32 1.0, %v8029_v9  ;;  %v5751_v25 = vsub.f32 0.0, %v10107_v7  ;;  %v10116_v12 = vadd.f32 %v7424_v18, %v10053_v22  ;;  %v2866_v27 = vpop.f32.mrb[17].mxu1 }
 0x35c   : > { %8050 = vrcp.f32 %v5839_v39  ;;  %v5840_v37 = vadd.f32 1.0, %v8031_v49  ;;  %v5799_v34 = vmul.f32 1.442695, %v5753_v6  ;;  %v5754_v0 = vsub.f32 0.0, %v10112_v33  ;;  %v7090_v31 = vpop.f32.mrb[18].mxu1 }
 0x35d   : > { %v8033_v35 = vpop.eup %8032  ;;  %8052 = vrcp.f32 %v5842_v1  ;;  %v5795_v43 = vmul.f32 1.442695, %v5751_v25  ;;  %v5752_v20 = vsub.f32 0.0, %v10116_v12  ;;  %v7395_v17 = vpop.f32.mrb[16].mxu0 }
 0x35e   : > { %v2869_v2 = vpop.f32.mrb[19].mxu1  ;;  %v8035_v19 = vpop.eup %8034  ;;  %v5901_v11 = vmul.f32 %v8033_v35, %v10056_v58  ;;  %8054 = vrcp.f32 %v5840_v37  ;;  %v5801_v57 = vmul.f32 1.442695, %v5754_v0  ;;  %v7425_v30 = vadd.f32 %v7395_v17, %v7089_v63 }
 0x35f   : > { %v5573_v61 = vpop.f32.mrb[17].mxu0  ;;  %v8037_v14 = vpop.eup %8036  ;;  %v5899_v26 = vmul.f32 %v8035_v19, %v10059_v13  ;;  %8056 = vpow2.f32 %v5799_v34  ;;  %v5797_v5 = vmul.f32 1.442695, %v5752_v20 }
 0x360   : > { %v7426_v51 = vadd.f32 %v5573_v61, %v2866_v27  ;;  %v7396_v15 = vpop.f32.mrb[18].mxu0  ;;  %v8039_v50 = vpop.eup %8038  ;;  %5933 = vst.msk [vmem:[%s10122_s21 + $0x10] sm:$0xff] %vm738_vm4, %v5901_v11  ;;  %v5902_v36 = vmul.f32 %v8037_v14, %v10063_v29  ;;  %8058 = vpow2.f32 %v5795_v43  ;;  %v10131_v58 = vadd.f32 %v7425_v30, %v10053_v22 }
 0x361   : > { %v7427_v52 = vadd.f32 %v7396_v15, %v7090_v31  ;;  %v5576_v45 = vpop.f32.mrb[19].mxu0  ;;  %v8041_v8 = vpop.eup %8040  ;;  %5931 = vst.msk [vmem:[%s10122_s21] sm:$0xff] %vm738_vm4, %v5899_v26  ;;  %v5900_v13 = vmul.f32 %v8039_v50, %v10067_v53  ;;  %8060 = vpow2.f32 %v5801_v57 }
 0x362   : > { %v10137_v3 = vadd.f32 %v7426_v51, %v10053_v22  ;;  %v7428_v16 = vadd.f32 %v5576_v45, %v2869_v2  ;;  %v8043_v54 = vpop.eup %8042  ;;  %5934 = vst.msk [vmem:[%s10122_s21 + $0x18] sm:$0xff] %vm738_vm4, %v5902_v36  ;;  %v5845_v29 = vadd.f32 1.0, %v8041_v8  ;;  %8062 = vpow2.f32 %v5797_v5  ;;  %v7093_v48 = vpop.f32.mrb[20].mxu1 }
 0x363   : > { %v5757_v4 = vsub.f32 0.0, %v10131_v58  ;;  %v10143_v41 = vadd.f32 %v7427_v52, %v10053_v22  ;;  %v8045_v23 = vpop.eup %8044  ;;  %5932 = vst.msk [vmem:[%s10122_s21 + $0x8] sm:$0xff] %vm738_vm4, %v5900_v13  ;;  %v5843_v53 = vadd.f32 1.0, %v8043_v54  ;;  %v2882_v10 = vpop.f32.mrb[21].mxu1 }
 0x364   : > { %v5755_v62 = vsub.f32 0.0, %v10137_v3  ;;  %v10149_v21 = vadd.f32 %v7428_v16, %v10053_v22  ;;  %v8047_v55 = vpop.eup %8046  ;;  %8064 = vrcp.f32 %v5845_v29  ;;  %v5846_v59 = vadd.f32 1.0, %v8045_v23  ;;  %v7094_v18 = vpop.f32.mrb[22].mxu1 }
 0x365   : > { %v5807_v40 = vmul.f32 1.442695, %v5757_v4  ;;  %v5758_v28 = vsub.f32 0.0, %v10143_v41  ;;  %v8049_v9 = vpop.eup %8048  ;;  %8066 = vrcp.f32 %v5843_v53  ;;  %v5844_v39 = vadd.f32 1.0, %v8047_v55  ;;  %v7399_v49 = vpop.f32.mrb[20].mxu0 }
 0x366   : > { %v5803_v6 = vmul.f32 1.442695, %v5755_v62  ;;  %v5756_v63 = vsub.f32 0.0, %v10149_v21  ;;  %v2885_v1 = vpop.f32.mrb[23].mxu1  ;;  %v8051_v25 = vpop.eup %8050  ;;  %v5905_v27 = vmul.f32 %v8049_v9, %v10072_v60  ;;  %8068 = vrcp.f32 %v5846_v59 }
 0x367   : > { %v5809_v37 = vmul.f32 1.442695, %v5758_v28  ;;  %v7429_v34 = vadd.f32 %v7399_v49, %v7093_v48  ;;  %v5589_v0 = vpop.f32.mrb[21].mxu0  ;;  %v8053_v31 = vpop.eup %8052  ;;  %v5903_v35 = vmul.f32 %v8051_v25, %v10075_v44  ;;  %8070 = vrcp.f32 %v5844_v39 }
 0x368   : > { %v5805_v43 = vmul.f32 1.442695, %v5756_v63  ;;  %v7430_v20 = vadd.f32 %v5589_v0, %v2882_v10  ;;  %v7400_v17 = vpop.f32.mrb[22].mxu0  ;;  %v8055_v2 = vpop.eup %8054  ;;  %5937 = vst.msk [vmem:[%s10122_s21 + $0x30] sm:$0xff] %vm738_vm4, %v5905_v27  ;;  %v5906_v19 = vmul.f32 %v8053_v31, %v10079_v38  ;;  %8072 = vpow2.f32 %v5807_v40 }
 0x369   : > { %v10159_v60 = vadd.f32 %v7429_v34, %v10053_v22  ;;  %v7431_v11 = vadd.f32 %v7400_v17, %v7094_v18  ;;  %v5592_v57 = vpop.f32.mrb[23].mxu0  ;;  %v8057_v30 = vpop.eup %8056  ;;  %5935 = vst.msk [vmem:[%s10122_s21 + $0x20] sm:$0xff] %vm738_vm4, %v5903_v35  ;;  %v5904_v44 = vmul.f32 %v8055_v2, %v10083_v42  ;;  %8074 = vpow2.f32 %v5803_v6 }
 0x36a   : > { %v10165_v61 = vadd.f32 %v7430_v20, %v10053_v22  ;;  %v7432_v14 = vadd.f32 %v5592_v57, %v2885_v1  ;;  %v8059_v26 = vpop.eup %8058  ;;  %5938 = vst.msk [vmem:[%s10122_s21 + $0x38] sm:$0xff] %vm738_vm4, %v5906_v19  ;;  %v5849_v38 = vadd.f32 1.0, %v8057_v30  ;;  %8076 = vpow2.f32 %v5809_v37  ;;  %v7097_v15 = vpop.f32.mrb[24].mxu1 }
 0x36b   : > { %v5761_v5 = vsub.f32 0.0, %v10159_v60  ;;  %v10171_v51 = vadd.f32 %v7431_v11, %v10053_v22  ;;  %v8061_v50 = vpop.eup %8060  ;;  %5936 = vst.msk [vmem:[%s10122_s21 + $0x28] sm:$0xff] %vm738_vm4, %v5904_v44  ;;  %v5847_v42 = vadd.f32 1.0, %v8059_v26  ;;  %8078 = vpow2.f32 %v5805_v43  ;;  %v2898_v45 = vpop.f32.mrb[25].mxu1 }
 0x36c   : > { %v5759_v36 = vsub.f32 0.0, %v10165_v61  ;;  %v10177_v52 = vadd.f32 %v7432_v14, %v10053_v22  ;;  %v8063_v8 = vpop.eup %8062  ;;  %8080 = vrcp.f32 %v5849_v38  ;;  %v5850_v13 = vadd.f32 1.0, %v8061_v50  ;;  %v7098_v29 = vpop.f32.mrb[26].mxu1 }
 0x36d   : > { %v5815_v16 = vmul.f32 1.442695, %v5761_v5  ;;  %v5762_v54 = vsub.f32 0.0, %v10171_v51  ;;  %8082 = vrcp.f32 %v5847_v42  ;;  %v5848_v4 = vadd.f32 1.0, %v8063_v8  ;;  %v7403_v53 = vpop.f32.mrb[24].mxu0  ;;  %v2901_v62 = vpop.f32.mrb[27].mxu1 }
 0x36e   : > { %v5811_v48 = vmul.f32 1.442695, %v5759_v36  ;;  %v5760_v23 = vsub.f32 0.0, %v10177_v52  ;;  %v8065_v10 = vpop.eup %8064  ;;  %8084 = vrcp.f32 %v5850_v13  ;;  %v7433_v59 = vadd.f32 %v7403_v53, %v7097_v15  ;;  %v5605_v40 = vpop.f32.mrb[25].mxu0 }
 0x36f   : > { %v5817_v55 = vmul.f32 1.442695, %v5762_v54  ;;  %v8067_v28 = vpop.eup %8066  ;;  %v5909_v18 = vmul.f32 %v8065_v10, %v10088_v32  ;;  %8086 = vrcp.f32 %v5848_v4  ;;  %v7434_v39 = vadd.f32 %v5605_v40, %v2898_v45  ;;  %v7404_v6 = vpop.f32.mrb[26].mxu0 }
 0x370   : > { %v5813_v9 = vmul.f32 1.442695, %v5760_v23  ;;  %v8069_v63 = vpop.eup %8068  ;;  %v5907_v49 = vmul.f32 %v8067_v28, %v10091_v24  ;;  %8088 = vpow2.f32 %v5815_v16  ;;  %v10184_v1 = vadd.f32 %v7433_v59, %v10053_v22  ;;  %v5608_v27 = vpop.f32.mrb[27].mxu0 }
 0x371   : > { %v7435_v25 = vadd.f32 %v7404_v6, %v7098_v29  ;;  %v8071_v37 = vpop.eup %8070  ;;  %5941 = vst.msk [vmem:[%s10122_s21 + $0x50] sm:$0xff] %vm738_vm4, %v5909_v18  ;;  %v5910_v32 = vmul.f32 %v8069_v63, %v10095_v46  ;;  %8090 = vpow2.f32 %v5811_v48  ;;  %v10190_v34 = vadd.f32 %v7434_v39, %v10053_v22 }
 0x372   : > { %v7436_v0 = vadd.f32 %v5608_v27, %v2901_v62  ;;  %v8073_v31 = vpop.eup %8072  ;;  %5939 = vst.msk [vmem:[%s10122_s21 + $0x40] sm:$0xff] %vm738_vm4, %v5907_v49  ;;  %v5908_v24 = vmul.f32 %v8071_v37, %v10099_v47  ;;  %8092 = vpow2.f32 %v5817_v55  ;;  %v5765_v35 = vsub.f32 0.0, %v10184_v1  ;;  %v7101_v20 = vpop.f32.mrb[28].mxu1 }
 0x373   : > { %v10197_v43 = vadd.f32 %v7435_v25, %v10053_v22  ;;  %v8075_v17 = vpop.eup %8074  ;;  %5942 = vst.msk [vmem:[%s10122_s21 + $0x58] sm:$0xff] %vm738_vm4, %v5910_v32  ;;  %v5853_v46 = vadd.f32 1.0, %v8073_v31  ;;  %8094 = vpow2.f32 %v5813_v9  ;;  %v5763_v2 = vsub.f32 0.0, %v10190_v34  ;;  %v2914_v11 = vpop.f32.mrb[29].mxu1 }
 0x374   : > { %v10203_v19 = vadd.f32 %v7436_v0, %v10053_v22  ;;  %v8077_v57 = vpop.eup %8076  ;;  %5940 = vst.msk [vmem:[%s10122_s21 + $0x48] sm:$0xff] %vm738_vm4, %v5908_v24  ;;  %v5851_v47 = vadd.f32 1.0, %v8075_v17  ;;  %v5823_v30 = vmul.f32 1.442695, %v5765_v35  ;;  %v7102_v14 = vpop.f32.mrb[30].mxu1 }
 0x375   : > { %v5766_v44 = vsub.f32 0.0, %v10197_v43  ;;  %v8079_v26 = vpop.eup %8078  ;;  %8096 = vrcp.f32 %v5853_v46  ;;  %v5854_v38 = vadd.f32 1.0, %v8077_v57  ;;  %v5819_v5 = vmul.f32 1.442695, %v5763_v2  ;;  %v7407_v50 = vpop.f32.mrb[28].mxu0 }
 0x376   : > { %v5764_v15 = vsub.f32 0.0, %v10203_v19  ;;  %v2917_v42 = vpop.f32.mrb[31].mxu1  ;;  %v8081_v36 = vpop.eup %8080  ;;  %8098 = vrcp.f32 %v5851_v47  ;;  %v5852_v45 = vadd.f32 1.0, %v8079_v26  ;;  %v7437_v13 = vadd.f32 %v7407_v50, %v7101_v20 }
 0x377   : > { %v5825_v8 = vmul.f32 1.442695, %v5766_v44  ;;  %v5621_v16 = vpop.f32.mrb[29].mxu0  ;;  %v8083_v54 = vpop.eup %8082  ;;  %v5913_v29 = vmul.f32 %v8081_v36, %v10104_v56  ;;  %8100 = vrcp.f32 %v5854_v38 }
 0x378   : > { %v5821_v4 = vmul.f32 1.442695, %v5764_v15  ;;  %v7438_v48 = vadd.f32 %v5621_v16, %v2914_v11  ;;  %v7408_v23 = vpop.f32.mrb[30].mxu0  ;;  %v8085_v53 = vpop.eup %8084  ;;  %v5911_v62 = vmul.f32 %v8083_v54, %v10107_v7  ;;  %8102 = vrcp.f32 %v5852_v45 }
 0x379   : > { %v10212_v10 = vadd.f32 %v7437_v13, %v10053_v22  ;;  %v7439_v55 = vadd.f32 %v7408_v23, %v7102_v14  ;;  %v5624_v59 = vpop.f32.mrb[31].mxu0  ;;  %v8087_v40 = vpop.eup %8086  ;;  %5945 = vst.msk [vmem:[%s10122_s21 + $0x70] sm:$0xff] %vm738_vm4, %v5913_v29  ;;  %v5914_v56 = vmul.f32 %v8085_v53, %v10112_v33  ;;  %8104 = vpow2.f32 %v5823_v30 }
 0x37a   : > { %v10218_v28 = vadd.f32 %v7438_v48, %v10053_v22  ;;  %v7440_v18 = vadd.f32 %v5624_v59, %v2917_v42  ;;  %v8089_v9 = vpop.eup %8088  ;;  %5943 = vst.msk [vmem:[%s10122_s21 + $0x60] sm:$0xff] %vm738_vm4, %v5911_v62  ;;  %v5912_v7 = vmul.f32 %v8087_v40, %v10116_v12  ;;  %8106 = vpow2.f32 %v5819_v5 }
 0x37b   : > { %v5769_v39 = vsub.f32 0.0, %v10212_v10  ;;  %v10225_v6 = vadd.f32 %v7439_v55, %v10053_v22  ;;  %v8091_v63 = vpop.eup %8090  ;;  %5946 = vst.msk [vmem:[%s10122_s21 + $0x78] sm:$0xff] %vm738_vm4, %v5914_v56  ;;  %v5857_v33 = vadd.f32 1.0, %v8089_v9  ;;  %8108 = vpow2.f32 %v5825_v8 }
 0x37c   : > { %v5767_v49 = vsub.f32 0.0, %v10218_v28  ;;  %v10231_v25 = vadd.f32 %v7440_v18, %v10053_v22  ;;  %v8093_v27 = vpop.eup %8092  ;;  %5944 = vst.msk [vmem:[%s10122_s21 + $0x68] sm:$0xff] %vm738_vm4, %v5912_v7  ;;  %v5855_v12 = vadd.f32 1.0, %v8091_v63  ;;  %8110 = vpow2.f32 %v5821_v4 }
 0x37d   : > { %v5770_v37 = vsub.f32 0.0, %v10225_v6  ;;  %v8095_v32 = vpop.eup %8094  ;;  %8112 = vrcp.f32 %v5857_v33  ;;  %v5858_v0 = vadd.f32 1.0, %v8093_v27  ;;  %v5831_v31 = vmul.f32 1.442695, %v5769_v39 }
 0x37e   : > { %v5768_v24 = vsub.f32 0.0, %v10231_v25  ;;  %8114 = vrcp.f32 %v5855_v12  ;;  %v5856_v35 = vadd.f32 1.0, %v8095_v32  ;;  %v5827_v20 = vmul.f32 1.442695, %v5767_v49 }
 0x37f   : > { %v8097_v22 = vpop.eup %8096  ;;  %8116 = vrcp.f32 %v5858_v0  ;;  %v5833_v17 = vmul.f32 1.442695, %v5770_v37 }
 0x380   : > { %v8099_v46 = vpop.eup %8098  ;;  %v5917_v2 = vmul.f32 %v8097_v22, %v10131_v58  ;;  %8118 = vrcp.f32 %v5856_v35  ;;  %v5829_v11 = vmul.f32 1.442695, %v5768_v24 }
 0x381   : > { %v8101_v57 = vpop.eup %8100  ;;  %v5915_v47 = vmul.f32 %v8099_v46, %v10137_v3  ;;  %8120 = vpow2.f32 %v5831_v31 }
 0x382   : > { %v8103_v30 = vpop.eup %8102  ;;  %5949 = vst.msk [vmem:[%s10122_s21 + $0x90] sm:$0xff] %vm738_vm4, %v5917_v2  ;;  %v5918_v44 = vmul.f32 %v8101_v57, %v10143_v41  ;;  %8122 = vpow2.f32 %v5827_v20 }
 0x383   : > { %v8105_v14 = vpop.eup %8104  ;;  %5947 = vst.msk [vmem:[%s10122_s21 + $0x80] sm:$0xff] %vm738_vm4, %v5915_v47  ;;  %v5916_v26 = vmul.f32 %v8103_v30, %v10149_v21  ;;  %8124 = vpow2.f32 %v5833_v17 }
 0x384   : > { %v8107_v58 = vpop.eup %8106  ;;  %5950 = vst.msk [vmem:[%s10122_s21 + $0x98] sm:$0xff] %vm738_vm4, %v5918_v44  ;;  %v5861_v38 = vadd.f32 1.0, %v8105_v14  ;;  %8126 = vpow2.f32 %v5829_v11 }
 0x385   : > { %v8109_v5 = vpop.eup %8108  ;;  %5948 = vst.msk [vmem:[%s10122_s21 + $0x88] sm:$0xff] %vm738_vm4, %v5916_v26  ;;  %v5859_v3 = vadd.f32 1.0, %v8107_v58 }
 0x386   : > { %v8111_v15 = vpop.eup %8110  ;;  %8128 = vrcp.f32 %v5861_v38  ;;  %v5862_v41 = vadd.f32 1.0, %v8109_v5 }
 0x387   : > { %v8113_v50 = vpop.eup %8112  ;;  %8130 = vrcp.f32 %v5859_v3  ;;  %v5860_v42 = vadd.f32 1.0, %v8111_v15 }
 0x388   : > { %v8115_v21 = vpop.eup %8114  ;;  %v5921_v36 = vmul.f32 %v8113_v50, %v10159_v60  ;;  %8132 = vrcp.f32 %v5862_v41 }
 0x389   : > { %v8117_v45 = vpop.eup %8116  ;;  %v5919_v8 = vmul.f32 %v8115_v21, %v10165_v61  ;;  %8134 = vrcp.f32 %v5860_v42 }
 0x38a   : > { %v8119_v13 = vpop.eup %8118  ;;  %5953 = vst.msk [vmem:[%s10122_s21 + $0xb0] sm:$0xff] %vm738_vm4, %v5921_v36  ;;  %v5922_v16 = vmul.f32 %v8117_v45, %v10171_v51 }
 0x38b   : > { %v8121_v54 = vpop.eup %8120  ;;  %5951 = vst.msk [vmem:[%s10122_s21 + $0xa0] sm:$0xff] %vm738_vm4, %v5919_v8  ;;  %v5920_v29 = vmul.f32 %v8119_v13, %v10177_v52 }
 0x38c   : > { %v8123_v4 = vpop.eup %8122  ;;  %5954 = vst.msk [vmem:[%s10122_s21 + $0xb8] sm:$0xff] %vm738_vm4, %v5922_v16  ;;  %v5865_v48 = vadd.f32 1.0, %v8121_v54 }
 0x38d   : > { %v8125_v60 = vpop.eup %8124  ;;  %5952 = vst.msk [vmem:[%s10122_s21 + $0xa8] sm:$0xff] %vm738_vm4, %v5920_v29  ;;  %v5863_v61 = vadd.f32 1.0, %v8123_v4 }
 0x38e   : > { %v8127_v23 = vpop.eup %8126  ;;  %8136 = vrcp.f32 %v5865_v48  ;;  %v5866_v53 = vadd.f32 1.0, %v8125_v60 }
 0x38f   : > { %8138 = vrcp.f32 %v5863_v61  ;;  %v5864_v51 = vadd.f32 1.0, %v8127_v23 }
 0x390   : > { %v8129_v62 = vpop.eup %8128  ;;  %8140 = vrcp.f32 %v5866_v53 }
 0x391   : > { %v8131_v52 = vpop.eup %8130  ;;  %v5925_v55 = vmul.f32 %v8129_v62, %v10184_v1  ;;  %8142 = vrcp.f32 %v5864_v51 }
 0x392   : > { %v8133_v59 = vpop.eup %8132  ;;  %v5923_v40 = vmul.f32 %v8131_v52, %v10190_v34 }
 0x393   : > { %v8135_v56 = vpop.eup %8134  ;;  %5957 = vst.msk [vmem:[%s10122_s21 + $0xd0] sm:$0xff] %vm738_vm4, %v5925_v55  ;;  %v5926_v18 = vmul.f32 %v8133_v59, %v10197_v43 }
 0x394   : > { %5955 = vst.msk [vmem:[%s10122_s21 + $0xc0] sm:$0xff] %vm738_vm4, %v5923_v40  ;;  %v5924_v9 = vmul.f32 %v8135_v56, %v10203_v19 }
 0x395   : > { %5958 = vst.msk [vmem:[%s10122_s21 + $0xd8] sm:$0xff] %vm738_vm4, %v5926_v18 }
 0x396   : > { %5956 = vst.msk [vmem:[%s10122_s21 + $0xc8] sm:$0xff] %vm738_vm4, %v5924_v9 }
 0x398   : > { %v8137_v1 = vpop.eup %8136 }
 0x399   : > { %v8139_v7 = vpop.eup %8138  ;;  %v5929_v34 = vmul.f32 %v8137_v1, %v10212_v10 }
 0x39a   : > { %v8141_v39 = vpop.eup %8140  ;;  %v5927_v63 = vmul.f32 %v8139_v7, %v10218_v28 }
 0x39b   : > { %v8143_v33 = vpop.eup %8142  ;;  %5961 = vst.msk [vmem:[%s10122_s21 + $0xf0] sm:$0xff] %vm738_vm4, %v5929_v34  ;;  %v5930_v43 = vmul.f32 %v8141_v39, %v10225_v6 }
 0x39c   : > { %5959 = vst.msk [vmem:[%s10122_s21 + $0xe0] sm:$0xff] %vm738_vm4, %v5927_v63  ;;  %v5928_v19 = vmul.f32 %v8143_v33, %v10231_v25 }
 0x39d   : > { %5962 = vst.msk [vmem:[%s10122_s21 + $0xf8] sm:$0xff] %vm738_vm4, %v5930_v43 }
 0x39e   : > { %5960 = vst.msk [vmem:[%s10122_s21 + $0xe8] sm:$0xff] %vm738_vm4, %v5928_v19 }
 0x39f PF: > { %s15_s18 = sadd.s32 1, %s8210_s18  }
 0x3a0   : > { %p12_p4 = scmp.ge.s32.totalorder %s15_s18, 4  }
 0x3a2   :  { %14 = sbr.rel (!%p12_p4) target bundleno = 1 (0x1), region = 89 }

</bundles_post_ra>
